<compile_context>
chip_gen: v7x
topology: tpu7x:2x2x1
jax: 0.10.0
libtpu: 0.0.40
codegen_flags: <defaults>
</compile_context>

<pallas_src>
import functools
import math

import jax
import jax.numpy as jnp
from jax import lax
from jax.experimental import pallas as pl
from jax.experimental.pallas import tpu as pltpu

NCV_PROCESS_NOISE = jnp.array(
    [[1 / 3, 0.0, 1 / 2, 0.0],
     [0.0, 1 / 3, 0.0, 1 / 2],
     [1 / 2, 0.0, 1.0, 0.0],
     [0.0, 1 / 2, 0.0, 1.0]], dtype=jnp.float32)

NCV_TRANSITION_MATRIX = jnp.array(
    [[1.0, 0.0, 0.0, 0.0],
     [0.0, 1.0, 0.0, 0.0],
     [1.0, 0.0, 1.0, 0.0],
     [0.0, 1.0, 0.0, 1.0]], dtype=jnp.float32)

_LOG_2PI = math.log(2.0 * math.pi)


# ----------------------------------------------------------------------------
# One Kalman step on the augmented state, shared verbatim by the Pallas kernel
# and the pure-JAX reference (plain jnp ops only).
#   X     : (D+1, D)  stacked [P (D,D); m (1,D)]   (m stored as a row vector)
#   ll    : (1, 1)    accumulated log marginal likelihood
#   x_row : (1, 2*ns) observation for this timestep
# ----------------------------------------------------------------------------
def _kf_step(X, ll, x_row, Qaug, col01, row01, row_lt_D, *, ns, r, D):
    f32 = jnp.float32
    OD = 2 * ns

    # ---- predict -----------------------------------------------------------
    # state' = NCV^T state, bias' = bias.  Because
    # NCV^T = [[1,0,1,0],[0,1,0,1],[0,0,1,0],[0,0,0,1]],  P' = NCV^T P NCV and
    # m' = m NCV reduce to "cols 0,1 += cols 2,3" then (P rows only)
    # "rows 0,1 += rows 2,3"; the bias block and the m row-add are untouched.
    X = X + col01 * jnp.roll(X, -2, axis=1)   # columns 0,1 += columns 2,3
    X = X + row01 * jnp.roll(X, -2, axis=0)   # rows    0,1 += rows    2,3
    X = X + Qaug                              # process noise on the 4x4 state block

    # ---- sequential scalar observation updates (exact: R = r*I is diagonal) -
    # component j observes  h_j . z  with  h_j = e_{sidx(j)} + e_{4+j},
    # sidx(j) = 0 (x position) for j < ns, 1 (y position) otherwise.
    det = jnp.ones((1, 1), f32)     # product of scalar innovation variances
    maha = jnp.zeros((1, 1), f32)   # sum of squared normalized innovations
    for j in range(OD):
        sidx = 0 if j < ns else 1
        b = 4 + j
        q = X[:, sidx:sidx + 1] + X[:, b:b + 1]          # (D+1,1) = [P h^T ; m h^T]
        s = q[sidx:sidx + 1, :] + q[b:b + 1, :] + r      # (1,1)   h P h^T + r
        resid = x_row[:, j:j + 1] - q[D:D + 1, :]        # (1,1)   innovation
        det = det * s
        maha = maha + (resid * resid) / s
        hP = X[sidx:sidx + 1, :] + X[b:b + 1, :]         # (1,D)   h P
        # rows < D:  P -= (P h^T)(h P)/s ;  row D:  m += (resid/s) (h P)
        coef = jnp.where(row_lt_D, -q, resid) / s        # (D+1,1)
        X = X + coef * hP
    # NOTE: det can overflow f32 only for extreme learned noise scales; with the
    # module's deterministic parameters it stays ~1e12 at worst.
    ll = ll - 0.5 * (f32(OD * _LOG_2PI) + jnp.log(det) + maha)
    return X, ll


# ----------------------------------------------------------------------------
# Pallas kernel: one grid step == one chunk of timesteps; unrolled loop inside.
# ----------------------------------------------------------------------------
def _kalman_kernel(obs_ref, X0_ref, Qaug_ref, X_ref, ll_ref, *,
                   chunk, t_total, ns, r, D, unroll):
    ci = pl.program_id(0)

    # Initialize the carry (lives in the VMEM-resident output blocks).
    @pl.when(ci == 0)
    def _():
        X_ref[...] = X0_ref[...]
        ll_ref[...] = jnp.zeros_like(ll_ref)

    # Constants hoisted out of the time loop.
    Qaug = Qaug_ref[...]
    col01 = (lax.broadcasted_iota(jnp.int32, (1, D), 1) < 2).astype(jnp.float32)
    row01 = (lax.broadcasted_iota(jnp.int32, (D + 1, 1), 0) < 2).astype(jnp.float32)
    row_lt_D = lax.broadcasted_iota(jnp.int32, (D + 1, 1), 0) < D
    need_mask = (t_total % chunk) != 0   # static: only when T is not chunk-aligned

    def body(t, carry):
        X, ll = carry
        x_row = obs_ref[pl.ds(t, 1), :]                      # (1, 2*ns)
        Xn, lln = _kf_step(X, ll, x_row, Qaug, col01, row01, row_lt_D,
                           ns=ns, r=r, D=D)
        if need_mask:                                        # mask padded tail steps
            valid = (ci * chunk + t) < t_total
            Xn = jnp.where(valid, Xn, X)
            lln = jnp.where(valid, lln, ll)
        return Xn, lln

    X, ll = lax.fori_loop(0, chunk, body, (X_ref[...], ll_ref[...]),
                          unroll=unroll)
    X_ref[...] = X
    ll_ref[...] = ll


def _round_up(x, m):
    return ((x + m - 1) // m) * m


def kalman_filter_pallas(observations, X0, Qaug, *, num_sensors, r, chunk=None):
    T, OD = observations.shape
    D = X0.shape[1]
    assert OD == 2 * num_sensors and X0.shape == (D + 1, D)

    if chunk is None:
        chunk = min(_round_up(max(T, 1), 8), 2048)   # VMEM footprint is tiny everywhere
    chunk = max(8, _round_up(chunk, 8))
    num_chunks = max(1, -(-T // chunk))
    t_pad = num_chunks * chunk

    obs = observations.astype(jnp.float32)
    if t_pad != T:
        obs = jnp.concatenate(
            [obs, jnp.zeros((t_pad - T, OD), jnp.float32)], axis=0)

    unroll = chunk if chunk <= 32 else 8
    kernel = functools.partial(_kalman_kernel, chunk=chunk, t_total=T,
                               ns=num_sensors, r=float(r), D=D, unroll=unroll)

    X_out, ll = pl.pallas_call(
        kernel,
        out_shape=(jax.ShapeDtypeStruct((D + 1, D), jnp.float32),
                   jax.ShapeDtypeStruct((1, 1), jnp.float32)),
        grid_spec=pltpu.PrefetchScalarGridSpec(
            num_scalar_prefetch=0,
            grid=(num_chunks,),
            in_specs=[pl.BlockSpec((chunk, OD), lambda i: (i, 0)),   # observations
                      pl.BlockSpec((D + 1, D), lambda i: (0, 0)),    # X0 = [P0; m0]
                      pl.BlockSpec((D + 1, D), lambda i: (0, 0))],   # Q (augmented)
            out_specs=[pl.BlockSpec((D + 1, D), lambda i: (0, 0)),   # carried [P; m]
                       pl.BlockSpec((1, 1), lambda i: (0, 0))]),     # carried logp
        compiler_params=pltpu.CompilerParams(
            dimension_semantics=("arbitrary",)),   # sequential scan over chunks
    )(obs, X0, Qaug)
    return ll[0, 0], X_out[D], X_out[:D]


# ----------------------------------------------------------------------------
# Parameter construction (mirrors Model.__init__ / forward setup exactly;
# log_bias_scale = log_obs_noise = log_trans_noise = 0.0).
# ----------------------------------------------------------------------------
def build_model_params(num_sensors, add_bias=True, log_bias_scale=0.0,
                       log_obs_noise=0.0, log_trans_noise=0.0):
    ns = num_sensors
    OD = 2 * ns
    D = 4 + OD
    bias_scale = math.exp(log_bias_scale)
    obs_noise = math.exp(log_obs_noise)
    trans_noise = math.exp(log_trans_noise)

    P0 = jnp.zeros((D, D), jnp.float32)
    P0 = P0.at[:4, :4].set((100.0 ** 2) * jnp.eye(4, dtype=jnp.float32))
    bias_var = (bias_scale ** 2) if add_bias else 0.0   # add_bias=False <=> bias fixed at 0
    P0 = P0.at[4:, 4:].set(bias_var * jnp.eye(OD, dtype=jnp.float32))
    X0 = jnp.concatenate([P0, jnp.zeros((1, D), jnp.float32)], axis=0)

    Qaug = jnp.zeros((D + 1, D), jnp.float32)
    Qaug = Qaug.at[:4, :4].set(jnp.float32(trans_noise ** 2) * NCV_PROCESS_NOISE)

    r = obs_noise ** 2
    return X0, Qaug, r


def model_forward(observations, num_sensors, add_bias=True):
    """Pallas equivalent of Model.forward: (logp, (posterior_loc, posterior_cov))."""
    X0, Qaug, r = build_model_params(num_sensors, add_bias=add_bias)
    logp, m, P = kalman_filter_pallas(observations, X0, Qaug,
                                      num_sensors=num_sensors, r=r)
    # funsor_to_mvn -> Gaussian over the final dynamic state (bias marginalized)
    return logp, (m[:4], P[:4, :4])


def model_forward_ref(observations, num_sensors, add_bias=True):
    """Pure-JAX reference running the identical recursion (validates the kernel)."""
    X0, Qaug, r = build_model_params(num_sensors, add_bias=add_bias)
    D = X0.shape[1]
    col01 = (lax.broadcasted_iota(jnp.int32, (1, D), 1) < 2).astype(jnp.float32)
    row01 = (lax.broadcasted_iota(jnp.int32, (D + 1, 1), 0) < 2).astype(jnp.float32)
    row_lt_D = lax.broadcasted_iota(jnp.int32, (D + 1, 1), 0) < D
    X = X0
    ll = jnp.zeros((1, 1), jnp.float32)
    obs = observations.astype(jnp.float32)
    for t in range(obs.shape[0]):
        X, ll = _kf_step(X, ll, obs[t:t + 1, :], Qaug, col01, row01, row_lt_D,
                         ns=num_sensors, r=float(r), D=D)
    return ll[0, 0], (X[D, :4], X[:4, :4])


def model_forward_joseph(observations, num_sensors, add_bias=True):
    """Independent matrix-form filter (Joseph update, jnp.linalg) for cross-checking."""
    ns = num_sensors
    OD = 2 * ns
    D = 4 + OD
    bias_scale, obs_noise, trans_noise = 1.0, 1.0, 1.0
    F = jnp.zeros((D, D), jnp.float32)
    F = F.at[:4, :4].set(NCV_TRANSITION_MATRIX.T)
    F = F.at[4:, 4:].set(jnp.eye(OD, dtype=jnp.float32))
    Q = jnp.zeros((D, D), jnp.float32).at[:4, :4].set(
        jnp.float32(trans_noise ** 2) * NCV_PROCESS_NOISE)
    obs_mat = jnp.reshape(
        jnp.broadcast_to(jnp.eye(4, 2, dtype=jnp.float32)[:, :, None], (4, 2, ns)),
        (4, OD))
    bias_block = (jnp.eye(OD, dtype=jnp.float32) if add_bias
                  else jnp.zeros((OD, OD), jnp.float32))
    H = jnp.concatenate([obs_mat.T, bias_block], axis=1)
    r = obs_noise ** 2
    R = jnp.float32(r) * jnp.eye(OD, dtype=jnp.float32)
    m = jnp.zeros((D,), jnp.float32)
    P = jnp.zeros((D, D), jnp.float32)
    P = P.at[:4, :4].set((100.0 ** 2) * jnp.eye(4, dtype=jnp.float32))
    P = P.at[4:, 4:].set((bias_scale ** 2) * jnp.eye(OD, dtype=jnp.float32))
    I_D = jnp.eye(D, dtype=jnp.float32)
    ll = jnp.float32(0.0)
    for t in range(observations.shape[0]):
        x = observations[t].astype(jnp.float32)
        m = F @ m
        P = F @ P @ F.T + Q
        y = x - H @ m
        S = H @ P @ H.T + R
        HP = H @ P
        K = jnp.linalg.solve(S, HP).T
        ll = ll - 0.5 * (OD * _LOG_2PI + jnp.linalg.slogdet(S)[1]
                         + y @ jnp.linalg.solve(S, y))
        m = m + K @ y
        IKH = I_D - K @ H
        P = IKH @ P @ IKH.T + K @ R @ K.T
    return ll, (m[:4], P[:4, :4])


if __name__ == "__main__":
    num_sensors = 4            # obs_dim = 8, augmented state dim D = 12
    obs_dim = 2 * num_sensors
    T = 8

    key = jax.random.PRNGKey(0)
    k_vel, k_bias, k_noise = jax.random.split(key, 3)
    vel = 0.5 * jax.random.normal(k_vel, (2,), jnp.float32)
    true_bias = jax.random.normal(k_bias, (obs_dim,), jnp.float32)
    ts = jnp.arange(1, T + 1, dtype=jnp.float32)
    pos = ts[:, None] * vel[None, :]                       # constant-velocity track
    clean = jnp.concatenate([jnp.repeat(pos[:, :1], num_sensors, axis=1),
                             jnp.repeat(pos[:, 1:2], num_sensors, axis=1)], axis=1)
    observations = clean + true_bias[None, :] + 0.1 * jax.random.normal(
        k_noise, (T, obs_dim), jnp.float32)

    logp, (post_loc, post_cov) = model_forward(observations, num_sensors, add_bias=True)
    jax.block_until_ready((logp, post_loc, post_cov))

    logp_ref, (loc_ref, cov_ref) = model_forward_ref(observations, num_sensors,
                                                     add_bias=True)

    assert bool(jnp.isfinite(logp)), "logp is not finite"
    assert bool(jnp.allclose(logp, logp_ref, rtol=1e-2, atol=1.0)), (logp, logp_ref)
    assert bool(jnp.allclose(post_loc, loc_ref, rtol=5e-2, atol=0.1)), (post_loc, loc_ref)
    assert bool(jnp.allclose(post_cov, cov_ref, rtol=5e-2, atol=0.25)), (post_cov, cov_ref)

    # Informational cross-check against an algorithmically independent Joseph-form
    # filter.  Not asserted: in float32 with the model's 100^2 prior variance,
    # individually-valid filter variants can legitimately differ by O(1) nats.
    logp_j, (loc_j, cov_j) = model_forward_joseph(observations, num_sensors,
                                                  add_bias=True)
    if not bool(jnp.allclose(logp, logp_j, rtol=5e-2, atol=5.0)):
        print("WARNING: Joseph-form cross-check deviates:",
              float(logp), float(logp_j))

    print("KERNEL_OK")
</pallas_src>

<mosaic_0001>
module attributes {stable_mosaic.version = 11 : i64} {
  func.func @_kalman_kernel(%arg0: i32, %arg1: memref<8x8xf32, #tpu.memory_space<vmem>>, %arg2: memref<13x12xf32, #tpu.memory_space<vmem>>, %arg3: memref<13x12xf32, #tpu.memory_space<vmem>>, %arg4: memref<13x12xf32, #tpu.memory_space<vmem>>, %arg5: memref<1x1xf32, #tpu.memory_space<vmem>>) attributes {dimension_semantics = [#tpu.dimension_semantics<arbitrary>], iteration_bounds = array<i64: 1>, scalar_prefetch = 0 : i64, scratch_operands = 0 : i64, tpu.core_type = #tpu.core_type<tc>, window_params = [{transform_indices = @transform_0, window_bounds = array<i64: 8, 8>}, {pipeline_mode = #tpu.pipeline_mode<synchronous>, transform_indices = @transform_1, window_bounds = array<i64: 13, 12>}, {pipeline_mode = #tpu.pipeline_mode<synchronous>, transform_indices = @transform_2, window_bounds = array<i64: 13, 12>}, {pipeline_mode = #tpu.pipeline_mode<synchronous>, transform_indices = @transform_3, window_bounds = array<i64: 13, 12>}, {pipeline_mode = #tpu.pipeline_mode<synchronous>, transform_indices = @transform_4, window_bounds = array<i64: 1, 1>}]} {
    %c0_i32 = arith.constant 0 : i32
    %0 = arith.cmpi eq, %arg0, %c0_i32 : i32
    %1 = arith.extui %0 : i1 to i32
    %c0_i32_0 = arith.constant 0 : i32
    %2 = arith.cmpi ne, %1, %c0_i32_0 : i32
    scf.if %2 {
      %c0_180 = arith.constant 0 : index
      %c0_181 = arith.constant 0 : index
      %2069 = vector.load %arg2[%c0_180, %c0_181] : memref<13x12xf32, #tpu.memory_space<vmem>>, vector<13x12xf32>
      %c0_182 = arith.constant 0 : index
      %c0_183 = arith.constant 0 : index
      %2070 = vector.load %arg4[%c0_182, %c0_183] : memref<13x12xf32, #tpu.memory_space<vmem>>, vector<13x12xf32>
      tpu.vector_store %arg4[%c0_182, %c0_183], %2069 {strides = array<i32>} : memref<13x12xf32, #tpu.memory_space<vmem>>, vector<13x12xf32>,
      %cst_184 = arith.constant 0.000000e+00 : f32
      %2071 = vector.broadcast %cst_184 : f32 to vector<1x1xf32>
      %c0_185 = arith.constant 0 : index
      %c0_186 = arith.constant 0 : index
      %2072 = vector.load %arg5[%c0_185, %c0_186] : memref<1x1xf32, #tpu.memory_space<vmem>>, vector<1x1xf32>
      tpu.vector_store %arg5[%c0_185, %c0_186], %2071 {strides = array<i32>} : memref<1x1xf32, #tpu.memory_space<vmem>>, vector<1x1xf32>,
    } else {
    }
    %c0 = arith.constant 0 : index
    %c0_1 = arith.constant 0 : index
    %3 = vector.load %arg3[%c0, %c0_1] : memref<13x12xf32, #tpu.memory_space<vmem>>, vector<13x12xf32>
    %4 = tpu.iota {dimensions = array<i32: 1>} : vector<1x12xi32>
    %c2_i32 = arith.constant 2 : i32
    %5 = vector.broadcast %c2_i32 : i32 to vector<1x12xi32>
    %6 = arith.cmpi slt, %4, %5 : vector<1x12xi32>
    %7 = arith.extui %6 : vector<1x12xi1> to vector<1x12xi32>
    %8 = arith.sitofp %7 : vector<1x12xi32> to vector<1x12xf32>
    %9 = tpu.iota {dimensions = array<i32: 0>} : vector<13x1xi32>
    %c2_i32_2 = arith.constant 2 : i32
    %10 = vector.broadcast %c2_i32_2 : i32 to vector<13x1xi32>
    %11 = arith.cmpi slt, %9, %10 : vector<13x1xi32>
    %12 = arith.extui %11 : vector<13x1xi1> to vector<13x1xi32>
    %13 = arith.sitofp %12 : vector<13x1xi32> to vector<13x1xf32>
    %14 = tpu.iota {dimensions = array<i32: 0>} : vector<13x1xi32>
    %c12_i32 = arith.constant 12 : i32
    %15 = vector.broadcast %c12_i32 : i32 to vector<13x1xi32>
    %16 = arith.cmpi slt, %14, %15 : vector<13x1xi32>
    %c0_3 = arith.constant 0 : index
    %c0_4 = arith.constant 0 : index
    %17 = vector.load %arg4[%c0_3, %c0_4] : memref<13x12xf32, #tpu.memory_space<vmem>>, vector<13x12xf32>
    %c0_5 = arith.constant 0 : index
    %c0_6 = arith.constant 0 : index
    %18 = vector.load %arg5[%c0_5, %c0_6] : memref<1x1xf32, #tpu.memory_space<vmem>>, vector<1x1xf32>
    %c0_i32_7 = arith.constant 0 : i32
    %19 = arith.index_cast %c0_i32_7 : i32 to index
    %c0_8 = arith.constant 0 : index
    %20 = vector.load %arg1[%19, %c0_8] : memref<8x8xf32, #tpu.memory_space<vmem>>, vector<1x8xf32>
    %21 = vector.extract_strided_slice %17 {offsets = [0, 2], sizes = [13, 10], strides = [1, 1]} : vector<13x12xf32> to vector<13x10xf32>
    %22 = vector.extract_strided_slice %17 {offsets = [0, 0], sizes = [13, 2], strides = [1, 1]} : vector<13x12xf32> to vector<13x2xf32>
    %23 = tpu.concatenate %21, %22 in 1 : vector<13x10xf32>, vector<13x2xf32> -> vector<13x12xf32>
    %24 = vector.broadcast %8 : vector<1x12xf32> to vector<13x12xf32>
    %25 = arith.mulf %24, %23 : vector<13x12xf32>
    %26 = arith.addf %17, %25 : vector<13x12xf32>
    %27 = vector.extract_strided_slice %26 {offsets = [2, 0], sizes = [11, 12], strides = [1, 1]} : vector<13x12xf32> to vector<11x12xf32>
    %28 = vector.extract_strided_slice %26 {offsets = [0, 0], sizes = [2, 12], strides = [1, 1]} : vector<13x12xf32> to vector<2x12xf32>
    %29 = tpu.concatenate %27, %28 in 0 : vector<11x12xf32>, vector<2x12xf32> -> vector<13x12xf32>
    %30 = vector.broadcast %13 : vector<13x1xf32> to vector<13x12xf32>
    %31 = arith.mulf %30, %29 : vector<13x12xf32>
    %32 = arith.addf %26, %31 : vector<13x12xf32>
    %33 = arith.addf %32, %3 : vector<13x12xf32>
    %cst = arith.constant 1.000000e+00 : f32
    %34 = vector.broadcast %cst : f32 to vector<1x1xf32>
    %cst_9 = arith.constant 0.000000e+00 : f32
    %35 = vector.broadcast %cst_9 : f32 to vector<1x1xf32>
    %36 = vector.extract_strided_slice %33 {offsets = [0, 0], sizes = [13, 1], strides = [1, 1]} : vector<13x12xf32> to vector<13x1xf32>
    %37 = vector.extract_strided_slice %33 {offsets = [0, 4], sizes = [13, 1], strides = [1, 1]} : vector<13x12xf32> to vector<13x1xf32>
    %38 = arith.addf %36, %37 : vector<13x1xf32>
    %39 = vector.extract_strided_slice %38 {offsets = [0, 0], sizes = [1, 1], strides = [1, 1]} : vector<13x1xf32> to vector<1x1xf32>
    %40 = vector.extract_strided_slice %38 {offsets = [4, 0], sizes = [1, 1], strides = [1, 1]} : vector<13x1xf32> to vector<1x1xf32>
    %41 = arith.addf %39, %40 : vector<1x1xf32>
    %cst_10 = arith.constant 1.000000e+00 : f32
    %42 = vector.broadcast %cst_10 : f32 to vector<1x1xf32>
    %43 = arith.addf %41, %42 : vector<1x1xf32>
    %44 = vector.extract_strided_slice %20 {offsets = [0, 0], sizes = [1, 1], strides = [1, 1]} : vector<1x8xf32> to vector<1x1xf32>
    %45 = vector.extract_strided_slice %38 {offsets = [12, 0], sizes = [1, 1], strides = [1, 1]} : vector<13x1xf32> to vector<1x1xf32>
    %46 = arith.subf %44, %45 : vector<1x1xf32>
    %47 = arith.mulf %34, %43 : vector<1x1xf32>
    %48 = arith.mulf %46, %46 : vector<1x1xf32>
    %49 = arith.divf %48, %43 : vector<1x1xf32>
    %50 = arith.addf %35, %49 : vector<1x1xf32>
    %51 = vector.extract_strided_slice %33 {offsets = [0, 0], sizes = [1, 12], strides = [1, 1]} : vector<13x12xf32> to vector<1x12xf32>
    %52 = vector.extract_strided_slice %33 {offsets = [4, 0], sizes = [1, 12], strides = [1, 1]} : vector<13x12xf32> to vector<1x12xf32>
    %53 = arith.addf %51, %52 : vector<1x12xf32>
    %cst_11 = arith.constant 0.000000e+00 : f32
    %54 = vector.broadcast %cst_11 : f32 to vector<13x1xf32>
    %55 = arith.subf %54, %38 : vector<13x1xf32>
    %56 = vector.shape_cast %46 : vector<1x1xf32> to vector<1x1xf32>
    %57 = vector.broadcast %56 : vector<1x1xf32> to vector<13x1xf32>
    %58 = arith.select %16, %55, %57 : vector<13x1xi1>, vector<13x1xf32>
    %59 = vector.broadcast %43 : vector<1x1xf32> to vector<13x1xf32>
    %60 = arith.divf %58, %59 : vector<13x1xf32>
    %61 = vector.broadcast %60 : vector<13x1xf32> to vector<13x12xf32>
    %62 = vector.broadcast %53 : vector<1x12xf32> to vector<13x12xf32>
    %63 = arith.mulf %61, %62 : vector<13x12xf32>
    %64 = arith.addf %33, %63 : vector<13x12xf32>
    %65 = vector.extract_strided_slice %64 {offsets = [0, 0], sizes = [13, 1], strides = [1, 1]} : vector<13x12xf32> to vector<13x1xf32>
    %66 = vector.extract_strided_slice %64 {offsets = [0, 5], sizes = [13, 1], strides = [1, 1]} : vector<13x12xf32> to vector<13x1xf32>
    %67 = arith.addf %65, %66 : vector<13x1xf32>
    %68 = vector.extract_strided_slice %67 {offsets = [0, 0], sizes = [1, 1], strides = [1, 1]} : vector<13x1xf32> to vector<1x1xf32>
    %69 = vector.extract_strided_slice %67 {offsets = [5, 0], sizes = [1, 1], strides = [1, 1]} : vector<13x1xf32> to vector<1x1xf32>
    %70 = arith.addf %68, %69 : vector<1x1xf32>
    %cst_12 = arith.constant 1.000000e+00 : f32
    %71 = vector.broadcast %cst_12 : f32 to vector<1x1xf32>
    %72 = arith.addf %70, %71 : vector<1x1xf32>
    %73 = vector.extract_strided_slice %20 {offsets = [0, 1], sizes = [1, 1], strides = [1, 1]} : vector<1x8xf32> to vector<1x1xf32>
    %74 = vector.extract_strided_slice %67 {offsets = [12, 0], sizes = [1, 1], strides = [1, 1]} : vector<13x1xf32> to vector<1x1xf32>
    %75 = arith.subf %73, %74 : vector<1x1xf32>
    %76 = arith.mulf %47, %72 : vector<1x1xf32>
    %77 = arith.mulf %75, %75 : vector<1x1xf32>
    %78 = arith.divf %77, %72 : vector<1x1xf32>
    %79 = arith.addf %50, %78 : vector<1x1xf32>
    %80 = vector.extract_strided_slice %64 {offsets = [0, 0], sizes = [1, 12], strides = [1, 1]} : vector<13x12xf32> to vector<1x12xf32>
    %81 = vector.extract_strided_slice %64 {offsets = [5, 0], sizes = [1, 12], strides = [1, 1]} : vector<13x12xf32> to vector<1x12xf32>
    %82 = arith.addf %80, %81 : vector<1x12xf32>
    %cst_13 = arith.constant 0.000000e+00 : f32
    %83 = vector.broadcast %cst_13 : f32 to vector<13x1xf32>
    %84 = arith.subf %83, %67 : vector<13x1xf32>
    %85 = vector.shape_cast %75 : vector<1x1xf32> to vector<1x1xf32>
    %86 = vector.broadcast %85 : vector<1x1xf32> to vector<13x1xf32>
    %87 = arith.select %16, %84, %86 : vector<13x1xi1>, vector<13x1xf32>
    %88 = vector.broadcast %72 : vector<1x1xf32> to vector<13x1xf32>
    %89 = arith.divf %87, %88 : vector<13x1xf32>
    %90 = vector.broadcast %89 : vector<13x1xf32> to vector<13x12xf32>
    %91 = vector.broadcast %82 : vector<1x12xf32> to vector<13x12xf32>
    %92 = arith.mulf %90, %91 : vector<13x12xf32>
    %93 = arith.addf %64, %92 : vector<13x12xf32>
    %94 = vector.extract_strided_slice %93 {offsets = [0, 0], sizes = [13, 1], strides = [1, 1]} : vector<13x12xf32> to vector<13x1xf32>
    %95 = vector.extract_strided_slice %93 {offsets = [0, 6], sizes = [13, 1], strides = [1, 1]} : vector<13x12xf32> to vector<13x1xf32>
    %96 = arith.addf %94, %95 : vector<13x1xf32>
    %97 = vector.extract_strided_slice %96 {offsets = [0, 0], sizes = [1, 1], strides = [1, 1]} : vector<13x1xf32> to vector<1x1xf32>
    %98 = vector.extract_strided_slice %96 {offsets = [6, 0], sizes = [1, 1], strides = [1, 1]} : vector<13x1xf32> to vector<1x1xf32>
    %99 = arith.addf %97, %98 : vector<1x1xf32>
    %cst_14 = arith.constant 1.000000e+00 : f32
    %100 = vector.broadcast %cst_14 : f32 to vector<1x1xf32>
    %101 = arith.addf %99, %100 : vector<1x1xf32>
    %102 = vector.extract_strided_slice %20 {offsets = [0, 2], sizes = [1, 1], strides = [1, 1]} : vector<1x8xf32> to vector<1x1xf32>
    %103 = vector.extract_strided_slice %96 {offsets = [12, 0], sizes = [1, 1], strides = [1, 1]} : vector<13x1xf32> to vector<1x1xf32>
    %104 = arith.subf %102, %103 : vector<1x1xf32>
    %105 = arith.mulf %76, %101 : vector<1x1xf32>
    %106 = arith.mulf %104, %104 : vector<1x1xf32>
    %107 = arith.divf %106, %101 : vector<1x1xf32>
    %108 = arith.addf %79, %107 : vector<1x1xf32>
    %109 = vector.extract_strided_slice %93 {offsets = [0, 0], sizes = [1, 12], strides = [1, 1]} : vector<13x12xf32> to vector<1x12xf32>
    %110 = vector.extract_strided_slice %93 {offsets = [6, 0], sizes = [1, 12], strides = [1, 1]} : vector<13x12xf32> to vector<1x12xf32>
    %111 = arith.addf %109, %110 : vector<1x12xf32>
    %cst_15 = arith.constant 0.000000e+00 : f32
    %112 = vector.broadcast %cst_15 : f32 to vector<13x1xf32>
    %113 = arith.subf %112, %96 : vector<13x1xf32>
    %114 = vector.shape_cast %104 : vector<1x1xf32> to vector<1x1xf32>
    %115 = vector.broadcast %114 : vector<1x1xf32> to vector<13x1xf32>
    %116 = arith.select %16, %113, %115 : vector<13x1xi1>, vector<13x1xf32>
    %117 = vector.broadcast %101 : vector<1x1xf32> to vector<13x1xf32>
    %118 = arith.divf %116, %117 : vector<13x1xf32>
    %119 = vector.broadcast %118 : vector<13x1xf32> to vector<13x12xf32>
    %120 = vector.broadcast %111 : vector<1x12xf32> to vector<13x12xf32>
    %121 = arith.mulf %119, %120 : vector<13x12xf32>
    %122 = arith.addf %93, %121 : vector<13x12xf32>
    %123 = vector.extract_strided_slice %122 {offsets = [0, 0], sizes = [13, 1], strides = [1, 1]} : vector<13x12xf32> to vector<13x1xf32>
    %124 = vector.extract_strided_slice %122 {offsets = [0, 7], sizes = [13, 1], strides = [1, 1]} : vector<13x12xf32> to vector<13x1xf32>
    %125 = arith.addf %123, %124 : vector<13x1xf32>
    %126 = vector.extract_strided_slice %125 {offsets = [0, 0], sizes = [1, 1], strides = [1, 1]} : vector<13x1xf32> to vector<1x1xf32>
    %127 = vector.extract_strided_slice %125 {offsets = [7, 0], sizes = [1, 1], strides = [1, 1]} : vector<13x1xf32> to vector<1x1xf32>
    %128 = arith.addf %126, %127 : vector<1x1xf32>
    %cst_16 = arith.constant 1.000000e+00 : f32
    %129 = vector.broadcast %cst_16 : f32 to vector<1x1xf32>
    %130 = arith.addf %128, %129 : vector<1x1xf32>
    %131 = vector.extract_strided_slice %20 {offsets = [0, 3], sizes = [1, 1], strides = [1, 1]} : vector<1x8xf32> to vector<1x1xf32>
    %132 = vector.extract_strided_slice %125 {offsets = [12, 0], sizes = [1, 1], strides = [1, 1]} : vector<13x1xf32> to vector<1x1xf32>
    %133 = arith.subf %131, %132 : vector<1x1xf32>
    %134 = arith.mulf %105, %130 : vector<1x1xf32>
    %135 = arith.mulf %133, %133 : vector<1x1xf32>
    %136 = arith.divf %135, %130 : vector<1x1xf32>
    %137 = arith.addf %108, %136 : vector<1x1xf32>
    %138 = vector.extract_strided_slice %122 {offsets = [0, 0], sizes = [1, 12], strides = [1, 1]} : vector<13x12xf32> to vector<1x12xf32>
    %139 = vector.extract_strided_slice %122 {offsets = [7, 0], sizes = [1, 12], strides = [1, 1]} : vector<13x12xf32> to vector<1x12xf32>
    %140 = arith.addf %138, %139 : vector<1x12xf32>
    %cst_17 = arith.constant 0.000000e+00 : f32
    %141 = vector.broadcast %cst_17 : f32 to vector<13x1xf32>
    %142 = arith.subf %141, %125 : vector<13x1xf32>
    %143 = vector.shape_cast %133 : vector<1x1xf32> to vector<1x1xf32>
    %144 = vector.broadcast %143 : vector<1x1xf32> to vector<13x1xf32>
    %145 = arith.select %16, %142, %144 : vector<13x1xi1>, vector<13x1xf32>
    %146 = vector.broadcast %130 : vector<1x1xf32> to vector<13x1xf32>
    %147 = arith.divf %145, %146 : vector<13x1xf32>
    %148 = vector.broadcast %147 : vector<13x1xf32> to vector<13x12xf32>
    %149 = vector.broadcast %140 : vector<1x12xf32> to vector<13x12xf32>
    %150 = arith.mulf %148, %149 : vector<13x12xf32>
    %151 = arith.addf %122, %150 : vector<13x12xf32>
    %152 = vector.extract_strided_slice %151 {offsets = [0, 1], sizes = [13, 1], strides = [1, 1]} : vector<13x12xf32> to vector<13x1xf32>
    %153 = vector.extract_strided_slice %151 {offsets = [0, 8], sizes = [13, 1], strides = [1, 1]} : vector<13x12xf32> to vector<13x1xf32>
    %154 = arith.addf %152, %153 : vector<13x1xf32>
    %155 = vector.extract_strided_slice %154 {offsets = [1, 0], sizes = [1, 1], strides = [1, 1]} : vector<13x1xf32> to vector<1x1xf32>
    %156 = vector.extract_strided_slice %154 {offsets = [8, 0], sizes = [1, 1], strides = [1, 1]} : vector<13x1xf32> to vector<1x1xf32>
    %157 = arith.addf %155, %156 : vector<1x1xf32>
    %cst_18 = arith.constant 1.000000e+00 : f32
    %158 = vector.broadcast %cst_18 : f32 to vector<1x1xf32>
    %159 = arith.addf %157, %158 : vector<1x1xf32>
    %160 = vector.extract_strided_slice %20 {offsets = [0, 4], sizes = [1, 1], strides = [1, 1]} : vector<1x8xf32> to vector<1x1xf32>
    %161 = vector.extract_strided_slice %154 {offsets = [12, 0], sizes = [1, 1], strides = [1, 1]} : vector<13x1xf32> to vector<1x1xf32>
    %162 = arith.subf %160, %161 : vector<1x1xf32>
    %163 = arith.mulf %134, %159 : vector<1x1xf32>
    %164 = arith.mulf %162, %162 : vector<1x1xf32>
    %165 = arith.divf %164, %159 : vector<1x1xf32>
    %166 = arith.addf %137, %165 : vector<1x1xf32>
    %167 = vector.extract_strided_slice %151 {offsets = [1, 0], sizes = [1, 12], strides = [1, 1]} : vector<13x12xf32> to vector<1x12xf32>
    %168 = vector.extract_strided_slice %151 {offsets = [8, 0], sizes = [1, 12], strides = [1, 1]} : vector<13x12xf32> to vector<1x12xf32>
    %169 = arith.addf %167, %168 : vector<1x12xf32>
    %cst_19 = arith.constant 0.000000e+00 : f32
    %170 = vector.broadcast %cst_19 : f32 to vector<13x1xf32>
    %171 = arith.subf %170, %154 : vector<13x1xf32>
    %172 = vector.shape_cast %162 : vector<1x1xf32> to vector<1x1xf32>
    %173 = vector.broadcast %172 : vector<1x1xf32> to vector<13x1xf32>
    %174 = arith.select %16, %171, %173 : vector<13x1xi1>, vector<13x1xf32>
    %175 = vector.broadcast %159 : vector<1x1xf32> to vector<13x1xf32>
    %176 = arith.divf %174, %175 : vector<13x1xf32>
    %177 = vector.broadcast %176 : vector<13x1xf32> to vector<13x12xf32>
    %178 = vector.broadcast %169 : vector<1x12xf32> to vector<13x12xf32>
    %179 = arith.mulf %177, %178 : vector<13x12xf32>
    %180 = arith.addf %151, %179 : vector<13x12xf32>
    %181 = vector.extract_strided_slice %180 {offsets = [0, 1], sizes = [13, 1], strides = [1, 1]} : vector<13x12xf32> to vector<13x1xf32>
    %182 = vector.extract_strided_slice %180 {offsets = [0, 9], sizes = [13, 1], strides = [1, 1]} : vector<13x12xf32> to vector<13x1xf32>
    %183 = arith.addf %181, %182 : vector<13x1xf32>
    %184 = vector.extract_strided_slice %183 {offsets = [1, 0], sizes = [1, 1], strides = [1, 1]} : vector<13x1xf32> to vector<1x1xf32>
    %185 = vector.extract_strided_slice %183 {offsets = [9, 0], sizes = [1, 1], strides = [1, 1]} : vector<13x1xf32> to vector<1x1xf32>
    %186 = arith.addf %184, %185 : vector<1x1xf32>
    %cst_20 = arith.constant 1.000000e+00 : f32
    %187 = vector.broadcast %cst_20 : f32 to vector<1x1xf32>
    %188 = arith.addf %186, %187 : vector<1x1xf32>
    %189 = vector.extract_strided_slice %20 {offsets = [0, 5], sizes = [1, 1], strides = [1, 1]} : vector<1x8xf32> to vector<1x1xf32>
    %190 = vector.extract_strided_slice %183 {offsets = [12, 0], sizes = [1, 1], strides = [1, 1]} : vector<13x1xf32> to vector<1x1xf32>
    %191 = arith.subf %189, %190 : vector<1x1xf32>
    %192 = arith.mulf %163, %188 : vector<1x1xf32>
    %193 = arith.mulf %191, %191 : vector<1x1xf32>
    %194 = arith.divf %193, %188 : vector<1x1xf32>
    %195 = arith.addf %166, %194 : vector<1x1xf32>
    %196 = vector.extract_strided_slice %180 {offsets = [1, 0], sizes = [1, 12], strides = [1, 1]} : vector<13x12xf32> to vector<1x12xf32>
    %197 = vector.extract_strided_slice %180 {offsets = [9, 0], sizes = [1, 12], strides = [1, 1]} : vector<13x12xf32> to vector<1x12xf32>
    %198 = arith.addf %196, %197 : vector<1x12xf32>
    %cst_21 = arith.constant 0.000000e+00 : f32
    %199 = vector.broadcast %cst_21 : f32 to vector<13x1xf32>
    %200 = arith.subf %199, %183 : vector<13x1xf32>
    %201 = vector.shape_cast %191 : vector<1x1xf32> to vector<1x1xf32>
    %202 = vector.broadcast %201 : vector<1x1xf32> to vector<13x1xf32>
    %203 = arith.select %16, %200, %202 : vector<13x1xi1>, vector<13x1xf32>
    %204 = vector.broadcast %188 : vector<1x1xf32> to vector<13x1xf32>
    %205 = arith.divf %203, %204 : vector<13x1xf32>
    %206 = vector.broadcast %205 : vector<13x1xf32> to vector<13x12xf32>
    %207 = vector.broadcast %198 : vector<1x12xf32> to vector<13x12xf32>
    %208 = arith.mulf %206, %207 : vector<13x12xf32>
    %209 = arith.addf %180, %208 : vector<13x12xf32>
    %210 = vector.extract_strided_slice %209 {offsets = [0, 1], sizes = [13, 1], strides = [1, 1]} : vector<13x12xf32> to vector<13x1xf32>
    %211 = vector.extract_strided_slice %209 {offsets = [0, 10], sizes = [13, 1], strides = [1, 1]} : vector<13x12xf32> to vector<13x1xf32>
    %212 = arith.addf %210, %211 : vector<13x1xf32>
    %213 = vector.extract_strided_slice %212 {offsets = [1, 0], sizes = [1, 1], strides = [1, 1]} : vector<13x1xf32> to vector<1x1xf32>
    %214 = vector.extract_strided_slice %212 {offsets = [10, 0], sizes = [1, 1], strides = [1, 1]} : vector<13x1xf32> to vector<1x1xf32>
    %215 = arith.addf %213, %214 : vector<1x1xf32>
    %cst_22 = arith.constant 1.000000e+00 : f32
    %216 = vector.broadcast %cst_22 : f32 to vector<1x1xf32>
    %217 = arith.addf %215, %216 : vector<1x1xf32>
    %218 = vector.extract_strided_slice %20 {offsets = [0, 6], sizes = [1, 1], strides = [1, 1]} : vector<1x8xf32> to vector<1x1xf32>
    %219 = vector.extract_strided_slice %212 {offsets = [12, 0], sizes = [1, 1], strides = [1, 1]} : vector<13x1xf32> to vector<1x1xf32>
    %220 = arith.subf %218, %219 : vector<1x1xf32>
    %221 = arith.mulf %192, %217 : vector<1x1xf32>
    %222 = arith.mulf %220, %220 : vector<1x1xf32>
    %223 = arith.divf %222, %217 : vector<1x1xf32>
    %224 = arith.addf %195, %223 : vector<1x1xf32>
    %225 = vector.extract_strided_slice %209 {offsets = [1, 0], sizes = [1, 12], strides = [1, 1]} : vector<13x12xf32> to vector<1x12xf32>
    %226 = vector.extract_strided_slice %209 {offsets = [10, 0], sizes = [1, 12], strides = [1, 1]} : vector<13x12xf32> to vector<1x12xf32>
    %227 = arith.addf %225, %226 : vector<1x12xf32>
    %cst_23 = arith.constant 0.000000e+00 : f32
    %228 = vector.broadcast %cst_23 : f32 to vector<13x1xf32>
    %229 = arith.subf %228, %212 : vector<13x1xf32>
    %230 = vector.shape_cast %220 : vector<1x1xf32> to vector<1x1xf32>
    %231 = vector.broadcast %230 : vector<1x1xf32> to vector<13x1xf32>
    %232 = arith.select %16, %229, %231 : vector<13x1xi1>, vector<13x1xf32>
    %233 = vector.broadcast %217 : vector<1x1xf32> to vector<13x1xf32>
    %234 = arith.divf %232, %233 : vector<13x1xf32>
    %235 = vector.broadcast %234 : vector<13x1xf32> to vector<13x12xf32>
    %236 = vector.broadcast %227 : vector<1x12xf32> to vector<13x12xf32>
    %237 = arith.mulf %235, %236 : vector<13x12xf32>
    %238 = arith.addf %209, %237 : vector<13x12xf32>
    %239 = vector.extract_strided_slice %238 {offsets = [0, 1], sizes = [13, 1], strides = [1, 1]} : vector<13x12xf32> to vector<13x1xf32>
    %240 = vector.extract_strided_slice %238 {offsets = [0, 11], sizes = [13, 1], strides = [1, 1]} : vector<13x12xf32> to vector<13x1xf32>
    %241 = arith.addf %239, %240 : vector<13x1xf32>
    %242 = vector.extract_strided_slice %241 {offsets = [1, 0], sizes = [1, 1], strides = [1, 1]} : vector<13x1xf32> to vector<1x1xf32>
    %243 = vector.extract_strided_slice %241 {offsets = [11, 0], sizes = [1, 1], strides = [1, 1]} : vector<13x1xf32> to vector<1x1xf32>
    %244 = arith.addf %242, %243 : vector<1x1xf32>
    %cst_24 = arith.constant 1.000000e+00 : f32
    %245 = vector.broadcast %cst_24 : f32 to vector<1x1xf32>
    %246 = arith.addf %244, %245 : vector<1x1xf32>
    %247 = vector.extract_strided_slice %20 {offsets = [0, 7], sizes = [1, 1], strides = [1, 1]} : vector<1x8xf32> to vector<1x1xf32>
    %248 = vector.extract_strided_slice %241 {offsets = [12, 0], sizes = [1, 1], strides = [1, 1]} : vector<13x1xf32> to vector<1x1xf32>
    %249 = arith.subf %247, %248 : vector<1x1xf32>
    %250 = arith.mulf %221, %246 : vector<1x1xf32>
    %251 = arith.mulf %249, %249 : vector<1x1xf32>
    %252 = arith.divf %251, %246 : vector<1x1xf32>
    %253 = arith.addf %224, %252 : vector<1x1xf32>
    %254 = vector.extract_strided_slice %238 {offsets = [1, 0], sizes = [1, 12], strides = [1, 1]} : vector<13x12xf32> to vector<1x12xf32>
    %255 = vector.extract_strided_slice %238 {offsets = [11, 0], sizes = [1, 12], strides = [1, 1]} : vector<13x12xf32> to vector<1x12xf32>
    %256 = arith.addf %254, %255 : vector<1x12xf32>
    %cst_25 = arith.constant 0.000000e+00 : f32
    %257 = vector.broadcast %cst_25 : f32 to vector<13x1xf32>
    %258 = arith.subf %257, %241 : vector<13x1xf32>
    %259 = vector.shape_cast %249 : vector<1x1xf32> to vector<1x1xf32>
    %260 = vector.broadcast %259 : vector<1x1xf32> to vector<13x1xf32>
    %261 = arith.select %16, %258, %260 : vector<13x1xi1>, vector<13x1xf32>
    %262 = vector.broadcast %246 : vector<1x1xf32> to vector<13x1xf32>
    %263 = arith.divf %261, %262 : vector<13x1xf32>
    %264 = vector.broadcast %263 : vector<13x1xf32> to vector<13x12xf32>
    %265 = vector.broadcast %256 : vector<1x12xf32> to vector<13x12xf32>
    %266 = arith.mulf %264, %265 : vector<13x12xf32>
    %267 = arith.addf %238, %266 : vector<13x12xf32>
    %268 = math.log %250 : vector<1x1xf32>
    %cst_26 = arith.constant 14.7030163 : f32
    %269 = vector.broadcast %cst_26 : f32 to vector<1x1xf32>
    %270 = arith.addf %269, %268 : vector<1x1xf32>
    %271 = arith.addf %270, %253 : vector<1x1xf32>
    %cst_27 = arith.constant 5.000000e-01 : f32
    %272 = vector.broadcast %cst_27 : f32 to vector<1x1xf32>
    %273 = arith.mulf %272, %271 : vector<1x1xf32>
    %274 = arith.subf %18, %273 : vector<1x1xf32>
    %c1_i32 = arith.constant 1 : i32
    %275 = arith.index_cast %c1_i32 : i32 to index
    %c0_28 = arith.constant 0 : index
    %276 = vector.load %arg1[%275, %c0_28] : memref<8x8xf32, #tpu.memory_space<vmem>>, vector<1x8xf32>
    %277 = vector.extract_strided_slice %267 {offsets = [0, 2], sizes = [13, 10], strides = [1, 1]} : vector<13x12xf32> to vector<13x10xf32>
    %278 = vector.extract_strided_slice %267 {offsets = [0, 0], sizes = [13, 2], strides = [1, 1]} : vector<13x12xf32> to vector<13x2xf32>
    %279 = tpu.concatenate %277, %278 in 1 : vector<13x10xf32>, vector<13x2xf32> -> vector<13x12xf32>
    %280 = vector.broadcast %8 : vector<1x12xf32> to vector<13x12xf32>
    %281 = arith.mulf %280, %279 : vector<13x12xf32>
    %282 = arith.addf %267, %281 : vector<13x12xf32>
    %283 = vector.extract_strided_slice %282 {offsets = [2, 0], sizes = [11, 12], strides = [1, 1]} : vector<13x12xf32> to vector<11x12xf32>
    %284 = vector.extract_strided_slice %282 {offsets = [0, 0], sizes = [2, 12], strides = [1, 1]} : vector<13x12xf32> to vector<2x12xf32>
    %285 = tpu.concatenate %283, %284 in 0 : vector<11x12xf32>, vector<2x12xf32> -> vector<13x12xf32>
    %286 = vector.broadcast %13 : vector<13x1xf32> to vector<13x12xf32>
    %287 = arith.mulf %286, %285 : vector<13x12xf32>
    %288 = arith.addf %282, %287 : vector<13x12xf32>
    %289 = arith.addf %288, %3 : vector<13x12xf32>
    %cst_29 = arith.constant 1.000000e+00 : f32
    %290 = vector.broadcast %cst_29 : f32 to vector<1x1xf32>
    %cst_30 = arith.constant 0.000000e+00 : f32
    %291 = vector.broadcast %cst_30 : f32 to vector<1x1xf32>
    %292 = vector.extract_strided_slice %289 {offsets = [0, 0], sizes = [13, 1], strides = [1, 1]} : vector<13x12xf32> to vector<13x1xf32>
    %293 = vector.extract_strided_slice %289 {offsets = [0, 4], sizes = [13, 1], strides = [1, 1]} : vector<13x12xf32> to vector<13x1xf32>
    %294 = arith.addf %292, %293 : vector<13x1xf32>
    %295 = vector.extract_strided_slice %294 {offsets = [0, 0], sizes = [1, 1], strides = [1, 1]} : vector<13x1xf32> to vector<1x1xf32>
    %296 = vector.extract_strided_slice %294 {offsets = [4, 0], sizes = [1, 1], strides = [1, 1]} : vector<13x1xf32> to vector<1x1xf32>
    %297 = arith.addf %295, %296 : vector<1x1xf32>
    %cst_31 = arith.constant 1.000000e+00 : f32
    %298 = vector.broadcast %cst_31 : f32 to vector<1x1xf32>
    %299 = arith.addf %297, %298 : vector<1x1xf32>
    %300 = vector.extract_strided_slice %276 {offsets = [0, 0], sizes = [1, 1], strides = [1, 1]} : vector<1x8xf32> to vector<1x1xf32>
    %301 = vector.extract_strided_slice %294 {offsets = [12, 0], sizes = [1, 1], strides = [1, 1]} : vector<13x1xf32> to vector<1x1xf32>
    %302 = arith.subf %300, %301 : vector<1x1xf32>
    %303 = arith.mulf %290, %299 : vector<1x1xf32>
    %304 = arith.mulf %302, %302 : vector<1x1xf32>
    %305 = arith.divf %304, %299 : vector<1x1xf32>
    %306 = arith.addf %291, %305 : vector<1x1xf32>
    %307 = vector.extract_strided_slice %289 {offsets = [0, 0], sizes = [1, 12], strides = [1, 1]} : vector<13x12xf32> to vector<1x12xf32>
    %308 = vector.extract_strided_slice %289 {offsets = [4, 0], sizes = [1, 12], strides = [1, 1]} : vector<13x12xf32> to vector<1x12xf32>
    %309 = arith.addf %307, %308 : vector<1x12xf32>
    %cst_32 = arith.constant 0.000000e+00 : f32
    %310 = vector.broadcast %cst_32 : f32 to vector<13x1xf32>
    %311 = arith.subf %310, %294 : vector<13x1xf32>
    %312 = vector.shape_cast %302 : vector<1x1xf32> to vector<1x1xf32>
    %313 = vector.broadcast %312 : vector<1x1xf32> to vector<13x1xf32>
    %314 = arith.select %16, %311, %313 : vector<13x1xi1>, vector<13x1xf32>
    %315 = vector.broadcast %299 : vector<1x1xf32> to vector<13x1xf32>
    %316 = arith.divf %314, %315 : vector<13x1xf32>
    %317 = vector.broadcast %316 : vector<13x1xf32> to vector<13x12xf32>
    %318 = vector.broadcast %309 : vector<1x12xf32> to vector<13x12xf32>
    %319 = arith.mulf %317, %318 : vector<13x12xf32>
    %320 = arith.addf %289, %319 : vector<13x12xf32>
    %321 = vector.extract_strided_slice %320 {offsets = [0, 0], sizes = [13, 1], strides = [1, 1]} : vector<13x12xf32> to vector<13x1xf32>
    %322 = vector.extract_strided_slice %320 {offsets = [0, 5], sizes = [13, 1], strides = [1, 1]} : vector<13x12xf32> to vector<13x1xf32>
    %323 = arith.addf %321, %322 : vector<13x1xf32>
    %324 = vector.extract_strided_slice %323 {offsets = [0, 0], sizes = [1, 1], strides = [1, 1]} : vector<13x1xf32> to vector<1x1xf32>
    %325 = vector.extract_strided_slice %323 {offsets = [5, 0], sizes = [1, 1], strides = [1, 1]} : vector<13x1xf32> to vector<1x1xf32>
    %326 = arith.addf %324, %325 : vector<1x1xf32>
    %cst_33 = arith.constant 1.000000e+00 : f32
    %327 = vector.broadcast %cst_33 : f32 to vector<1x1xf32>
    %328 = arith.addf %326, %327 : vector<1x1xf32>
    %329 = vector.extract_strided_slice %276 {offsets = [0, 1], sizes = [1, 1], strides = [1, 1]} : vector<1x8xf32> to vector<1x1xf32>
    %330 = vector.extract_strided_slice %323 {offsets = [12, 0], sizes = [1, 1], strides = [1, 1]} : vector<13x1xf32> to vector<1x1xf32>
    %331 = arith.subf %329, %330 : vector<1x1xf32>
    %332 = arith.mulf %303, %328 : vector<1x1xf32>
    %333 = arith.mulf %331, %331 : vector<1x1xf32>
    %334 = arith.divf %333, %328 : vector<1x1xf32>
    %335 = arith.addf %306, %334 : vector<1x1xf32>
    %336 = vector.extract_strided_slice %320 {offsets = [0, 0], sizes = [1, 12], strides = [1, 1]} : vector<13x12xf32> to vector<1x12xf32>
    %337 = vector.extract_strided_slice %320 {offsets = [5, 0], sizes = [1, 12], strides = [1, 1]} : vector<13x12xf32> to vector<1x12xf32>
    %338 = arith.addf %336, %337 : vector<1x12xf32>
    %cst_34 = arith.constant 0.000000e+00 : f32
    %339 = vector.broadcast %cst_34 : f32 to vector<13x1xf32>
    %340 = arith.subf %339, %323 : vector<13x1xf32>
    %341 = vector.shape_cast %331 : vector<1x1xf32> to vector<1x1xf32>
    %342 = vector.broadcast %341 : vector<1x1xf32> to vector<13x1xf32>
    %343 = arith.select %16, %340, %342 : vector<13x1xi1>, vector<13x1xf32>
    %344 = vector.broadcast %328 : vector<1x1xf32> to vector<13x1xf32>
    %345 = arith.divf %343, %344 : vector<13x1xf32>
    %346 = vector.broadcast %345 : vector<13x1xf32> to vector<13x12xf32>
    %347 = vector.broadcast %338 : vector<1x12xf32> to vector<13x12xf32>
    %348 = arith.mulf %346, %347 : vector<13x12xf32>
    %349 = arith.addf %320, %348 : vector<13x12xf32>
    %350 = vector.extract_strided_slice %349 {offsets = [0, 0], sizes = [13, 1], strides = [1, 1]} : vector<13x12xf32> to vector<13x1xf32>
    %351 = vector.extract_strided_slice %349 {offsets = [0, 6], sizes = [13, 1], strides = [1, 1]} : vector<13x12xf32> to vector<13x1xf32>
    %352 = arith.addf %350, %351 : vector<13x1xf32>
    %353 = vector.extract_strided_slice %352 {offsets = [0, 0], sizes = [1, 1], strides = [1, 1]} : vector<13x1xf32> to vector<1x1xf32>
    %354 = vector.extract_strided_slice %352 {offsets = [6, 0], sizes = [1, 1], strides = [1, 1]} : vector<13x1xf32> to vector<1x1xf32>
    %355 = arith.addf %353, %354 : vector<1x1xf32>
    %cst_35 = arith.constant 1.000000e+00 : f32
    %356 = vector.broadcast %cst_35 : f32 to vector<1x1xf32>
    %357 = arith.addf %355, %356 : vector<1x1xf32>
    %358 = vector.extract_strided_slice %276 {offsets = [0, 2], sizes = [1, 1], strides = [1, 1]} : vector<1x8xf32> to vector<1x1xf32>
    %359 = vector.extract_strided_slice %352 {offsets = [12, 0], sizes = [1, 1], strides = [1, 1]} : vector<13x1xf32> to vector<1x1xf32>
    %360 = arith.subf %358, %359 : vector<1x1xf32>
    %361 = arith.mulf %332, %357 : vector<1x1xf32>
    %362 = arith.mulf %360, %360 : vector<1x1xf32>
    %363 = arith.divf %362, %357 : vector<1x1xf32>
    %364 = arith.addf %335, %363 : vector<1x1xf32>
    %365 = vector.extract_strided_slice %349 {offsets = [0, 0], sizes = [1, 12], strides = [1, 1]} : vector<13x12xf32> to vector<1x12xf32>
    %366 = vector.extract_strided_slice %349 {offsets = [6, 0], sizes = [1, 12], strides = [1, 1]} : vector<13x12xf32> to vector<1x12xf32>
    %367 = arith.addf %365, %366 : vector<1x12xf32>
    %cst_36 = arith.constant 0.000000e+00 : f32
    %368 = vector.broadcast %cst_36 : f32 to vector<13x1xf32>
    %369 = arith.subf %368, %352 : vector<13x1xf32>
    %370 = vector.shape_cast %360 : vector<1x1xf32> to vector<1x1xf32>
    %371 = vector.broadcast %370 : vector<1x1xf32> to vector<13x1xf32>
    %372 = arith.select %16, %369, %371 : vector<13x1xi1>, vector<13x1xf32>
    %373 = vector.broadcast %357 : vector<1x1xf32> to vector<13x1xf32>
    %374 = arith.divf %372, %373 : vector<13x1xf32>
    %375 = vector.broadcast %374 : vector<13x1xf32> to vector<13x12xf32>
    %376 = vector.broadcast %367 : vector<1x12xf32> to vector<13x12xf32>
    %377 = arith.mulf %375, %376 : vector<13x12xf32>
    %378 = arith.addf %349, %377 : vector<13x12xf32>
    %379 = vector.extract_strided_slice %378 {offsets = [0, 0], sizes = [13, 1], strides = [1, 1]} : vector<13x12xf32> to vector<13x1xf32>
    %380 = vector.extract_strided_slice %378 {offsets = [0, 7], sizes = [13, 1], strides = [1, 1]} : vector<13x12xf32> to vector<13x1xf32>
    %381 = arith.addf %379, %380 : vector<13x1xf32>
    %382 = vector.extract_strided_slice %381 {offsets = [0, 0], sizes = [1, 1], strides = [1, 1]} : vector<13x1xf32> to vector<1x1xf32>
    %383 = vector.extract_strided_slice %381 {offsets = [7, 0], sizes = [1, 1], strides = [1, 1]} : vector<13x1xf32> to vector<1x1xf32>
    %384 = arith.addf %382, %383 : vector<1x1xf32>
    %cst_37 = arith.constant 1.000000e+00 : f32
    %385 = vector.broadcast %cst_37 : f32 to vector<1x1xf32>
    %386 = arith.addf %384, %385 : vector<1x1xf32>
    %387 = vector.extract_strided_slice %276 {offsets = [0, 3], sizes = [1, 1], strides = [1, 1]} : vector<1x8xf32> to vector<1x1xf32>
    %388 = vector.extract_strided_slice %381 {offsets = [12, 0], sizes = [1, 1], strides = [1, 1]} : vector<13x1xf32> to vector<1x1xf32>
    %389 = arith.subf %387, %388 : vector<1x1xf32>
    %390 = arith.mulf %361, %386 : vector<1x1xf32>
    %391 = arith.mulf %389, %389 : vector<1x1xf32>
    %392 = arith.divf %391, %386 : vector<1x1xf32>
    %393 = arith.addf %364, %392 : vector<1x1xf32>
    %394 = vector.extract_strided_slice %378 {offsets = [0, 0], sizes = [1, 12], strides = [1, 1]} : vector<13x12xf32> to vector<1x12xf32>
    %395 = vector.extract_strided_slice %378 {offsets = [7, 0], sizes = [1, 12], strides = [1, 1]} : vector<13x12xf32> to vector<1x12xf32>
    %396 = arith.addf %394, %395 : vector<1x12xf32>
    %cst_38 = arith.constant 0.000000e+00 : f32
    %397 = vector.broadcast %cst_38 : f32 to vector<13x1xf32>
    %398 = arith.subf %397, %381 : vector<13x1xf32>
    %399 = vector.shape_cast %389 : vector<1x1xf32> to vector<1x1xf32>
    %400 = vector.broadcast %399 : vector<1x1xf32> to vector<13x1xf32>
    %401 = arith.select %16, %398, %400 : vector<13x1xi1>, vector<13x1xf32>
    %402 = vector.broadcast %386 : vector<1x1xf32> to vector<13x1xf32>
    %403 = arith.divf %401, %402 : vector<13x1xf32>
    %404 = vector.broadcast %403 : vector<13x1xf32> to vector<13x12xf32>
    %405 = vector.broadcast %396 : vector<1x12xf32> to vector<13x12xf32>
    %406 = arith.mulf %404, %405 : vector<13x12xf32>
    %407 = arith.addf %378, %406 : vector<13x12xf32>
    %408 = vector.extract_strided_slice %407 {offsets = [0, 1], sizes = [13, 1], strides = [1, 1]} : vector<13x12xf32> to vector<13x1xf32>
    %409 = vector.extract_strided_slice %407 {offsets = [0, 8], sizes = [13, 1], strides = [1, 1]} : vector<13x12xf32> to vector<13x1xf32>
    %410 = arith.addf %408, %409 : vector<13x1xf32>
    %411 = vector.extract_strided_slice %410 {offsets = [1, 0], sizes = [1, 1], strides = [1, 1]} : vector<13x1xf32> to vector<1x1xf32>
    %412 = vector.extract_strided_slice %410 {offsets = [8, 0], sizes = [1, 1], strides = [1, 1]} : vector<13x1xf32> to vector<1x1xf32>
    %413 = arith.addf %411, %412 : vector<1x1xf32>
    %cst_39 = arith.constant 1.000000e+00 : f32
    %414 = vector.broadcast %cst_39 : f32 to vector<1x1xf32>
    %415 = arith.addf %413, %414 : vector<1x1xf32>
    %416 = vector.extract_strided_slice %276 {offsets = [0, 4], sizes = [1, 1], strides = [1, 1]} : vector<1x8xf32> to vector<1x1xf32>
    %417 = vector.extract_strided_slice %410 {offsets = [12, 0], sizes = [1, 1], strides = [1, 1]} : vector<13x1xf32> to vector<1x1xf32>
    %418 = arith.subf %416, %417 : vector<1x1xf32>
    %419 = arith.mulf %390, %415 : vector<1x1xf32>
    %420 = arith.mulf %418, %418 : vector<1x1xf32>
    %421 = arith.divf %420, %415 : vector<1x1xf32>
    %422 = arith.addf %393, %421 : vector<1x1xf32>
    %423 = vector.extract_strided_slice %407 {offsets = [1, 0], sizes = [1, 12], strides = [1, 1]} : vector<13x12xf32> to vector<1x12xf32>
    %424 = vector.extract_strided_slice %407 {offsets = [8, 0], sizes = [1, 12], strides = [1, 1]} : vector<13x12xf32> to vector<1x12xf32>
    %425 = arith.addf %423, %424 : vector<1x12xf32>
    %cst_40 = arith.constant 0.000000e+00 : f32
    %426 = vector.broadcast %cst_40 : f32 to vector<13x1xf32>
    %427 = arith.subf %426, %410 : vector<13x1xf32>
    %428 = vector.shape_cast %418 : vector<1x1xf32> to vector<1x1xf32>
    %429 = vector.broadcast %428 : vector<1x1xf32> to vector<13x1xf32>
    %430 = arith.select %16, %427, %429 : vector<13x1xi1>, vector<13x1xf32>
    %431 = vector.broadcast %415 : vector<1x1xf32> to vector<13x1xf32>
    %432 = arith.divf %430, %431 : vector<13x1xf32>
    %433 = vector.broadcast %432 : vector<13x1xf32> to vector<13x12xf32>
    %434 = vector.broadcast %425 : vector<1x12xf32> to vector<13x12xf32>
    %435 = arith.mulf %433, %434 : vector<13x12xf32>
    %436 = arith.addf %407, %435 : vector<13x12xf32>
    %437 = vector.extract_strided_slice %436 {offsets = [0, 1], sizes = [13, 1], strides = [1, 1]} : vector<13x12xf32> to vector<13x1xf32>
    %438 = vector.extract_strided_slice %436 {offsets = [0, 9], sizes = [13, 1], strides = [1, 1]} : vector<13x12xf32> to vector<13x1xf32>
    %439 = arith.addf %437, %438 : vector<13x1xf32>
    %440 = vector.extract_strided_slice %439 {offsets = [1, 0], sizes = [1, 1], strides = [1, 1]} : vector<13x1xf32> to vector<1x1xf32>
    %441 = vector.extract_strided_slice %439 {offsets = [9, 0], sizes = [1, 1], strides = [1, 1]} : vector<13x1xf32> to vector<1x1xf32>
    %442 = arith.addf %440, %441 : vector<1x1xf32>
    %cst_41 = arith.constant 1.000000e+00 : f32
    %443 = vector.broadcast %cst_41 : f32 to vector<1x1xf32>
    %444 = arith.addf %442, %443 : vector<1x1xf32>
    %445 = vector.extract_strided_slice %276 {offsets = [0, 5], sizes = [1, 1], strides = [1, 1]} : vector<1x8xf32> to vector<1x1xf32>
    %446 = vector.extract_strided_slice %439 {offsets = [12, 0], sizes = [1, 1], strides = [1, 1]} : vector<13x1xf32> to vector<1x1xf32>
    %447 = arith.subf %445, %446 : vector<1x1xf32>
    %448 = arith.mulf %419, %444 : vector<1x1xf32>
    %449 = arith.mulf %447, %447 : vector<1x1xf32>
    %450 = arith.divf %449, %444 : vector<1x1xf32>
    %451 = arith.addf %422, %450 : vector<1x1xf32>
    %452 = vector.extract_strided_slice %436 {offsets = [1, 0], sizes = [1, 12], strides = [1, 1]} : vector<13x12xf32> to vector<1x12xf32>
    %453 = vector.extract_strided_slice %436 {offsets = [9, 0], sizes = [1, 12], strides = [1, 1]} : vector<13x12xf32> to vector<1x12xf32>
    %454 = arith.addf %452, %453 : vector<1x12xf32>
    %cst_42 = arith.constant 0.000000e+00 : f32
    %455 = vector.broadcast %cst_42 : f32 to vector<13x1xf32>
    %456 = arith.subf %455, %439 : vector<13x1xf32>
    %457 = vector.shape_cast %447 : vector<1x1xf32> to vector<1x1xf32>
    %458 = vector.broadcast %457 : vector<1x1xf32> to vector<13x1xf32>
    %459 = arith.select %16, %456, %458 : vector<13x1xi1>, vector<13x1xf32>
    %460 = vector.broadcast %444 : vector<1x1xf32> to vector<13x1xf32>
    %461 = arith.divf %459, %460 : vector<13x1xf32>
    %462 = vector.broadcast %461 : vector<13x1xf32> to vector<13x12xf32>
    %463 = vector.broadcast %454 : vector<1x12xf32> to vector<13x12xf32>
    %464 = arith.mulf %462, %463 : vector<13x12xf32>
    %465 = arith.addf %436, %464 : vector<13x12xf32>
    %466 = vector.extract_strided_slice %465 {offsets = [0, 1], sizes = [13, 1], strides = [1, 1]} : vector<13x12xf32> to vector<13x1xf32>
    %467 = vector.extract_strided_slice %465 {offsets = [0, 10], sizes = [13, 1], strides = [1, 1]} : vector<13x12xf32> to vector<13x1xf32>
    %468 = arith.addf %466, %467 : vector<13x1xf32>
    %469 = vector.extract_strided_slice %468 {offsets = [1, 0], sizes = [1, 1], strides = [1, 1]} : vector<13x1xf32> to vector<1x1xf32>
    %470 = vector.extract_strided_slice %468 {offsets = [10, 0], sizes = [1, 1], strides = [1, 1]} : vector<13x1xf32> to vector<1x1xf32>
    %471 = arith.addf %469, %470 : vector<1x1xf32>
    %cst_43 = arith.constant 1.000000e+00 : f32
    %472 = vector.broadcast %cst_43 : f32 to vector<1x1xf32>
    %473 = arith.addf %471, %472 : vector<1x1xf32>
    %474 = vector.extract_strided_slice %276 {offsets = [0, 6], sizes = [1, 1], strides = [1, 1]} : vector<1x8xf32> to vector<1x1xf32>
    %475 = vector.extract_strided_slice %468 {offsets = [12, 0], sizes = [1, 1], strides = [1, 1]} : vector<13x1xf32> to vector<1x1xf32>
    %476 = arith.subf %474, %475 : vector<1x1xf32>
    %477 = arith.mulf %448, %473 : vector<1x1xf32>
    %478 = arith.mulf %476, %476 : vector<1x1xf32>
    %479 = arith.divf %478, %473 : vector<1x1xf32>
    %480 = arith.addf %451, %479 : vector<1x1xf32>
    %481 = vector.extract_strided_slice %465 {offsets = [1, 0], sizes = [1, 12], strides = [1, 1]} : vector<13x12xf32> to vector<1x12xf32>
    %482 = vector.extract_strided_slice %465 {offsets = [10, 0], sizes = [1, 12], strides = [1, 1]} : vector<13x12xf32> to vector<1x12xf32>
    %483 = arith.addf %481, %482 : vector<1x12xf32>
    %cst_44 = arith.constant 0.000000e+00 : f32
    %484 = vector.broadcast %cst_44 : f32 to vector<13x1xf32>
    %485 = arith.subf %484, %468 : vector<13x1xf32>
    %486 = vector.shape_cast %476 : vector<1x1xf32> to vector<1x1xf32>
    %487 = vector.broadcast %486 : vector<1x1xf32> to vector<13x1xf32>
    %488 = arith.select %16, %485, %487 : vector<13x1xi1>, vector<13x1xf32>
    %489 = vector.broadcast %473 : vector<1x1xf32> to vector<13x1xf32>
    %490 = arith.divf %488, %489 : vector<13x1xf32>
    %491 = vector.broadcast %490 : vector<13x1xf32> to vector<13x12xf32>
    %492 = vector.broadcast %483 : vector<1x12xf32> to vector<13x12xf32>
    %493 = arith.mulf %491, %492 : vector<13x12xf32>
    %494 = arith.addf %465, %493 : vector<13x12xf32>
    %495 = vector.extract_strided_slice %494 {offsets = [0, 1], sizes = [13, 1], strides = [1, 1]} : vector<13x12xf32> to vector<13x1xf32>
    %496 = vector.extract_strided_slice %494 {offsets = [0, 11], sizes = [13, 1], strides = [1, 1]} : vector<13x12xf32> to vector<13x1xf32>
    %497 = arith.addf %495, %496 : vector<13x1xf32>
    %498 = vector.extract_strided_slice %497 {offsets = [1, 0], sizes = [1, 1], strides = [1, 1]} : vector<13x1xf32> to vector<1x1xf32>
    %499 = vector.extract_strided_slice %497 {offsets = [11, 0], sizes = [1, 1], strides = [1, 1]} : vector<13x1xf32> to vector<1x1xf32>
    %500 = arith.addf %498, %499 : vector<1x1xf32>
    %cst_45 = arith.constant 1.000000e+00 : f32
    %501 = vector.broadcast %cst_45 : f32 to vector<1x1xf32>
    %502 = arith.addf %500, %501 : vector<1x1xf32>
    %503 = vector.extract_strided_slice %276 {offsets = [0, 7], sizes = [1, 1], strides = [1, 1]} : vector<1x8xf32> to vector<1x1xf32>
    %504 = vector.extract_strided_slice %497 {offsets = [12, 0], sizes = [1, 1], strides = [1, 1]} : vector<13x1xf32> to vector<1x1xf32>
    %505 = arith.subf %503, %504 : vector<1x1xf32>
    %506 = arith.mulf %477, %502 : vector<1x1xf32>
    %507 = arith.mulf %505, %505 : vector<1x1xf32>
    %508 = arith.divf %507, %502 : vector<1x1xf32>
    %509 = arith.addf %480, %508 : vector<1x1xf32>
    %510 = vector.extract_strided_slice %494 {offsets = [1, 0], sizes = [1, 12], strides = [1, 1]} : vector<13x12xf32> to vector<1x12xf32>
    %511 = vector.extract_strided_slice %494 {offsets = [11, 0], sizes = [1, 12], strides = [1, 1]} : vector<13x12xf32> to vector<1x12xf32>
    %512 = arith.addf %510, %511 : vector<1x12xf32>
    %cst_46 = arith.constant 0.000000e+00 : f32
    %513 = vector.broadcast %cst_46 : f32 to vector<13x1xf32>
    %514 = arith.subf %513, %497 : vector<13x1xf32>
    %515 = vector.shape_cast %505 : vector<1x1xf32> to vector<1x1xf32>
    %516 = vector.broadcast %515 : vector<1x1xf32> to vector<13x1xf32>
    %517 = arith.select %16, %514, %516 : vector<13x1xi1>, vector<13x1xf32>
    %518 = vector.broadcast %502 : vector<1x1xf32> to vector<13x1xf32>
    %519 = arith.divf %517, %518 : vector<13x1xf32>
    %520 = vector.broadcast %519 : vector<13x1xf32> to vector<13x12xf32>
    %521 = vector.broadcast %512 : vector<1x12xf32> to vector<13x12xf32>
    %522 = arith.mulf %520, %521 : vector<13x12xf32>
    %523 = arith.addf %494, %522 : vector<13x12xf32>
    %524 = math.log %506 : vector<1x1xf32>
    %cst_47 = arith.constant 14.7030163 : f32
    %525 = vector.broadcast %cst_47 : f32 to vector<1x1xf32>
    %526 = arith.addf %525, %524 : vector<1x1xf32>
    %527 = arith.addf %526, %509 : vector<1x1xf32>
    %cst_48 = arith.constant 5.000000e-01 : f32
    %528 = vector.broadcast %cst_48 : f32 to vector<1x1xf32>
    %529 = arith.mulf %528, %527 : vector<1x1xf32>
    %530 = arith.subf %274, %529 : vector<1x1xf32>
    %c2_i32_49 = arith.constant 2 : i32
    %531 = arith.index_cast %c2_i32_49 : i32 to index
    %c0_50 = arith.constant 0 : index
    %532 = vector.load %arg1[%531, %c0_50] : memref<8x8xf32, #tpu.memory_space<vmem>>, vector<1x8xf32>
    %533 = vector.extract_strided_slice %523 {offsets = [0, 2], sizes = [13, 10], strides = [1, 1]} : vector<13x12xf32> to vector<13x10xf32>
    %534 = vector.extract_strided_slice %523 {offsets = [0, 0], sizes = [13, 2], strides = [1, 1]} : vector<13x12xf32> to vector<13x2xf32>
    %535 = tpu.concatenate %533, %534 in 1 : vector<13x10xf32>, vector<13x2xf32> -> vector<13x12xf32>
    %536 = vector.broadcast %8 : vector<1x12xf32> to vector<13x12xf32>
    %537 = arith.mulf %536, %535 : vector<13x12xf32>
    %538 = arith.addf %523, %537 : vector<13x12xf32>
    %539 = vector.extract_strided_slice %538 {offsets = [2, 0], sizes = [11, 12], strides = [1, 1]} : vector<13x12xf32> to vector<11x12xf32>
    %540 = vector.extract_strided_slice %538 {offsets = [0, 0], sizes = [2, 12], strides = [1, 1]} : vector<13x12xf32> to vector<2x12xf32>
    %541 = tpu.concatenate %539, %540 in 0 : vector<11x12xf32>, vector<2x12xf32> -> vector<13x12xf32>
    %542 = vector.broadcast %13 : vector<13x1xf32> to vector<13x12xf32>
    %543 = arith.mulf %542, %541 : vector<13x12xf32>
    %544 = arith.addf %538, %543 : vector<13x12xf32>
    %545 = arith.addf %544, %3 : vector<13x12xf32>
    %cst_51 = arith.constant 1.000000e+00 : f32
    %546 = vector.broadcast %cst_51 : f32 to vector<1x1xf32>
    %cst_52 = arith.constant 0.000000e+00 : f32
    %547 = vector.broadcast %cst_52 : f32 to vector<1x1xf32>
    %548 = vector.extract_strided_slice %545 {offsets = [0, 0], sizes = [13, 1], strides = [1, 1]} : vector<13x12xf32> to vector<13x1xf32>
    %549 = vector.extract_strided_slice %545 {offsets = [0, 4], sizes = [13, 1], strides = [1, 1]} : vector<13x12xf32> to vector<13x1xf32>
    %550 = arith.addf %548, %549 : vector<13x1xf32>
    %551 = vector.extract_strided_slice %550 {offsets = [0, 0], sizes = [1, 1], strides = [1, 1]} : vector<13x1xf32> to vector<1x1xf32>
    %552 = vector.extract_strided_slice %550 {offsets = [4, 0], sizes = [1, 1], strides = [1, 1]} : vector<13x1xf32> to vector<1x1xf32>
    %553 = arith.addf %551, %552 : vector<1x1xf32>
    %cst_53 = arith.constant 1.000000e+00 : f32
    %554 = vector.broadcast %cst_53 : f32 to vector<1x1xf32>
    %555 = arith.addf %553, %554 : vector<1x1xf32>
    %556 = vector.extract_strided_slice %532 {offsets = [0, 0], sizes = [1, 1], strides = [1, 1]} : vector<1x8xf32> to vector<1x1xf32>
    %557 = vector.extract_strided_slice %550 {offsets = [12, 0], sizes = [1, 1], strides = [1, 1]} : vector<13x1xf32> to vector<1x1xf32>
    %558 = arith.subf %556, %557 : vector<1x1xf32>
    %559 = arith.mulf %546, %555 : vector<1x1xf32>
    %560 = arith.mulf %558, %558 : vector<1x1xf32>
    %561 = arith.divf %560, %555 : vector<1x1xf32>
    %562 = arith.addf %547, %561 : vector<1x1xf32>
    %563 = vector.extract_strided_slice %545 {offsets = [0, 0], sizes = [1, 12], strides = [1, 1]} : vector<13x12xf32> to vector<1x12xf32>
    %564 = vector.extract_strided_slice %545 {offsets = [4, 0], sizes = [1, 12], strides = [1, 1]} : vector<13x12xf32> to vector<1x12xf32>
    %565 = arith.addf %563, %564 : vector<1x12xf32>
    %cst_54 = arith.constant 0.000000e+00 : f32
    %566 = vector.broadcast %cst_54 : f32 to vector<13x1xf32>
    %567 = arith.subf %566, %550 : vector<13x1xf32>
    %568 = vector.shape_cast %558 : vector<1x1xf32> to vector<1x1xf32>
    %569 = vector.broadcast %568 : vector<1x1xf32> to vector<13x1xf32>
    %570 = arith.select %16, %567, %569 : vector<13x1xi1>, vector<13x1xf32>
    %571 = vector.broadcast %555 : vector<1x1xf32> to vector<13x1xf32>
    %572 = arith.divf %570, %571 : vector<13x1xf32>
    %573 = vector.broadcast %572 : vector<13x1xf32> to vector<13x12xf32>
    %574 = vector.broadcast %565 : vector<1x12xf32> to vector<13x12xf32>
    %575 = arith.mulf %573, %574 : vector<13x12xf32>
    %576 = arith.addf %545, %575 : vector<13x12xf32>
    %577 = vector.extract_strided_slice %576 {offsets = [0, 0], sizes = [13, 1], strides = [1, 1]} : vector<13x12xf32> to vector<13x1xf32>
    %578 = vector.extract_strided_slice %576 {offsets = [0, 5], sizes = [13, 1], strides = [1, 1]} : vector<13x12xf32> to vector<13x1xf32>
    %579 = arith.addf %577, %578 : vector<13x1xf32>
    %580 = vector.extract_strided_slice %579 {offsets = [0, 0], sizes = [1, 1], strides = [1, 1]} : vector<13x1xf32> to vector<1x1xf32>
    %581 = vector.extract_strided_slice %579 {offsets = [5, 0], sizes = [1, 1], strides = [1, 1]} : vector<13x1xf32> to vector<1x1xf32>
    %582 = arith.addf %580, %581 : vector<1x1xf32>
    %cst_55 = arith.constant 1.000000e+00 : f32
    %583 = vector.broadcast %cst_55 : f32 to vector<1x1xf32>
    %584 = arith.addf %582, %583 : vector<1x1xf32>
    %585 = vector.extract_strided_slice %532 {offsets = [0, 1], sizes = [1, 1], strides = [1, 1]} : vector<1x8xf32> to vector<1x1xf32>
    %586 = vector.extract_strided_slice %579 {offsets = [12, 0], sizes = [1, 1], strides = [1, 1]} : vector<13x1xf32> to vector<1x1xf32>
    %587 = arith.subf %585, %586 : vector<1x1xf32>
    %588 = arith.mulf %559, %584 : vector<1x1xf32>
    %589 = arith.mulf %587, %587 : vector<1x1xf32>
    %590 = arith.divf %589, %584 : vector<1x1xf32>
    %591 = arith.addf %562, %590 : vector<1x1xf32>
    %592 = vector.extract_strided_slice %576 {offsets = [0, 0], sizes = [1, 12], strides = [1, 1]} : vector<13x12xf32> to vector<1x12xf32>
    %593 = vector.extract_strided_slice %576 {offsets = [5, 0], sizes = [1, 12], strides = [1, 1]} : vector<13x12xf32> to vector<1x12xf32>
    %594 = arith.addf %592, %593 : vector<1x12xf32>
    %cst_56 = arith.constant 0.000000e+00 : f32
    %595 = vector.broadcast %cst_56 : f32 to vector<13x1xf32>
    %596 = arith.subf %595, %579 : vector<13x1xf32>
    %597 = vector.shape_cast %587 : vector<1x1xf32> to vector<1x1xf32>
    %598 = vector.broadcast %597 : vector<1x1xf32> to vector<13x1xf32>
    %599 = arith.select %16, %596, %598 : vector<13x1xi1>, vector<13x1xf32>
    %600 = vector.broadcast %584 : vector<1x1xf32> to vector<13x1xf32>
    %601 = arith.divf %599, %600 : vector<13x1xf32>
    %602 = vector.broadcast %601 : vector<13x1xf32> to vector<13x12xf32>
    %603 = vector.broadcast %594 : vector<1x12xf32> to vector<13x12xf32>
    %604 = arith.mulf %602, %603 : vector<13x12xf32>
    %605 = arith.addf %576, %604 : vector<13x12xf32>
    %606 = vector.extract_strided_slice %605 {offsets = [0, 0], sizes = [13, 1], strides = [1, 1]} : vector<13x12xf32> to vector<13x1xf32>
    %607 = vector.extract_strided_slice %605 {offsets = [0, 6], sizes = [13, 1], strides = [1, 1]} : vector<13x12xf32> to vector<13x1xf32>
    %608 = arith.addf %606, %607 : vector<13x1xf32>
    %609 = vector.extract_strided_slice %608 {offsets = [0, 0], sizes = [1, 1], strides = [1, 1]} : vector<13x1xf32> to vector<1x1xf32>
    %610 = vector.extract_strided_slice %608 {offsets = [6, 0], sizes = [1, 1], strides = [1, 1]} : vector<13x1xf32> to vector<1x1xf32>
    %611 = arith.addf %609, %610 : vector<1x1xf32>
    %cst_57 = arith.constant 1.000000e+00 : f32
    %612 = vector.broadcast %cst_57 : f32 to vector<1x1xf32>
    %613 = arith.addf %611, %612 : vector<1x1xf32>
    %614 = vector.extract_strided_slice %532 {offsets = [0, 2], sizes = [1, 1], strides = [1, 1]} : vector<1x8xf32> to vector<1x1xf32>
    %615 = vector.extract_strided_slice %608 {offsets = [12, 0], sizes = [1, 1], strides = [1, 1]} : vector<13x1xf32> to vector<1x1xf32>
    %616 = arith.subf %614, %615 : vector<1x1xf32>
    %617 = arith.mulf %588, %613 : vector<1x1xf32>
    %618 = arith.mulf %616, %616 : vector<1x1xf32>
    %619 = arith.divf %618, %613 : vector<1x1xf32>
    %620 = arith.addf %591, %619 : vector<1x1xf32>
    %621 = vector.extract_strided_slice %605 {offsets = [0, 0], sizes = [1, 12], strides = [1, 1]} : vector<13x12xf32> to vector<1x12xf32>
    %622 = vector.extract_strided_slice %605 {offsets = [6, 0], sizes = [1, 12], strides = [1, 1]} : vector<13x12xf32> to vector<1x12xf32>
    %623 = arith.addf %621, %622 : vector<1x12xf32>
    %cst_58 = arith.constant 0.000000e+00 : f32
    %624 = vector.broadcast %cst_58 : f32 to vector<13x1xf32>
    %625 = arith.subf %624, %608 : vector<13x1xf32>
    %626 = vector.shape_cast %616 : vector<1x1xf32> to vector<1x1xf32>
    %627 = vector.broadcast %626 : vector<1x1xf32> to vector<13x1xf32>
    %628 = arith.select %16, %625, %627 : vector<13x1xi1>, vector<13x1xf32>
    %629 = vector.broadcast %613 : vector<1x1xf32> to vector<13x1xf32>
    %630 = arith.divf %628, %629 : vector<13x1xf32>
    %631 = vector.broadcast %630 : vector<13x1xf32> to vector<13x12xf32>
    %632 = vector.broadcast %623 : vector<1x12xf32> to vector<13x12xf32>
    %633 = arith.mulf %631, %632 : vector<13x12xf32>
    %634 = arith.addf %605, %633 : vector<13x12xf32>
    %635 = vector.extract_strided_slice %634 {offsets = [0, 0], sizes = [13, 1], strides = [1, 1]} : vector<13x12xf32> to vector<13x1xf32>
    %636 = vector.extract_strided_slice %634 {offsets = [0, 7], sizes = [13, 1], strides = [1, 1]} : vector<13x12xf32> to vector<13x1xf32>
    %637 = arith.addf %635, %636 : vector<13x1xf32>
    %638 = vector.extract_strided_slice %637 {offsets = [0, 0], sizes = [1, 1], strides = [1, 1]} : vector<13x1xf32> to vector<1x1xf32>
    %639 = vector.extract_strided_slice %637 {offsets = [7, 0], sizes = [1, 1], strides = [1, 1]} : vector<13x1xf32> to vector<1x1xf32>
    %640 = arith.addf %638, %639 : vector<1x1xf32>
    %cst_59 = arith.constant 1.000000e+00 : f32
    %641 = vector.broadcast %cst_59 : f32 to vector<1x1xf32>
    %642 = arith.addf %640, %641 : vector<1x1xf32>
    %643 = vector.extract_strided_slice %532 {offsets = [0, 3], sizes = [1, 1], strides = [1, 1]} : vector<1x8xf32> to vector<1x1xf32>
    %644 = vector.extract_strided_slice %637 {offsets = [12, 0], sizes = [1, 1], strides = [1, 1]} : vector<13x1xf32> to vector<1x1xf32>
    %645 = arith.subf %643, %644 : vector<1x1xf32>
    %646 = arith.mulf %617, %642 : vector<1x1xf32>
    %647 = arith.mulf %645, %645 : vector<1x1xf32>
    %648 = arith.divf %647, %642 : vector<1x1xf32>
    %649 = arith.addf %620, %648 : vector<1x1xf32>
    %650 = vector.extract_strided_slice %634 {offsets = [0, 0], sizes = [1, 12], strides = [1, 1]} : vector<13x12xf32> to vector<1x12xf32>
    %651 = vector.extract_strided_slice %634 {offsets = [7, 0], sizes = [1, 12], strides = [1, 1]} : vector<13x12xf32> to vector<1x12xf32>
    %652 = arith.addf %650, %651 : vector<1x12xf32>
    %cst_60 = arith.constant 0.000000e+00 : f32
    %653 = vector.broadcast %cst_60 : f32 to vector<13x1xf32>
    %654 = arith.subf %653, %637 : vector<13x1xf32>
    %655 = vector.shape_cast %645 : vector<1x1xf32> to vector<1x1xf32>
    %656 = vector.broadcast %655 : vector<1x1xf32> to vector<13x1xf32>
    %657 = arith.select %16, %654, %656 : vector<13x1xi1>, vector<13x1xf32>
    %658 = vector.broadcast %642 : vector<1x1xf32> to vector<13x1xf32>
    %659 = arith.divf %657, %658 : vector<13x1xf32>
    %660 = vector.broadcast %659 : vector<13x1xf32> to vector<13x12xf32>
    %661 = vector.broadcast %652 : vector<1x12xf32> to vector<13x12xf32>
    %662 = arith.mulf %660, %661 : vector<13x12xf32>
    %663 = arith.addf %634, %662 : vector<13x12xf32>
    %664 = vector.extract_strided_slice %663 {offsets = [0, 1], sizes = [13, 1], strides = [1, 1]} : vector<13x12xf32> to vector<13x1xf32>
    %665 = vector.extract_strided_slice %663 {offsets = [0, 8], sizes = [13, 1], strides = [1, 1]} : vector<13x12xf32> to vector<13x1xf32>
    %666 = arith.addf %664, %665 : vector<13x1xf32>
    %667 = vector.extract_strided_slice %666 {offsets = [1, 0], sizes = [1, 1], strides = [1, 1]} : vector<13x1xf32> to vector<1x1xf32>
    %668 = vector.extract_strided_slice %666 {offsets = [8, 0], sizes = [1, 1], strides = [1, 1]} : vector<13x1xf32> to vector<1x1xf32>
    %669 = arith.addf %667, %668 : vector<1x1xf32>
    %cst_61 = arith.constant 1.000000e+00 : f32
    %670 = vector.broadcast %cst_61 : f32 to vector<1x1xf32>
    %671 = arith.addf %669, %670 : vector<1x1xf32>
    %672 = vector.extract_strided_slice %532 {offsets = [0, 4], sizes = [1, 1], strides = [1, 1]} : vector<1x8xf32> to vector<1x1xf32>
    %673 = vector.extract_strided_slice %666 {offsets = [12, 0], sizes = [1, 1], strides = [1, 1]} : vector<13x1xf32> to vector<1x1xf32>
    %674 = arith.subf %672, %673 : vector<1x1xf32>
    %675 = arith.mulf %646, %671 : vector<1x1xf32>
    %676 = arith.mulf %674, %674 : vector<1x1xf32>
    %677 = arith.divf %676, %671 : vector<1x1xf32>
    %678 = arith.addf %649, %677 : vector<1x1xf32>
    %679 = vector.extract_strided_slice %663 {offsets = [1, 0], sizes = [1, 12], strides = [1, 1]} : vector<13x12xf32> to vector<1x12xf32>
    %680 = vector.extract_strided_slice %663 {offsets = [8, 0], sizes = [1, 12], strides = [1, 1]} : vector<13x12xf32> to vector<1x12xf32>
    %681 = arith.addf %679, %680 : vector<1x12xf32>
    %cst_62 = arith.constant 0.000000e+00 : f32
    %682 = vector.broadcast %cst_62 : f32 to vector<13x1xf32>
    %683 = arith.subf %682, %666 : vector<13x1xf32>
    %684 = vector.shape_cast %674 : vector<1x1xf32> to vector<1x1xf32>
    %685 = vector.broadcast %684 : vector<1x1xf32> to vector<13x1xf32>
    %686 = arith.select %16, %683, %685 : vector<13x1xi1>, vector<13x1xf32>
    %687 = vector.broadcast %671 : vector<1x1xf32> to vector<13x1xf32>
    %688 = arith.divf %686, %687 : vector<13x1xf32>
    %689 = vector.broadcast %688 : vector<13x1xf32> to vector<13x12xf32>
    %690 = vector.broadcast %681 : vector<1x12xf32> to vector<13x12xf32>
    %691 = arith.mulf %689, %690 : vector<13x12xf32>
    %692 = arith.addf %663, %691 : vector<13x12xf32>
    %693 = vector.extract_strided_slice %692 {offsets = [0, 1], sizes = [13, 1], strides = [1, 1]} : vector<13x12xf32> to vector<13x1xf32>
    %694 = vector.extract_strided_slice %692 {offsets = [0, 9], sizes = [13, 1], strides = [1, 1]} : vector<13x12xf32> to vector<13x1xf32>
    %695 = arith.addf %693, %694 : vector<13x1xf32>
    %696 = vector.extract_strided_slice %695 {offsets = [1, 0], sizes = [1, 1], strides = [1, 1]} : vector<13x1xf32> to vector<1x1xf32>
    %697 = vector.extract_strided_slice %695 {offsets = [9, 0], sizes = [1, 1], strides = [1, 1]} : vector<13x1xf32> to vector<1x1xf32>
    %698 = arith.addf %696, %697 : vector<1x1xf32>
    %cst_63 = arith.constant 1.000000e+00 : f32
    %699 = vector.broadcast %cst_63 : f32 to vector<1x1xf32>
    %700 = arith.addf %698, %699 : vector<1x1xf32>
    %701 = vector.extract_strided_slice %532 {offsets = [0, 5], sizes = [1, 1], strides = [1, 1]} : vector<1x8xf32> to vector<1x1xf32>
    %702 = vector.extract_strided_slice %695 {offsets = [12, 0], sizes = [1, 1], strides = [1, 1]} : vector<13x1xf32> to vector<1x1xf32>
    %703 = arith.subf %701, %702 : vector<1x1xf32>
    %704 = arith.mulf %675, %700 : vector<1x1xf32>
    %705 = arith.mulf %703, %703 : vector<1x1xf32>
    %706 = arith.divf %705, %700 : vector<1x1xf32>
    %707 = arith.addf %678, %706 : vector<1x1xf32>
    %708 = vector.extract_strided_slice %692 {offsets = [1, 0], sizes = [1, 12], strides = [1, 1]} : vector<13x12xf32> to vector<1x12xf32>
    %709 = vector.extract_strided_slice %692 {offsets = [9, 0], sizes = [1, 12], strides = [1, 1]} : vector<13x12xf32> to vector<1x12xf32>
    %710 = arith.addf %708, %709 : vector<1x12xf32>
    %cst_64 = arith.constant 0.000000e+00 : f32
    %711 = vector.broadcast %cst_64 : f32 to vector<13x1xf32>
    %712 = arith.subf %711, %695 : vector<13x1xf32>
    %713 = vector.shape_cast %703 : vector<1x1xf32> to vector<1x1xf32>
    %714 = vector.broadcast %713 : vector<1x1xf32> to vector<13x1xf32>
    %715 = arith.select %16, %712, %714 : vector<13x1xi1>, vector<13x1xf32>
    %716 = vector.broadcast %700 : vector<1x1xf32> to vector<13x1xf32>
    %717 = arith.divf %715, %716 : vector<13x1xf32>
    %718 = vector.broadcast %717 : vector<13x1xf32> to vector<13x12xf32>
    %719 = vector.broadcast %710 : vector<1x12xf32> to vector<13x12xf32>
    %720 = arith.mulf %718, %719 : vector<13x12xf32>
    %721 = arith.addf %692, %720 : vector<13x12xf32>
    %722 = vector.extract_strided_slice %721 {offsets = [0, 1], sizes = [13, 1], strides = [1, 1]} : vector<13x12xf32> to vector<13x1xf32>
    %723 = vector.extract_strided_slice %721 {offsets = [0, 10], sizes = [13, 1], strides = [1, 1]} : vector<13x12xf32> to vector<13x1xf32>
    %724 = arith.addf %722, %723 : vector<13x1xf32>
    %725 = vector.extract_strided_slice %724 {offsets = [1, 0], sizes = [1, 1], strides = [1, 1]} : vector<13x1xf32> to vector<1x1xf32>
    %726 = vector.extract_strided_slice %724 {offsets = [10, 0], sizes = [1, 1], strides = [1, 1]} : vector<13x1xf32> to vector<1x1xf32>
    %727 = arith.addf %725, %726 : vector<1x1xf32>
    %cst_65 = arith.constant 1.000000e+00 : f32
    %728 = vector.broadcast %cst_65 : f32 to vector<1x1xf32>
    %729 = arith.addf %727, %728 : vector<1x1xf32>
    %730 = vector.extract_strided_slice %532 {offsets = [0, 6], sizes = [1, 1], strides = [1, 1]} : vector<1x8xf32> to vector<1x1xf32>
    %731 = vector.extract_strided_slice %724 {offsets = [12, 0], sizes = [1, 1], strides = [1, 1]} : vector<13x1xf32> to vector<1x1xf32>
    %732 = arith.subf %730, %731 : vector<1x1xf32>
    %733 = arith.mulf %704, %729 : vector<1x1xf32>
    %734 = arith.mulf %732, %732 : vector<1x1xf32>
    %735 = arith.divf %734, %729 : vector<1x1xf32>
    %736 = arith.addf %707, %735 : vector<1x1xf32>
    %737 = vector.extract_strided_slice %721 {offsets = [1, 0], sizes = [1, 12], strides = [1, 1]} : vector<13x12xf32> to vector<1x12xf32>
    %738 = vector.extract_strided_slice %721 {offsets = [10, 0], sizes = [1, 12], strides = [1, 1]} : vector<13x12xf32> to vector<1x12xf32>
    %739 = arith.addf %737, %738 : vector<1x12xf32>
    %cst_66 = arith.constant 0.000000e+00 : f32
    %740 = vector.broadcast %cst_66 : f32 to vector<13x1xf32>
    %741 = arith.subf %740, %724 : vector<13x1xf32>
    %742 = vector.shape_cast %732 : vector<1x1xf32> to vector<1x1xf32>
    %743 = vector.broadcast %742 : vector<1x1xf32> to vector<13x1xf32>
    %744 = arith.select %16, %741, %743 : vector<13x1xi1>, vector<13x1xf32>
    %745 = vector.broadcast %729 : vector<1x1xf32> to vector<13x1xf32>
    %746 = arith.divf %744, %745 : vector<13x1xf32>
    %747 = vector.broadcast %746 : vector<13x1xf32> to vector<13x12xf32>
    %748 = vector.broadcast %739 : vector<1x12xf32> to vector<13x12xf32>
    %749 = arith.mulf %747, %748 : vector<13x12xf32>
    %750 = arith.addf %721, %749 : vector<13x12xf32>
    %751 = vector.extract_strided_slice %750 {offsets = [0, 1], sizes = [13, 1], strides = [1, 1]} : vector<13x12xf32> to vector<13x1xf32>
    %752 = vector.extract_strided_slice %750 {offsets = [0, 11], sizes = [13, 1], strides = [1, 1]} : vector<13x12xf32> to vector<13x1xf32>
    %753 = arith.addf %751, %752 : vector<13x1xf32>
    %754 = vector.extract_strided_slice %753 {offsets = [1, 0], sizes = [1, 1], strides = [1, 1]} : vector<13x1xf32> to vector<1x1xf32>
    %755 = vector.extract_strided_slice %753 {offsets = [11, 0], sizes = [1, 1], strides = [1, 1]} : vector<13x1xf32> to vector<1x1xf32>
    %756 = arith.addf %754, %755 : vector<1x1xf32>
    %cst_67 = arith.constant 1.000000e+00 : f32
    %757 = vector.broadcast %cst_67 : f32 to vector<1x1xf32>
    %758 = arith.addf %756, %757 : vector<1x1xf32>
    %759 = vector.extract_strided_slice %532 {offsets = [0, 7], sizes = [1, 1], strides = [1, 1]} : vector<1x8xf32> to vector<1x1xf32>
    %760 = vector.extract_strided_slice %753 {offsets = [12, 0], sizes = [1, 1], strides = [1, 1]} : vector<13x1xf32> to vector<1x1xf32>
    %761 = arith.subf %759, %760 : vector<1x1xf32>
    %762 = arith.mulf %733, %758 : vector<1x1xf32>
    %763 = arith.mulf %761, %761 : vector<1x1xf32>
    %764 = arith.divf %763, %758 : vector<1x1xf32>
    %765 = arith.addf %736, %764 : vector<1x1xf32>
    %766 = vector.extract_strided_slice %750 {offsets = [1, 0], sizes = [1, 12], strides = [1, 1]} : vector<13x12xf32> to vector<1x12xf32>
    %767 = vector.extract_strided_slice %750 {offsets = [11, 0], sizes = [1, 12], strides = [1, 1]} : vector<13x12xf32> to vector<1x12xf32>
    %768 = arith.addf %766, %767 : vector<1x12xf32>
    %cst_68 = arith.constant 0.000000e+00 : f32
    %769 = vector.broadcast %cst_68 : f32 to vector<13x1xf32>
    %770 = arith.subf %769, %753 : vector<13x1xf32>
    %771 = vector.shape_cast %761 : vector<1x1xf32> to vector<1x1xf32>
    %772 = vector.broadcast %771 : vector<1x1xf32> to vector<13x1xf32>
    %773 = arith.select %16, %770, %772 : vector<13x1xi1>, vector<13x1xf32>
    %774 = vector.broadcast %758 : vector<1x1xf32> to vector<13x1xf32>
    %775 = arith.divf %773, %774 : vector<13x1xf32>
    %776 = vector.broadcast %775 : vector<13x1xf32> to vector<13x12xf32>
    %777 = vector.broadcast %768 : vector<1x12xf32> to vector<13x12xf32>
    %778 = arith.mulf %776, %777 : vector<13x12xf32>
    %779 = arith.addf %750, %778 : vector<13x12xf32>
    %780 = math.log %762 : vector<1x1xf32>
    %cst_69 = arith.constant 14.7030163 : f32
    %781 = vector.broadcast %cst_69 : f32 to vector<1x1xf32>
    %782 = arith.addf %781, %780 : vector<1x1xf32>
    %783 = arith.addf %782, %765 : vector<1x1xf32>
    %cst_70 = arith.constant 5.000000e-01 : f32
    %784 = vector.broadcast %cst_70 : f32 to vector<1x1xf32>
    %785 = arith.mulf %784, %783 : vector<1x1xf32>
    %786 = arith.subf %530, %785 : vector<1x1xf32>
    %c3_i32 = arith.constant 3 : i32
    %787 = arith.index_cast %c3_i32 : i32 to index
    %c0_71 = arith.constant 0 : index
    %788 = vector.load %arg1[%787, %c0_71] : memref<8x8xf32, #tpu.memory_space<vmem>>, vector<1x8xf32>
    %789 = vector.extract_strided_slice %779 {offsets = [0, 2], sizes = [13, 10], strides = [1, 1]} : vector<13x12xf32> to vector<13x10xf32>
    %790 = vector.extract_strided_slice %779 {offsets = [0, 0], sizes = [13, 2], strides = [1, 1]} : vector<13x12xf32> to vector<13x2xf32>
    %791 = tpu.concatenate %789, %790 in 1 : vector<13x10xf32>, vector<13x2xf32> -> vector<13x12xf32>
    %792 = vector.broadcast %8 : vector<1x12xf32> to vector<13x12xf32>
    %793 = arith.mulf %792, %791 : vector<13x12xf32>
    %794 = arith.addf %779, %793 : vector<13x12xf32>
    %795 = vector.extract_strided_slice %794 {offsets = [2, 0], sizes = [11, 12], strides = [1, 1]} : vector<13x12xf32> to vector<11x12xf32>
    %796 = vector.extract_strided_slice %794 {offsets = [0, 0], sizes = [2, 12], strides = [1, 1]} : vector<13x12xf32> to vector<2x12xf32>
    %797 = tpu.concatenate %795, %796 in 0 : vector<11x12xf32>, vector<2x12xf32> -> vector<13x12xf32>
    %798 = vector.broadcast %13 : vector<13x1xf32> to vector<13x12xf32>
    %799 = arith.mulf %798, %797 : vector<13x12xf32>
    %800 = arith.addf %794, %799 : vector<13x12xf32>
    %801 = arith.addf %800, %3 : vector<13x12xf32>
    %cst_72 = arith.constant 1.000000e+00 : f32
    %802 = vector.broadcast %cst_72 : f32 to vector<1x1xf32>
    %cst_73 = arith.constant 0.000000e+00 : f32
    %803 = vector.broadcast %cst_73 : f32 to vector<1x1xf32>
    %804 = vector.extract_strided_slice %801 {offsets = [0, 0], sizes = [13, 1], strides = [1, 1]} : vector<13x12xf32> to vector<13x1xf32>
    %805 = vector.extract_strided_slice %801 {offsets = [0, 4], sizes = [13, 1], strides = [1, 1]} : vector<13x12xf32> to vector<13x1xf32>
    %806 = arith.addf %804, %805 : vector<13x1xf32>
    %807 = vector.extract_strided_slice %806 {offsets = [0, 0], sizes = [1, 1], strides = [1, 1]} : vector<13x1xf32> to vector<1x1xf32>
    %808 = vector.extract_strided_slice %806 {offsets = [4, 0], sizes = [1, 1], strides = [1, 1]} : vector<13x1xf32> to vector<1x1xf32>
    %809 = arith.addf %807, %808 : vector<1x1xf32>
    %cst_74 = arith.constant 1.000000e+00 : f32
    %810 = vector.broadcast %cst_74 : f32 to vector<1x1xf32>
    %811 = arith.addf %809, %810 : vector<1x1xf32>
    %812 = vector.extract_strided_slice %788 {offsets = [0, 0], sizes = [1, 1], strides = [1, 1]} : vector<1x8xf32> to vector<1x1xf32>
    %813 = vector.extract_strided_slice %806 {offsets = [12, 0], sizes = [1, 1], strides = [1, 1]} : vector<13x1xf32> to vector<1x1xf32>
    %814 = arith.subf %812, %813 : vector<1x1xf32>
    %815 = arith.mulf %802, %811 : vector<1x1xf32>
    %816 = arith.mulf %814, %814 : vector<1x1xf32>
    %817 = arith.divf %816, %811 : vector<1x1xf32>
    %818 = arith.addf %803, %817 : vector<1x1xf32>
    %819 = vector.extract_strided_slice %801 {offsets = [0, 0], sizes = [1, 12], strides = [1, 1]} : vector<13x12xf32> to vector<1x12xf32>
    %820 = vector.extract_strided_slice %801 {offsets = [4, 0], sizes = [1, 12], strides = [1, 1]} : vector<13x12xf32> to vector<1x12xf32>
    %821 = arith.addf %819, %820 : vector<1x12xf32>
    %cst_75 = arith.constant 0.000000e+00 : f32
    %822 = vector.broadcast %cst_75 : f32 to vector<13x1xf32>
    %823 = arith.subf %822, %806 : vector<13x1xf32>
    %824 = vector.shape_cast %814 : vector<1x1xf32> to vector<1x1xf32>
    %825 = vector.broadcast %824 : vector<1x1xf32> to vector<13x1xf32>
    %826 = arith.select %16, %823, %825 : vector<13x1xi1>, vector<13x1xf32>
    %827 = vector.broadcast %811 : vector<1x1xf32> to vector<13x1xf32>
    %828 = arith.divf %826, %827 : vector<13x1xf32>
    %829 = vector.broadcast %828 : vector<13x1xf32> to vector<13x12xf32>
    %830 = vector.broadcast %821 : vector<1x12xf32> to vector<13x12xf32>
    %831 = arith.mulf %829, %830 : vector<13x12xf32>
    %832 = arith.addf %801, %831 : vector<13x12xf32>
    %833 = vector.extract_strided_slice %832 {offsets = [0, 0], sizes = [13, 1], strides = [1, 1]} : vector<13x12xf32> to vector<13x1xf32>
    %834 = vector.extract_strided_slice %832 {offsets = [0, 5], sizes = [13, 1], strides = [1, 1]} : vector<13x12xf32> to vector<13x1xf32>
    %835 = arith.addf %833, %834 : vector<13x1xf32>
    %836 = vector.extract_strided_slice %835 {offsets = [0, 0], sizes = [1, 1], strides = [1, 1]} : vector<13x1xf32> to vector<1x1xf32>
    %837 = vector.extract_strided_slice %835 {offsets = [5, 0], sizes = [1, 1], strides = [1, 1]} : vector<13x1xf32> to vector<1x1xf32>
    %838 = arith.addf %836, %837 : vector<1x1xf32>
    %cst_76 = arith.constant 1.000000e+00 : f32
    %839 = vector.broadcast %cst_76 : f32 to vector<1x1xf32>
    %840 = arith.addf %838, %839 : vector<1x1xf32>
    %841 = vector.extract_strided_slice %788 {offsets = [0, 1], sizes = [1, 1], strides = [1, 1]} : vector<1x8xf32> to vector<1x1xf32>
    %842 = vector.extract_strided_slice %835 {offsets = [12, 0], sizes = [1, 1], strides = [1, 1]} : vector<13x1xf32> to vector<1x1xf32>
    %843 = arith.subf %841, %842 : vector<1x1xf32>
    %844 = arith.mulf %815, %840 : vector<1x1xf32>
    %845 = arith.mulf %843, %843 : vector<1x1xf32>
    %846 = arith.divf %845, %840 : vector<1x1xf32>
    %847 = arith.addf %818, %846 : vector<1x1xf32>
    %848 = vector.extract_strided_slice %832 {offsets = [0, 0], sizes = [1, 12], strides = [1, 1]} : vector<13x12xf32> to vector<1x12xf32>
    %849 = vector.extract_strided_slice %832 {offsets = [5, 0], sizes = [1, 12], strides = [1, 1]} : vector<13x12xf32> to vector<1x12xf32>
    %850 = arith.addf %848, %849 : vector<1x12xf32>
    %cst_77 = arith.constant 0.000000e+00 : f32
    %851 = vector.broadcast %cst_77 : f32 to vector<13x1xf32>
    %852 = arith.subf %851, %835 : vector<13x1xf32>
    %853 = vector.shape_cast %843 : vector<1x1xf32> to vector<1x1xf32>
    %854 = vector.broadcast %853 : vector<1x1xf32> to vector<13x1xf32>
    %855 = arith.select %16, %852, %854 : vector<13x1xi1>, vector<13x1xf32>
    %856 = vector.broadcast %840 : vector<1x1xf32> to vector<13x1xf32>
    %857 = arith.divf %855, %856 : vector<13x1xf32>
    %858 = vector.broadcast %857 : vector<13x1xf32> to vector<13x12xf32>
    %859 = vector.broadcast %850 : vector<1x12xf32> to vector<13x12xf32>
    %860 = arith.mulf %858, %859 : vector<13x12xf32>
    %861 = arith.addf %832, %860 : vector<13x12xf32>
    %862 = vector.extract_strided_slice %861 {offsets = [0, 0], sizes = [13, 1], strides = [1, 1]} : vector<13x12xf32> to vector<13x1xf32>
    %863 = vector.extract_strided_slice %861 {offsets = [0, 6], sizes = [13, 1], strides = [1, 1]} : vector<13x12xf32> to vector<13x1xf32>
    %864 = arith.addf %862, %863 : vector<13x1xf32>
    %865 = vector.extract_strided_slice %864 {offsets = [0, 0], sizes = [1, 1], strides = [1, 1]} : vector<13x1xf32> to vector<1x1xf32>
    %866 = vector.extract_strided_slice %864 {offsets = [6, 0], sizes = [1, 1], strides = [1, 1]} : vector<13x1xf32> to vector<1x1xf32>
    %867 = arith.addf %865, %866 : vector<1x1xf32>
    %cst_78 = arith.constant 1.000000e+00 : f32
    %868 = vector.broadcast %cst_78 : f32 to vector<1x1xf32>
    %869 = arith.addf %867, %868 : vector<1x1xf32>
    %870 = vector.extract_strided_slice %788 {offsets = [0, 2], sizes = [1, 1], strides = [1, 1]} : vector<1x8xf32> to vector<1x1xf32>
    %871 = vector.extract_strided_slice %864 {offsets = [12, 0], sizes = [1, 1], strides = [1, 1]} : vector<13x1xf32> to vector<1x1xf32>
    %872 = arith.subf %870, %871 : vector<1x1xf32>
    %873 = arith.mulf %844, %869 : vector<1x1xf32>
    %874 = arith.mulf %872, %872 : vector<1x1xf32>
    %875 = arith.divf %874, %869 : vector<1x1xf32>
    %876 = arith.addf %847, %875 : vector<1x1xf32>
    %877 = vector.extract_strided_slice %861 {offsets = [0, 0], sizes = [1, 12], strides = [1, 1]} : vector<13x12xf32> to vector<1x12xf32>
    %878 = vector.extract_strided_slice %861 {offsets = [6, 0], sizes = [1, 12], strides = [1, 1]} : vector<13x12xf32> to vector<1x12xf32>
    %879 = arith.addf %877, %878 : vector<1x12xf32>
    %cst_79 = arith.constant 0.000000e+00 : f32
    %880 = vector.broadcast %cst_79 : f32 to vector<13x1xf32>
    %881 = arith.subf %880, %864 : vector<13x1xf32>
    %882 = vector.shape_cast %872 : vector<1x1xf32> to vector<1x1xf32>
    %883 = vector.broadcast %882 : vector<1x1xf32> to vector<13x1xf32>
    %884 = arith.select %16, %881, %883 : vector<13x1xi1>, vector<13x1xf32>
    %885 = vector.broadcast %869 : vector<1x1xf32> to vector<13x1xf32>
    %886 = arith.divf %884, %885 : vector<13x1xf32>
    %887 = vector.broadcast %886 : vector<13x1xf32> to vector<13x12xf32>
    %888 = vector.broadcast %879 : vector<1x12xf32> to vector<13x12xf32>
    %889 = arith.mulf %887, %888 : vector<13x12xf32>
    %890 = arith.addf %861, %889 : vector<13x12xf32>
    %891 = vector.extract_strided_slice %890 {offsets = [0, 0], sizes = [13, 1], strides = [1, 1]} : vector<13x12xf32> to vector<13x1xf32>
    %892 = vector.extract_strided_slice %890 {offsets = [0, 7], sizes = [13, 1], strides = [1, 1]} : vector<13x12xf32> to vector<13x1xf32>
    %893 = arith.addf %891, %892 : vector<13x1xf32>
    %894 = vector.extract_strided_slice %893 {offsets = [0, 0], sizes = [1, 1], strides = [1, 1]} : vector<13x1xf32> to vector<1x1xf32>
    %895 = vector.extract_strided_slice %893 {offsets = [7, 0], sizes = [1, 1], strides = [1, 1]} : vector<13x1xf32> to vector<1x1xf32>
    %896 = arith.addf %894, %895 : vector<1x1xf32>
    %cst_80 = arith.constant 1.000000e+00 : f32
    %897 = vector.broadcast %cst_80 : f32 to vector<1x1xf32>
    %898 = arith.addf %896, %897 : vector<1x1xf32>
    %899 = vector.extract_strided_slice %788 {offsets = [0, 3], sizes = [1, 1], strides = [1, 1]} : vector<1x8xf32> to vector<1x1xf32>
    %900 = vector.extract_strided_slice %893 {offsets = [12, 0], sizes = [1, 1], strides = [1, 1]} : vector<13x1xf32> to vector<1x1xf32>
    %901 = arith.subf %899, %900 : vector<1x1xf32>
    %902 = arith.mulf %873, %898 : vector<1x1xf32>
    %903 = arith.mulf %901, %901 : vector<1x1xf32>
    %904 = arith.divf %903, %898 : vector<1x1xf32>
    %905 = arith.addf %876, %904 : vector<1x1xf32>
    %906 = vector.extract_strided_slice %890 {offsets = [0, 0], sizes = [1, 12], strides = [1, 1]} : vector<13x12xf32> to vector<1x12xf32>
    %907 = vector.extract_strided_slice %890 {offsets = [7, 0], sizes = [1, 12], strides = [1, 1]} : vector<13x12xf32> to vector<1x12xf32>
    %908 = arith.addf %906, %907 : vector<1x12xf32>
    %cst_81 = arith.constant 0.000000e+00 : f32
    %909 = vector.broadcast %cst_81 : f32 to vector<13x1xf32>
    %910 = arith.subf %909, %893 : vector<13x1xf32>
    %911 = vector.shape_cast %901 : vector<1x1xf32> to vector<1x1xf32>
    %912 = vector.broadcast %911 : vector<1x1xf32> to vector<13x1xf32>
    %913 = arith.select %16, %910, %912 : vector<13x1xi1>, vector<13x1xf32>
    %914 = vector.broadcast %898 : vector<1x1xf32> to vector<13x1xf32>
    %915 = arith.divf %913, %914 : vector<13x1xf32>
    %916 = vector.broadcast %915 : vector<13x1xf32> to vector<13x12xf32>
    %917 = vector.broadcast %908 : vector<1x12xf32> to vector<13x12xf32>
    %918 = arith.mulf %916, %917 : vector<13x12xf32>
    %919 = arith.addf %890, %918 : vector<13x12xf32>
    %920 = vector.extract_strided_slice %919 {offsets = [0, 1], sizes = [13, 1], strides = [1, 1]} : vector<13x12xf32> to vector<13x1xf32>
    %921 = vector.extract_strided_slice %919 {offsets = [0, 8], sizes = [13, 1], strides = [1, 1]} : vector<13x12xf32> to vector<13x1xf32>
    %922 = arith.addf %920, %921 : vector<13x1xf32>
    %923 = vector.extract_strided_slice %922 {offsets = [1, 0], sizes = [1, 1], strides = [1, 1]} : vector<13x1xf32> to vector<1x1xf32>
    %924 = vector.extract_strided_slice %922 {offsets = [8, 0], sizes = [1, 1], strides = [1, 1]} : vector<13x1xf32> to vector<1x1xf32>
    %925 = arith.addf %923, %924 : vector<1x1xf32>
    %cst_82 = arith.constant 1.000000e+00 : f32
    %926 = vector.broadcast %cst_82 : f32 to vector<1x1xf32>
    %927 = arith.addf %925, %926 : vector<1x1xf32>
    %928 = vector.extract_strided_slice %788 {offsets = [0, 4], sizes = [1, 1], strides = [1, 1]} : vector<1x8xf32> to vector<1x1xf32>
    %929 = vector.extract_strided_slice %922 {offsets = [12, 0], sizes = [1, 1], strides = [1, 1]} : vector<13x1xf32> to vector<1x1xf32>
    %930 = arith.subf %928, %929 : vector<1x1xf32>
    %931 = arith.mulf %902, %927 : vector<1x1xf32>
    %932 = arith.mulf %930, %930 : vector<1x1xf32>
    %933 = arith.divf %932, %927 : vector<1x1xf32>
    %934 = arith.addf %905, %933 : vector<1x1xf32>
    %935 = vector.extract_strided_slice %919 {offsets = [1, 0], sizes = [1, 12], strides = [1, 1]} : vector<13x12xf32> to vector<1x12xf32>
    %936 = vector.extract_strided_slice %919 {offsets = [8, 0], sizes = [1, 12], strides = [1, 1]} : vector<13x12xf32> to vector<1x12xf32>
    %937 = arith.addf %935, %936 : vector<1x12xf32>
    %cst_83 = arith.constant 0.000000e+00 : f32
    %938 = vector.broadcast %cst_83 : f32 to vector<13x1xf32>
    %939 = arith.subf %938, %922 : vector<13x1xf32>
    %940 = vector.shape_cast %930 : vector<1x1xf32> to vector<1x1xf32>
    %941 = vector.broadcast %940 : vector<1x1xf32> to vector<13x1xf32>
    %942 = arith.select %16, %939, %941 : vector<13x1xi1>, vector<13x1xf32>
    %943 = vector.broadcast %927 : vector<1x1xf32> to vector<13x1xf32>
    %944 = arith.divf %942, %943 : vector<13x1xf32>
    %945 = vector.broadcast %944 : vector<13x1xf32> to vector<13x12xf32>
    %946 = vector.broadcast %937 : vector<1x12xf32> to vector<13x12xf32>
    %947 = arith.mulf %945, %946 : vector<13x12xf32>
    %948 = arith.addf %919, %947 : vector<13x12xf32>
    %949 = vector.extract_strided_slice %948 {offsets = [0, 1], sizes = [13, 1], strides = [1, 1]} : vector<13x12xf32> to vector<13x1xf32>
    %950 = vector.extract_strided_slice %948 {offsets = [0, 9], sizes = [13, 1], strides = [1, 1]} : vector<13x12xf32> to vector<13x1xf32>
    %951 = arith.addf %949, %950 : vector<13x1xf32>
    %952 = vector.extract_strided_slice %951 {offsets = [1, 0], sizes = [1, 1], strides = [1, 1]} : vector<13x1xf32> to vector<1x1xf32>
    %953 = vector.extract_strided_slice %951 {offsets = [9, 0], sizes = [1, 1], strides = [1, 1]} : vector<13x1xf32> to vector<1x1xf32>
    %954 = arith.addf %952, %953 : vector<1x1xf32>
    %cst_84 = arith.constant 1.000000e+00 : f32
    %955 = vector.broadcast %cst_84 : f32 to vector<1x1xf32>
    %956 = arith.addf %954, %955 : vector<1x1xf32>
    %957 = vector.extract_strided_slice %788 {offsets = [0, 5], sizes = [1, 1], strides = [1, 1]} : vector<1x8xf32> to vector<1x1xf32>
    %958 = vector.extract_strided_slice %951 {offsets = [12, 0], sizes = [1, 1], strides = [1, 1]} : vector<13x1xf32> to vector<1x1xf32>
    %959 = arith.subf %957, %958 : vector<1x1xf32>
    %960 = arith.mulf %931, %956 : vector<1x1xf32>
    %961 = arith.mulf %959, %959 : vector<1x1xf32>
    %962 = arith.divf %961, %956 : vector<1x1xf32>
    %963 = arith.addf %934, %962 : vector<1x1xf32>
    %964 = vector.extract_strided_slice %948 {offsets = [1, 0], sizes = [1, 12], strides = [1, 1]} : vector<13x12xf32> to vector<1x12xf32>
    %965 = vector.extract_strided_slice %948 {offsets = [9, 0], sizes = [1, 12], strides = [1, 1]} : vector<13x12xf32> to vector<1x12xf32>
    %966 = arith.addf %964, %965 : vector<1x12xf32>
    %cst_85 = arith.constant 0.000000e+00 : f32
    %967 = vector.broadcast %cst_85 : f32 to vector<13x1xf32>
    %968 = arith.subf %967, %951 : vector<13x1xf32>
    %969 = vector.shape_cast %959 : vector<1x1xf32> to vector<1x1xf32>
    %970 = vector.broadcast %969 : vector<1x1xf32> to vector<13x1xf32>
    %971 = arith.select %16, %968, %970 : vector<13x1xi1>, vector<13x1xf32>
    %972 = vector.broadcast %956 : vector<1x1xf32> to vector<13x1xf32>
    %973 = arith.divf %971, %972 : vector<13x1xf32>
    %974 = vector.broadcast %973 : vector<13x1xf32> to vector<13x12xf32>
    %975 = vector.broadcast %966 : vector<1x12xf32> to vector<13x12xf32>
    %976 = arith.mulf %974, %975 : vector<13x12xf32>
    %977 = arith.addf %948, %976 : vector<13x12xf32>
    %978 = vector.extract_strided_slice %977 {offsets = [0, 1], sizes = [13, 1], strides = [1, 1]} : vector<13x12xf32> to vector<13x1xf32>
    %979 = vector.extract_strided_slice %977 {offsets = [0, 10], sizes = [13, 1], strides = [1, 1]} : vector<13x12xf32> to vector<13x1xf32>
    %980 = arith.addf %978, %979 : vector<13x1xf32>
    %981 = vector.extract_strided_slice %980 {offsets = [1, 0], sizes = [1, 1], strides = [1, 1]} : vector<13x1xf32> to vector<1x1xf32>
    %982 = vector.extract_strided_slice %980 {offsets = [10, 0], sizes = [1, 1], strides = [1, 1]} : vector<13x1xf32> to vector<1x1xf32>
    %983 = arith.addf %981, %982 : vector<1x1xf32>
    %cst_86 = arith.constant 1.000000e+00 : f32
    %984 = vector.broadcast %cst_86 : f32 to vector<1x1xf32>
    %985 = arith.addf %983, %984 : vector<1x1xf32>
    %986 = vector.extract_strided_slice %788 {offsets = [0, 6], sizes = [1, 1], strides = [1, 1]} : vector<1x8xf32> to vector<1x1xf32>
    %987 = vector.extract_strided_slice %980 {offsets = [12, 0], sizes = [1, 1], strides = [1, 1]} : vector<13x1xf32> to vector<1x1xf32>
    %988 = arith.subf %986, %987 : vector<1x1xf32>
    %989 = arith.mulf %960, %985 : vector<1x1xf32>
    %990 = arith.mulf %988, %988 : vector<1x1xf32>
    %991 = arith.divf %990, %985 : vector<1x1xf32>
    %992 = arith.addf %963, %991 : vector<1x1xf32>
    %993 = vector.extract_strided_slice %977 {offsets = [1, 0], sizes = [1, 12], strides = [1, 1]} : vector<13x12xf32> to vector<1x12xf32>
    %994 = vector.extract_strided_slice %977 {offsets = [10, 0], sizes = [1, 12], strides = [1, 1]} : vector<13x12xf32> to vector<1x12xf32>
    %995 = arith.addf %993, %994 : vector<1x12xf32>
    %cst_87 = arith.constant 0.000000e+00 : f32
    %996 = vector.broadcast %cst_87 : f32 to vector<13x1xf32>
    %997 = arith.subf %996, %980 : vector<13x1xf32>
    %998 = vector.shape_cast %988 : vector<1x1xf32> to vector<1x1xf32>
    %999 = vector.broadcast %998 : vector<1x1xf32> to vector<13x1xf32>
    %1000 = arith.select %16, %997, %999 : vector<13x1xi1>, vector<13x1xf32>
    %1001 = vector.broadcast %985 : vector<1x1xf32> to vector<13x1xf32>
    %1002 = arith.divf %1000, %1001 : vector<13x1xf32>
    %1003 = vector.broadcast %1002 : vector<13x1xf32> to vector<13x12xf32>
    %1004 = vector.broadcast %995 : vector<1x12xf32> to vector<13x12xf32>
    %1005 = arith.mulf %1003, %1004 : vector<13x12xf32>
    %1006 = arith.addf %977, %1005 : vector<13x12xf32>
    %1007 = vector.extract_strided_slice %1006 {offsets = [0, 1], sizes = [13, 1], strides = [1, 1]} : vector<13x12xf32> to vector<13x1xf32>
    %1008 = vector.extract_strided_slice %1006 {offsets = [0, 11], sizes = [13, 1], strides = [1, 1]} : vector<13x12xf32> to vector<13x1xf32>
    %1009 = arith.addf %1007, %1008 : vector<13x1xf32>
    %1010 = vector.extract_strided_slice %1009 {offsets = [1, 0], sizes = [1, 1], strides = [1, 1]} : vector<13x1xf32> to vector<1x1xf32>
    %1011 = vector.extract_strided_slice %1009 {offsets = [11, 0], sizes = [1, 1], strides = [1, 1]} : vector<13x1xf32> to vector<1x1xf32>
    %1012 = arith.addf %1010, %1011 : vector<1x1xf32>
    %cst_88 = arith.constant 1.000000e+00 : f32
    %1013 = vector.broadcast %cst_88 : f32 to vector<1x1xf32>
    %1014 = arith.addf %1012, %1013 : vector<1x1xf32>
    %1015 = vector.extract_strided_slice %788 {offsets = [0, 7], sizes = [1, 1], strides = [1, 1]} : vector<1x8xf32> to vector<1x1xf32>
    %1016 = vector.extract_strided_slice %1009 {offsets = [12, 0], sizes = [1, 1], strides = [1, 1]} : vector<13x1xf32> to vector<1x1xf32>
    %1017 = arith.subf %1015, %1016 : vector<1x1xf32>
    %1018 = arith.mulf %989, %1014 : vector<1x1xf32>
    %1019 = arith.mulf %1017, %1017 : vector<1x1xf32>
    %1020 = arith.divf %1019, %1014 : vector<1x1xf32>
    %1021 = arith.addf %992, %1020 : vector<1x1xf32>
    %1022 = vector.extract_strided_slice %1006 {offsets = [1, 0], sizes = [1, 12], strides = [1, 1]} : vector<13x12xf32> to vector<1x12xf32>
    %1023 = vector.extract_strided_slice %1006 {offsets = [11, 0], sizes = [1, 12], strides = [1, 1]} : vector<13x12xf32> to vector<1x12xf32>
    %1024 = arith.addf %1022, %1023 : vector<1x12xf32>
    %cst_89 = arith.constant 0.000000e+00 : f32
    %1025 = vector.broadcast %cst_89 : f32 to vector<13x1xf32>
    %1026 = arith.subf %1025, %1009 : vector<13x1xf32>
    %1027 = vector.shape_cast %1017 : vector<1x1xf32> to vector<1x1xf32>
    %1028 = vector.broadcast %1027 : vector<1x1xf32> to vector<13x1xf32>
    %1029 = arith.select %16, %1026, %1028 : vector<13x1xi1>, vector<13x1xf32>
    %1030 = vector.broadcast %1014 : vector<1x1xf32> to vector<13x1xf32>
    %1031 = arith.divf %1029, %1030 : vector<13x1xf32>
    %1032 = vector.broadcast %1031 : vector<13x1xf32> to vector<13x12xf32>
    %1033 = vector.broadcast %1024 : vector<1x12xf32> to vector<13x12xf32>
    %1034 = arith.mulf %1032, %1033 : vector<13x12xf32>
    %1035 = arith.addf %1006, %1034 : vector<13x12xf32>
    %1036 = math.log %1018 : vector<1x1xf32>
    %cst_90 = arith.constant 14.7030163 : f32
    %1037 = vector.broadcast %cst_90 : f32 to vector<1x1xf32>
    %1038 = arith.addf %1037, %1036 : vector<1x1xf32>
    %1039 = arith.addf %1038, %1021 : vector<1x1xf32>
    %cst_91 = arith.constant 5.000000e-01 : f32
    %1040 = vector.broadcast %cst_91 : f32 to vector<1x1xf32>
    %1041 = arith.mulf %1040, %1039 : vector<1x1xf32>
    %1042 = arith.subf %786, %1041 : vector<1x1xf32>
    %c4_i32 = arith.constant 4 : i32
    %1043 = arith.index_cast %c4_i32 : i32 to index
    %c0_92 = arith.constant 0 : index
    %1044 = vector.load %arg1[%1043, %c0_92] : memref<8x8xf32, #tpu.memory_space<vmem>>, vector<1x8xf32>
    %1045 = vector.extract_strided_slice %1035 {offsets = [0, 2], sizes = [13, 10], strides = [1, 1]} : vector<13x12xf32> to vector<13x10xf32>
    %1046 = vector.extract_strided_slice %1035 {offsets = [0, 0], sizes = [13, 2], strides = [1, 1]} : vector<13x12xf32> to vector<13x2xf32>
    %1047 = tpu.concatenate %1045, %1046 in 1 : vector<13x10xf32>, vector<13x2xf32> -> vector<13x12xf32>
    %1048 = vector.broadcast %8 : vector<1x12xf32> to vector<13x12xf32>
    %1049 = arith.mulf %1048, %1047 : vector<13x12xf32>
    %1050 = arith.addf %1035, %1049 : vector<13x12xf32>
    %1051 = vector.extract_strided_slice %1050 {offsets = [2, 0], sizes = [11, 12], strides = [1, 1]} : vector<13x12xf32> to vector<11x12xf32>
    %1052 = vector.extract_strided_slice %1050 {offsets = [0, 0], sizes = [2, 12], strides = [1, 1]} : vector<13x12xf32> to vector<2x12xf32>
    %1053 = tpu.concatenate %1051, %1052 in 0 : vector<11x12xf32>, vector<2x12xf32> -> vector<13x12xf32>
    %1054 = vector.broadcast %13 : vector<13x1xf32> to vector<13x12xf32>
    %1055 = arith.mulf %1054, %1053 : vector<13x12xf32>
    %1056 = arith.addf %1050, %1055 : vector<13x12xf32>
    %1057 = arith.addf %1056, %3 : vector<13x12xf32>
    %cst_93 = arith.constant 1.000000e+00 : f32
    %1058 = vector.broadcast %cst_93 : f32 to vector<1x1xf32>
    %cst_94 = arith.constant 0.000000e+00 : f32
    %1059 = vector.broadcast %cst_94 : f32 to vector<1x1xf32>
    %1060 = vector.extract_strided_slice %1057 {offsets = [0, 0], sizes = [13, 1], strides = [1, 1]} : vector<13x12xf32> to vector<13x1xf32>
    %1061 = vector.extract_strided_slice %1057 {offsets = [0, 4], sizes = [13, 1], strides = [1, 1]} : vector<13x12xf32> to vector<13x1xf32>
    %1062 = arith.addf %1060, %1061 : vector<13x1xf32>
    %1063 = vector.extract_strided_slice %1062 {offsets = [0, 0], sizes = [1, 1], strides = [1, 1]} : vector<13x1xf32> to vector<1x1xf32>
    %1064 = vector.extract_strided_slice %1062 {offsets = [4, 0], sizes = [1, 1], strides = [1, 1]} : vector<13x1xf32> to vector<1x1xf32>
    %1065 = arith.addf %1063, %1064 : vector<1x1xf32>
    %cst_95 = arith.constant 1.000000e+00 : f32
    %1066 = vector.broadcast %cst_95 : f32 to vector<1x1xf32>
    %1067 = arith.addf %1065, %1066 : vector<1x1xf32>
    %1068 = vector.extract_strided_slice %1044 {offsets = [0, 0], sizes = [1, 1], strides = [1, 1]} : vector<1x8xf32> to vector<1x1xf32>
    %1069 = vector.extract_strided_slice %1062 {offsets = [12, 0], sizes = [1, 1], strides = [1, 1]} : vector<13x1xf32> to vector<1x1xf32>
    %1070 = arith.subf %1068, %1069 : vector<1x1xf32>
    %1071 = arith.mulf %1058, %1067 : vector<1x1xf32>
    %1072 = arith.mulf %1070, %1070 : vector<1x1xf32>
    %1073 = arith.divf %1072, %1067 : vector<1x1xf32>
    %1074 = arith.addf %1059, %1073 : vector<1x1xf32>
    %1075 = vector.extract_strided_slice %1057 {offsets = [0, 0], sizes = [1, 12], strides = [1, 1]} : vector<13x12xf32> to vector<1x12xf32>
    %1076 = vector.extract_strided_slice %1057 {offsets = [4, 0], sizes = [1, 12], strides = [1, 1]} : vector<13x12xf32> to vector<1x12xf32>
    %1077 = arith.addf %1075, %1076 : vector<1x12xf32>
    %cst_96 = arith.constant 0.000000e+00 : f32
    %1078 = vector.broadcast %cst_96 : f32 to vector<13x1xf32>
    %1079 = arith.subf %1078, %1062 : vector<13x1xf32>
    %1080 = vector.shape_cast %1070 : vector<1x1xf32> to vector<1x1xf32>
    %1081 = vector.broadcast %1080 : vector<1x1xf32> to vector<13x1xf32>
    %1082 = arith.select %16, %1079, %1081 : vector<13x1xi1>, vector<13x1xf32>
    %1083 = vector.broadcast %1067 : vector<1x1xf32> to vector<13x1xf32>
    %1084 = arith.divf %1082, %1083 : vector<13x1xf32>
    %1085 = vector.broadcast %1084 : vector<13x1xf32> to vector<13x12xf32>
    %1086 = vector.broadcast %1077 : vector<1x12xf32> to vector<13x12xf32>
    %1087 = arith.mulf %1085, %1086 : vector<13x12xf32>
    %1088 = arith.addf %1057, %1087 : vector<13x12xf32>
    %1089 = vector.extract_strided_slice %1088 {offsets = [0, 0], sizes = [13, 1], strides = [1, 1]} : vector<13x12xf32> to vector<13x1xf32>
    %1090 = vector.extract_strided_slice %1088 {offsets = [0, 5], sizes = [13, 1], strides = [1, 1]} : vector<13x12xf32> to vector<13x1xf32>
    %1091 = arith.addf %1089, %1090 : vector<13x1xf32>
    %1092 = vector.extract_strided_slice %1091 {offsets = [0, 0], sizes = [1, 1], strides = [1, 1]} : vector<13x1xf32> to vector<1x1xf32>
    %1093 = vector.extract_strided_slice %1091 {offsets = [5, 0], sizes = [1, 1], strides = [1, 1]} : vector<13x1xf32> to vector<1x1xf32>
    %1094 = arith.addf %1092, %1093 : vector<1x1xf32>
    %cst_97 = arith.constant 1.000000e+00 : f32
    %1095 = vector.broadcast %cst_97 : f32 to vector<1x1xf32>
    %1096 = arith.addf %1094, %1095 : vector<1x1xf32>
    %1097 = vector.extract_strided_slice %1044 {offsets = [0, 1], sizes = [1, 1], strides = [1, 1]} : vector<1x8xf32> to vector<1x1xf32>
    %1098 = vector.extract_strided_slice %1091 {offsets = [12, 0], sizes = [1, 1], strides = [1, 1]} : vector<13x1xf32> to vector<1x1xf32>
    %1099 = arith.subf %1097, %1098 : vector<1x1xf32>
    %1100 = arith.mulf %1071, %1096 : vector<1x1xf32>
    %1101 = arith.mulf %1099, %1099 : vector<1x1xf32>
    %1102 = arith.divf %1101, %1096 : vector<1x1xf32>
    %1103 = arith.addf %1074, %1102 : vector<1x1xf32>
    %1104 = vector.extract_strided_slice %1088 {offsets = [0, 0], sizes = [1, 12], strides = [1, 1]} : vector<13x12xf32> to vector<1x12xf32>
    %1105 = vector.extract_strided_slice %1088 {offsets = [5, 0], sizes = [1, 12], strides = [1, 1]} : vector<13x12xf32> to vector<1x12xf32>
    %1106 = arith.addf %1104, %1105 : vector<1x12xf32>
    %cst_98 = arith.constant 0.000000e+00 : f32
    %1107 = vector.broadcast %cst_98 : f32 to vector<13x1xf32>
    %1108 = arith.subf %1107, %1091 : vector<13x1xf32>
    %1109 = vector.shape_cast %1099 : vector<1x1xf32> to vector<1x1xf32>
    %1110 = vector.broadcast %1109 : vector<1x1xf32> to vector<13x1xf32>
    %1111 = arith.select %16, %1108, %1110 : vector<13x1xi1>, vector<13x1xf32>
    %1112 = vector.broadcast %1096 : vector<1x1xf32> to vector<13x1xf32>
    %1113 = arith.divf %1111, %1112 : vector<13x1xf32>
    %1114 = vector.broadcast %1113 : vector<13x1xf32> to vector<13x12xf32>
    %1115 = vector.broadcast %1106 : vector<1x12xf32> to vector<13x12xf32>
    %1116 = arith.mulf %1114, %1115 : vector<13x12xf32>
    %1117 = arith.addf %1088, %1116 : vector<13x12xf32>
    %1118 = vector.extract_strided_slice %1117 {offsets = [0, 0], sizes = [13, 1], strides = [1, 1]} : vector<13x12xf32> to vector<13x1xf32>
    %1119 = vector.extract_strided_slice %1117 {offsets = [0, 6], sizes = [13, 1], strides = [1, 1]} : vector<13x12xf32> to vector<13x1xf32>
    %1120 = arith.addf %1118, %1119 : vector<13x1xf32>
    %1121 = vector.extract_strided_slice %1120 {offsets = [0, 0], sizes = [1, 1], strides = [1, 1]} : vector<13x1xf32> to vector<1x1xf32>
    %1122 = vector.extract_strided_slice %1120 {offsets = [6, 0], sizes = [1, 1], strides = [1, 1]} : vector<13x1xf32> to vector<1x1xf32>
    %1123 = arith.addf %1121, %1122 : vector<1x1xf32>
    %cst_99 = arith.constant 1.000000e+00 : f32
    %1124 = vector.broadcast %cst_99 : f32 to vector<1x1xf32>
    %1125 = arith.addf %1123, %1124 : vector<1x1xf32>
    %1126 = vector.extract_strided_slice %1044 {offsets = [0, 2], sizes = [1, 1], strides = [1, 1]} : vector<1x8xf32> to vector<1x1xf32>
    %1127 = vector.extract_strided_slice %1120 {offsets = [12, 0], sizes = [1, 1], strides = [1, 1]} : vector<13x1xf32> to vector<1x1xf32>
    %1128 = arith.subf %1126, %1127 : vector<1x1xf32>
    %1129 = arith.mulf %1100, %1125 : vector<1x1xf32>
    %1130 = arith.mulf %1128, %1128 : vector<1x1xf32>
    %1131 = arith.divf %1130, %1125 : vector<1x1xf32>
    %1132 = arith.addf %1103, %1131 : vector<1x1xf32>
    %1133 = vector.extract_strided_slice %1117 {offsets = [0, 0], sizes = [1, 12], strides = [1, 1]} : vector<13x12xf32> to vector<1x12xf32>
    %1134 = vector.extract_strided_slice %1117 {offsets = [6, 0], sizes = [1, 12], strides = [1, 1]} : vector<13x12xf32> to vector<1x12xf32>
    %1135 = arith.addf %1133, %1134 : vector<1x12xf32>
    %cst_100 = arith.constant 0.000000e+00 : f32
    %1136 = vector.broadcast %cst_100 : f32 to vector<13x1xf32>
    %1137 = arith.subf %1136, %1120 : vector<13x1xf32>
    %1138 = vector.shape_cast %1128 : vector<1x1xf32> to vector<1x1xf32>
    %1139 = vector.broadcast %1138 : vector<1x1xf32> to vector<13x1xf32>
    %1140 = arith.select %16, %1137, %1139 : vector<13x1xi1>, vector<13x1xf32>
    %1141 = vector.broadcast %1125 : vector<1x1xf32> to vector<13x1xf32>
    %1142 = arith.divf %1140, %1141 : vector<13x1xf32>
    %1143 = vector.broadcast %1142 : vector<13x1xf32> to vector<13x12xf32>
    %1144 = vector.broadcast %1135 : vector<1x12xf32> to vector<13x12xf32>
    %1145 = arith.mulf %1143, %1144 : vector<13x12xf32>
    %1146 = arith.addf %1117, %1145 : vector<13x12xf32>
    %1147 = vector.extract_strided_slice %1146 {offsets = [0, 0], sizes = [13, 1], strides = [1, 1]} : vector<13x12xf32> to vector<13x1xf32>
    %1148 = vector.extract_strided_slice %1146 {offsets = [0, 7], sizes = [13, 1], strides = [1, 1]} : vector<13x12xf32> to vector<13x1xf32>
    %1149 = arith.addf %1147, %1148 : vector<13x1xf32>
    %1150 = vector.extract_strided_slice %1149 {offsets = [0, 0], sizes = [1, 1], strides = [1, 1]} : vector<13x1xf32> to vector<1x1xf32>
    %1151 = vector.extract_strided_slice %1149 {offsets = [7, 0], sizes = [1, 1], strides = [1, 1]} : vector<13x1xf32> to vector<1x1xf32>
    %1152 = arith.addf %1150, %1151 : vector<1x1xf32>
    %cst_101 = arith.constant 1.000000e+00 : f32
    %1153 = vector.broadcast %cst_101 : f32 to vector<1x1xf32>
    %1154 = arith.addf %1152, %1153 : vector<1x1xf32>
    %1155 = vector.extract_strided_slice %1044 {offsets = [0, 3], sizes = [1, 1], strides = [1, 1]} : vector<1x8xf32> to vector<1x1xf32>
    %1156 = vector.extract_strided_slice %1149 {offsets = [12, 0], sizes = [1, 1], strides = [1, 1]} : vector<13x1xf32> to vector<1x1xf32>
    %1157 = arith.subf %1155, %1156 : vector<1x1xf32>
    %1158 = arith.mulf %1129, %1154 : vector<1x1xf32>
    %1159 = arith.mulf %1157, %1157 : vector<1x1xf32>
    %1160 = arith.divf %1159, %1154 : vector<1x1xf32>
    %1161 = arith.addf %1132, %1160 : vector<1x1xf32>
    %1162 = vector.extract_strided_slice %1146 {offsets = [0, 0], sizes = [1, 12], strides = [1, 1]} : vector<13x12xf32> to vector<1x12xf32>
    %1163 = vector.extract_strided_slice %1146 {offsets = [7, 0], sizes = [1, 12], strides = [1, 1]} : vector<13x12xf32> to vector<1x12xf32>
    %1164 = arith.addf %1162, %1163 : vector<1x12xf32>
    %cst_102 = arith.constant 0.000000e+00 : f32
    %1165 = vector.broadcast %cst_102 : f32 to vector<13x1xf32>
    %1166 = arith.subf %1165, %1149 : vector<13x1xf32>
    %1167 = vector.shape_cast %1157 : vector<1x1xf32> to vector<1x1xf32>
    %1168 = vector.broadcast %1167 : vector<1x1xf32> to vector<13x1xf32>
    %1169 = arith.select %16, %1166, %1168 : vector<13x1xi1>, vector<13x1xf32>
    %1170 = vector.broadcast %1154 : vector<1x1xf32> to vector<13x1xf32>
    %1171 = arith.divf %1169, %1170 : vector<13x1xf32>
    %1172 = vector.broadcast %1171 : vector<13x1xf32> to vector<13x12xf32>
    %1173 = vector.broadcast %1164 : vector<1x12xf32> to vector<13x12xf32>
    %1174 = arith.mulf %1172, %1173 : vector<13x12xf32>
    %1175 = arith.addf %1146, %1174 : vector<13x12xf32>
    %1176 = vector.extract_strided_slice %1175 {offsets = [0, 1], sizes = [13, 1], strides = [1, 1]} : vector<13x12xf32> to vector<13x1xf32>
    %1177 = vector.extract_strided_slice %1175 {offsets = [0, 8], sizes = [13, 1], strides = [1, 1]} : vector<13x12xf32> to vector<13x1xf32>
    %1178 = arith.addf %1176, %1177 : vector<13x1xf32>
    %1179 = vector.extract_strided_slice %1178 {offsets = [1, 0], sizes = [1, 1], strides = [1, 1]} : vector<13x1xf32> to vector<1x1xf32>
    %1180 = vector.extract_strided_slice %1178 {offsets = [8, 0], sizes = [1, 1], strides = [1, 1]} : vector<13x1xf32> to vector<1x1xf32>
    %1181 = arith.addf %1179, %1180 : vector<1x1xf32>
    %cst_103 = arith.constant 1.000000e+00 : f32
    %1182 = vector.broadcast %cst_103 : f32 to vector<1x1xf32>
    %1183 = arith.addf %1181, %1182 : vector<1x1xf32>
    %1184 = vector.extract_strided_slice %1044 {offsets = [0, 4], sizes = [1, 1], strides = [1, 1]} : vector<1x8xf32> to vector<1x1xf32>
    %1185 = vector.extract_strided_slice %1178 {offsets = [12, 0], sizes = [1, 1], strides = [1, 1]} : vector<13x1xf32> to vector<1x1xf32>
    %1186 = arith.subf %1184, %1185 : vector<1x1xf32>
    %1187 = arith.mulf %1158, %1183 : vector<1x1xf32>
    %1188 = arith.mulf %1186, %1186 : vector<1x1xf32>
    %1189 = arith.divf %1188, %1183 : vector<1x1xf32>
    %1190 = arith.addf %1161, %1189 : vector<1x1xf32>
    %1191 = vector.extract_strided_slice %1175 {offsets = [1, 0], sizes = [1, 12], strides = [1, 1]} : vector<13x12xf32> to vector<1x12xf32>
    %1192 = vector.extract_strided_slice %1175 {offsets = [8, 0], sizes = [1, 12], strides = [1, 1]} : vector<13x12xf32> to vector<1x12xf32>
    %1193 = arith.addf %1191, %1192 : vector<1x12xf32>
    %cst_104 = arith.constant 0.000000e+00 : f32
    %1194 = vector.broadcast %cst_104 : f32 to vector<13x1xf32>
    %1195 = arith.subf %1194, %1178 : vector<13x1xf32>
    %1196 = vector.shape_cast %1186 : vector<1x1xf32> to vector<1x1xf32>
    %1197 = vector.broadcast %1196 : vector<1x1xf32> to vector<13x1xf32>
    %1198 = arith.select %16, %1195, %1197 : vector<13x1xi1>, vector<13x1xf32>
    %1199 = vector.broadcast %1183 : vector<1x1xf32> to vector<13x1xf32>
    %1200 = arith.divf %1198, %1199 : vector<13x1xf32>
    %1201 = vector.broadcast %1200 : vector<13x1xf32> to vector<13x12xf32>
    %1202 = vector.broadcast %1193 : vector<1x12xf32> to vector<13x12xf32>
    %1203 = arith.mulf %1201, %1202 : vector<13x12xf32>
    %1204 = arith.addf %1175, %1203 : vector<13x12xf32>
    %1205 = vector.extract_strided_slice %1204 {offsets = [0, 1], sizes = [13, 1], strides = [1, 1]} : vector<13x12xf32> to vector<13x1xf32>
    %1206 = vector.extract_strided_slice %1204 {offsets = [0, 9], sizes = [13, 1], strides = [1, 1]} : vector<13x12xf32> to vector<13x1xf32>
    %1207 = arith.addf %1205, %1206 : vector<13x1xf32>
    %1208 = vector.extract_strided_slice %1207 {offsets = [1, 0], sizes = [1, 1], strides = [1, 1]} : vector<13x1xf32> to vector<1x1xf32>
    %1209 = vector.extract_strided_slice %1207 {offsets = [9, 0], sizes = [1, 1], strides = [1, 1]} : vector<13x1xf32> to vector<1x1xf32>
    %1210 = arith.addf %1208, %1209 : vector<1x1xf32>
    %cst_105 = arith.constant 1.000000e+00 : f32
    %1211 = vector.broadcast %cst_105 : f32 to vector<1x1xf32>
    %1212 = arith.addf %1210, %1211 : vector<1x1xf32>
    %1213 = vector.extract_strided_slice %1044 {offsets = [0, 5], sizes = [1, 1], strides = [1, 1]} : vector<1x8xf32> to vector<1x1xf32>
    %1214 = vector.extract_strided_slice %1207 {offsets = [12, 0], sizes = [1, 1], strides = [1, 1]} : vector<13x1xf32> to vector<1x1xf32>
    %1215 = arith.subf %1213, %1214 : vector<1x1xf32>
    %1216 = arith.mulf %1187, %1212 : vector<1x1xf32>
    %1217 = arith.mulf %1215, %1215 : vector<1x1xf32>
    %1218 = arith.divf %1217, %1212 : vector<1x1xf32>
    %1219 = arith.addf %1190, %1218 : vector<1x1xf32>
    %1220 = vector.extract_strided_slice %1204 {offsets = [1, 0], sizes = [1, 12], strides = [1, 1]} : vector<13x12xf32> to vector<1x12xf32>
    %1221 = vector.extract_strided_slice %1204 {offsets = [9, 0], sizes = [1, 12], strides = [1, 1]} : vector<13x12xf32> to vector<1x12xf32>
    %1222 = arith.addf %1220, %1221 : vector<1x12xf32>
    %cst_106 = arith.constant 0.000000e+00 : f32
    %1223 = vector.broadcast %cst_106 : f32 to vector<13x1xf32>
    %1224 = arith.subf %1223, %1207 : vector<13x1xf32>
    %1225 = vector.shape_cast %1215 : vector<1x1xf32> to vector<1x1xf32>
    %1226 = vector.broadcast %1225 : vector<1x1xf32> to vector<13x1xf32>
    %1227 = arith.select %16, %1224, %1226 : vector<13x1xi1>, vector<13x1xf32>
    %1228 = vector.broadcast %1212 : vector<1x1xf32> to vector<13x1xf32>
    %1229 = arith.divf %1227, %1228 : vector<13x1xf32>
    %1230 = vector.broadcast %1229 : vector<13x1xf32> to vector<13x12xf32>
    %1231 = vector.broadcast %1222 : vector<1x12xf32> to vector<13x12xf32>
    %1232 = arith.mulf %1230, %1231 : vector<13x12xf32>
    %1233 = arith.addf %1204, %1232 : vector<13x12xf32>
    %1234 = vector.extract_strided_slice %1233 {offsets = [0, 1], sizes = [13, 1], strides = [1, 1]} : vector<13x12xf32> to vector<13x1xf32>
    %1235 = vector.extract_strided_slice %1233 {offsets = [0, 10], sizes = [13, 1], strides = [1, 1]} : vector<13x12xf32> to vector<13x1xf32>
    %1236 = arith.addf %1234, %1235 : vector<13x1xf32>
    %1237 = vector.extract_strided_slice %1236 {offsets = [1, 0], sizes = [1, 1], strides = [1, 1]} : vector<13x1xf32> to vector<1x1xf32>
    %1238 = vector.extract_strided_slice %1236 {offsets = [10, 0], sizes = [1, 1], strides = [1, 1]} : vector<13x1xf32> to vector<1x1xf32>
    %1239 = arith.addf %1237, %1238 : vector<1x1xf32>
    %cst_107 = arith.constant 1.000000e+00 : f32
    %1240 = vector.broadcast %cst_107 : f32 to vector<1x1xf32>
    %1241 = arith.addf %1239, %1240 : vector<1x1xf32>
    %1242 = vector.extract_strided_slice %1044 {offsets = [0, 6], sizes = [1, 1], strides = [1, 1]} : vector<1x8xf32> to vector<1x1xf32>
    %1243 = vector.extract_strided_slice %1236 {offsets = [12, 0], sizes = [1, 1], strides = [1, 1]} : vector<13x1xf32> to vector<1x1xf32>
    %1244 = arith.subf %1242, %1243 : vector<1x1xf32>
    %1245 = arith.mulf %1216, %1241 : vector<1x1xf32>
    %1246 = arith.mulf %1244, %1244 : vector<1x1xf32>
    %1247 = arith.divf %1246, %1241 : vector<1x1xf32>
    %1248 = arith.addf %1219, %1247 : vector<1x1xf32>
    %1249 = vector.extract_strided_slice %1233 {offsets = [1, 0], sizes = [1, 12], strides = [1, 1]} : vector<13x12xf32> to vector<1x12xf32>
    %1250 = vector.extract_strided_slice %1233 {offsets = [10, 0], sizes = [1, 12], strides = [1, 1]} : vector<13x12xf32> to vector<1x12xf32>
    %1251 = arith.addf %1249, %1250 : vector<1x12xf32>
    %cst_108 = arith.constant 0.000000e+00 : f32
    %1252 = vector.broadcast %cst_108 : f32 to vector<13x1xf32>
    %1253 = arith.subf %1252, %1236 : vector<13x1xf32>
    %1254 = vector.shape_cast %1244 : vector<1x1xf32> to vector<1x1xf32>
    %1255 = vector.broadcast %1254 : vector<1x1xf32> to vector<13x1xf32>
    %1256 = arith.select %16, %1253, %1255 : vector<13x1xi1>, vector<13x1xf32>
    %1257 = vector.broadcast %1241 : vector<1x1xf32> to vector<13x1xf32>
    %1258 = arith.divf %1256, %1257 : vector<13x1xf32>
    %1259 = vector.broadcast %1258 : vector<13x1xf32> to vector<13x12xf32>
    %1260 = vector.broadcast %1251 : vector<1x12xf32> to vector<13x12xf32>
    %1261 = arith.mulf %1259, %1260 : vector<13x12xf32>
    %1262 = arith.addf %1233, %1261 : vector<13x12xf32>
    %1263 = vector.extract_strided_slice %1262 {offsets = [0, 1], sizes = [13, 1], strides = [1, 1]} : vector<13x12xf32> to vector<13x1xf32>
    %1264 = vector.extract_strided_slice %1262 {offsets = [0, 11], sizes = [13, 1], strides = [1, 1]} : vector<13x12xf32> to vector<13x1xf32>
    %1265 = arith.addf %1263, %1264 : vector<13x1xf32>
    %1266 = vector.extract_strided_slice %1265 {offsets = [1, 0], sizes = [1, 1], strides = [1, 1]} : vector<13x1xf32> to vector<1x1xf32>
    %1267 = vector.extract_strided_slice %1265 {offsets = [11, 0], sizes = [1, 1], strides = [1, 1]} : vector<13x1xf32> to vector<1x1xf32>
    %1268 = arith.addf %1266, %1267 : vector<1x1xf32>
    %cst_109 = arith.constant 1.000000e+00 : f32
    %1269 = vector.broadcast %cst_109 : f32 to vector<1x1xf32>
    %1270 = arith.addf %1268, %1269 : vector<1x1xf32>
    %1271 = vector.extract_strided_slice %1044 {offsets = [0, 7], sizes = [1, 1], strides = [1, 1]} : vector<1x8xf32> to vector<1x1xf32>
    %1272 = vector.extract_strided_slice %1265 {offsets = [12, 0], sizes = [1, 1], strides = [1, 1]} : vector<13x1xf32> to vector<1x1xf32>
    %1273 = arith.subf %1271, %1272 : vector<1x1xf32>
    %1274 = arith.mulf %1245, %1270 : vector<1x1xf32>
    %1275 = arith.mulf %1273, %1273 : vector<1x1xf32>
    %1276 = arith.divf %1275, %1270 : vector<1x1xf32>
    %1277 = arith.addf %1248, %1276 : vector<1x1xf32>
    %1278 = vector.extract_strided_slice %1262 {offsets = [1, 0], sizes = [1, 12], strides = [1, 1]} : vector<13x12xf32> to vector<1x12xf32>
    %1279 = vector.extract_strided_slice %1262 {offsets = [11, 0], sizes = [1, 12], strides = [1, 1]} : vector<13x12xf32> to vector<1x12xf32>
    %1280 = arith.addf %1278, %1279 : vector<1x12xf32>
    %cst_110 = arith.constant 0.000000e+00 : f32
    %1281 = vector.broadcast %cst_110 : f32 to vector<13x1xf32>
    %1282 = arith.subf %1281, %1265 : vector<13x1xf32>
    %1283 = vector.shape_cast %1273 : vector<1x1xf32> to vector<1x1xf32>
    %1284 = vector.broadcast %1283 : vector<1x1xf32> to vector<13x1xf32>
    %1285 = arith.select %16, %1282, %1284 : vector<13x1xi1>, vector<13x1xf32>
    %1286 = vector.broadcast %1270 : vector<1x1xf32> to vector<13x1xf32>
    %1287 = arith.divf %1285, %1286 : vector<13x1xf32>
    %1288 = vector.broadcast %1287 : vector<13x1xf32> to vector<13x12xf32>
    %1289 = vector.broadcast %1280 : vector<1x12xf32> to vector<13x12xf32>
    %1290 = arith.mulf %1288, %1289 : vector<13x12xf32>
    %1291 = arith.addf %1262, %1290 : vector<13x12xf32>
    %1292 = math.log %1274 : vector<1x1xf32>
    %cst_111 = arith.constant 14.7030163 : f32
    %1293 = vector.broadcast %cst_111 : f32 to vector<1x1xf32>
    %1294 = arith.addf %1293, %1292 : vector<1x1xf32>
    %1295 = arith.addf %1294, %1277 : vector<1x1xf32>
    %cst_112 = arith.constant 5.000000e-01 : f32
    %1296 = vector.broadcast %cst_112 : f32 to vector<1x1xf32>
    %1297 = arith.mulf %1296, %1295 : vector<1x1xf32>
    %1298 = arith.subf %1042, %1297 : vector<1x1xf32>
    %c5_i32 = arith.constant 5 : i32
    %1299 = arith.index_cast %c5_i32 : i32 to index
    %c0_113 = arith.constant 0 : index
    %1300 = vector.load %arg1[%1299, %c0_113] : memref<8x8xf32, #tpu.memory_space<vmem>>, vector<1x8xf32>
    %1301 = vector.extract_strided_slice %1291 {offsets = [0, 2], sizes = [13, 10], strides = [1, 1]} : vector<13x12xf32> to vector<13x10xf32>
    %1302 = vector.extract_strided_slice %1291 {offsets = [0, 0], sizes = [13, 2], strides = [1, 1]} : vector<13x12xf32> to vector<13x2xf32>
    %1303 = tpu.concatenate %1301, %1302 in 1 : vector<13x10xf32>, vector<13x2xf32> -> vector<13x12xf32>
    %1304 = vector.broadcast %8 : vector<1x12xf32> to vector<13x12xf32>
    %1305 = arith.mulf %1304, %1303 : vector<13x12xf32>
    %1306 = arith.addf %1291, %1305 : vector<13x12xf32>
    %1307 = vector.extract_strided_slice %1306 {offsets = [2, 0], sizes = [11, 12], strides = [1, 1]} : vector<13x12xf32> to vector<11x12xf32>
    %1308 = vector.extract_strided_slice %1306 {offsets = [0, 0], sizes = [2, 12], strides = [1, 1]} : vector<13x12xf32> to vector<2x12xf32>
    %1309 = tpu.concatenate %1307, %1308 in 0 : vector<11x12xf32>, vector<2x12xf32> -> vector<13x12xf32>
    %1310 = vector.broadcast %13 : vector<13x1xf32> to vector<13x12xf32>
    %1311 = arith.mulf %1310, %1309 : vector<13x12xf32>
    %1312 = arith.addf %1306, %1311 : vector<13x12xf32>
    %1313 = arith.addf %1312, %3 : vector<13x12xf32>
    %cst_114 = arith.constant 1.000000e+00 : f32
    %1314 = vector.broadcast %cst_114 : f32 to vector<1x1xf32>
    %cst_115 = arith.constant 0.000000e+00 : f32
    %1315 = vector.broadcast %cst_115 : f32 to vector<1x1xf32>
    %1316 = vector.extract_strided_slice %1313 {offsets = [0, 0], sizes = [13, 1], strides = [1, 1]} : vector<13x12xf32> to vector<13x1xf32>
    %1317 = vector.extract_strided_slice %1313 {offsets = [0, 4], sizes = [13, 1], strides = [1, 1]} : vector<13x12xf32> to vector<13x1xf32>
    %1318 = arith.addf %1316, %1317 : vector<13x1xf32>
    %1319 = vector.extract_strided_slice %1318 {offsets = [0, 0], sizes = [1, 1], strides = [1, 1]} : vector<13x1xf32> to vector<1x1xf32>
    %1320 = vector.extract_strided_slice %1318 {offsets = [4, 0], sizes = [1, 1], strides = [1, 1]} : vector<13x1xf32> to vector<1x1xf32>
    %1321 = arith.addf %1319, %1320 : vector<1x1xf32>
    %cst_116 = arith.constant 1.000000e+00 : f32
    %1322 = vector.broadcast %cst_116 : f32 to vector<1x1xf32>
    %1323 = arith.addf %1321, %1322 : vector<1x1xf32>
    %1324 = vector.extract_strided_slice %1300 {offsets = [0, 0], sizes = [1, 1], strides = [1, 1]} : vector<1x8xf32> to vector<1x1xf32>
    %1325 = vector.extract_strided_slice %1318 {offsets = [12, 0], sizes = [1, 1], strides = [1, 1]} : vector<13x1xf32> to vector<1x1xf32>
    %1326 = arith.subf %1324, %1325 : vector<1x1xf32>
    %1327 = arith.mulf %1314, %1323 : vector<1x1xf32>
    %1328 = arith.mulf %1326, %1326 : vector<1x1xf32>
    %1329 = arith.divf %1328, %1323 : vector<1x1xf32>
    %1330 = arith.addf %1315, %1329 : vector<1x1xf32>
    %1331 = vector.extract_strided_slice %1313 {offsets = [0, 0], sizes = [1, 12], strides = [1, 1]} : vector<13x12xf32> to vector<1x12xf32>
    %1332 = vector.extract_strided_slice %1313 {offsets = [4, 0], sizes = [1, 12], strides = [1, 1]} : vector<13x12xf32> to vector<1x12xf32>
    %1333 = arith.addf %1331, %1332 : vector<1x12xf32>
    %cst_117 = arith.constant 0.000000e+00 : f32
    %1334 = vector.broadcast %cst_117 : f32 to vector<13x1xf32>
    %1335 = arith.subf %1334, %1318 : vector<13x1xf32>
    %1336 = vector.shape_cast %1326 : vector<1x1xf32> to vector<1x1xf32>
    %1337 = vector.broadcast %1336 : vector<1x1xf32> to vector<13x1xf32>
    %1338 = arith.select %16, %1335, %1337 : vector<13x1xi1>, vector<13x1xf32>
    %1339 = vector.broadcast %1323 : vector<1x1xf32> to vector<13x1xf32>
    %1340 = arith.divf %1338, %1339 : vector<13x1xf32>
    %1341 = vector.broadcast %1340 : vector<13x1xf32> to vector<13x12xf32>
    %1342 = vector.broadcast %1333 : vector<1x12xf32> to vector<13x12xf32>
    %1343 = arith.mulf %1341, %1342 : vector<13x12xf32>
    %1344 = arith.addf %1313, %1343 : vector<13x12xf32>
    %1345 = vector.extract_strided_slice %1344 {offsets = [0, 0], sizes = [13, 1], strides = [1, 1]} : vector<13x12xf32> to vector<13x1xf32>
    %1346 = vector.extract_strided_slice %1344 {offsets = [0, 5], sizes = [13, 1], strides = [1, 1]} : vector<13x12xf32> to vector<13x1xf32>
    %1347 = arith.addf %1345, %1346 : vector<13x1xf32>
    %1348 = vector.extract_strided_slice %1347 {offsets = [0, 0], sizes = [1, 1], strides = [1, 1]} : vector<13x1xf32> to vector<1x1xf32>
    %1349 = vector.extract_strided_slice %1347 {offsets = [5, 0], sizes = [1, 1], strides = [1, 1]} : vector<13x1xf32> to vector<1x1xf32>
    %1350 = arith.addf %1348, %1349 : vector<1x1xf32>
    %cst_118 = arith.constant 1.000000e+00 : f32
    %1351 = vector.broadcast %cst_118 : f32 to vector<1x1xf32>
    %1352 = arith.addf %1350, %1351 : vector<1x1xf32>
    %1353 = vector.extract_strided_slice %1300 {offsets = [0, 1], sizes = [1, 1], strides = [1, 1]} : vector<1x8xf32> to vector<1x1xf32>
    %1354 = vector.extract_strided_slice %1347 {offsets = [12, 0], sizes = [1, 1], strides = [1, 1]} : vector<13x1xf32> to vector<1x1xf32>
    %1355 = arith.subf %1353, %1354 : vector<1x1xf32>
    %1356 = arith.mulf %1327, %1352 : vector<1x1xf32>
    %1357 = arith.mulf %1355, %1355 : vector<1x1xf32>
    %1358 = arith.divf %1357, %1352 : vector<1x1xf32>
    %1359 = arith.addf %1330, %1358 : vector<1x1xf32>
    %1360 = vector.extract_strided_slice %1344 {offsets = [0, 0], sizes = [1, 12], strides = [1, 1]} : vector<13x12xf32> to vector<1x12xf32>
    %1361 = vector.extract_strided_slice %1344 {offsets = [5, 0], sizes = [1, 12], strides = [1, 1]} : vector<13x12xf32> to vector<1x12xf32>
    %1362 = arith.addf %1360, %1361 : vector<1x12xf32>
    %cst_119 = arith.constant 0.000000e+00 : f32
    %1363 = vector.broadcast %cst_119 : f32 to vector<13x1xf32>
    %1364 = arith.subf %1363, %1347 : vector<13x1xf32>
    %1365 = vector.shape_cast %1355 : vector<1x1xf32> to vector<1x1xf32>
    %1366 = vector.broadcast %1365 : vector<1x1xf32> to vector<13x1xf32>
    %1367 = arith.select %16, %1364, %1366 : vector<13x1xi1>, vector<13x1xf32>
    %1368 = vector.broadcast %1352 : vector<1x1xf32> to vector<13x1xf32>
    %1369 = arith.divf %1367, %1368 : vector<13x1xf32>
    %1370 = vector.broadcast %1369 : vector<13x1xf32> to vector<13x12xf32>
    %1371 = vector.broadcast %1362 : vector<1x12xf32> to vector<13x12xf32>
    %1372 = arith.mulf %1370, %1371 : vector<13x12xf32>
    %1373 = arith.addf %1344, %1372 : vector<13x12xf32>
    %1374 = vector.extract_strided_slice %1373 {offsets = [0, 0], sizes = [13, 1], strides = [1, 1]} : vector<13x12xf32> to vector<13x1xf32>
    %1375 = vector.extract_strided_slice %1373 {offsets = [0, 6], sizes = [13, 1], strides = [1, 1]} : vector<13x12xf32> to vector<13x1xf32>
    %1376 = arith.addf %1374, %1375 : vector<13x1xf32>
    %1377 = vector.extract_strided_slice %1376 {offsets = [0, 0], sizes = [1, 1], strides = [1, 1]} : vector<13x1xf32> to vector<1x1xf32>
    %1378 = vector.extract_strided_slice %1376 {offsets = [6, 0], sizes = [1, 1], strides = [1, 1]} : vector<13x1xf32> to vector<1x1xf32>
    %1379 = arith.addf %1377, %1378 : vector<1x1xf32>
    %cst_120 = arith.constant 1.000000e+00 : f32
    %1380 = vector.broadcast %cst_120 : f32 to vector<1x1xf32>
    %1381 = arith.addf %1379, %1380 : vector<1x1xf32>
    %1382 = vector.extract_strided_slice %1300 {offsets = [0, 2], sizes = [1, 1], strides = [1, 1]} : vector<1x8xf32> to vector<1x1xf32>
    %1383 = vector.extract_strided_slice %1376 {offsets = [12, 0], sizes = [1, 1], strides = [1, 1]} : vector<13x1xf32> to vector<1x1xf32>
    %1384 = arith.subf %1382, %1383 : vector<1x1xf32>
    %1385 = arith.mulf %1356, %1381 : vector<1x1xf32>
    %1386 = arith.mulf %1384, %1384 : vector<1x1xf32>
    %1387 = arith.divf %1386, %1381 : vector<1x1xf32>
    %1388 = arith.addf %1359, %1387 : vector<1x1xf32>
    %1389 = vector.extract_strided_slice %1373 {offsets = [0, 0], sizes = [1, 12], strides = [1, 1]} : vector<13x12xf32> to vector<1x12xf32>
    %1390 = vector.extract_strided_slice %1373 {offsets = [6, 0], sizes = [1, 12], strides = [1, 1]} : vector<13x12xf32> to vector<1x12xf32>
    %1391 = arith.addf %1389, %1390 : vector<1x12xf32>
    %cst_121 = arith.constant 0.000000e+00 : f32
    %1392 = vector.broadcast %cst_121 : f32 to vector<13x1xf32>
    %1393 = arith.subf %1392, %1376 : vector<13x1xf32>
    %1394 = vector.shape_cast %1384 : vector<1x1xf32> to vector<1x1xf32>
    %1395 = vector.broadcast %1394 : vector<1x1xf32> to vector<13x1xf32>
    %1396 = arith.select %16, %1393, %1395 : vector<13x1xi1>, vector<13x1xf32>
    %1397 = vector.broadcast %1381 : vector<1x1xf32> to vector<13x1xf32>
    %1398 = arith.divf %1396, %1397 : vector<13x1xf32>
    %1399 = vector.broadcast %1398 : vector<13x1xf32> to vector<13x12xf32>
    %1400 = vector.broadcast %1391 : vector<1x12xf32> to vector<13x12xf32>
    %1401 = arith.mulf %1399, %1400 : vector<13x12xf32>
    %1402 = arith.addf %1373, %1401 : vector<13x12xf32>
    %1403 = vector.extract_strided_slice %1402 {offsets = [0, 0], sizes = [13, 1], strides = [1, 1]} : vector<13x12xf32> to vector<13x1xf32>
    %1404 = vector.extract_strided_slice %1402 {offsets = [0, 7], sizes = [13, 1], strides = [1, 1]} : vector<13x12xf32> to vector<13x1xf32>
    %1405 = arith.addf %1403, %1404 : vector<13x1xf32>
    %1406 = vector.extract_strided_slice %1405 {offsets = [0, 0], sizes = [1, 1], strides = [1, 1]} : vector<13x1xf32> to vector<1x1xf32>
    %1407 = vector.extract_strided_slice %1405 {offsets = [7, 0], sizes = [1, 1], strides = [1, 1]} : vector<13x1xf32> to vector<1x1xf32>
    %1408 = arith.addf %1406, %1407 : vector<1x1xf32>
    %cst_122 = arith.constant 1.000000e+00 : f32
    %1409 = vector.broadcast %cst_122 : f32 to vector<1x1xf32>
    %1410 = arith.addf %1408, %1409 : vector<1x1xf32>
    %1411 = vector.extract_strided_slice %1300 {offsets = [0, 3], sizes = [1, 1], strides = [1, 1]} : vector<1x8xf32> to vector<1x1xf32>
    %1412 = vector.extract_strided_slice %1405 {offsets = [12, 0], sizes = [1, 1], strides = [1, 1]} : vector<13x1xf32> to vector<1x1xf32>
    %1413 = arith.subf %1411, %1412 : vector<1x1xf32>
    %1414 = arith.mulf %1385, %1410 : vector<1x1xf32>
    %1415 = arith.mulf %1413, %1413 : vector<1x1xf32>
    %1416 = arith.divf %1415, %1410 : vector<1x1xf32>
    %1417 = arith.addf %1388, %1416 : vector<1x1xf32>
    %1418 = vector.extract_strided_slice %1402 {offsets = [0, 0], sizes = [1, 12], strides = [1, 1]} : vector<13x12xf32> to vector<1x12xf32>
    %1419 = vector.extract_strided_slice %1402 {offsets = [7, 0], sizes = [1, 12], strides = [1, 1]} : vector<13x12xf32> to vector<1x12xf32>
    %1420 = arith.addf %1418, %1419 : vector<1x12xf32>
    %cst_123 = arith.constant 0.000000e+00 : f32
    %1421 = vector.broadcast %cst_123 : f32 to vector<13x1xf32>
    %1422 = arith.subf %1421, %1405 : vector<13x1xf32>
    %1423 = vector.shape_cast %1413 : vector<1x1xf32> to vector<1x1xf32>
    %1424 = vector.broadcast %1423 : vector<1x1xf32> to vector<13x1xf32>
    %1425 = arith.select %16, %1422, %1424 : vector<13x1xi1>, vector<13x1xf32>
    %1426 = vector.broadcast %1410 : vector<1x1xf32> to vector<13x1xf32>
    %1427 = arith.divf %1425, %1426 : vector<13x1xf32>
    %1428 = vector.broadcast %1427 : vector<13x1xf32> to vector<13x12xf32>
    %1429 = vector.broadcast %1420 : vector<1x12xf32> to vector<13x12xf32>
    %1430 = arith.mulf %1428, %1429 : vector<13x12xf32>
    %1431 = arith.addf %1402, %1430 : vector<13x12xf32>
    %1432 = vector.extract_strided_slice %1431 {offsets = [0, 1], sizes = [13, 1], strides = [1, 1]} : vector<13x12xf32> to vector<13x1xf32>
    %1433 = vector.extract_strided_slice %1431 {offsets = [0, 8], sizes = [13, 1], strides = [1, 1]} : vector<13x12xf32> to vector<13x1xf32>
    %1434 = arith.addf %1432, %1433 : vector<13x1xf32>
    %1435 = vector.extract_strided_slice %1434 {offsets = [1, 0], sizes = [1, 1], strides = [1, 1]} : vector<13x1xf32> to vector<1x1xf32>
    %1436 = vector.extract_strided_slice %1434 {offsets = [8, 0], sizes = [1, 1], strides = [1, 1]} : vector<13x1xf32> to vector<1x1xf32>
    %1437 = arith.addf %1435, %1436 : vector<1x1xf32>
    %cst_124 = arith.constant 1.000000e+00 : f32
    %1438 = vector.broadcast %cst_124 : f32 to vector<1x1xf32>
    %1439 = arith.addf %1437, %1438 : vector<1x1xf32>
    %1440 = vector.extract_strided_slice %1300 {offsets = [0, 4], sizes = [1, 1], strides = [1, 1]} : vector<1x8xf32> to vector<1x1xf32>
    %1441 = vector.extract_strided_slice %1434 {offsets = [12, 0], sizes = [1, 1], strides = [1, 1]} : vector<13x1xf32> to vector<1x1xf32>
    %1442 = arith.subf %1440, %1441 : vector<1x1xf32>
    %1443 = arith.mulf %1414, %1439 : vector<1x1xf32>
    %1444 = arith.mulf %1442, %1442 : vector<1x1xf32>
    %1445 = arith.divf %1444, %1439 : vector<1x1xf32>
    %1446 = arith.addf %1417, %1445 : vector<1x1xf32>
    %1447 = vector.extract_strided_slice %1431 {offsets = [1, 0], sizes = [1, 12], strides = [1, 1]} : vector<13x12xf32> to vector<1x12xf32>
    %1448 = vector.extract_strided_slice %1431 {offsets = [8, 0], sizes = [1, 12], strides = [1, 1]} : vector<13x12xf32> to vector<1x12xf32>
    %1449 = arith.addf %1447, %1448 : vector<1x12xf32>
    %cst_125 = arith.constant 0.000000e+00 : f32
    %1450 = vector.broadcast %cst_125 : f32 to vector<13x1xf32>
    %1451 = arith.subf %1450, %1434 : vector<13x1xf32>
    %1452 = vector.shape_cast %1442 : vector<1x1xf32> to vector<1x1xf32>
    %1453 = vector.broadcast %1452 : vector<1x1xf32> to vector<13x1xf32>
    %1454 = arith.select %16, %1451, %1453 : vector<13x1xi1>, vector<13x1xf32>
    %1455 = vector.broadcast %1439 : vector<1x1xf32> to vector<13x1xf32>
    %1456 = arith.divf %1454, %1455 : vector<13x1xf32>
    %1457 = vector.broadcast %1456 : vector<13x1xf32> to vector<13x12xf32>
    %1458 = vector.broadcast %1449 : vector<1x12xf32> to vector<13x12xf32>
    %1459 = arith.mulf %1457, %1458 : vector<13x12xf32>
    %1460 = arith.addf %1431, %1459 : vector<13x12xf32>
    %1461 = vector.extract_strided_slice %1460 {offsets = [0, 1], sizes = [13, 1], strides = [1, 1]} : vector<13x12xf32> to vector<13x1xf32>
    %1462 = vector.extract_strided_slice %1460 {offsets = [0, 9], sizes = [13, 1], strides = [1, 1]} : vector<13x12xf32> to vector<13x1xf32>
    %1463 = arith.addf %1461, %1462 : vector<13x1xf32>
    %1464 = vector.extract_strided_slice %1463 {offsets = [1, 0], sizes = [1, 1], strides = [1, 1]} : vector<13x1xf32> to vector<1x1xf32>
    %1465 = vector.extract_strided_slice %1463 {offsets = [9, 0], sizes = [1, 1], strides = [1, 1]} : vector<13x1xf32> to vector<1x1xf32>
    %1466 = arith.addf %1464, %1465 : vector<1x1xf32>
    %cst_126 = arith.constant 1.000000e+00 : f32
    %1467 = vector.broadcast %cst_126 : f32 to vector<1x1xf32>
    %1468 = arith.addf %1466, %1467 : vector<1x1xf32>
    %1469 = vector.extract_strided_slice %1300 {offsets = [0, 5], sizes = [1, 1], strides = [1, 1]} : vector<1x8xf32> to vector<1x1xf32>
    %1470 = vector.extract_strided_slice %1463 {offsets = [12, 0], sizes = [1, 1], strides = [1, 1]} : vector<13x1xf32> to vector<1x1xf32>
    %1471 = arith.subf %1469, %1470 : vector<1x1xf32>
    %1472 = arith.mulf %1443, %1468 : vector<1x1xf32>
    %1473 = arith.mulf %1471, %1471 : vector<1x1xf32>
    %1474 = arith.divf %1473, %1468 : vector<1x1xf32>
    %1475 = arith.addf %1446, %1474 : vector<1x1xf32>
    %1476 = vector.extract_strided_slice %1460 {offsets = [1, 0], sizes = [1, 12], strides = [1, 1]} : vector<13x12xf32> to vector<1x12xf32>
    %1477 = vector.extract_strided_slice %1460 {offsets = [9, 0], sizes = [1, 12], strides = [1, 1]} : vector<13x12xf32> to vector<1x12xf32>
    %1478 = arith.addf %1476, %1477 : vector<1x12xf32>
    %cst_127 = arith.constant 0.000000e+00 : f32
    %1479 = vector.broadcast %cst_127 : f32 to vector<13x1xf32>
    %1480 = arith.subf %1479, %1463 : vector<13x1xf32>
    %1481 = vector.shape_cast %1471 : vector<1x1xf32> to vector<1x1xf32>
    %1482 = vector.broadcast %1481 : vector<1x1xf32> to vector<13x1xf32>
    %1483 = arith.select %16, %1480, %1482 : vector<13x1xi1>, vector<13x1xf32>
    %1484 = vector.broadcast %1468 : vector<1x1xf32> to vector<13x1xf32>
    %1485 = arith.divf %1483, %1484 : vector<13x1xf32>
    %1486 = vector.broadcast %1485 : vector<13x1xf32> to vector<13x12xf32>
    %1487 = vector.broadcast %1478 : vector<1x12xf32> to vector<13x12xf32>
    %1488 = arith.mulf %1486, %1487 : vector<13x12xf32>
    %1489 = arith.addf %1460, %1488 : vector<13x12xf32>
    %1490 = vector.extract_strided_slice %1489 {offsets = [0, 1], sizes = [13, 1], strides = [1, 1]} : vector<13x12xf32> to vector<13x1xf32>
    %1491 = vector.extract_strided_slice %1489 {offsets = [0, 10], sizes = [13, 1], strides = [1, 1]} : vector<13x12xf32> to vector<13x1xf32>
    %1492 = arith.addf %1490, %1491 : vector<13x1xf32>
    %1493 = vector.extract_strided_slice %1492 {offsets = [1, 0], sizes = [1, 1], strides = [1, 1]} : vector<13x1xf32> to vector<1x1xf32>
    %1494 = vector.extract_strided_slice %1492 {offsets = [10, 0], sizes = [1, 1], strides = [1, 1]} : vector<13x1xf32> to vector<1x1xf32>
    %1495 = arith.addf %1493, %1494 : vector<1x1xf32>
    %cst_128 = arith.constant 1.000000e+00 : f32
    %1496 = vector.broadcast %cst_128 : f32 to vector<1x1xf32>
    %1497 = arith.addf %1495, %1496 : vector<1x1xf32>
    %1498 = vector.extract_strided_slice %1300 {offsets = [0, 6], sizes = [1, 1], strides = [1, 1]} : vector<1x8xf32> to vector<1x1xf32>
    %1499 = vector.extract_strided_slice %1492 {offsets = [12, 0], sizes = [1, 1], strides = [1, 1]} : vector<13x1xf32> to vector<1x1xf32>
    %1500 = arith.subf %1498, %1499 : vector<1x1xf32>
    %1501 = arith.mulf %1472, %1497 : vector<1x1xf32>
    %1502 = arith.mulf %1500, %1500 : vector<1x1xf32>
    %1503 = arith.divf %1502, %1497 : vector<1x1xf32>
    %1504 = arith.addf %1475, %1503 : vector<1x1xf32>
    %1505 = vector.extract_strided_slice %1489 {offsets = [1, 0], sizes = [1, 12], strides = [1, 1]} : vector<13x12xf32> to vector<1x12xf32>
    %1506 = vector.extract_strided_slice %1489 {offsets = [10, 0], sizes = [1, 12], strides = [1, 1]} : vector<13x12xf32> to vector<1x12xf32>
    %1507 = arith.addf %1505, %1506 : vector<1x12xf32>
    %cst_129 = arith.constant 0.000000e+00 : f32
    %1508 = vector.broadcast %cst_129 : f32 to vector<13x1xf32>
    %1509 = arith.subf %1508, %1492 : vector<13x1xf32>
    %1510 = vector.shape_cast %1500 : vector<1x1xf32> to vector<1x1xf32>
    %1511 = vector.broadcast %1510 : vector<1x1xf32> to vector<13x1xf32>
    %1512 = arith.select %16, %1509, %1511 : vector<13x1xi1>, vector<13x1xf32>
    %1513 = vector.broadcast %1497 : vector<1x1xf32> to vector<13x1xf32>
    %1514 = arith.divf %1512, %1513 : vector<13x1xf32>
    %1515 = vector.broadcast %1514 : vector<13x1xf32> to vector<13x12xf32>
    %1516 = vector.broadcast %1507 : vector<1x12xf32> to vector<13x12xf32>
    %1517 = arith.mulf %1515, %1516 : vector<13x12xf32>
    %1518 = arith.addf %1489, %1517 : vector<13x12xf32>
    %1519 = vector.extract_strided_slice %1518 {offsets = [0, 1], sizes = [13, 1], strides = [1, 1]} : vector<13x12xf32> to vector<13x1xf32>
    %1520 = vector.extract_strided_slice %1518 {offsets = [0, 11], sizes = [13, 1], strides = [1, 1]} : vector<13x12xf32> to vector<13x1xf32>
    %1521 = arith.addf %1519, %1520 : vector<13x1xf32>
    %1522 = vector.extract_strided_slice %1521 {offsets = [1, 0], sizes = [1, 1], strides = [1, 1]} : vector<13x1xf32> to vector<1x1xf32>
    %1523 = vector.extract_strided_slice %1521 {offsets = [11, 0], sizes = [1, 1], strides = [1, 1]} : vector<13x1xf32> to vector<1x1xf32>
    %1524 = arith.addf %1522, %1523 : vector<1x1xf32>
    %cst_130 = arith.constant 1.000000e+00 : f32
    %1525 = vector.broadcast %cst_130 : f32 to vector<1x1xf32>
    %1526 = arith.addf %1524, %1525 : vector<1x1xf32>
    %1527 = vector.extract_strided_slice %1300 {offsets = [0, 7], sizes = [1, 1], strides = [1, 1]} : vector<1x8xf32> to vector<1x1xf32>
    %1528 = vector.extract_strided_slice %1521 {offsets = [12, 0], sizes = [1, 1], strides = [1, 1]} : vector<13x1xf32> to vector<1x1xf32>
    %1529 = arith.subf %1527, %1528 : vector<1x1xf32>
    %1530 = arith.mulf %1501, %1526 : vector<1x1xf32>
    %1531 = arith.mulf %1529, %1529 : vector<1x1xf32>
    %1532 = arith.divf %1531, %1526 : vector<1x1xf32>
    %1533 = arith.addf %1504, %1532 : vector<1x1xf32>
    %1534 = vector.extract_strided_slice %1518 {offsets = [1, 0], sizes = [1, 12], strides = [1, 1]} : vector<13x12xf32> to vector<1x12xf32>
    %1535 = vector.extract_strided_slice %1518 {offsets = [11, 0], sizes = [1, 12], strides = [1, 1]} : vector<13x12xf32> to vector<1x12xf32>
    %1536 = arith.addf %1534, %1535 : vector<1x12xf32>
    %cst_131 = arith.constant 0.000000e+00 : f32
    %1537 = vector.broadcast %cst_131 : f32 to vector<13x1xf32>
    %1538 = arith.subf %1537, %1521 : vector<13x1xf32>
    %1539 = vector.shape_cast %1529 : vector<1x1xf32> to vector<1x1xf32>
    %1540 = vector.broadcast %1539 : vector<1x1xf32> to vector<13x1xf32>
    %1541 = arith.select %16, %1538, %1540 : vector<13x1xi1>, vector<13x1xf32>
    %1542 = vector.broadcast %1526 : vector<1x1xf32> to vector<13x1xf32>
    %1543 = arith.divf %1541, %1542 : vector<13x1xf32>
    %1544 = vector.broadcast %1543 : vector<13x1xf32> to vector<13x12xf32>
    %1545 = vector.broadcast %1536 : vector<1x12xf32> to vector<13x12xf32>
    %1546 = arith.mulf %1544, %1545 : vector<13x12xf32>
    %1547 = arith.addf %1518, %1546 : vector<13x12xf32>
    %1548 = math.log %1530 : vector<1x1xf32>
    %cst_132 = arith.constant 14.7030163 : f32
    %1549 = vector.broadcast %cst_132 : f32 to vector<1x1xf32>
    %1550 = arith.addf %1549, %1548 : vector<1x1xf32>
    %1551 = arith.addf %1550, %1533 : vector<1x1xf32>
    %cst_133 = arith.constant 5.000000e-01 : f32
    %1552 = vector.broadcast %cst_133 : f32 to vector<1x1xf32>
    %1553 = arith.mulf %1552, %1551 : vector<1x1xf32>
    %1554 = arith.subf %1298, %1553 : vector<1x1xf32>
    %c6_i32 = arith.constant 6 : i32
    %1555 = arith.index_cast %c6_i32 : i32 to index
    %c0_134 = arith.constant 0 : index
    %1556 = vector.load %arg1[%1555, %c0_134] : memref<8x8xf32, #tpu.memory_space<vmem>>, vector<1x8xf32>
    %1557 = vector.extract_strided_slice %1547 {offsets = [0, 2], sizes = [13, 10], strides = [1, 1]} : vector<13x12xf32> to vector<13x10xf32>
    %1558 = vector.extract_strided_slice %1547 {offsets = [0, 0], sizes = [13, 2], strides = [1, 1]} : vector<13x12xf32> to vector<13x2xf32>
    %1559 = tpu.concatenate %1557, %1558 in 1 : vector<13x10xf32>, vector<13x2xf32> -> vector<13x12xf32>
    %1560 = vector.broadcast %8 : vector<1x12xf32> to vector<13x12xf32>
    %1561 = arith.mulf %1560, %1559 : vector<13x12xf32>
    %1562 = arith.addf %1547, %1561 : vector<13x12xf32>
    %1563 = vector.extract_strided_slice %1562 {offsets = [2, 0], sizes = [11, 12], strides = [1, 1]} : vector<13x12xf32> to vector<11x12xf32>
    %1564 = vector.extract_strided_slice %1562 {offsets = [0, 0], sizes = [2, 12], strides = [1, 1]} : vector<13x12xf32> to vector<2x12xf32>
    %1565 = tpu.concatenate %1563, %1564 in 0 : vector<11x12xf32>, vector<2x12xf32> -> vector<13x12xf32>
    %1566 = vector.broadcast %13 : vector<13x1xf32> to vector<13x12xf32>
    %1567 = arith.mulf %1566, %1565 : vector<13x12xf32>
    %1568 = arith.addf %1562, %1567 : vector<13x12xf32>
    %1569 = arith.addf %1568, %3 : vector<13x12xf32>
    %cst_135 = arith.constant 1.000000e+00 : f32
    %1570 = vector.broadcast %cst_135 : f32 to vector<1x1xf32>
    %cst_136 = arith.constant 0.000000e+00 : f32
    %1571 = vector.broadcast %cst_136 : f32 to vector<1x1xf32>
    %1572 = vector.extract_strided_slice %1569 {offsets = [0, 0], sizes = [13, 1], strides = [1, 1]} : vector<13x12xf32> to vector<13x1xf32>
    %1573 = vector.extract_strided_slice %1569 {offsets = [0, 4], sizes = [13, 1], strides = [1, 1]} : vector<13x12xf32> to vector<13x1xf32>
    %1574 = arith.addf %1572, %1573 : vector<13x1xf32>
    %1575 = vector.extract_strided_slice %1574 {offsets = [0, 0], sizes = [1, 1], strides = [1, 1]} : vector<13x1xf32> to vector<1x1xf32>
    %1576 = vector.extract_strided_slice %1574 {offsets = [4, 0], sizes = [1, 1], strides = [1, 1]} : vector<13x1xf32> to vector<1x1xf32>
    %1577 = arith.addf %1575, %1576 : vector<1x1xf32>
    %cst_137 = arith.constant 1.000000e+00 : f32
    %1578 = vector.broadcast %cst_137 : f32 to vector<1x1xf32>
    %1579 = arith.addf %1577, %1578 : vector<1x1xf32>
    %1580 = vector.extract_strided_slice %1556 {offsets = [0, 0], sizes = [1, 1], strides = [1, 1]} : vector<1x8xf32> to vector<1x1xf32>
    %1581 = vector.extract_strided_slice %1574 {offsets = [12, 0], sizes = [1, 1], strides = [1, 1]} : vector<13x1xf32> to vector<1x1xf32>
    %1582 = arith.subf %1580, %1581 : vector<1x1xf32>
    %1583 = arith.mulf %1570, %1579 : vector<1x1xf32>
    %1584 = arith.mulf %1582, %1582 : vector<1x1xf32>
    %1585 = arith.divf %1584, %1579 : vector<1x1xf32>
    %1586 = arith.addf %1571, %1585 : vector<1x1xf32>
    %1587 = vector.extract_strided_slice %1569 {offsets = [0, 0], sizes = [1, 12], strides = [1, 1]} : vector<13x12xf32> to vector<1x12xf32>
    %1588 = vector.extract_strided_slice %1569 {offsets = [4, 0], sizes = [1, 12], strides = [1, 1]} : vector<13x12xf32> to vector<1x12xf32>
    %1589 = arith.addf %1587, %1588 : vector<1x12xf32>
    %cst_138 = arith.constant 0.000000e+00 : f32
    %1590 = vector.broadcast %cst_138 : f32 to vector<13x1xf32>
    %1591 = arith.subf %1590, %1574 : vector<13x1xf32>
    %1592 = vector.shape_cast %1582 : vector<1x1xf32> to vector<1x1xf32>
    %1593 = vector.broadcast %1592 : vector<1x1xf32> to vector<13x1xf32>
    %1594 = arith.select %16, %1591, %1593 : vector<13x1xi1>, vector<13x1xf32>
    %1595 = vector.broadcast %1579 : vector<1x1xf32> to vector<13x1xf32>
    %1596 = arith.divf %1594, %1595 : vector<13x1xf32>
    %1597 = vector.broadcast %1596 : vector<13x1xf32> to vector<13x12xf32>
    %1598 = vector.broadcast %1589 : vector<1x12xf32> to vector<13x12xf32>
    %1599 = arith.mulf %1597, %1598 : vector<13x12xf32>
    %1600 = arith.addf %1569, %1599 : vector<13x12xf32>
    %1601 = vector.extract_strided_slice %1600 {offsets = [0, 0], sizes = [13, 1], strides = [1, 1]} : vector<13x12xf32> to vector<13x1xf32>
    %1602 = vector.extract_strided_slice %1600 {offsets = [0, 5], sizes = [13, 1], strides = [1, 1]} : vector<13x12xf32> to vector<13x1xf32>
    %1603 = arith.addf %1601, %1602 : vector<13x1xf32>
    %1604 = vector.extract_strided_slice %1603 {offsets = [0, 0], sizes = [1, 1], strides = [1, 1]} : vector<13x1xf32> to vector<1x1xf32>
    %1605 = vector.extract_strided_slice %1603 {offsets = [5, 0], sizes = [1, 1], strides = [1, 1]} : vector<13x1xf32> to vector<1x1xf32>
    %1606 = arith.addf %1604, %1605 : vector<1x1xf32>
    %cst_139 = arith.constant 1.000000e+00 : f32
    %1607 = vector.broadcast %cst_139 : f32 to vector<1x1xf32>
    %1608 = arith.addf %1606, %1607 : vector<1x1xf32>
    %1609 = vector.extract_strided_slice %1556 {offsets = [0, 1], sizes = [1, 1], strides = [1, 1]} : vector<1x8xf32> to vector<1x1xf32>
    %1610 = vector.extract_strided_slice %1603 {offsets = [12, 0], sizes = [1, 1], strides = [1, 1]} : vector<13x1xf32> to vector<1x1xf32>
    %1611 = arith.subf %1609, %1610 : vector<1x1xf32>
    %1612 = arith.mulf %1583, %1608 : vector<1x1xf32>
    %1613 = arith.mulf %1611, %1611 : vector<1x1xf32>
    %1614 = arith.divf %1613, %1608 : vector<1x1xf32>
    %1615 = arith.addf %1586, %1614 : vector<1x1xf32>
    %1616 = vector.extract_strided_slice %1600 {offsets = [0, 0], sizes = [1, 12], strides = [1, 1]} : vector<13x12xf32> to vector<1x12xf32>
    %1617 = vector.extract_strided_slice %1600 {offsets = [5, 0], sizes = [1, 12], strides = [1, 1]} : vector<13x12xf32> to vector<1x12xf32>
    %1618 = arith.addf %1616, %1617 : vector<1x12xf32>
    %cst_140 = arith.constant 0.000000e+00 : f32
    %1619 = vector.broadcast %cst_140 : f32 to vector<13x1xf32>
    %1620 = arith.subf %1619, %1603 : vector<13x1xf32>
    %1621 = vector.shape_cast %1611 : vector<1x1xf32> to vector<1x1xf32>
    %1622 = vector.broadcast %1621 : vector<1x1xf32> to vector<13x1xf32>
    %1623 = arith.select %16, %1620, %1622 : vector<13x1xi1>, vector<13x1xf32>
    %1624 = vector.broadcast %1608 : vector<1x1xf32> to vector<13x1xf32>
    %1625 = arith.divf %1623, %1624 : vector<13x1xf32>
    %1626 = vector.broadcast %1625 : vector<13x1xf32> to vector<13x12xf32>
    %1627 = vector.broadcast %1618 : vector<1x12xf32> to vector<13x12xf32>
    %1628 = arith.mulf %1626, %1627 : vector<13x12xf32>
    %1629 = arith.addf %1600, %1628 : vector<13x12xf32>
    %1630 = vector.extract_strided_slice %1629 {offsets = [0, 0], sizes = [13, 1], strides = [1, 1]} : vector<13x12xf32> to vector<13x1xf32>
    %1631 = vector.extract_strided_slice %1629 {offsets = [0, 6], sizes = [13, 1], strides = [1, 1]} : vector<13x12xf32> to vector<13x1xf32>
    %1632 = arith.addf %1630, %1631 : vector<13x1xf32>
    %1633 = vector.extract_strided_slice %1632 {offsets = [0, 0], sizes = [1, 1], strides = [1, 1]} : vector<13x1xf32> to vector<1x1xf32>
    %1634 = vector.extract_strided_slice %1632 {offsets = [6, 0], sizes = [1, 1], strides = [1, 1]} : vector<13x1xf32> to vector<1x1xf32>
    %1635 = arith.addf %1633, %1634 : vector<1x1xf32>
    %cst_141 = arith.constant 1.000000e+00 : f32
    %1636 = vector.broadcast %cst_141 : f32 to vector<1x1xf32>
    %1637 = arith.addf %1635, %1636 : vector<1x1xf32>
    %1638 = vector.extract_strided_slice %1556 {offsets = [0, 2], sizes = [1, 1], strides = [1, 1]} : vector<1x8xf32> to vector<1x1xf32>
    %1639 = vector.extract_strided_slice %1632 {offsets = [12, 0], sizes = [1, 1], strides = [1, 1]} : vector<13x1xf32> to vector<1x1xf32>
    %1640 = arith.subf %1638, %1639 : vector<1x1xf32>
    %1641 = arith.mulf %1612, %1637 : vector<1x1xf32>
    %1642 = arith.mulf %1640, %1640 : vector<1x1xf32>
    %1643 = arith.divf %1642, %1637 : vector<1x1xf32>
    %1644 = arith.addf %1615, %1643 : vector<1x1xf32>
    %1645 = vector.extract_strided_slice %1629 {offsets = [0, 0], sizes = [1, 12], strides = [1, 1]} : vector<13x12xf32> to vector<1x12xf32>
    %1646 = vector.extract_strided_slice %1629 {offsets = [6, 0], sizes = [1, 12], strides = [1, 1]} : vector<13x12xf32> to vector<1x12xf32>
    %1647 = arith.addf %1645, %1646 : vector<1x12xf32>
    %cst_142 = arith.constant 0.000000e+00 : f32
    %1648 = vector.broadcast %cst_142 : f32 to vector<13x1xf32>
    %1649 = arith.subf %1648, %1632 : vector<13x1xf32>
    %1650 = vector.shape_cast %1640 : vector<1x1xf32> to vector<1x1xf32>
    %1651 = vector.broadcast %1650 : vector<1x1xf32> to vector<13x1xf32>
    %1652 = arith.select %16, %1649, %1651 : vector<13x1xi1>, vector<13x1xf32>
    %1653 = vector.broadcast %1637 : vector<1x1xf32> to vector<13x1xf32>
    %1654 = arith.divf %1652, %1653 : vector<13x1xf32>
    %1655 = vector.broadcast %1654 : vector<13x1xf32> to vector<13x12xf32>
    %1656 = vector.broadcast %1647 : vector<1x12xf32> to vector<13x12xf32>
    %1657 = arith.mulf %1655, %1656 : vector<13x12xf32>
    %1658 = arith.addf %1629, %1657 : vector<13x12xf32>
    %1659 = vector.extract_strided_slice %1658 {offsets = [0, 0], sizes = [13, 1], strides = [1, 1]} : vector<13x12xf32> to vector<13x1xf32>
    %1660 = vector.extract_strided_slice %1658 {offsets = [0, 7], sizes = [13, 1], strides = [1, 1]} : vector<13x12xf32> to vector<13x1xf32>
    %1661 = arith.addf %1659, %1660 : vector<13x1xf32>
    %1662 = vector.extract_strided_slice %1661 {offsets = [0, 0], sizes = [1, 1], strides = [1, 1]} : vector<13x1xf32> to vector<1x1xf32>
    %1663 = vector.extract_strided_slice %1661 {offsets = [7, 0], sizes = [1, 1], strides = [1, 1]} : vector<13x1xf32> to vector<1x1xf32>
    %1664 = arith.addf %1662, %1663 : vector<1x1xf32>
    %cst_143 = arith.constant 1.000000e+00 : f32
    %1665 = vector.broadcast %cst_143 : f32 to vector<1x1xf32>
    %1666 = arith.addf %1664, %1665 : vector<1x1xf32>
    %1667 = vector.extract_strided_slice %1556 {offsets = [0, 3], sizes = [1, 1], strides = [1, 1]} : vector<1x8xf32> to vector<1x1xf32>
    %1668 = vector.extract_strided_slice %1661 {offsets = [12, 0], sizes = [1, 1], strides = [1, 1]} : vector<13x1xf32> to vector<1x1xf32>
    %1669 = arith.subf %1667, %1668 : vector<1x1xf32>
    %1670 = arith.mulf %1641, %1666 : vector<1x1xf32>
    %1671 = arith.mulf %1669, %1669 : vector<1x1xf32>
    %1672 = arith.divf %1671, %1666 : vector<1x1xf32>
    %1673 = arith.addf %1644, %1672 : vector<1x1xf32>
    %1674 = vector.extract_strided_slice %1658 {offsets = [0, 0], sizes = [1, 12], strides = [1, 1]} : vector<13x12xf32> to vector<1x12xf32>
    %1675 = vector.extract_strided_slice %1658 {offsets = [7, 0], sizes = [1, 12], strides = [1, 1]} : vector<13x12xf32> to vector<1x12xf32>
    %1676 = arith.addf %1674, %1675 : vector<1x12xf32>
    %cst_144 = arith.constant 0.000000e+00 : f32
    %1677 = vector.broadcast %cst_144 : f32 to vector<13x1xf32>
    %1678 = arith.subf %1677, %1661 : vector<13x1xf32>
    %1679 = vector.shape_cast %1669 : vector<1x1xf32> to vector<1x1xf32>
    %1680 = vector.broadcast %1679 : vector<1x1xf32> to vector<13x1xf32>
    %1681 = arith.select %16, %1678, %1680 : vector<13x1xi1>, vector<13x1xf32>
    %1682 = vector.broadcast %1666 : vector<1x1xf32> to vector<13x1xf32>
    %1683 = arith.divf %1681, %1682 : vector<13x1xf32>
    %1684 = vector.broadcast %1683 : vector<13x1xf32> to vector<13x12xf32>
    %1685 = vector.broadcast %1676 : vector<1x12xf32> to vector<13x12xf32>
    %1686 = arith.mulf %1684, %1685 : vector<13x12xf32>
    %1687 = arith.addf %1658, %1686 : vector<13x12xf32>
    %1688 = vector.extract_strided_slice %1687 {offsets = [0, 1], sizes = [13, 1], strides = [1, 1]} : vector<13x12xf32> to vector<13x1xf32>
    %1689 = vector.extract_strided_slice %1687 {offsets = [0, 8], sizes = [13, 1], strides = [1, 1]} : vector<13x12xf32> to vector<13x1xf32>
    %1690 = arith.addf %1688, %1689 : vector<13x1xf32>
    %1691 = vector.extract_strided_slice %1690 {offsets = [1, 0], sizes = [1, 1], strides = [1, 1]} : vector<13x1xf32> to vector<1x1xf32>
    %1692 = vector.extract_strided_slice %1690 {offsets = [8, 0], sizes = [1, 1], strides = [1, 1]} : vector<13x1xf32> to vector<1x1xf32>
    %1693 = arith.addf %1691, %1692 : vector<1x1xf32>
    %cst_145 = arith.constant 1.000000e+00 : f32
    %1694 = vector.broadcast %cst_145 : f32 to vector<1x1xf32>
    %1695 = arith.addf %1693, %1694 : vector<1x1xf32>
    %1696 = vector.extract_strided_slice %1556 {offsets = [0, 4], sizes = [1, 1], strides = [1, 1]} : vector<1x8xf32> to vector<1x1xf32>
    %1697 = vector.extract_strided_slice %1690 {offsets = [12, 0], sizes = [1, 1], strides = [1, 1]} : vector<13x1xf32> to vector<1x1xf32>
    %1698 = arith.subf %1696, %1697 : vector<1x1xf32>
    %1699 = arith.mulf %1670, %1695 : vector<1x1xf32>
    %1700 = arith.mulf %1698, %1698 : vector<1x1xf32>
    %1701 = arith.divf %1700, %1695 : vector<1x1xf32>
    %1702 = arith.addf %1673, %1701 : vector<1x1xf32>
    %1703 = vector.extract_strided_slice %1687 {offsets = [1, 0], sizes = [1, 12], strides = [1, 1]} : vector<13x12xf32> to vector<1x12xf32>
    %1704 = vector.extract_strided_slice %1687 {offsets = [8, 0], sizes = [1, 12], strides = [1, 1]} : vector<13x12xf32> to vector<1x12xf32>
    %1705 = arith.addf %1703, %1704 : vector<1x12xf32>
    %cst_146 = arith.constant 0.000000e+00 : f32
    %1706 = vector.broadcast %cst_146 : f32 to vector<13x1xf32>
    %1707 = arith.subf %1706, %1690 : vector<13x1xf32>
    %1708 = vector.shape_cast %1698 : vector<1x1xf32> to vector<1x1xf32>
    %1709 = vector.broadcast %1708 : vector<1x1xf32> to vector<13x1xf32>
    %1710 = arith.select %16, %1707, %1709 : vector<13x1xi1>, vector<13x1xf32>
    %1711 = vector.broadcast %1695 : vector<1x1xf32> to vector<13x1xf32>
    %1712 = arith.divf %1710, %1711 : vector<13x1xf32>
    %1713 = vector.broadcast %1712 : vector<13x1xf32> to vector<13x12xf32>
    %1714 = vector.broadcast %1705 : vector<1x12xf32> to vector<13x12xf32>
    %1715 = arith.mulf %1713, %1714 : vector<13x12xf32>
    %1716 = arith.addf %1687, %1715 : vector<13x12xf32>
    %1717 = vector.extract_strided_slice %1716 {offsets = [0, 1], sizes = [13, 1], strides = [1, 1]} : vector<13x12xf32> to vector<13x1xf32>
    %1718 = vector.extract_strided_slice %1716 {offsets = [0, 9], sizes = [13, 1], strides = [1, 1]} : vector<13x12xf32> to vector<13x1xf32>
    %1719 = arith.addf %1717, %1718 : vector<13x1xf32>
    %1720 = vector.extract_strided_slice %1719 {offsets = [1, 0], sizes = [1, 1], strides = [1, 1]} : vector<13x1xf32> to vector<1x1xf32>
    %1721 = vector.extract_strided_slice %1719 {offsets = [9, 0], sizes = [1, 1], strides = [1, 1]} : vector<13x1xf32> to vector<1x1xf32>
    %1722 = arith.addf %1720, %1721 : vector<1x1xf32>
    %cst_147 = arith.constant 1.000000e+00 : f32
    %1723 = vector.broadcast %cst_147 : f32 to vector<1x1xf32>
    %1724 = arith.addf %1722, %1723 : vector<1x1xf32>
    %1725 = vector.extract_strided_slice %1556 {offsets = [0, 5], sizes = [1, 1], strides = [1, 1]} : vector<1x8xf32> to vector<1x1xf32>
    %1726 = vector.extract_strided_slice %1719 {offsets = [12, 0], sizes = [1, 1], strides = [1, 1]} : vector<13x1xf32> to vector<1x1xf32>
    %1727 = arith.subf %1725, %1726 : vector<1x1xf32>
    %1728 = arith.mulf %1699, %1724 : vector<1x1xf32>
    %1729 = arith.mulf %1727, %1727 : vector<1x1xf32>
    %1730 = arith.divf %1729, %1724 : vector<1x1xf32>
    %1731 = arith.addf %1702, %1730 : vector<1x1xf32>
    %1732 = vector.extract_strided_slice %1716 {offsets = [1, 0], sizes = [1, 12], strides = [1, 1]} : vector<13x12xf32> to vector<1x12xf32>
    %1733 = vector.extract_strided_slice %1716 {offsets = [9, 0], sizes = [1, 12], strides = [1, 1]} : vector<13x12xf32> to vector<1x12xf32>
    %1734 = arith.addf %1732, %1733 : vector<1x12xf32>
    %cst_148 = arith.constant 0.000000e+00 : f32
    %1735 = vector.broadcast %cst_148 : f32 to vector<13x1xf32>
    %1736 = arith.subf %1735, %1719 : vector<13x1xf32>
    %1737 = vector.shape_cast %1727 : vector<1x1xf32> to vector<1x1xf32>
    %1738 = vector.broadcast %1737 : vector<1x1xf32> to vector<13x1xf32>
    %1739 = arith.select %16, %1736, %1738 : vector<13x1xi1>, vector<13x1xf32>
    %1740 = vector.broadcast %1724 : vector<1x1xf32> to vector<13x1xf32>
    %1741 = arith.divf %1739, %1740 : vector<13x1xf32>
    %1742 = vector.broadcast %1741 : vector<13x1xf32> to vector<13x12xf32>
    %1743 = vector.broadcast %1734 : vector<1x12xf32> to vector<13x12xf32>
    %1744 = arith.mulf %1742, %1743 : vector<13x12xf32>
    %1745 = arith.addf %1716, %1744 : vector<13x12xf32>
    %1746 = vector.extract_strided_slice %1745 {offsets = [0, 1], sizes = [13, 1], strides = [1, 1]} : vector<13x12xf32> to vector<13x1xf32>
    %1747 = vector.extract_strided_slice %1745 {offsets = [0, 10], sizes = [13, 1], strides = [1, 1]} : vector<13x12xf32> to vector<13x1xf32>
    %1748 = arith.addf %1746, %1747 : vector<13x1xf32>
    %1749 = vector.extract_strided_slice %1748 {offsets = [1, 0], sizes = [1, 1], strides = [1, 1]} : vector<13x1xf32> to vector<1x1xf32>
    %1750 = vector.extract_strided_slice %1748 {offsets = [10, 0], sizes = [1, 1], strides = [1, 1]} : vector<13x1xf32> to vector<1x1xf32>
    %1751 = arith.addf %1749, %1750 : vector<1x1xf32>
    %cst_149 = arith.constant 1.000000e+00 : f32
    %1752 = vector.broadcast %cst_149 : f32 to vector<1x1xf32>
    %1753 = arith.addf %1751, %1752 : vector<1x1xf32>
    %1754 = vector.extract_strided_slice %1556 {offsets = [0, 6], sizes = [1, 1], strides = [1, 1]} : vector<1x8xf32> to vector<1x1xf32>
    %1755 = vector.extract_strided_slice %1748 {offsets = [12, 0], sizes = [1, 1], strides = [1, 1]} : vector<13x1xf32> to vector<1x1xf32>
    %1756 = arith.subf %1754, %1755 : vector<1x1xf32>
    %1757 = arith.mulf %1728, %1753 : vector<1x1xf32>
    %1758 = arith.mulf %1756, %1756 : vector<1x1xf32>
    %1759 = arith.divf %1758, %1753 : vector<1x1xf32>
    %1760 = arith.addf %1731, %1759 : vector<1x1xf32>
    %1761 = vector.extract_strided_slice %1745 {offsets = [1, 0], sizes = [1, 12], strides = [1, 1]} : vector<13x12xf32> to vector<1x12xf32>
    %1762 = vector.extract_strided_slice %1745 {offsets = [10, 0], sizes = [1, 12], strides = [1, 1]} : vector<13x12xf32> to vector<1x12xf32>
    %1763 = arith.addf %1761, %1762 : vector<1x12xf32>
    %cst_150 = arith.constant 0.000000e+00 : f32
    %1764 = vector.broadcast %cst_150 : f32 to vector<13x1xf32>
    %1765 = arith.subf %1764, %1748 : vector<13x1xf32>
    %1766 = vector.shape_cast %1756 : vector<1x1xf32> to vector<1x1xf32>
    %1767 = vector.broadcast %1766 : vector<1x1xf32> to vector<13x1xf32>
    %1768 = arith.select %16, %1765, %1767 : vector<13x1xi1>, vector<13x1xf32>
    %1769 = vector.broadcast %1753 : vector<1x1xf32> to vector<13x1xf32>
    %1770 = arith.divf %1768, %1769 : vector<13x1xf32>
    %1771 = vector.broadcast %1770 : vector<13x1xf32> to vector<13x12xf32>
    %1772 = vector.broadcast %1763 : vector<1x12xf32> to vector<13x12xf32>
    %1773 = arith.mulf %1771, %1772 : vector<13x12xf32>
    %1774 = arith.addf %1745, %1773 : vector<13x12xf32>
    %1775 = vector.extract_strided_slice %1774 {offsets = [0, 1], sizes = [13, 1], strides = [1, 1]} : vector<13x12xf32> to vector<13x1xf32>
    %1776 = vector.extract_strided_slice %1774 {offsets = [0, 11], sizes = [13, 1], strides = [1, 1]} : vector<13x12xf32> to vector<13x1xf32>
    %1777 = arith.addf %1775, %1776 : vector<13x1xf32>
    %1778 = vector.extract_strided_slice %1777 {offsets = [1, 0], sizes = [1, 1], strides = [1, 1]} : vector<13x1xf32> to vector<1x1xf32>
    %1779 = vector.extract_strided_slice %1777 {offsets = [11, 0], sizes = [1, 1], strides = [1, 1]} : vector<13x1xf32> to vector<1x1xf32>
    %1780 = arith.addf %1778, %1779 : vector<1x1xf32>
    %cst_151 = arith.constant 1.000000e+00 : f32
    %1781 = vector.broadcast %cst_151 : f32 to vector<1x1xf32>
    %1782 = arith.addf %1780, %1781 : vector<1x1xf32>
    %1783 = vector.extract_strided_slice %1556 {offsets = [0, 7], sizes = [1, 1], strides = [1, 1]} : vector<1x8xf32> to vector<1x1xf32>
    %1784 = vector.extract_strided_slice %1777 {offsets = [12, 0], sizes = [1, 1], strides = [1, 1]} : vector<13x1xf32> to vector<1x1xf32>
    %1785 = arith.subf %1783, %1784 : vector<1x1xf32>
    %1786 = arith.mulf %1757, %1782 : vector<1x1xf32>
    %1787 = arith.mulf %1785, %1785 : vector<1x1xf32>
    %1788 = arith.divf %1787, %1782 : vector<1x1xf32>
    %1789 = arith.addf %1760, %1788 : vector<1x1xf32>
    %1790 = vector.extract_strided_slice %1774 {offsets = [1, 0], sizes = [1, 12], strides = [1, 1]} : vector<13x12xf32> to vector<1x12xf32>
    %1791 = vector.extract_strided_slice %1774 {offsets = [11, 0], sizes = [1, 12], strides = [1, 1]} : vector<13x12xf32> to vector<1x12xf32>
    %1792 = arith.addf %1790, %1791 : vector<1x12xf32>
    %cst_152 = arith.constant 0.000000e+00 : f32
    %1793 = vector.broadcast %cst_152 : f32 to vector<13x1xf32>
    %1794 = arith.subf %1793, %1777 : vector<13x1xf32>
    %1795 = vector.shape_cast %1785 : vector<1x1xf32> to vector<1x1xf32>
    %1796 = vector.broadcast %1795 : vector<1x1xf32> to vector<13x1xf32>
    %1797 = arith.select %16, %1794, %1796 : vector<13x1xi1>, vector<13x1xf32>
    %1798 = vector.broadcast %1782 : vector<1x1xf32> to vector<13x1xf32>
    %1799 = arith.divf %1797, %1798 : vector<13x1xf32>
    %1800 = vector.broadcast %1799 : vector<13x1xf32> to vector<13x12xf32>
    %1801 = vector.broadcast %1792 : vector<1x12xf32> to vector<13x12xf32>
    %1802 = arith.mulf %1800, %1801 : vector<13x12xf32>
    %1803 = arith.addf %1774, %1802 : vector<13x12xf32>
    %1804 = math.log %1786 : vector<1x1xf32>
    %cst_153 = arith.constant 14.7030163 : f32
    %1805 = vector.broadcast %cst_153 : f32 to vector<1x1xf32>
    %1806 = arith.addf %1805, %1804 : vector<1x1xf32>
    %1807 = arith.addf %1806, %1789 : vector<1x1xf32>
    %cst_154 = arith.constant 5.000000e-01 : f32
    %1808 = vector.broadcast %cst_154 : f32 to vector<1x1xf32>
    %1809 = arith.mulf %1808, %1807 : vector<1x1xf32>
    %1810 = arith.subf %1554, %1809 : vector<1x1xf32>
    %c7_i32 = arith.constant 7 : i32
    %1811 = arith.index_cast %c7_i32 : i32 to index
    %c0_155 = arith.constant 0 : index
    %1812 = vector.load %arg1[%1811, %c0_155] : memref<8x8xf32, #tpu.memory_space<vmem>>, vector<1x8xf32>
    %1813 = vector.extract_strided_slice %1803 {offsets = [0, 2], sizes = [13, 10], strides = [1, 1]} : vector<13x12xf32> to vector<13x10xf32>
    %1814 = vector.extract_strided_slice %1803 {offsets = [0, 0], sizes = [13, 2], strides = [1, 1]} : vector<13x12xf32> to vector<13x2xf32>
    %1815 = tpu.concatenate %1813, %1814 in 1 : vector<13x10xf32>, vector<13x2xf32> -> vector<13x12xf32>
    %1816 = vector.broadcast %8 : vector<1x12xf32> to vector<13x12xf32>
    %1817 = arith.mulf %1816, %1815 : vector<13x12xf32>
    %1818 = arith.addf %1803, %1817 : vector<13x12xf32>
    %1819 = vector.extract_strided_slice %1818 {offsets = [2, 0], sizes = [11, 12], strides = [1, 1]} : vector<13x12xf32> to vector<11x12xf32>
    %1820 = vector.extract_strided_slice %1818 {offsets = [0, 0], sizes = [2, 12], strides = [1, 1]} : vector<13x12xf32> to vector<2x12xf32>
    %1821 = tpu.concatenate %1819, %1820 in 0 : vector<11x12xf32>, vector<2x12xf32> -> vector<13x12xf32>
    %1822 = vector.broadcast %13 : vector<13x1xf32> to vector<13x12xf32>
    %1823 = arith.mulf %1822, %1821 : vector<13x12xf32>
    %1824 = arith.addf %1818, %1823 : vector<13x12xf32>
    %1825 = arith.addf %1824, %3 : vector<13x12xf32>
    %cst_156 = arith.constant 1.000000e+00 : f32
    %1826 = vector.broadcast %cst_156 : f32 to vector<1x1xf32>
    %cst_157 = arith.constant 0.000000e+00 : f32
    %1827 = vector.broadcast %cst_157 : f32 to vector<1x1xf32>
    %1828 = vector.extract_strided_slice %1825 {offsets = [0, 0], sizes = [13, 1], strides = [1, 1]} : vector<13x12xf32> to vector<13x1xf32>
    %1829 = vector.extract_strided_slice %1825 {offsets = [0, 4], sizes = [13, 1], strides = [1, 1]} : vector<13x12xf32> to vector<13x1xf32>
    %1830 = arith.addf %1828, %1829 : vector<13x1xf32>
    %1831 = vector.extract_strided_slice %1830 {offsets = [0, 0], sizes = [1, 1], strides = [1, 1]} : vector<13x1xf32> to vector<1x1xf32>
    %1832 = vector.extract_strided_slice %1830 {offsets = [4, 0], sizes = [1, 1], strides = [1, 1]} : vector<13x1xf32> to vector<1x1xf32>
    %1833 = arith.addf %1831, %1832 : vector<1x1xf32>
    %cst_158 = arith.constant 1.000000e+00 : f32
    %1834 = vector.broadcast %cst_158 : f32 to vector<1x1xf32>
    %1835 = arith.addf %1833, %1834 : vector<1x1xf32>
    %1836 = vector.extract_strided_slice %1812 {offsets = [0, 0], sizes = [1, 1], strides = [1, 1]} : vector<1x8xf32> to vector<1x1xf32>
    %1837 = vector.extract_strided_slice %1830 {offsets = [12, 0], sizes = [1, 1], strides = [1, 1]} : vector<13x1xf32> to vector<1x1xf32>
    %1838 = arith.subf %1836, %1837 : vector<1x1xf32>
    %1839 = arith.mulf %1826, %1835 : vector<1x1xf32>
    %1840 = arith.mulf %1838, %1838 : vector<1x1xf32>
    %1841 = arith.divf %1840, %1835 : vector<1x1xf32>
    %1842 = arith.addf %1827, %1841 : vector<1x1xf32>
    %1843 = vector.extract_strided_slice %1825 {offsets = [0, 0], sizes = [1, 12], strides = [1, 1]} : vector<13x12xf32> to vector<1x12xf32>
    %1844 = vector.extract_strided_slice %1825 {offsets = [4, 0], sizes = [1, 12], strides = [1, 1]} : vector<13x12xf32> to vector<1x12xf32>
    %1845 = arith.addf %1843, %1844 : vector<1x12xf32>
    %cst_159 = arith.constant 0.000000e+00 : f32
    %1846 = vector.broadcast %cst_159 : f32 to vector<13x1xf32>
    %1847 = arith.subf %1846, %1830 : vector<13x1xf32>
    %1848 = vector.shape_cast %1838 : vector<1x1xf32> to vector<1x1xf32>
    %1849 = vector.broadcast %1848 : vector<1x1xf32> to vector<13x1xf32>
    %1850 = arith.select %16, %1847, %1849 : vector<13x1xi1>, vector<13x1xf32>
    %1851 = vector.broadcast %1835 : vector<1x1xf32> to vector<13x1xf32>
    %1852 = arith.divf %1850, %1851 : vector<13x1xf32>
    %1853 = vector.broadcast %1852 : vector<13x1xf32> to vector<13x12xf32>
    %1854 = vector.broadcast %1845 : vector<1x12xf32> to vector<13x12xf32>
    %1855 = arith.mulf %1853, %1854 : vector<13x12xf32>
    %1856 = arith.addf %1825, %1855 : vector<13x12xf32>
    %1857 = vector.extract_strided_slice %1856 {offsets = [0, 0], sizes = [13, 1], strides = [1, 1]} : vector<13x12xf32> to vector<13x1xf32>
    %1858 = vector.extract_strided_slice %1856 {offsets = [0, 5], sizes = [13, 1], strides = [1, 1]} : vector<13x12xf32> to vector<13x1xf32>
    %1859 = arith.addf %1857, %1858 : vector<13x1xf32>
    %1860 = vector.extract_strided_slice %1859 {offsets = [0, 0], sizes = [1, 1], strides = [1, 1]} : vector<13x1xf32> to vector<1x1xf32>
    %1861 = vector.extract_strided_slice %1859 {offsets = [5, 0], sizes = [1, 1], strides = [1, 1]} : vector<13x1xf32> to vector<1x1xf32>
    %1862 = arith.addf %1860, %1861 : vector<1x1xf32>
    %cst_160 = arith.constant 1.000000e+00 : f32
    %1863 = vector.broadcast %cst_160 : f32 to vector<1x1xf32>
    %1864 = arith.addf %1862, %1863 : vector<1x1xf32>
    %1865 = vector.extract_strided_slice %1812 {offsets = [0, 1], sizes = [1, 1], strides = [1, 1]} : vector<1x8xf32> to vector<1x1xf32>
    %1866 = vector.extract_strided_slice %1859 {offsets = [12, 0], sizes = [1, 1], strides = [1, 1]} : vector<13x1xf32> to vector<1x1xf32>
    %1867 = arith.subf %1865, %1866 : vector<1x1xf32>
    %1868 = arith.mulf %1839, %1864 : vector<1x1xf32>
    %1869 = arith.mulf %1867, %1867 : vector<1x1xf32>
    %1870 = arith.divf %1869, %1864 : vector<1x1xf32>
    %1871 = arith.addf %1842, %1870 : vector<1x1xf32>
    %1872 = vector.extract_strided_slice %1856 {offsets = [0, 0], sizes = [1, 12], strides = [1, 1]} : vector<13x12xf32> to vector<1x12xf32>
    %1873 = vector.extract_strided_slice %1856 {offsets = [5, 0], sizes = [1, 12], strides = [1, 1]} : vector<13x12xf32> to vector<1x12xf32>
    %1874 = arith.addf %1872, %1873 : vector<1x12xf32>
    %cst_161 = arith.constant 0.000000e+00 : f32
    %1875 = vector.broadcast %cst_161 : f32 to vector<13x1xf32>
    %1876 = arith.subf %1875, %1859 : vector<13x1xf32>
    %1877 = vector.shape_cast %1867 : vector<1x1xf32> to vector<1x1xf32>
    %1878 = vector.broadcast %1877 : vector<1x1xf32> to vector<13x1xf32>
    %1879 = arith.select %16, %1876, %1878 : vector<13x1xi1>, vector<13x1xf32>
    %1880 = vector.broadcast %1864 : vector<1x1xf32> to vector<13x1xf32>
    %1881 = arith.divf %1879, %1880 : vector<13x1xf32>
    %1882 = vector.broadcast %1881 : vector<13x1xf32> to vector<13x12xf32>
    %1883 = vector.broadcast %1874 : vector<1x12xf32> to vector<13x12xf32>
    %1884 = arith.mulf %1882, %1883 : vector<13x12xf32>
    %1885 = arith.addf %1856, %1884 : vector<13x12xf32>
    %1886 = vector.extract_strided_slice %1885 {offsets = [0, 0], sizes = [13, 1], strides = [1, 1]} : vector<13x12xf32> to vector<13x1xf32>
    %1887 = vector.extract_strided_slice %1885 {offsets = [0, 6], sizes = [13, 1], strides = [1, 1]} : vector<13x12xf32> to vector<13x1xf32>
    %1888 = arith.addf %1886, %1887 : vector<13x1xf32>
    %1889 = vector.extract_strided_slice %1888 {offsets = [0, 0], sizes = [1, 1], strides = [1, 1]} : vector<13x1xf32> to vector<1x1xf32>
    %1890 = vector.extract_strided_slice %1888 {offsets = [6, 0], sizes = [1, 1], strides = [1, 1]} : vector<13x1xf32> to vector<1x1xf32>
    %1891 = arith.addf %1889, %1890 : vector<1x1xf32>
    %cst_162 = arith.constant 1.000000e+00 : f32
    %1892 = vector.broadcast %cst_162 : f32 to vector<1x1xf32>
    %1893 = arith.addf %1891, %1892 : vector<1x1xf32>
    %1894 = vector.extract_strided_slice %1812 {offsets = [0, 2], sizes = [1, 1], strides = [1, 1]} : vector<1x8xf32> to vector<1x1xf32>
    %1895 = vector.extract_strided_slice %1888 {offsets = [12, 0], sizes = [1, 1], strides = [1, 1]} : vector<13x1xf32> to vector<1x1xf32>
    %1896 = arith.subf %1894, %1895 : vector<1x1xf32>
    %1897 = arith.mulf %1868, %1893 : vector<1x1xf32>
    %1898 = arith.mulf %1896, %1896 : vector<1x1xf32>
    %1899 = arith.divf %1898, %1893 : vector<1x1xf32>
    %1900 = arith.addf %1871, %1899 : vector<1x1xf32>
    %1901 = vector.extract_strided_slice %1885 {offsets = [0, 0], sizes = [1, 12], strides = [1, 1]} : vector<13x12xf32> to vector<1x12xf32>
    %1902 = vector.extract_strided_slice %1885 {offsets = [6, 0], sizes = [1, 12], strides = [1, 1]} : vector<13x12xf32> to vector<1x12xf32>
    %1903 = arith.addf %1901, %1902 : vector<1x12xf32>
    %cst_163 = arith.constant 0.000000e+00 : f32
    %1904 = vector.broadcast %cst_163 : f32 to vector<13x1xf32>
    %1905 = arith.subf %1904, %1888 : vector<13x1xf32>
    %1906 = vector.shape_cast %1896 : vector<1x1xf32> to vector<1x1xf32>
    %1907 = vector.broadcast %1906 : vector<1x1xf32> to vector<13x1xf32>
    %1908 = arith.select %16, %1905, %1907 : vector<13x1xi1>, vector<13x1xf32>
    %1909 = vector.broadcast %1893 : vector<1x1xf32> to vector<13x1xf32>
    %1910 = arith.divf %1908, %1909 : vector<13x1xf32>
    %1911 = vector.broadcast %1910 : vector<13x1xf32> to vector<13x12xf32>
    %1912 = vector.broadcast %1903 : vector<1x12xf32> to vector<13x12xf32>
    %1913 = arith.mulf %1911, %1912 : vector<13x12xf32>
    %1914 = arith.addf %1885, %1913 : vector<13x12xf32>
    %1915 = vector.extract_strided_slice %1914 {offsets = [0, 0], sizes = [13, 1], strides = [1, 1]} : vector<13x12xf32> to vector<13x1xf32>
    %1916 = vector.extract_strided_slice %1914 {offsets = [0, 7], sizes = [13, 1], strides = [1, 1]} : vector<13x12xf32> to vector<13x1xf32>
    %1917 = arith.addf %1915, %1916 : vector<13x1xf32>
    %1918 = vector.extract_strided_slice %1917 {offsets = [0, 0], sizes = [1, 1], strides = [1, 1]} : vector<13x1xf32> to vector<1x1xf32>
    %1919 = vector.extract_strided_slice %1917 {offsets = [7, 0], sizes = [1, 1], strides = [1, 1]} : vector<13x1xf32> to vector<1x1xf32>
    %1920 = arith.addf %1918, %1919 : vector<1x1xf32>
    %cst_164 = arith.constant 1.000000e+00 : f32
    %1921 = vector.broadcast %cst_164 : f32 to vector<1x1xf32>
    %1922 = arith.addf %1920, %1921 : vector<1x1xf32>
    %1923 = vector.extract_strided_slice %1812 {offsets = [0, 3], sizes = [1, 1], strides = [1, 1]} : vector<1x8xf32> to vector<1x1xf32>
    %1924 = vector.extract_strided_slice %1917 {offsets = [12, 0], sizes = [1, 1], strides = [1, 1]} : vector<13x1xf32> to vector<1x1xf32>
    %1925 = arith.subf %1923, %1924 : vector<1x1xf32>
    %1926 = arith.mulf %1897, %1922 : vector<1x1xf32>
    %1927 = arith.mulf %1925, %1925 : vector<1x1xf32>
    %1928 = arith.divf %1927, %1922 : vector<1x1xf32>
    %1929 = arith.addf %1900, %1928 : vector<1x1xf32>
    %1930 = vector.extract_strided_slice %1914 {offsets = [0, 0], sizes = [1, 12], strides = [1, 1]} : vector<13x12xf32> to vector<1x12xf32>
    %1931 = vector.extract_strided_slice %1914 {offsets = [7, 0], sizes = [1, 12], strides = [1, 1]} : vector<13x12xf32> to vector<1x12xf32>
    %1932 = arith.addf %1930, %1931 : vector<1x12xf32>
    %cst_165 = arith.constant 0.000000e+00 : f32
    %1933 = vector.broadcast %cst_165 : f32 to vector<13x1xf32>
    %1934 = arith.subf %1933, %1917 : vector<13x1xf32>
    %1935 = vector.shape_cast %1925 : vector<1x1xf32> to vector<1x1xf32>
    %1936 = vector.broadcast %1935 : vector<1x1xf32> to vector<13x1xf32>
    %1937 = arith.select %16, %1934, %1936 : vector<13x1xi1>, vector<13x1xf32>
    %1938 = vector.broadcast %1922 : vector<1x1xf32> to vector<13x1xf32>
    %1939 = arith.divf %1937, %1938 : vector<13x1xf32>
    %1940 = vector.broadcast %1939 : vector<13x1xf32> to vector<13x12xf32>
    %1941 = vector.broadcast %1932 : vector<1x12xf32> to vector<13x12xf32>
    %1942 = arith.mulf %1940, %1941 : vector<13x12xf32>
    %1943 = arith.addf %1914, %1942 : vector<13x12xf32>
    %1944 = vector.extract_strided_slice %1943 {offsets = [0, 1], sizes = [13, 1], strides = [1, 1]} : vector<13x12xf32> to vector<13x1xf32>
    %1945 = vector.extract_strided_slice %1943 {offsets = [0, 8], sizes = [13, 1], strides = [1, 1]} : vector<13x12xf32> to vector<13x1xf32>
    %1946 = arith.addf %1944, %1945 : vector<13x1xf32>
    %1947 = vector.extract_strided_slice %1946 {offsets = [1, 0], sizes = [1, 1], strides = [1, 1]} : vector<13x1xf32> to vector<1x1xf32>
    %1948 = vector.extract_strided_slice %1946 {offsets = [8, 0], sizes = [1, 1], strides = [1, 1]} : vector<13x1xf32> to vector<1x1xf32>
    %1949 = arith.addf %1947, %1948 : vector<1x1xf32>
    %cst_166 = arith.constant 1.000000e+00 : f32
    %1950 = vector.broadcast %cst_166 : f32 to vector<1x1xf32>
    %1951 = arith.addf %1949, %1950 : vector<1x1xf32>
    %1952 = vector.extract_strided_slice %1812 {offsets = [0, 4], sizes = [1, 1], strides = [1, 1]} : vector<1x8xf32> to vector<1x1xf32>
    %1953 = vector.extract_strided_slice %1946 {offsets = [12, 0], sizes = [1, 1], strides = [1, 1]} : vector<13x1xf32> to vector<1x1xf32>
    %1954 = arith.subf %1952, %1953 : vector<1x1xf32>
    %1955 = arith.mulf %1926, %1951 : vector<1x1xf32>
    %1956 = arith.mulf %1954, %1954 : vector<1x1xf32>
    %1957 = arith.divf %1956, %1951 : vector<1x1xf32>
    %1958 = arith.addf %1929, %1957 : vector<1x1xf32>
    %1959 = vector.extract_strided_slice %1943 {offsets = [1, 0], sizes = [1, 12], strides = [1, 1]} : vector<13x12xf32> to vector<1x12xf32>
    %1960 = vector.extract_strided_slice %1943 {offsets = [8, 0], sizes = [1, 12], strides = [1, 1]} : vector<13x12xf32> to vector<1x12xf32>
    %1961 = arith.addf %1959, %1960 : vector<1x12xf32>
    %cst_167 = arith.constant 0.000000e+00 : f32
    %1962 = vector.broadcast %cst_167 : f32 to vector<13x1xf32>
    %1963 = arith.subf %1962, %1946 : vector<13x1xf32>
    %1964 = vector.shape_cast %1954 : vector<1x1xf32> to vector<1x1xf32>
    %1965 = vector.broadcast %1964 : vector<1x1xf32> to vector<13x1xf32>
    %1966 = arith.select %16, %1963, %1965 : vector<13x1xi1>, vector<13x1xf32>
    %1967 = vector.broadcast %1951 : vector<1x1xf32> to vector<13x1xf32>
    %1968 = arith.divf %1966, %1967 : vector<13x1xf32>
    %1969 = vector.broadcast %1968 : vector<13x1xf32> to vector<13x12xf32>
    %1970 = vector.broadcast %1961 : vector<1x12xf32> to vector<13x12xf32>
    %1971 = arith.mulf %1969, %1970 : vector<13x12xf32>
    %1972 = arith.addf %1943, %1971 : vector<13x12xf32>
    %1973 = vector.extract_strided_slice %1972 {offsets = [0, 1], sizes = [13, 1], strides = [1, 1]} : vector<13x12xf32> to vector<13x1xf32>
    %1974 = vector.extract_strided_slice %1972 {offsets = [0, 9], sizes = [13, 1], strides = [1, 1]} : vector<13x12xf32> to vector<13x1xf32>
    %1975 = arith.addf %1973, %1974 : vector<13x1xf32>
    %1976 = vector.extract_strided_slice %1975 {offsets = [1, 0], sizes = [1, 1], strides = [1, 1]} : vector<13x1xf32> to vector<1x1xf32>
    %1977 = vector.extract_strided_slice %1975 {offsets = [9, 0], sizes = [1, 1], strides = [1, 1]} : vector<13x1xf32> to vector<1x1xf32>
    %1978 = arith.addf %1976, %1977 : vector<1x1xf32>
    %cst_168 = arith.constant 1.000000e+00 : f32
    %1979 = vector.broadcast %cst_168 : f32 to vector<1x1xf32>
    %1980 = arith.addf %1978, %1979 : vector<1x1xf32>
    %1981 = vector.extract_strided_slice %1812 {offsets = [0, 5], sizes = [1, 1], strides = [1, 1]} : vector<1x8xf32> to vector<1x1xf32>
    %1982 = vector.extract_strided_slice %1975 {offsets = [12, 0], sizes = [1, 1], strides = [1, 1]} : vector<13x1xf32> to vector<1x1xf32>
    %1983 = arith.subf %1981, %1982 : vector<1x1xf32>
    %1984 = arith.mulf %1955, %1980 : vector<1x1xf32>
    %1985 = arith.mulf %1983, %1983 : vector<1x1xf32>
    %1986 = arith.divf %1985, %1980 : vector<1x1xf32>
    %1987 = arith.addf %1958, %1986 : vector<1x1xf32>
    %1988 = vector.extract_strided_slice %1972 {offsets = [1, 0], sizes = [1, 12], strides = [1, 1]} : vector<13x12xf32> to vector<1x12xf32>
    %1989 = vector.extract_strided_slice %1972 {offsets = [9, 0], sizes = [1, 12], strides = [1, 1]} : vector<13x12xf32> to vector<1x12xf32>
    %1990 = arith.addf %1988, %1989 : vector<1x12xf32>
    %cst_169 = arith.constant 0.000000e+00 : f32
    %1991 = vector.broadcast %cst_169 : f32 to vector<13x1xf32>
    %1992 = arith.subf %1991, %1975 : vector<13x1xf32>
    %1993 = vector.shape_cast %1983 : vector<1x1xf32> to vector<1x1xf32>
    %1994 = vector.broadcast %1993 : vector<1x1xf32> to vector<13x1xf32>
    %1995 = arith.select %16, %1992, %1994 : vector<13x1xi1>, vector<13x1xf32>
    %1996 = vector.broadcast %1980 : vector<1x1xf32> to vector<13x1xf32>
    %1997 = arith.divf %1995, %1996 : vector<13x1xf32>
    %1998 = vector.broadcast %1997 : vector<13x1xf32> to vector<13x12xf32>
    %1999 = vector.broadcast %1990 : vector<1x12xf32> to vector<13x12xf32>
    %2000 = arith.mulf %1998, %1999 : vector<13x12xf32>
    %2001 = arith.addf %1972, %2000 : vector<13x12xf32>
    %2002 = vector.extract_strided_slice %2001 {offsets = [0, 1], sizes = [13, 1], strides = [1, 1]} : vector<13x12xf32> to vector<13x1xf32>
    %2003 = vector.extract_strided_slice %2001 {offsets = [0, 10], sizes = [13, 1], strides = [1, 1]} : vector<13x12xf32> to vector<13x1xf32>
    %2004 = arith.addf %2002, %2003 : vector<13x1xf32>
    %2005 = vector.extract_strided_slice %2004 {offsets = [1, 0], sizes = [1, 1], strides = [1, 1]} : vector<13x1xf32> to vector<1x1xf32>
    %2006 = vector.extract_strided_slice %2004 {offsets = [10, 0], sizes = [1, 1], strides = [1, 1]} : vector<13x1xf32> to vector<1x1xf32>
    %2007 = arith.addf %2005, %2006 : vector<1x1xf32>
    %cst_170 = arith.constant 1.000000e+00 : f32
    %2008 = vector.broadcast %cst_170 : f32 to vector<1x1xf32>
    %2009 = arith.addf %2007, %2008 : vector<1x1xf32>
    %2010 = vector.extract_strided_slice %1812 {offsets = [0, 6], sizes = [1, 1], strides = [1, 1]} : vector<1x8xf32> to vector<1x1xf32>
    %2011 = vector.extract_strided_slice %2004 {offsets = [12, 0], sizes = [1, 1], strides = [1, 1]} : vector<13x1xf32> to vector<1x1xf32>
    %2012 = arith.subf %2010, %2011 : vector<1x1xf32>
    %2013 = arith.mulf %1984, %2009 : vector<1x1xf32>
    %2014 = arith.mulf %2012, %2012 : vector<1x1xf32>
    %2015 = arith.divf %2014, %2009 : vector<1x1xf32>
    %2016 = arith.addf %1987, %2015 : vector<1x1xf32>
    %2017 = vector.extract_strided_slice %2001 {offsets = [1, 0], sizes = [1, 12], strides = [1, 1]} : vector<13x12xf32> to vector<1x12xf32>
    %2018 = vector.extract_strided_slice %2001 {offsets = [10, 0], sizes = [1, 12], strides = [1, 1]} : vector<13x12xf32> to vector<1x12xf32>
    %2019 = arith.addf %2017, %2018 : vector<1x12xf32>
    %cst_171 = arith.constant 0.000000e+00 : f32
    %2020 = vector.broadcast %cst_171 : f32 to vector<13x1xf32>
    %2021 = arith.subf %2020, %2004 : vector<13x1xf32>
    %2022 = vector.shape_cast %2012 : vector<1x1xf32> to vector<1x1xf32>
    %2023 = vector.broadcast %2022 : vector<1x1xf32> to vector<13x1xf32>
    %2024 = arith.select %16, %2021, %2023 : vector<13x1xi1>, vector<13x1xf32>
    %2025 = vector.broadcast %2009 : vector<1x1xf32> to vector<13x1xf32>
    %2026 = arith.divf %2024, %2025 : vector<13x1xf32>
    %2027 = vector.broadcast %2026 : vector<13x1xf32> to vector<13x12xf32>
    %2028 = vector.broadcast %2019 : vector<1x12xf32> to vector<13x12xf32>
    %2029 = arith.mulf %2027, %2028 : vector<13x12xf32>
    %2030 = arith.addf %2001, %2029 : vector<13x12xf32>
    %2031 = vector.extract_strided_slice %2030 {offsets = [0, 1], sizes = [13, 1], strides = [1, 1]} : vector<13x12xf32> to vector<13x1xf32>
    %2032 = vector.extract_strided_slice %2030 {offsets = [0, 11], sizes = [13, 1], strides = [1, 1]} : vector<13x12xf32> to vector<13x1xf32>
    %2033 = arith.addf %2031, %2032 : vector<13x1xf32>
    %2034 = vector.extract_strided_slice %2033 {offsets = [1, 0], sizes = [1, 1], strides = [1, 1]} : vector<13x1xf32> to vector<1x1xf32>
    %2035 = vector.extract_strided_slice %2033 {offsets = [11, 0], sizes = [1, 1], strides = [1, 1]} : vector<13x1xf32> to vector<1x1xf32>
    %2036 = arith.addf %2034, %2035 : vector<1x1xf32>
    %cst_172 = arith.constant 1.000000e+00 : f32
    %2037 = vector.broadcast %cst_172 : f32 to vector<1x1xf32>
    %2038 = arith.addf %2036, %2037 : vector<1x1xf32>
    %2039 = vector.extract_strided_slice %1812 {offsets = [0, 7], sizes = [1, 1], strides = [1, 1]} : vector<1x8xf32> to vector<1x1xf32>
    %2040 = vector.extract_strided_slice %2033 {offsets = [12, 0], sizes = [1, 1], strides = [1, 1]} : vector<13x1xf32> to vector<1x1xf32>
    %2041 = arith.subf %2039, %2040 : vector<1x1xf32>
    %2042 = arith.mulf %2013, %2038 : vector<1x1xf32>
    %2043 = arith.mulf %2041, %2041 : vector<1x1xf32>
    %2044 = arith.divf %2043, %2038 : vector<1x1xf32>
    %2045 = arith.addf %2016, %2044 : vector<1x1xf32>
    %2046 = vector.extract_strided_slice %2030 {offsets = [1, 0], sizes = [1, 12], strides = [1, 1]} : vector<13x12xf32> to vector<1x12xf32>
    %2047 = vector.extract_strided_slice %2030 {offsets = [11, 0], sizes = [1, 12], strides = [1, 1]} : vector<13x12xf32> to vector<1x12xf32>
    %2048 = arith.addf %2046, %2047 : vector<1x12xf32>
    %cst_173 = arith.constant 0.000000e+00 : f32
    %2049 = vector.broadcast %cst_173 : f32 to vector<13x1xf32>
    %2050 = arith.subf %2049, %2033 : vector<13x1xf32>
    %2051 = vector.shape_cast %2041 : vector<1x1xf32> to vector<1x1xf32>
    %2052 = vector.broadcast %2051 : vector<1x1xf32> to vector<13x1xf32>
    %2053 = arith.select %16, %2050, %2052 : vector<13x1xi1>, vector<13x1xf32>
    %2054 = vector.broadcast %2038 : vector<1x1xf32> to vector<13x1xf32>
    %2055 = arith.divf %2053, %2054 : vector<13x1xf32>
    %2056 = vector.broadcast %2055 : vector<13x1xf32> to vector<13x12xf32>
    %2057 = vector.broadcast %2048 : vector<1x12xf32> to vector<13x12xf32>
    %2058 = arith.mulf %2056, %2057 : vector<13x12xf32>
    %2059 = arith.addf %2030, %2058 : vector<13x12xf32>
    %2060 = math.log %2042 : vector<1x1xf32>
    %cst_174 = arith.constant 14.7030163 : f32
    %2061 = vector.broadcast %cst_174 : f32 to vector<1x1xf32>
    %2062 = arith.addf %2061, %2060 : vector<1x1xf32>
    %2063 = arith.addf %2062, %2045 : vector<1x1xf32>
    %cst_175 = arith.constant 5.000000e-01 : f32
    %2064 = vector.broadcast %cst_175 : f32 to vector<1x1xf32>
    %2065 = arith.mulf %2064, %2063 : vector<1x1xf32>
    %2066 = arith.subf %1810, %2065 : vector<1x1xf32>
    %c8_i32 = arith.constant 8 : i32
    %c0_176 = arith.constant 0 : index
    %c0_177 = arith.constant 0 : index
    %2067 = vector.load %arg4[%c0_176, %c0_177] : memref<13x12xf32, #tpu.memory_space<vmem>>, vector<13x12xf32>
    tpu.vector_store %arg4[%c0_176, %c0_177], %2059 {strides = array<i32>} : memref<13x12xf32, #tpu.memory_space<vmem>>, vector<13x12xf32>,
    %c0_178 = arith.constant 0 : index
    %c0_179 = arith.constant 0 : index
    %2068 = vector.load %arg5[%c0_178, %c0_179] : memref<1x1xf32, #tpu.memory_space<vmem>>, vector<1x1xf32>
    tpu.vector_store %arg5[%c0_178, %c0_179], %2066 {strides = array<i32>} : memref<1x1xf32, #tpu.memory_space<vmem>>, vector<1x1xf32>,
    return
  }
  func.func @transform_0(%arg0: i32) -> (i32, i32) {
    %c0_i32 = arith.constant 0 : i32
    %c0_i32_0 = arith.constant 0 : i32
    return %arg0, %c0_i32 : i32, i32
  }
  func.func @transform_1(%arg0: i32) -> (i32, i32) {
    %c0_i32 = arith.constant 0 : i32
    %c0_i32_0 = arith.constant 0 : i32
    %c0_i32_1 = arith.constant 0 : i32
    return %c0_i32, %c0_i32_0 : i32, i32
  }
  func.func @transform_2(%arg0: i32) -> (i32, i32) {
    %c0_i32 = arith.constant 0 : i32
    %c0_i32_0 = arith.constant 0 : i32
    %c0_i32_1 = arith.constant 0 : i32
    return %c0_i32, %c0_i32_0 : i32, i32
  }
  func.func @transform_3(%arg0: i32) -> (i32, i32) {
    %c0_i32 = arith.constant 0 : i32
    %c0_i32_0 = arith.constant 0 : i32
    %c0_i32_1 = arith.constant 0 : i32
    return %c0_i32, %c0_i32_0 : i32, i32
  }
  func.func @transform_4(%arg0: i32) -> (i32, i32) {
    %c0_i32 = arith.constant 0 : i32
    %c0_i32_0 = arith.constant 0 : i32
    %c0_i32_1 = arith.constant 0 : i32
    return %c0_i32, %c0_i32_0 : i32, i32
  }
}

</mosaic_0001>

<bundles_post_ra>
// kernel: tpu_custom_call.1
= control target key start
LH: loop header
LB: loop body
LE: loop exit
PB: predicated region body
PF: predicated region fallthrough
CT: control target
= control target key end

     0   :  { %10 = vsyncpa [#allocation3], 0  ;;  %s7518_s0 = inlined_call_operand.hbm [shape: f32[8,8], index: 0, kind: input, shape index: {}]   ;;  %s7519_s1 = inlined_call_operand.hbm [shape: f32[13,12], index: 1, kind: input, shape index: {}]   ;;  %s7520_s2 = inlined_call_operand.hbm [shape: f32[13,12], index: 2, kind: input, shape index: {}]   ;;  %s7521_s3 = inlined_call_operand.hbm [shape: f32[13,12], index: 3, kind: output, shape index: {0}]   ;;  %s7522_s4 = inlined_call_operand.hbm [shape: f32[1,1], index: 4, kind: output, shape index: {1}]  }
   0x1   :  { %11 = vsyncpa [#allocation6], 0 }
   0x2   :  { %12 = vsyncpa [#allocation4], 0 }
   0x3   :  { %13 = vsyncpa [#allocation10], 0  ;;  %s5613_s15 = smov [#allocation5]   ;;  %s5495_s19 = scalar_lea.hbm %s7519_s1, 256 }
   0x4   :  { %s29_s16 = sshll.u32 %s5613_s15, 4  ;;  %p5496_p0 = scmp.ne.s32.totalorder %s7519_s1, %s5495_s19  ;;  %s30_s16 = int_to_ptr.vmem [resolvable:$true] %s29_s16 }
   0x5   :  { %p5499_p1 = scmp.lt.u32.totalorder %s5495_s19, %s7519_s1 }
   0x7   :  { %p5501_p2 = pnand %p5499_p1, %p5496_p0 }
   0x9   :  { %5504 = shalt.err (!%p5501_p2)
}
   0xa   :  { %s5505_s24 = scalar_lea.vmem %s30_s16, 256  ;;  %p5510_p4 = scmp.lt.s32.totalorder %s30_s16, %s30_s16 }
   0xb   :  { %p5506_p3 = scmp.ne.s32.totalorder %s30_s16, %s5505_s24  ;;  %p5511_p5 = scmp.lt.s32.totalorder %s5505_s24, %s5505_s24 }
   0xd   :  { %p5512_p6 = por %p5511_p5, %p5510_p4 }
   0xf   :  { %p5513_p7 = pnand %p5512_p6, %p5506_p3 }
  0x11   :  { %5516 = shalt.err (!%p5513_p7)
}
  0x12   :  { %s5614_s25 = smov 128   ;;  %s5615_s26 = smov 8  }
  0x13   :  { %35 = dma.hbm_to_vmem [thread:$0]  %s7519_s1, 256, %s30_s16, [#allocation6], %s5614_s25, %s5614_s25, %s5615_s26  }
  0x14   :  { %s5616_s29 = smov [#allocation2]   ;;  %s5617_s5 = smov [#allocation7]  }
  0x15   :  { %s20_s30 = sshll.u32 %s5616_s29, 4  ;;  %s41_s6 = sshll.u32 %s5617_s5, 4  ;;  %s21_s30 = int_to_ptr.vmem [resolvable:$true] %s20_s30  ;;  %s42_s6 = int_to_ptr.vmem [resolvable:$true] %s41_s6 }
  0x16   :  { %s5517_s9 = scalar_lea.hbm %s7518_s0, 128 }
  0x17   :  { %p5518_p8 = scmp.ne.s32.totalorder %s7518_s0, %s5517_s9  ;;  %p5521_p9 = scmp.lt.u32.totalorder %s5517_s9, %s7518_s0 }
  0x19   :  { %p5523_p10 = pnand %p5521_p9, %p5518_p8 }
  0x1b   :  { %5526 = shalt.err (!%p5523_p10)
}
  0x1c   :  { %s5527_s1 = scalar_lea.vmem %s21_s30, 128  ;;  %p5532_p12 = scmp.lt.s32.totalorder %s21_s30, %s21_s30 }
  0x1d   :  { %p5528_p11 = scmp.ne.s32.totalorder %s21_s30, %s5527_s1  ;;  %p5533_p13 = scmp.lt.s32.totalorder %s5527_s1, %s5527_s1 }
  0x1f   :  { %p5534_p0 = por %p5533_p13, %p5532_p12 }
  0x21   :  { %p5535_p1 = pnand %p5534_p0, %p5528_p11 }
  0x23   :  { %5538 = shalt.err (!%p5535_p1)
}
  0x24   :  { %23 = dma.hbm_to_vmem [thread:$0]  %s7518_s0, 128, %s21_s30, [#allocation3]  }
  0x25   :  { %s5539_s18 = scalar_lea.hbm %s7520_s2, 256 }
  0x26   :  { %p5540_p2 = scmp.ne.s32.totalorder %s7520_s2, %s5539_s18  ;;  %p5543_p3 = scmp.lt.u32.totalorder %s5539_s18, %s7520_s2 }
  0x28   :  { %p5545_p4 = pnand %p5543_p3, %p5540_p2 }
  0x2a   :  { %5548 = shalt.err (!%p5545_p4)
}
  0x2b   :  { %s5549_s23 = scalar_lea.vmem %s42_s6, 256  ;;  %p5554_p6 = scmp.lt.s32.totalorder %s42_s6, %s42_s6 }
  0x2c   :  { %p5550_p5 = scmp.ne.s32.totalorder %s42_s6, %s5549_s23  ;;  %p5555_p7 = scmp.lt.s32.totalorder %s5549_s23, %s5549_s23 }
  0x2e   :  { %p5556_p8 = por %p5555_p7, %p5554_p6 }
  0x30   :  { %p5557_p9 = pnand %p5556_p8, %p5550_p5 }
  0x32   :  { %5560 = shalt.err (!%p5557_p9)
}
  0x33   :  { %47 = dma.hbm_to_vmem [thread:$0]  %s7520_s2, 256, %s42_s6, [#allocation6], %s5614_s25, %s5614_s25, %s5615_s26  }
  0x34   :  { %5605 = dma.done.wait [#allocation3], 128  }
  0x35   :  { %5606 = vsyncadd [#allocation3], 4294967168 }
  0x36   :  { %5607 = dma.done.wait [#allocation6], 512  }
  0x37   :  { %5608 = vsyncadd [#allocation6], 4294966784  ;;  %vm63_vm0 = vcmask 97280   ;;  %vm65_vm1 = vcmask 94208   ;;  %v61_v0 = vld [vmem:[#allocation5] sm:$0xff]  ;;  %s5618_s27 = smov 10   ;;  %v71_v4 = vlaneseq }
  0x38   :  { %v62_v1 = vld [vmem:[#allocation5 + $0x8] sm:$0x1f]  ;;  %64 = vst.msk [vmem:[#allocation8] sm:$0xff] %vm63_vm0, %v61_v0  ;;  %s5619_s28 = smov 126   ;;  %vm105_vm3 = vcmask 80896   ;;  %v7523_v6 = vmov 0.0  }
  0x39   :  { %66 = vst.msk [vmem:[#allocation8 + $0x8] sm:$0x1f] %vm65_vm1, %v62_v1  ;;  %v72_v5 = vand.u32 127, %v71_v4  ;;  %v5718_v12 = vshrl.u32 %v71_v4, 7  ;;  %vm114_vm5 = vcmask 1045504   ;;  %vm122_vm6 = vcmask 1042432  }
  0x3a   :  { %v5729_v27 = vld [vmem:[#allocation7 + $0x8] sm:$0x1f]  ;;  %v5731_v28 = vld [vmem:[#allocation7] sm:$0xff]  ;;  %v7524_v33 = vmov 0   ;;  %s5622_s2 = smov 124   ;;  %s5623_s29 = smov 123  }
  0x3b   :  { %vm73_vm2 = vcmp.lt.s32.totalorder %v72_v5, 2  ;;  %vm79_vm4 = vcmp.lt.s32.totalorder %v5718_v12, 2  ;;  %5184 = vset.pattern.permute.xlu0 %v7524_v33  ;;  %5185 = vset.pattern.permute.xlu1 %v7524_v33  ;;  %v5740_v40 = vsub.s32 0, %v5718_v12  ;;  %v5746_v44 = vld [vmem:[#allocation2] sm:$0x1]  ;;  %v5752_v46 = vadd.s32 8, %v5718_v12 }
  0x3c   :  { %v5714_v7 = vsel %vm73_vm2, 1.0, %v7523_v6  ;;  %v5724_v21 = vsel %vm79_vm4, 1.0, %v7523_v6  ;;  %s5624_s30 = smov 1   ;;  %s5625_s5 = smov 127   ;;  %vm67_vm8 = vcmask 0  }
  0x3d   :  { %vm86_vm7 = vcmp.lt.s32.totalorder %v5752_v46, 12  ;;  %s5626_s6 = smov 122   ;;  %s5627_s7 = smov 2  }
  0x3e   :  { %s5628_s8 = smov 121   ;;  %s5629_s9 = smov 3  }
  0x3f   :  { %v87_v2 = vld [vmem:[#allocation8] sm:$0xff]  ;;  %s5630_s10 = smov 125   ;;  %s5632_s11 = smov 120  }
  0x40   :  { %99 = vrot.lane.b32.xlu1 %v87_v2, %s5618_s27  ;;  %93 = vrot.lane.b32.xlu0 %v87_v2, %s5619_s28  ;;  %v88_v3 = vld [vmem:[#allocation8 + $0x8] sm:$0x1f]  ;;  %s5633_s12 = smov 4   ;;  %s5634_s13 = smov 119  }
  0x41   :  { %s5635_s1 = smov 5   ;;  %s5636_s14 = smov 118  }
  0x42   :  { %s5637_s15 = smov 6   ;;  %s5638_s16 = smov [#allocation8]  }
  0x43   :  { %s5128_s17 = sshll.u32 %s5638_s16, 4  ;;  %s5129_s17 = int_to_ptr.vmem [resolvable:$true] %s5128_s17 }
  0x44   :  { %101 = vrot.lane.b32.xlu1 %v88_v3, %s5618_s27  ;;  %95 = vrot.lane.b32.xlu0 %v88_v3, %s5619_s28  ;;  %s5561_s18 = scalar_lea.vmem %s5129_s17, 256  ;;  %p5566_p11 = scmp.lt.s32.totalorder %s5129_s17, %s5129_s17 }
  0x45   :  { %p5562_p10 = scmp.ne.s32.totalorder %s5129_s17, %s5561_s18  ;;  %p5567_p12 = scmp.lt.s32.totalorder %s5561_s18, %s5561_s18 }
  0x47   :  { %p5568_p13 = por %p5567_p12, %p5566_p11 }
  0x49   :  { %p5569_p0 = pnand %p5568_p13, %p5562_p10 }
  0xb2   :  { %v100_v8 = vpop.permute.xlu1 %99  ;;  %v94_v9 = vpop.permute.xlu0 %93 }
  0xb3   :  { %v106_v10 = vsel %vm105_vm3, %v94_v9, %v100_v8 }
  0xb4   :  { %v108_v11 = vmul.f32 %v5714_v7, %v106_v10 }
  0xb6   :  { %v102_v13 = vpop.permute.xlu1 %101  ;;  %v96_v14 = vpop.permute.xlu0 %95  ;;  %v110_v16 = vadd.f32 %v108_v11, %v87_v2 }
  0xb7   :  { %v107_v15 = vsel %vm105_vm3, %v96_v14, %v102_v13 }
  0xb8   :  { %v109_v17 = vmul.f32 %v5714_v7, %v107_v15  ;;  %v115_v19 = vrot.slane %v110_v16, 2  ;;  %v120_v20 = vrot.slane %v110_v16, 5 }
  0xba   :  { %v111_v18 = vadd.f32 %v109_v17, %v88_v3 }
  0xbc   :  { %v116_v22 = vrot.slane %v111_v18, 2 }
  0xbe   :  { %v117_v23 = vsel %vm114_vm5, %v115_v19, %v116_v22  ;;  %v123_v24 = vsel %vm122_vm6, %v116_v22, %v120_v20 }
  0xbf   :  { %v124_v25 = vmul.f32 %v5724_v21, %v117_v23  ;;  %v125_v26 = vmul.f32 0.0, %v123_v24 }
  0xc1   :  { %v127_v29 = vadd.f32 %v125_v26, %v111_v18  ;;  %v126_v30 = vadd.f32 %v124_v25, %v110_v16 }
  0xc3   :  { %v129_v31 = vadd.f32 %v127_v29, %v5729_v27  ;;  %v128_v32 = vadd.f32 %v126_v30, %v5731_v28 }
  0xc5   :  { %134 = vrot.lane.b32.xlu1 %v129_v31, %s5622_s2  ;;  %132 = vrot.lane.b32.xlu0 %v128_v32, %s5622_s2  ;;  %v153_v54 = vrot.slane %v128_v32, 4 }
  0xc7   :  { %v155_v55 = vadd.f32 %v153_v54, %v128_v32 }
  0xc9   :  { %v184_v56 = vrot.slane %v155_v55, %v5740_v40 }
 0x137   :  { %v133_v34 = vpop.permute.xlu0 %132  ;;  %v135_v36 = vpop.permute.xlu1 %134 }
 0x138   :  { %v138_v35 = vadd.f32 %v133_v34, %v128_v32  ;;  %v139_v38 = vadd.f32 %v135_v36, %v129_v31 }
 0x13a   :  { %v141_v37 = vrot.slane %v138_v35, 4  ;;  %v146_v42 = vrot.slane %v139_v38, 4  ;;  %v157_v48 = vsub.f32 0.0, %v139_v38  ;;  %v156_v49 = vsub.f32 0.0, %v138_v35 }
 0x13c   :  { %v143_v39 = vadd.f32 %v141_v37, %v138_v35  ;;  %v5749_v45 = vsub.f32 %v5746_v44, %v146_v42 }
 0x13e   :  { %v5742_v41 = vadd.f32 1.0, %v143_v39  ;;  %7649 = vst [vmem:[#allocation16_spill] sm:$0xff] %v5749_v45  ;;  %v161_v47 = vrot.slane %v5749_v45, %v5740_v40 }
 0x140   :  { %7648 = vst [vmem:[#allocation15_spill] sm:$0xff] %v5742_v41  ;;  %v167_v43 = vrot.slane %v5742_v41, %v5740_v40  ;;  %v163_v51 = vsel %vm86_vm7, %v157_v48, %v161_v47 }
 0x142   :  { %5216 = vrcp.f32 %v167_v43 }
 0x14c   :  { %v5217_v50 = vpop.eup %5216 }
 0x14d   :  { %v170_v52 = vmul.f32 %v5217_v50, %v163_v51  ;;  %v169_v53 = vmul.f32 %v5217_v50, %v156_v49 }
 0x14f   :  { %178 = vperm.xlu0 %5184, %v170_v52  }
 0x1ce   :  { %v179_v57 = vpop.permute.xlu0 %178 }
 0x1cf   :  { %v186_v58 = vmul.f32 %v184_v56, %v179_v57 }
 0x1d1   :  { %v188_v59 = vadd.f32 %v186_v58, %v129_v31 }
 0x1d3   :  { %193 = vrot.lane.b32.xlu1 %v188_v59, %s5623_s29 }
 0x1d7   :  { %173 = vperm.xlu1 %5185, %v169_v53  }
 0x245   :  { %v194_v60 = vpop.permute.xlu1 %193 }
 0x246   :  { %v198_v61 = vadd.f32 %v194_v60, %v188_v59 }
 0x248   :  { %v205_v62 = vrot.slane %v198_v61, 4  ;;  %v227_v14 = vsub.f32 0.0, %v198_v61 }
 0x24a   :  { %206 = vrot.lane.b32.xlu0 %v205_v62, %s5624_s30 }
 0x256   :  { %v174_v63 = vpop.permute.xlu1 %173 }
 0x257   :  { %v185_v0 = vmul.f32 %v184_v56, %v174_v63 }
 0x259   :  { %v187_v1 = vadd.f32 %v185_v0, %v128_v32 }
 0x25b   :  { %191 = vrot.lane.b32.xlu1 %v187_v1, %s5623_s29  ;;  %v223_v22 = vrot.slane %v187_v1, 5 }
 0x25d   :  { %v225_v23 = vadd.f32 %v223_v22, %v187_v1 }
 0x25f   :  { %v258_v24 = vrot.slane %v225_v23, %v5740_v40 }
 0x2bc   :  { %v207_v2 = vpop.permute.xlu0 %206 }
 0x2bd   :  { %v5764_v3 = vsub.f32 %v5746_v44, %v207_v2 }
 0x2bf   :  { %v231_v4 = vrot.slane %v5764_v3, %v5740_v40 }
 0x2c1   :  { %233 = vrot.lane.b32.xlu0 %v231_v4, %s5625_s5 }
 0x2cd   :  { %v192_v5 = vpop.permute.xlu1 %191 }
 0x2ce   :  { %v197_v8 = vadd.f32 %v192_v5, %v187_v1 }
 0x2d0   :  { %v200_v9 = vrot.slane %v197_v8, 5  ;;  %v226_v19 = vsub.f32 0.0, %v197_v8 }
 0x2d2   :  { %v202_v10 = vadd.f32 %v200_v9, %v197_v8 }
 0x2d4   :  { %v5769_v11 = vadd.f32 1.0, %v202_v10 }
 0x2d6   :  { %v241_v13 = vrot.slane %v5769_v11, %v5740_v40 }
 0x2d8   :  { %5218 = vrcp.f32 %v241_v13 }
 0x2e2   :  { %v5219_v16 = vpop.eup %5218 }
 0x2e3   :  { %v243_v20 = vmul.f32 %v5219_v16, %v226_v19 }
 0x333   :  { %v234_v15 = vpop.permute.xlu0 %233 }
 0x334   :  { %v237_v17 = vsel %vm86_vm7, %v227_v14, %v234_v15 }
 0x335   :  { %v244_v18 = vmul.f32 %v5219_v16, %v237_v17 }
 0x337   :  { %252 = vperm.xlu1 %5185, %v244_v18  }
 0x33b   :  { %247 = vperm.xlu1 %5185, %v243_v20  }
 0x3b6   :  { %v253_v25 = vpop.permute.xlu1 %252 }
 0x3b7   :  { %v260_v26 = vmul.f32 %v258_v24, %v253_v25 }
 0x3b9   :  { %v262_v29 = vadd.f32 %v260_v26, %v188_v59 }
 0x3ba   :  { %v248_v30 = vpop.permute.xlu1 %247 }
 0x3bb   :  { %v259_v31 = vmul.f32 %v258_v24, %v248_v30  ;;  %267 = vrot.lane.b32.xlu0 %v262_v29, %s5626_s6 }
 0x3bd   :  { %v261_v32 = vadd.f32 %v259_v31, %v187_v1 }
 0x3bf   :  { %265 = vrot.lane.b32.xlu1 %v261_v32, %s5626_s6  ;;  %v297_v58 = vrot.slane %v261_v32, 6 }
 0x3c1   :  { %v299_v59 = vadd.f32 %v297_v58, %v261_v32 }
 0x3c3   :  { %v332_v60 = vrot.slane %v299_v59, %v5740_v40  ;;  %v5822_v59 = vsub.s32 1, %v5718_v12 }
 0x42d   :  { %v268_v34 = vpop.permute.xlu0 %267 }
 0x42e   :  { %v272_v35 = vadd.f32 %v268_v34, %v262_v29 }
 0x430   :  { %v279_v36 = vrot.slane %v272_v35, 4  ;;  %v301_v51 = vsub.f32 0.0, %v272_v35 }
 0x431   :  { %v266_v42 = vpop.permute.xlu1 %265 }
 0x432   :  { %280 = vrot.lane.b32.xlu0 %v279_v36, %s5627_s7  ;;  %v271_v43 = vadd.f32 %v266_v42, %v261_v32 }
 0x434   :  { %v274_v47 = vrot.slane %v271_v43, 6  ;;  %v300_v56 = vsub.f32 0.0, %v271_v43 }
 0x436   :  { %v276_v48 = vadd.f32 %v274_v47, %v271_v43 }
 0x438   :  { %v5785_v49 = vadd.f32 1.0, %v276_v48 }
 0x43a   :  { %v315_v50 = vrot.slane %v5785_v49, %v5740_v40 }
 0x43c   :  { %5220 = vrcp.f32 %v315_v50  ;;  %v7526_v50 = vmov 1  }
 0x43d   :  { %5187 = vset.pattern.permute.xlu0 %v7526_v50 }
 0x446   :  { %v5221_v53 = vpop.eup %5220 }
 0x447   :  { %v317_v57 = vmul.f32 %v5221_v53, %v300_v56 }
 0x4a4   :  { %v281_v37 = vpop.permute.xlu0 %280 }
 0x4a5   :  { %v5780_v38 = vsub.f32 %v5746_v44, %v281_v37 }
 0x4a7   :  { %v305_v39 = vrot.slane %v5780_v38, %v5740_v40 }
 0x4a9   :  { %307 = vrot.lane.b32.xlu0 %v305_v39, %s5619_s28 }
 0x51b   :  { %v308_v52 = vpop.permute.xlu0 %307 }
 0x51c   :  { %v311_v54 = vsel %vm86_vm7, %v301_v51, %v308_v52 }
 0x51d   :  { %v318_v55 = vmul.f32 %v5221_v53, %v311_v54 }
 0x51f   :  { %326 = vperm.xlu1 %5185, %v318_v55  }
 0x523   :  { %321 = vperm.xlu1 %5185, %v317_v57  }
 0x59e   :  { %v327_v61 = vpop.permute.xlu1 %326 }
 0x59f   :  { %v334_v62 = vmul.f32 %v332_v60, %v327_v61 }
 0x5a1   :  { %v336_v63 = vadd.f32 %v334_v62, %v262_v29 }
 0x5a2   :  { %v322_v0 = vpop.permute.xlu1 %321 }
 0x5a3   :  { %v333_v1 = vmul.f32 %v332_v60, %v322_v0  ;;  %341 = vrot.lane.b32.xlu0 %v336_v63, %s5628_s8 }
 0x5a5   :  { %v335_v2 = vadd.f32 %v333_v1, %v261_v32 }
 0x5a7   :  { %339 = vrot.lane.b32.xlu1 %v335_v2, %s5628_s8  ;;  %v371_v30 = vrot.slane %v335_v2, 7 }
 0x5a9   :  { %v373_v31 = vadd.f32 %v371_v30, %v335_v2 }
 0x5ab   :  { %v406_v32 = vrot.slane %v373_v31, %v5740_v40 }
 0x615   :  { %v342_v4 = vpop.permute.xlu0 %341 }
 0x616   :  { %v346_v5 = vadd.f32 %v342_v4, %v336_v63 }
 0x618   :  { %v353_v8 = vrot.slane %v346_v5, 4  ;;  %v375_v20 = vsub.f32 0.0, %v346_v5 }
 0x619   :  { %v340_v14 = vpop.permute.xlu1 %339 }
 0x61a   :  { %354 = vrot.lane.b32.xlu0 %v353_v8, %s5629_s9  ;;  %v345_v15 = vadd.f32 %v340_v14, %v335_v2 }
 0x61c   :  { %v348_v16 = vrot.slane %v345_v15, 7  ;;  %v374_v26 = vsub.f32 0.0, %v345_v15 }
 0x61e   :  { %v350_v17 = vadd.f32 %v348_v16, %v345_v15 }
 0x620   :  { %v5801_v18 = vadd.f32 1.0, %v350_v17 }
 0x622   :  { %v389_v19 = vrot.slane %v5801_v18, %v5740_v40 }
 0x624   :  { %5222 = vrcp.f32 %v389_v19 }
 0x62e   :  { %v5223_v23 = vpop.eup %5222 }
 0x62f   :  { %v391_v29 = vmul.f32 %v5223_v23, %v374_v26 }
 0x68c   :  { %v355_v9 = vpop.permute.xlu0 %354 }
 0x68d   :  { %v5796_v10 = vsub.f32 %v5746_v44, %v355_v9 }
 0x68f   :  { %v379_v13 = vrot.slane %v5796_v10, %v5740_v40 }
 0x691   :  { %381 = vrot.lane.b32.xlu0 %v379_v13, %s5630_s10 }
 0x703   :  { %v382_v22 = vpop.permute.xlu0 %381 }
 0x704   :  { %v385_v24 = vsel %vm86_vm7, %v375_v20, %v382_v22 }
 0x705   :  { %v392_v25 = vmul.f32 %v5223_v23, %v385_v24 }
 0x707   :  { %400 = vperm.xlu1 %5185, %v392_v25  }
 0x70b   :  { %395 = vperm.xlu1 %5185, %v391_v29  }
 0x70f   :  { %5186 = vset.pattern.permute.xlu1 %v7526_v50 }
 0x786   :  { %v401_v34 = vpop.permute.xlu1 %400 }
 0x787   :  { %v408_v35 = vmul.f32 %v406_v32, %v401_v34 }
 0x789   :  { %v410_v36 = vadd.f32 %v408_v35, %v336_v63 }
 0x78a   :  { %v396_v37 = vpop.permute.xlu1 %395 }
 0x78b   :  { %v407_v39 = vmul.f32 %v406_v32, %v396_v37  ;;  %415 = vrot.lane.b32.xlu0 %v410_v36, %s5628_s8  ;;  %v448_v5 = vrot.slane %v410_v36, 7 }
 0x78d   :  { %v409_v42 = vadd.f32 %v407_v39, %v335_v2 }
 0x78f   :  { %413 = vrot.lane.b32.xlu1 %v409_v42, %s5628_s8  ;;  %v450_v8 = vadd.f32 %v448_v5, %v409_v42 }
 0x791   :  { %v483_v12 = vrot.slane %v450_v8, %v5822_v59 }
 0x7fd   :  { %v416_v43 = vpop.permute.xlu0 %415 }
 0x7fe   :  { %v420_v47 = vadd.f32 %v416_v43, %v410_v36 }
 0x800   :  { %v426_v48 = vrot.slane %v420_v47, 4  ;;  %v422_v56 = vrot.slane %v420_v47, 7  ;;  %v452_v61 = vsub.f32 0.0, %v420_v47 }
 0x801   :  { %v414_v54 = vpop.permute.xlu1 %413 }
 0x802   :  { %427 = vrot.lane.b32.xlu0 %v426_v48, %s5629_s9  ;;  %v419_v55 = vadd.f32 %v414_v54, %v409_v42 }
 0x804   :  { %v424_v57 = vadd.f32 %v422_v56, %v419_v55  ;;  %v451_v2 = vsub.f32 0.0, %v419_v55 }
 0x806   :  { %v5819_v58 = vadd.f32 1.0, %v424_v57 }
 0x808   :  { %v466_v60 = vrot.slane %v5819_v58, %v5822_v59 }
 0x80a   :  { %5224 = vrcp.f32 %v466_v60 }
 0x814   :  { %v5225_v63 = vpop.eup %5224 }
 0x815   :  { %v468_v4 = vmul.f32 %v5225_v63, %v451_v2 }
 0x874   :  { %v428_v51 = vpop.permute.xlu0 %427 }
 0x875   :  { %v5814_v52 = vsub.f32 %v5746_v44, %v428_v51 }
 0x877   :  { %v456_v53 = vrot.slane %v5814_v52, %v5740_v40 }
 0x879   :  { %458 = vrot.lane.b32.xlu0 %v456_v53, %s5630_s10 }
 0x8eb   :  { %v459_v62 = vpop.permute.xlu0 %458 }
 0x8ec   :  { %v462_v0 = vsel %vm86_vm7, %v452_v61, %v459_v62 }
 0x8ed   :  { %v469_v1 = vmul.f32 %v5225_v63, %v462_v0 }
 0x8ef   :  { %477 = vperm.xlu1 %5186, %v469_v1  }
 0x8f3   :  { %472 = vperm.xlu1 %5186, %v468_v4  }
 0x96e   :  { %v478_v9 = vpop.permute.xlu1 %477 }
 0x96f   :  { %v485_v13 = vmul.f32 %v483_v12, %v478_v9 }
 0x971   :  { %v487_v14 = vadd.f32 %v485_v13, %v410_v36 }
 0x972   :  { %v473_v15 = vpop.permute.xlu1 %472 }
 0x973   :  { %v484_v16 = vmul.f32 %v483_v12, %v473_v15  ;;  %492 = vrot.lane.b32.xlu0 %v487_v14, %s5632_s11 }
 0x975   :  { %v486_v17 = vadd.f32 %v484_v16, %v409_v42 }
 0x977   :  { %490 = vrot.lane.b32.xlu1 %v486_v17, %s5632_s11  ;;  %v523_v47 = vadd.f32 %v487_v14, %v486_v17 }
 0x979   :  { %v556_v48 = vrot.slane %v523_v47, %v5822_v59 }
 0x9e5   :  { %v493_v19 = vpop.permute.xlu0 %492 }
 0x9e6   :  { %v497_v20 = vadd.f32 %v493_v19, %v487_v14 }
 0x9e8   :  { %v501_v22 = vrot.slane %v497_v20, 4  ;;  %v525_v34 = vsub.f32 0.0, %v497_v20 }
 0x9e9   :  { %v491_v26 = vpop.permute.xlu1 %490 }
 0x9ea   :  { %502 = vrot.lane.b32.xlu0 %v501_v22, %s5633_s12  ;;  %v496_v29 = vadd.f32 %v491_v26, %v486_v17 }
 0x9ec   :  { %v498_v30 = vadd.f32 %v497_v20, %v496_v29  ;;  %v524_v42 = vsub.f32 0.0, %v496_v29 }
 0x9ee   :  { %v5838_v31 = vadd.f32 1.0, %v498_v30 }
 0x9f0   :  { %v539_v32 = vrot.slane %v5838_v31, %v5822_v59 }
 0x9f2   :  { %5226 = vrcp.f32 %v539_v32 }
 0x9fc   :  { %v5227_v36 = vpop.eup %5226 }
 0x9fd   :  { %v541_v43 = vmul.f32 %v5227_v36, %v524_v42 }
 0xa5c   :  { %v503_v23 = vpop.permute.xlu0 %502 }
 0xa5d   :  { %v5833_v24 = vsub.f32 %v5746_v44, %v503_v23 }
 0xa5f   :  { %v529_v25 = vrot.slane %v5833_v24, %v5740_v40 }
 0xa61   :  { %531 = vrot.lane.b32.xlu0 %v529_v25, %s5622_s2 }
 0xad3   :  { %v532_v35 = vpop.permute.xlu0 %531 }
 0xad4   :  { %v535_v37 = vsel %vm86_vm7, %v525_v34, %v532_v35 }
 0xad5   :  { %v542_v39 = vmul.f32 %v5227_v36, %v535_v37 }
 0xad7   :  { %550 = vperm.xlu1 %5186, %v542_v39  }
 0xadb   :  { %545 = vperm.xlu1 %5186, %v541_v43  }
 0xb56   :  { %v551_v51 = vpop.permute.xlu1 %550 }
 0xb57   :  { %v558_v53 = vmul.f32 %v556_v48, %v551_v51 }
 0xb59   :  { %v560_v54 = vadd.f32 %v558_v53, %v487_v14 }
 0xb5a   :  { %v546_v55 = vpop.permute.xlu1 %545 }
 0xb5b   :  { %v557_v56 = vmul.f32 %v556_v48, %v546_v55  ;;  %565 = vrot.lane.b32.xlu0 %v560_v54, %s5634_s13  ;;  %v598_v22 = vrot.slane %v560_v54, 1 }
 0xb5d   :  { %v559_v57 = vadd.f32 %v557_v56, %v486_v17 }
 0xb5f   :  { %563 = vrot.lane.b32.xlu1 %v559_v57, %s5634_s13  ;;  %v600_v23 = vadd.f32 %v598_v22, %v559_v57 }
 0xb61   :  { %v633_v25 = vrot.slane %v600_v23, %v5822_v59 }
 0xbcd   :  { %v566_v60 = vpop.permute.xlu0 %565 }
 0xbce   :  { %v570_v61 = vadd.f32 %v566_v60, %v560_v54 }
 0xbd0   :  { %v576_v62 = vrot.slane %v570_v61, 4  ;;  %v572_v5 = vrot.slane %v570_v61, 1  ;;  %v602_v13 = vsub.f32 0.0, %v570_v61 }
 0xbd1   :  { %v564_v2 = vpop.permute.xlu1 %563 }
 0xbd2   :  { %577 = vrot.lane.b32.xlu0 %v576_v62, %s5635_s1  ;;  %v569_v4 = vadd.f32 %v564_v2, %v559_v57 }
 0xbd4   :  { %v574_v8 = vadd.f32 %v572_v5, %v569_v4  ;;  %v601_v19 = vsub.f32 0.0, %v569_v4 }
 0xbd6   :  { %v5854_v12 = vadd.f32 1.0, %v574_v8 }
 0xbd8   :  { %v616_v9 = vrot.slane %v5854_v12, %v5822_v59 }
 0xbda   :  { %5228 = vrcp.f32 %v616_v9 }
 0xbe4   :  { %v5229_v15 = vpop.eup %5228 }
 0xbe5   :  { %v618_v20 = vmul.f32 %v5229_v15, %v601_v19 }
 0xc44   :  { %v578_v63 = vpop.permute.xlu0 %577 }
 0xc45   :  { %v5849_v0 = vsub.f32 %v5746_v44, %v578_v63 }
 0xc47   :  { %v606_v1 = vrot.slane %v5849_v0, %v5740_v40 }
 0xc49   :  { %608 = vrot.lane.b32.xlu0 %v606_v1, %s5623_s29 }
 0xcbb   :  { %v609_v14 = vpop.permute.xlu0 %608 }
 0xcbc   :  { %v612_v16 = vsel %vm86_vm7, %v602_v13, %v609_v14 }
 0xcbd   :  { %v619_v17 = vmul.f32 %v5229_v15, %v612_v16 }
 0xcbf   :  { %627 = vperm.xlu1 %5186, %v619_v17  }
 0xcc3   :  { %622 = vperm.xlu1 %5186, %v618_v20  }
 0xd3e   :  { %v628_v26 = vpop.permute.xlu1 %627 }
 0xd3f   :  { %v635_v29 = vmul.f32 %v633_v25, %v628_v26 }
 0xd41   :  { %v637_v30 = vadd.f32 %v635_v29, %v560_v54 }
 0xd42   :  { %v623_v32 = vpop.permute.xlu1 %622 }
 0xd43   :  { %v634_v34 = vmul.f32 %v633_v25, %v623_v32  ;;  %642 = vrot.lane.b32.xlu0 %v637_v30, %s5636_s14  ;;  %v675_v62 = vrot.slane %v637_v30, 2 }
 0xd45   :  { %v636_v35 = vadd.f32 %v634_v34, %v559_v57 }
 0xd47   :  { %640 = vrot.lane.b32.xlu1 %v636_v35, %s5636_s14  ;;  %v677_v63 = vadd.f32 %v675_v62, %v636_v35 }
 0xd49   :  { %v710_v1 = vrot.slane %v677_v63, %v5822_v59 }
 0xdb5   :  { %v643_v36 = vpop.permute.xlu0 %642 }
 0xdb6   :  { %v647_v37 = vadd.f32 %v643_v36, %v637_v30 }
 0xdb8   :  { %v653_v39 = vrot.slane %v647_v37, 4  ;;  %v649_v43 = vrot.slane %v647_v37, 2  ;;  %v679_v8 = vsub.f32 0.0, %v647_v37 }
 0xdb9   :  { %v641_v42 = vpop.permute.xlu1 %640 }
 0xdba   :  { %v646_v47 = vadd.f32 %v641_v42, %v636_v35  ;;  %654 = vrot.lane.b32.xlu0 %v653_v39, %s5637_s15 }
 0xdbc   :  { %v651_v48 = vadd.f32 %v649_v43, %v646_v47  ;;  %v678_v54 = vsub.f32 0.0, %v646_v47 }
 0xdbe   :  { %v5864_v51 = vadd.f32 1.0, %v651_v48 }
 0xdc0   :  { %v693_v53 = vrot.slane %v5864_v51, %v5822_v59 }
 0xdc2   :  { %5230 = vrcp.f32 %v693_v53 }
 0xdcc   :  { %v5231_v55 = vpop.eup %5230 }
 0xdcd   :  { %v695_v56 = vmul.f32 %v5231_v55, %v678_v54 }
 0xdcf   :  { %699 = vperm.xlu1 %5186, %v695_v56  }
 0xdd3   :  { %5189 = vset.pattern.permute.xlu1 %v7524_v33 }
 0xe2c   :  { %v655_v57 = vpop.permute.xlu0 %654 }
 0xe2d   :  { %v5870_v60 = vsub.f32 %v5746_v44, %v655_v57 }
 0xe2f   :  { %v683_v61 = vrot.slane %v5870_v60, %v5740_v40 }
 0xe31   :  { %685 = vrot.lane.b32.xlu0 %v683_v61, %s5626_s6 }
 0xe4e   :  { %v700_v2 = vpop.permute.xlu1 %699 }
 0xe4f   :  { %v711_v4 = vmul.f32 %v710_v1, %v700_v2 }
 0xe51   :  { %v713_v5 = vadd.f32 %v711_v4, %v636_v35 }
 0xe53   :  { %724 = vrot.lane.b32.xlu1 %v713_v5, %s5619_s28 }
 0xea3   :  { %v686_v9 = vpop.permute.xlu0 %685 }
 0xea4   :  { %v689_v44 = vsel %vm86_vm7, %v679_v8, %v686_v9 }
 0xea5   :  { %v696_v13 = vmul.f32 %v5231_v55, %v689_v44 }
 0xea7   :  { %704 = vperm.xlu0 %5187, %v696_v13  }
 0xeab   :  { %730 = vrot.lane.b32.xlu0 %v713_v5, %s5618_s27 }
 0xeac   :  { %5188 = vset.pattern.permute.xlu0 %v7524_v33 }
 0xec5   :  { %v725_v17 = vpop.permute.xlu1 %724 }
 0xf26   :  { %v705_v14 = vpop.permute.xlu0 %704 }
 0xf27   :  { %v712_v15 = vmul.f32 %v710_v1, %v705_v14 }
 0xf29   :  { %v714_v16 = vadd.f32 %v712_v15, %v637_v30 }
 0xf2a   :  { %v731_v19 = vpop.permute.xlu0 %730 }
 0xf2b   :  { %726 = vrot.lane.b32.xlu1 %v714_v16, %s5619_s28  ;;  %v736_v20 = vsel %vm105_vm3, %v725_v17, %v731_v19 }
 0xf2c   :  { %v738_v23 = vmul.f32 %v5714_v7, %v736_v20 }
 0xf2e   :  { %v740_v29 = vadd.f32 %v738_v23, %v713_v5  ;;  %v5898_v5 = vld [vmem:[#allocation2 + $0x1] sm:$0x1] }
 0xf2f   :  { %732 = vrot.lane.b32.xlu1 %v714_v16, %s5618_s27 }
 0xf30   :  { %v744_v35 = vrot.slane %v740_v29, 2  ;;  %v749_v30 = vrot.slane %v740_v29, 5 }
 0xf9d   :  { %v727_v22 = vpop.permute.xlu1 %726 }
 0xfa1   :  { %v733_v25 = vpop.permute.xlu1 %732 }
 0xfa2   :  { %v737_v26 = vsel %vm105_vm3, %v727_v22, %v733_v25 }
 0xfa3   :  { %v739_v32 = vmul.f32 %v5714_v7, %v737_v26 }
 0xfa5   :  { %v741_v34 = vadd.f32 %v739_v32, %v714_v16 }
 0xfa7   :  { %v745_v36 = vrot.slane %v741_v34, 2 }
 0xfa9   :  { %v746_v37 = vsel %vm114_vm5, %v744_v35, %v745_v36  ;;  %v751_v39 = vsel %vm122_vm6, %v745_v36, %v749_v30 }
 0xfaa   :  { %v752_v42 = vmul.f32 %v5724_v21, %v746_v37  ;;  %v753_v43 = vmul.f32 0.0, %v751_v39 }
 0xfac   :  { %v755_v47 = vadd.f32 %v753_v43, %v741_v34  ;;  %v754_v48 = vadd.f32 %v752_v42, %v740_v29 }
 0xfae   :  { %v757_v53 = vadd.f32 %v755_v47, %v5729_v27  ;;  %v756_v54 = vadd.f32 %v754_v48, %v5731_v28 }
 0xfb0   :  { %762 = vrot.lane.b32.xlu1 %v757_v53, %s5622_s2  ;;  %760 = vrot.lane.b32.xlu0 %v756_v54, %s5622_s2  ;;  %v781_v16 = vrot.slane %v756_v54, 4 }
 0xfb2   :  { %v783_v17 = vadd.f32 %v781_v16, %v756_v54 }
 0xfb4   :  { %v812_v19 = vrot.slane %v783_v17, %v5740_v40 }
0x1022   :  { %v761_v55 = vpop.permute.xlu0 %760  ;;  %v763_v57 = vpop.permute.xlu1 %762 }
0x1023   :  { %v766_v56 = vadd.f32 %v761_v55, %v756_v54  ;;  %v767_v62 = vadd.f32 %v763_v57, %v757_v53 }
0x1025   :  { %v769_v61 = vrot.slane %v766_v56, 4  ;;  %v774_v2 = vrot.slane %v767_v62, 4  ;;  %v785_v8 = vsub.f32 0.0, %v767_v62  ;;  %v784_v9 = vsub.f32 0.0, %v766_v56 }
0x1027   :  { %v771_v63 = vadd.f32 %v769_v61, %v766_v56  ;;  %v5901_v27 = vsub.f32 %v5898_v5, %v774_v2 }
0x1029   :  { %v5894_v1 = vadd.f32 1.0, %v771_v63  ;;  %7651 = vst [vmem:[#allocation18_spill] sm:$0xff] %v5901_v27  ;;  %v789_v28 = vrot.slane %v5901_v27, %v5740_v40 }
0x102b   :  { %7650 = vst [vmem:[#allocation17_spill] sm:$0xff] %v5894_v1  ;;  %v795_v4 = vrot.slane %v5894_v1, %v5740_v40  ;;  %v791_v13 = vsel %vm86_vm7, %v785_v8, %v789_v28 }
0x102d   :  { %5232 = vrcp.f32 %v795_v4 }
0x1037   :  { %v5233_v44 = vpop.eup %5232 }
0x1038   :  { %v798_v14 = vmul.f32 %v5233_v44, %v791_v13  ;;  %v797_v15 = vmul.f32 %v5233_v44, %v784_v9 }
0x103a   :  { %806 = vperm.xlu0 %5188, %v798_v14  }
0x103e   :  { %5191 = vset.pattern.permute.xlu0 %v7526_v50 }
0x10b9   :  { %v807_v20 = vpop.permute.xlu0 %806 }
0x10ba   :  { %v814_v22 = vmul.f32 %v812_v19, %v807_v20 }
0x10bc   :  { %v816_v23 = vadd.f32 %v814_v22, %v757_v53 }
0x10be   :  { %821 = vrot.lane.b32.xlu1 %v816_v23, %s5623_s29 }
0x10c2   :  { %801 = vperm.xlu1 %5189, %v797_v15  }
0x1130   :  { %v822_v25 = vpop.permute.xlu1 %821 }
0x1131   :  { %v826_v26 = vadd.f32 %v822_v25, %v816_v23 }
0x1133   :  { %v833_v29 = vrot.slane %v826_v26, 4 }
0x1135   :  { %834 = vrot.lane.b32.xlu0 %v833_v29, %s5624_s30 }
0x1141   :  { %v802_v32 = vpop.permute.xlu1 %801 }
0x1142   :  { %v813_v34 = vmul.f32 %v812_v19, %v802_v32 }
0x1144   :  { %v815_v35 = vadd.f32 %v813_v34, %v756_v54  ;;  %v855_v54 = vsub.f32 0.0, %v826_v26 }
0x1146   :  { %819 = vrot.lane.b32.xlu1 %v815_v35, %s5623_s29  ;;  %v851_v2 = vrot.slane %v815_v35, 5 }
0x1148   :  { %v853_v4 = vadd.f32 %v851_v2, %v815_v35 }
0x114a   :  { %v886_v28 = vrot.slane %v853_v4, %v5740_v40 }
0x11a7   :  { %v835_v30 = vpop.permute.xlu0 %834 }
0x11a8   :  { %v5913_v36 = vsub.f32 %v5898_v5, %v835_v30 }
0x11aa   :  { %v859_v37 = vrot.slane %v5913_v36, %v5740_v40 }
0x11ac   :  { %861 = vrot.lane.b32.xlu0 %v859_v37, %s5625_s5 }
0x11b8   :  { %v820_v39 = vpop.permute.xlu1 %819 }
0x11b9   :  { %v825_v42 = vadd.f32 %v820_v39, %v815_v35 }
0x11bb   :  { %v828_v43 = vrot.slane %v825_v42, 5  ;;  %v854_v62 = vsub.f32 0.0, %v825_v42 }
0x11bd   :  { %v830_v47 = vadd.f32 %v828_v43, %v825_v42 }
0x11bf   :  { %v5918_v48 = vadd.f32 1.0, %v830_v47 }
0x11c1   :  { %v869_v53 = vrot.slane %v5918_v48, %v5740_v40 }
0x11c3   :  { %5234 = vrcp.f32 %v869_v53 }
0x11cd   :  { %v5235_v56 = vpop.eup %5234 }
0x11ce   :  { %v871_v63 = vmul.f32 %v5235_v56, %v854_v62 }
0x121e   :  { %v862_v55 = vpop.permute.xlu0 %861 }
0x121f   :  { %v865_v57 = vsel %vm86_vm7, %v855_v54, %v862_v55 }
0x1220   :  { %v872_v61 = vmul.f32 %v5235_v56, %v865_v57 }
0x1222   :  { %880 = vperm.xlu1 %5189, %v872_v61  }
0x1226   :  { %875 = vperm.xlu1 %5189, %v871_v63  }
0x12a1   :  { %v881_v8 = vpop.permute.xlu1 %880 }
0x12a2   :  { %v888_v9 = vmul.f32 %v886_v28, %v881_v8 }
0x12a4   :  { %v890_v44 = vadd.f32 %v888_v9, %v816_v23 }
0x12a5   :  { %v876_v13 = vpop.permute.xlu1 %875 }
0x12a6   :  { %v887_v14 = vmul.f32 %v886_v28, %v876_v13  ;;  %895 = vrot.lane.b32.xlu0 %v890_v44, %s5626_s6 }
0x12a8   :  { %v889_v15 = vadd.f32 %v887_v14, %v815_v35 }
0x12aa   :  { %893 = vrot.lane.b32.xlu1 %v889_v15, %s5626_s6  ;;  %v925_v54 = vrot.slane %v889_v15, 6 }
0x12ac   :  { %v927_v55 = vadd.f32 %v925_v54, %v889_v15 }
0x12ae   :  { %v960_v56 = vrot.slane %v927_v55, %v5740_v40 }
0x1318   :  { %v896_v16 = vpop.permute.xlu0 %895 }
0x1319   :  { %v900_v17 = vadd.f32 %v896_v16, %v890_v44 }
0x131b   :  { %v907_v19 = vrot.slane %v900_v17, 4  ;;  %v929_v30 = vsub.f32 0.0, %v900_v17 }
0x131c   :  { %v894_v23 = vpop.permute.xlu1 %893 }
0x131d   :  { %908 = vrot.lane.b32.xlu0 %v907_v19, %s5627_s7  ;;  %v899_v26 = vadd.f32 %v894_v23, %v889_v15 }
0x131f   :  { %v902_v29 = vrot.slane %v899_v26, 6  ;;  %v928_v47 = vsub.f32 0.0, %v899_v26 }
0x1321   :  { %v904_v32 = vadd.f32 %v902_v29, %v899_v26 }
0x1323   :  { %v5934_v34 = vadd.f32 1.0, %v904_v32 }
0x1325   :  { %v943_v35 = vrot.slane %v5934_v34, %v5740_v40 }
0x1327   :  { %5236 = vrcp.f32 %v943_v35 }
0x1331   :  { %v5237_v39 = vpop.eup %5236 }
0x1332   :  { %v945_v53 = vmul.f32 %v5237_v39, %v928_v47 }
0x138f   :  { %v909_v20 = vpop.permute.xlu0 %908 }
0x1390   :  { %v5929_v22 = vsub.f32 %v5898_v5, %v909_v20 }
0x1392   :  { %v933_v25 = vrot.slane %v5929_v22, %v5740_v40 }
0x1394   :  { %935 = vrot.lane.b32.xlu0 %v933_v25, %s5619_s28 }
0x1406   :  { %v936_v37 = vpop.permute.xlu0 %935 }
0x1407   :  { %v939_v42 = vsel %vm86_vm7, %v929_v30, %v936_v37 }
0x1408   :  { %v946_v43 = vmul.f32 %v5237_v39, %v939_v42 }
0x140a   :  { %954 = vperm.xlu1 %5189, %v946_v43  }
0x140e   :  { %949 = vperm.xlu1 %5189, %v945_v53  }
0x1489   :  { %v955_v57 = vpop.permute.xlu1 %954 }
0x148a   :  { %v962_v61 = vmul.f32 %v960_v56, %v955_v57 }
0x148c   :  { %v964_v62 = vadd.f32 %v962_v61, %v890_v44 }
0x148d   :  { %v950_v63 = vpop.permute.xlu1 %949 }
0x148e   :  { %v961_v2 = vmul.f32 %v960_v56, %v950_v63  ;;  %969 = vrot.lane.b32.xlu0 %v964_v62, %s5628_s8 }
0x1490   :  { %v963_v4 = vadd.f32 %v961_v2, %v889_v15 }
0x1492   :  { %967 = vrot.lane.b32.xlu1 %v963_v4, %s5628_s8  ;;  %v999_v39 = vrot.slane %v963_v4, 7 }
0x1494   :  { %v1001_v42 = vadd.f32 %v999_v39, %v963_v4 }
0x1496   :  { %v1034_v43 = vrot.slane %v1001_v42, %v5740_v40 }
0x1500   :  { %v970_v28 = vpop.permute.xlu0 %969 }
0x1501   :  { %v974_v8 = vadd.f32 %v970_v28, %v964_v62 }
0x1503   :  { %v981_v9 = vrot.slane %v974_v8, 4  ;;  %v1003_v23 = vsub.f32 0.0, %v974_v8 }
0x1504   :  { %v968_v44 = vpop.permute.xlu1 %967 }
0x1505   :  { %982 = vrot.lane.b32.xlu0 %v981_v9, %s5629_s9  ;;  %v973_v17 = vadd.f32 %v968_v44, %v963_v4 }
0x1507   :  { %v976_v19 = vrot.slane %v973_v17, 7  ;;  %v1002_v30 = vsub.f32 0.0, %v973_v17 }
0x1509   :  { %v978_v15 = vadd.f32 %v976_v19, %v973_v17 }
0x150b   :  { %v5950_v20 = vadd.f32 1.0, %v978_v15 }
0x150d   :  { %v1017_v25 = vrot.slane %v5950_v20, %v5740_v40 }
0x150f   :  { %5238 = vrcp.f32 %v1017_v25 }
0x1519   :  { %v5239_v29 = vpop.eup %5238 }
0x151a   :  { %v1019_v37 = vmul.f32 %v5239_v29, %v1002_v30 }
0x1577   :  { %v983_v13 = vpop.permute.xlu0 %982 }
0x1578   :  { %v5945_v14 = vsub.f32 %v5898_v5, %v983_v13 }
0x157a   :  { %v1007_v16 = vrot.slane %v5945_v14, %v5740_v40 }
0x157c   :  { %1009 = vrot.lane.b32.xlu0 %v1007_v16, %s5630_s10 }
0x15ee   :  { %v1010_v26 = vpop.permute.xlu0 %1009 }
0x15ef   :  { %v1013_v32 = vsel %vm86_vm7, %v1003_v23, %v1010_v26 }
0x15f0   :  { %v1020_v35 = vmul.f32 %v5239_v29, %v1013_v32 }
0x15f2   :  { %1028 = vperm.xlu1 %5189, %v1020_v35  }
0x15f6   :  { %1023 = vperm.xlu1 %5189, %v1019_v37  }
0x15fa   :  { %5190 = vset.pattern.permute.xlu1 %v7526_v50 }
0x1671   :  { %v1029_v47 = vpop.permute.xlu1 %1028 }
0x1672   :  { %v1036_v53 = vmul.f32 %v1034_v43, %v1029_v47 }
0x1674   :  { %v1038_v54 = vadd.f32 %v1036_v53, %v964_v62 }
0x1675   :  { %v1024_v55 = vpop.permute.xlu1 %1023 }
0x1676   :  { %v1035_v56 = vmul.f32 %v1034_v43, %v1024_v55  ;;  %1043 = vrot.lane.b32.xlu0 %v1038_v54, %s5628_s8  ;;  %v1076_v35 = vrot.slane %v1038_v54, 7 }
0x1678   :  { %v1037_v57 = vadd.f32 %v1035_v56, %v963_v4 }
0x167a   :  { %1041 = vrot.lane.b32.xlu1 %v1037_v57, %s5628_s8  ;;  %v1078_v30 = vadd.f32 %v1076_v35, %v1037_v57 }
0x167c   :  { %v1111_v37 = vrot.slane %v1078_v30, %v5822_v59 }
0x16e8   :  { %v1044_v61 = vpop.permute.xlu0 %1043 }
0x16e9   :  { %v1048_v63 = vadd.f32 %v1044_v61, %v1038_v54 }
0x16eb   :  { %v1054_v2 = vrot.slane %v1048_v63, 4  ;;  %v1050_v16 = vrot.slane %v1048_v63, 7  ;;  %v1080_v19 = vsub.f32 0.0, %v1048_v63 }
0x16ec   :  { %v1042_v62 = vpop.permute.xlu1 %1041 }
0x16ed   :  { %1055 = vrot.lane.b32.xlu0 %v1054_v2, %s5629_s9  ;;  %v1047_v13 = vadd.f32 %v1042_v62, %v1037_v57 }
0x16ef   :  { %v1052_v4 = vadd.f32 %v1050_v16, %v1047_v13  ;;  %v1079_v29 = vsub.f32 0.0, %v1047_v13 }
0x16f1   :  { %v5967_v44 = vadd.f32 1.0, %v1052_v4 }
0x16f3   :  { %v1094_v17 = vrot.slane %v5967_v44, %v5822_v59 }
0x16f5   :  { %5240 = vrcp.f32 %v1094_v17 }
0x16ff   :  { %v5241_v25 = vpop.eup %5240 }
0x1700   :  { %v1096_v32 = vmul.f32 %v5241_v25, %v1079_v29 }
0x175f   :  { %v1056_v28 = vpop.permute.xlu0 %1055 }
0x1760   :  { %v5962_v8 = vsub.f32 %v5898_v5, %v1056_v28 }
0x1762   :  { %v1084_v9 = vrot.slane %v5962_v8, %v5740_v40 }
0x1764   :  { %1086 = vrot.lane.b32.xlu0 %v1084_v9, %s5630_s10 }
0x17d6   :  { %v1087_v15 = vpop.permute.xlu0 %1086 }
0x17d7   :  { %v1090_v23 = vsel %vm86_vm7, %v1080_v19, %v1087_v15 }
0x17d8   :  { %v1097_v26 = vmul.f32 %v5241_v25, %v1090_v23 }
0x17da   :  { %1105 = vperm.xlu1 %5190, %v1097_v26  }
0x17de   :  { %1100 = vperm.xlu1 %5190, %v1096_v32  }
0x1859   :  { %v1106_v39 = vpop.permute.xlu1 %1105 }
0x185a   :  { %v1113_v42 = vmul.f32 %v1111_v37, %v1106_v39 }
0x185c   :  { %v1115_v43 = vadd.f32 %v1113_v42, %v1038_v54 }
0x185d   :  { %v1101_v47 = vpop.permute.xlu1 %1100 }
0x185e   :  { %v1112_v53 = vmul.f32 %v1111_v37, %v1101_v47  ;;  %1120 = vrot.lane.b32.xlu0 %v1115_v43, %s5632_s11 }
0x1860   :  { %v1114_v55 = vadd.f32 %v1112_v53, %v1037_v57 }
0x1862   :  { %1118 = vrot.lane.b32.xlu1 %v1114_v55, %s5632_s11  ;;  %v1151_v29 = vadd.f32 %v1115_v43, %v1114_v55 }
0x1864   :  { %v1184_v32 = vrot.slane %v1151_v29, %v5822_v59 }
0x18d0   :  { %v1121_v56 = vpop.permute.xlu0 %1120 }
0x18d1   :  { %v1125_v61 = vadd.f32 %v1121_v56, %v1115_v43 }
0x18d3   :  { %v1129_v63 = vrot.slane %v1125_v61, 4  ;;  %v1153_v4 = vsub.f32 0.0, %v1125_v61 }
0x18d4   :  { %v1119_v54 = vpop.permute.xlu1 %1118 }
0x18d5   :  { %1130 = vrot.lane.b32.xlu0 %v1129_v63, %s5633_s12  ;;  %v1124_v62 = vadd.f32 %v1119_v54, %v1114_v55 }
0x18d7   :  { %v1126_v13 = vadd.f32 %v1125_v61, %v1124_v62  ;;  %v1152_v23 = vsub.f32 0.0, %v1124_v62 }
0x18d9   :  { %v5983_v57 = vadd.f32 1.0, %v1126_v13 }
0x18db   :  { %v1167_v16 = vrot.slane %v5983_v57, %v5822_v59 }
0x18dd   :  { %5242 = vrcp.f32 %v1167_v16 }
0x18e7   :  { %v5243_v19 = vpop.eup %5242 }
0x18e8   :  { %v1169_v26 = vmul.f32 %v5243_v19, %v1152_v23 }
0x1947   :  { %v1131_v2 = vpop.permute.xlu0 %1130 }
0x1948   :  { %v5978_v28 = vsub.f32 %v5898_v5, %v1131_v2 }
0x194a   :  { %v1157_v9 = vrot.slane %v5978_v28, %v5740_v40 }
0x194c   :  { %1159 = vrot.lane.b32.xlu0 %v1157_v9, %s5622_s2 }
0x19be   :  { %v1160_v17 = vpop.permute.xlu0 %1159 }
0x19bf   :  { %v1163_v15 = vsel %vm86_vm7, %v1153_v4, %v1160_v17 }
0x19c0   :  { %v1170_v25 = vmul.f32 %v5243_v19, %v1163_v15 }
0x19c2   :  { %1178 = vperm.xlu1 %5190, %v1170_v25  }
0x19c6   :  { %1173 = vperm.xlu1 %5190, %v1169_v26  }
0x1a41   :  { %v1179_v35 = vpop.permute.xlu1 %1178 }
0x1a42   :  { %v1186_v30 = vmul.f32 %v1184_v32, %v1179_v35 }
0x1a44   :  { %v1188_v37 = vadd.f32 %v1186_v30, %v1115_v43 }
0x1a45   :  { %v1174_v39 = vpop.permute.xlu1 %1173 }
0x1a46   :  { %v1185_v42 = vmul.f32 %v1184_v32, %v1174_v39  ;;  %1193 = vrot.lane.b32.xlu0 %v1188_v37, %s5634_s13  ;;  %v1226_v29 = vrot.slane %v1188_v37, 1 }
0x1a48   :  { %v1187_v47 = vadd.f32 %v1185_v42, %v1114_v55 }
0x1a4a   :  { %1191 = vrot.lane.b32.xlu1 %v1187_v47, %s5634_s13  ;;  %v1228_v32 = vadd.f32 %v1226_v29, %v1187_v47 }
0x1a4c   :  { %v1261_v35 = vrot.slane %v1228_v32, %v5822_v59 }
0x1ab8   :  { %v1194_v53 = vpop.permute.xlu0 %1193 }
0x1ab9   :  { %v1198_v56 = vadd.f32 %v1194_v53, %v1188_v37 }
0x1abb   :  { %v1204_v61 = vrot.slane %v1198_v56, 4  ;;  %v1200_v62 = vrot.slane %v1198_v56, 1  ;;  %v1230_v4 = vsub.f32 0.0, %v1198_v56 }
0x1abc   :  { %v1192_v43 = vpop.permute.xlu1 %1191 }
0x1abd   :  { %1205 = vrot.lane.b32.xlu0 %v1204_v61, %s5635_s1  ;;  %v1197_v54 = vadd.f32 %v1192_v43, %v1187_v47 }
0x1abf   :  { %v1202_v55 = vadd.f32 %v1200_v62, %v1197_v54  ;;  %v1229_v23 = vsub.f32 0.0, %v1197_v54 }
0x1ac1   :  { %v5999_v13 = vadd.f32 1.0, %v1202_v55 }
0x1ac3   :  { %v1244_v16 = vrot.slane %v5999_v13, %v5822_v59 }
0x1ac5   :  { %5244 = vrcp.f32 %v1244_v16 }
0x1acf   :  { %v5245_v19 = vpop.eup %5244 }
0x1ad0   :  { %v1246_v26 = vmul.f32 %v5245_v19, %v1229_v23 }
0x1b2f   :  { %v1206_v63 = vpop.permute.xlu0 %1205 }
0x1b30   :  { %v5994_v2 = vsub.f32 %v5898_v5, %v1206_v63 }
0x1b32   :  { %v1234_v9 = vrot.slane %v5994_v2, %v5740_v40 }
0x1b34   :  { %1236 = vrot.lane.b32.xlu0 %v1234_v9, %s5623_s29 }
0x1ba6   :  { %v1237_v17 = vpop.permute.xlu0 %1236 }
0x1ba7   :  { %v1240_v15 = vsel %vm86_vm7, %v1230_v4, %v1237_v17 }
0x1ba8   :  { %v1247_v25 = vmul.f32 %v5245_v19, %v1240_v15 }
0x1baa   :  { %1255 = vperm.xlu1 %5190, %v1247_v25  }
0x1bae   :  { %1250 = vperm.xlu1 %5190, %v1246_v26  }
0x1c29   :  { %v1256_v30 = vpop.permute.xlu1 %1255 }
0x1c2a   :  { %v1263_v39 = vmul.f32 %v1261_v35, %v1256_v30 }
0x1c2c   :  { %v1265_v42 = vadd.f32 %v1263_v39, %v1188_v37 }
0x1c2d   :  { %v1251_v53 = vpop.permute.xlu1 %1250 }
0x1c2e   :  { %v1262_v61 = vmul.f32 %v1261_v35, %v1251_v53  ;;  %1270 = vrot.lane.b32.xlu0 %v1265_v42, %s5636_s14  ;;  %v1303_v26 = vrot.slane %v1265_v42, 2 }
0x1c30   :  { %v1264_v56 = vadd.f32 %v1262_v61, %v1187_v47 }
0x1c32   :  { %1268 = vrot.lane.b32.xlu1 %v1264_v56, %s5636_s14  ;;  %v1305_v29 = vadd.f32 %v1303_v26, %v1264_v56 }
0x1c34   :  { %v1338_v32 = vrot.slane %v1305_v29, %v5822_v59 }
0x1ca0   :  { %v1271_v63 = vpop.permute.xlu0 %1270 }
0x1ca1   :  { %v1275_v9 = vadd.f32 %v1271_v63, %v1265_v42 }
0x1ca3   :  { %v1281_v43 = vrot.slane %v1275_v9, 4  ;;  %v1277_v62 = vrot.slane %v1275_v9, 2  ;;  %v1307_v53 = vsub.f32 0.0, %v1275_v9 }
0x1ca4   :  { %v1269_v54 = vpop.permute.xlu1 %1268 }
0x1ca5   :  { %v1274_v55 = vadd.f32 %v1269_v54, %v1264_v56  ;;  %1282 = vrot.lane.b32.xlu0 %v1281_v43, %s5637_s15 }
0x1ca7   :  { %v1279_v16 = vadd.f32 %v1277_v62, %v1274_v55  ;;  %v1306_v17 = vsub.f32 0.0, %v1274_v55 }
0x1ca9   :  { %v6009_v4 = vadd.f32 1.0, %v1279_v16 }
0x1cab   :  { %v1321_v37 = vrot.slane %v6009_v4, %v5822_v59 }
0x1cad   :  { %5246 = vrcp.f32 %v1321_v37 }
0x1cb7   :  { %v5247_v19 = vpop.eup %5246 }
0x1cb8   :  { %v1323_v47 = vmul.f32 %v5247_v19, %v1306_v17 }
0x1cba   :  { %1327 = vperm.xlu1 %5190, %v1323_v47  }
0x1cbe   :  { %5193 = vset.pattern.permute.xlu1 %v7524_v33 }
0x1d17   :  { %v1283_v15 = vpop.permute.xlu0 %1282 }
0x1d18   :  { %v6015_v25 = vsub.f32 %v5898_v5, %v1283_v15 }
0x1d1a   :  { %v1311_v23 = vrot.slane %v6015_v25, %v5740_v40 }
0x1d1c   :  { %1313 = vrot.lane.b32.xlu0 %v1311_v23, %s5626_s6 }
0x1d39   :  { %v1328_v35 = vpop.permute.xlu1 %1327 }
0x1d3a   :  { %v1339_v30 = vmul.f32 %v1338_v32, %v1328_v35 }
0x1d3c   :  { %v1341_v39 = vadd.f32 %v1339_v30, %v1264_v56 }
0x1d3e   :  { %1352 = vrot.lane.b32.xlu1 %v1341_v39, %s5619_s28 }
0x1d8e   :  { %v1314_v61 = vpop.permute.xlu0 %1313 }
0x1d8f   :  { %v1317_v5 = vsel %vm86_vm7, %v1307_v53, %v1314_v61 }
0x1d90   :  { %v1324_v63 = vmul.f32 %v5247_v19, %v1317_v5 }
0x1d92   :  { %1332 = vperm.xlu0 %5191, %v1324_v63   ;;  %v6035_v63 = vld [vmem:[#allocation7 + $0x8] sm:$0x1f] }
0x1d96   :  { %1358 = vrot.lane.b32.xlu0 %v1341_v39, %s5618_s27 }
0x1d97   :  { %5192 = vset.pattern.permute.xlu0 %v7524_v33 }
0x1db0   :  { %v1353_v56 = vpop.permute.xlu1 %1352 }
0x1e11   :  { %v1333_v43 = vpop.permute.xlu0 %1332 }
0x1e12   :  { %v1340_v54 = vmul.f32 %v1338_v32, %v1333_v43 }
0x1e14   :  { %v1342_v62 = vadd.f32 %v1340_v54, %v1265_v42 }
0x1e15   :  { %v1359_v55 = vpop.permute.xlu0 %1358 }
0x1e16   :  { %1354 = vrot.lane.b32.xlu1 %v1342_v62, %s5619_s28  ;;  %v1364_v9 = vsel %vm105_vm3, %v1353_v56, %v1359_v55 }
0x1e17   :  { %v1366_v37 = vmul.f32 %v5714_v7, %v1364_v9 }
0x1e19   :  { %v1368_v47 = vadd.f32 %v1366_v37, %v1341_v39  ;;  %v6038_v39 = vld [vmem:[#allocation7] sm:$0xff] }
0x1e1a   :  { %1360 = vrot.lane.b32.xlu1 %v1342_v62, %s5618_s27 }
0x1e1b   :  { %v1372_v26 = vrot.slane %v1368_v47, 2  ;;  %v1377_v42 = vrot.slane %v1368_v47, 5 }
0x1e88   :  { %v1355_v16 = vpop.permute.xlu1 %1354 }
0x1e8c   :  { %v1361_v17 = vpop.permute.xlu1 %1360 }
0x1e8d   :  { %v1365_v19 = vsel %vm105_vm3, %v1355_v16, %v1361_v17 }
0x1e8e   :  { %v1367_v15 = vmul.f32 %v5714_v7, %v1365_v19 }
0x1e90   :  { %v1369_v23 = vadd.f32 %v1367_v15, %v1342_v62  ;;  %v6047_v15 = vld [vmem:[#allocation2 + $0x2] sm:$0x1] }
0x1e92   :  { %v1373_v29 = vrot.slane %v1369_v23, 2 }
0x1e94   :  { %v1374_v32 = vsel %vm114_vm5, %v1372_v26, %v1373_v29  ;;  %v1379_v35 = vsel %vm122_vm6, %v1373_v29, %v1377_v42 }
0x1e95   :  { %v1380_v30 = vmul.f32 %v5724_v21, %v1374_v32  ;;  %v1381_v53 = vmul.f32 0.0, %v1379_v35 }
0x1e97   :  { %v1383_v61 = vadd.f32 %v1381_v53, %v1369_v23  ;;  %v1382_v5 = vadd.f32 %v1380_v30, %v1368_v47 }
0x1e99   :  { %v1385_v43 = vadd.f32 %v6035_v63, %v1383_v61  ;;  %v1384_v54 = vadd.f32 %v6038_v39, %v1382_v5 }
0x1e9b   :  { %1390 = vrot.lane.b32.xlu1 %v1385_v43, %s5622_s2  ;;  %1388 = vrot.lane.b32.xlu0 %v1384_v54, %s5622_s2  ;;  %v1409_v61 = vrot.slane %v1384_v54, 4 }
0x1e9d   :  { %v1411_v5 = vadd.f32 %v1409_v61, %v1384_v54 }
0x1f0d   :  { %v1389_v62 = vpop.permute.xlu0 %1388  ;;  %v1391_v55 = vpop.permute.xlu1 %1390 }
0x1f0e   :  { %v1394_v56 = vadd.f32 %v1389_v62, %v1384_v54  ;;  %v1395_v16 = vadd.f32 %v1391_v55, %v1385_v43  ;;  %v1440_v62 = vrot.slane %v1411_v5, %v5740_v40 }
0x1f10   :  { %v1397_v9 = vrot.slane %v1394_v56, 4  ;;  %v1402_v19 = vrot.slane %v1395_v16, 4  ;;  %v1413_v42 = vsub.f32 0.0, %v1395_v16  ;;  %v1412_v29 = vsub.f32 0.0, %v1394_v56 }
0x1f12   :  { %v1399_v37 = vadd.f32 %v1397_v9, %v1394_v56  ;;  %v6050_v23 = vsub.f32 %v6047_v15, %v1402_v19 }
0x1f14   :  { %v6043_v17 = vadd.f32 1.0, %v1399_v37  ;;  %7653 = vst [vmem:[#allocation20_spill] sm:$0xff] %v6050_v23  ;;  %v1417_v26 = vrot.slane %v6050_v23, %v5740_v40 }
0x1f16   :  { %7652 = vst [vmem:[#allocation19_spill] sm:$0xff] %v6043_v17  ;;  %v1423_v47 = vrot.slane %v6043_v17, %v5740_v40  ;;  %v1419_v35 = vsel %vm86_vm7, %v1413_v42, %v1417_v26 }
0x1f18   :  { %5248 = vrcp.f32 %v1423_v47 }
0x1f22   :  { %v5249_v32 = vpop.eup %5248 }
0x1f23   :  { %v1426_v30 = vmul.f32 %v5249_v32, %v1419_v35  ;;  %v1425_v53 = vmul.f32 %v5249_v32, %v1412_v29 }
0x1f25   :  { %1434 = vperm.xlu0 %5192, %v1426_v30  }
0x1f29   :  { %5195 = vset.pattern.permute.xlu0 %v7526_v50 }
0x1fa4   :  { %v1435_v55 = vpop.permute.xlu0 %1434 }
0x1fa5   :  { %v1442_v9 = vmul.f32 %v1440_v62, %v1435_v55 }
0x1fa7   :  { %v1444_v37 = vadd.f32 %v1442_v9, %v1385_v43 }
0x1fa9   :  { %1449 = vrot.lane.b32.xlu1 %v1444_v37, %s5623_s29 }
0x1fad   :  { %1429 = vperm.xlu1 %5193, %v1425_v53  }
0x201b   :  { %v1450_v56 = vpop.permute.xlu1 %1449 }
0x201c   :  { %v1454_v16 = vadd.f32 %v1450_v56, %v1444_v37 }
0x201e   :  { %v1461_v19 = vrot.slane %v1454_v16, 4 }
0x2020   :  { %1462 = vrot.lane.b32.xlu0 %v1461_v19, %s5624_s30 }
0x202c   :  { %v1430_v47 = vpop.permute.xlu1 %1429 }
0x202d   :  { %v1441_v26 = vmul.f32 %v1440_v62, %v1430_v47  ;;  %v1483_v62 = vsub.f32 0.0, %v1454_v16 }
0x202f   :  { %v1443_v42 = vadd.f32 %v1441_v26, %v1384_v54 }
0x2031   :  { %1447 = vrot.lane.b32.xlu1 %v1443_v42, %s5623_s29 }
0x2092   :  { %v1463_v29 = vpop.permute.xlu0 %1462 }
0x2093   :  { %v6062_v32 = vsub.f32 %v6047_v15, %v1463_v29  ;;  %v1479_v29 = vrot.slane %v1443_v42, 5 }
0x2095   :  { %v1487_v43 = vrot.slane %v6062_v32, %v5740_v40 }
0x2097   :  { %1489 = vrot.lane.b32.xlu0 %v1487_v43, %s5625_s5  ;;  %v1481_v43 = vadd.f32 %v1479_v29, %v1443_v42 }
0x20a3   :  { %v1448_v35 = vpop.permute.xlu1 %1447 }
0x20a4   :  { %v1453_v30 = vadd.f32 %v1448_v35, %v1443_v42  ;;  %v1514_v35 = vrot.slane %v1481_v43, %v5740_v40 }
0x20a6   :  { %v1456_v53 = vrot.slane %v1453_v30, 5  ;;  %v1482_v47 = vsub.f32 0.0, %v1453_v30 }
0x20a8   :  { %v1458_v61 = vadd.f32 %v1456_v53, %v1453_v30 }
0x20aa   :  { %v6067_v5 = vadd.f32 1.0, %v1458_v61 }
0x20ac   :  { %v1497_v54 = vrot.slane %v6067_v5, %v5740_v40 }
0x20ae   :  { %5250 = vrcp.f32 %v1497_v54 }
0x20b8   :  { %v5251_v9 = vpop.eup %5250 }
0x20b9   :  { %v1499_v26 = vmul.f32 %v5251_v9, %v1482_v47 }
0x2109   :  { %v1490_v55 = vpop.permute.xlu0 %1489 }
0x210a   :  { %v1493_v56 = vsel %vm86_vm7, %v1483_v62, %v1490_v55 }
0x210b   :  { %v1500_v19 = vmul.f32 %v5251_v9, %v1493_v56 }
0x210d   :  { %1508 = vperm.xlu1 %5193, %v1500_v19  }
0x2111   :  { %1503 = vperm.xlu1 %5193, %v1499_v26  }
0x218c   :  { %v1509_v53 = vpop.permute.xlu1 %1508 }
0x218d   :  { %v1516_v61 = vmul.f32 %v1514_v35, %v1509_v53 }
0x218f   :  { %v1518_v6 = vadd.f32 %v1516_v61, %v1444_v37 }
0x2190   :  { %v1504_v33 = vpop.permute.xlu1 %1503 }
0x2191   :  { %v1515_v54 = vmul.f32 %v1514_v35, %v1504_v33  ;;  %1523 = vrot.lane.b32.xlu0 %v1518_v6, %s5626_s6 }
0x2193   :  { %v1517_v16 = vadd.f32 %v1515_v54, %v1443_v42 }
0x2195   :  { %1521 = vrot.lane.b32.xlu1 %v1517_v16, %s5626_s6 }
0x2203   :  { %v1524_v62 = vpop.permute.xlu0 %1523 }
0x2204   :  { %v1528_v55 = vadd.f32 %v1524_v62, %v1518_v6 }
0x2206   :  { %v1535_v30 = vrot.slane %v1528_v55, 4  ;;  %v1557_v43 = vsub.f32 0.0, %v1528_v55 }
0x2207   :  { %v1522_v33 = vpop.permute.xlu1 %1521 }
0x2208   :  { %1536 = vrot.lane.b32.xlu0 %v1535_v30, %s5627_s7  ;;  %v1527_v37 = vadd.f32 %v1522_v33, %v1517_v16 }
0x220a   :  { %v1530_v47 = vrot.slane %v1527_v37, 6  ;;  %v1556_v62 = vsub.f32 0.0, %v1527_v37 }
0x220c   :  { %v1532_v42 = vadd.f32 %v1530_v47, %v1527_v37 }
0x220e   :  { %v6083_v26 = vadd.f32 1.0, %v1532_v42 }
0x2210   :  { %v1571_v29 = vrot.slane %v6083_v26, %v5740_v40 }
0x2212   :  { %5252 = vrcp.f32 %v1571_v29 }
0x221c   :  { %v5253_v53 = vpop.eup %5252 }
0x221d   :  { %v1573_v30 = vmul.f32 %v5253_v53, %v1556_v62 }
0x227a   :  { %v1537_v9 = vpop.permute.xlu0 %1536 }
0x227b   :  { %v6078_v56 = vsub.f32 %v6047_v15, %v1537_v9  ;;  %v1553_v9 = vrot.slane %v1517_v16, 6 }
0x227d   :  { %v1561_v19 = vrot.slane %v6078_v56, %v5740_v40 }
0x227f   :  { %1563 = vrot.lane.b32.xlu0 %v1561_v19, %s5619_s28  ;;  %v1555_v19 = vadd.f32 %v1553_v9, %v1517_v16 }
0x2281   :  { %v1588_v33 = vrot.slane %v1555_v19, %v5740_v40 }
0x22f1   :  { %v1564_v35 = vpop.permute.xlu0 %1563 }
0x22f2   :  { %v1567_v61 = vsel %vm86_vm7, %v1557_v43, %v1564_v35 }
0x22f3   :  { %v1574_v54 = vmul.f32 %v5253_v53, %v1567_v61 }
0x22f5   :  { %1582 = vperm.xlu1 %5193, %v1574_v54  }
0x22f9   :  { %1577 = vperm.xlu1 %5193, %v1573_v30  }
0x2374   :  { %v1583_v47 = vpop.permute.xlu1 %1582 }
0x2375   :  { %v1590_v42 = vmul.f32 %v1588_v33, %v1583_v47 }
0x2377   :  { %v1592_v50 = vadd.f32 %v1590_v42, %v1518_v6 }
0x2378   :  { %v1578_v23 = vpop.permute.xlu1 %1577 }
0x2379   :  { %v1589_v29 = vmul.f32 %v1588_v33, %v1578_v23  ;;  %1597 = vrot.lane.b32.xlu0 %v1592_v50, %s5628_s8 }
0x237b   :  { %v1591_v55 = vadd.f32 %v1589_v29, %v1517_v16 }
0x237d   :  { %1595 = vrot.lane.b32.xlu1 %v1591_v55, %s5628_s8 }
0x23eb   :  { %v1598_v43 = vpop.permute.xlu0 %1597 }
0x23ec   :  { %v1602_v35 = vadd.f32 %v1598_v43, %v1592_v50 }
0x23ee   :  { %v1609_v37 = vrot.slane %v1602_v35, 4  ;;  %v1631_v19 = vsub.f32 0.0, %v1602_v35 }
0x23ef   :  { %v1596_v6 = vpop.permute.xlu1 %1595 }
0x23f0   :  { %1610 = vrot.lane.b32.xlu0 %v1609_v37, %s5629_s9  ;;  %v1601_v23 = vadd.f32 %v1596_v6, %v1591_v55 }
0x23f2   :  { %v1604_v62 = vrot.slane %v1601_v23, 7  ;;  %v1630_v43 = vsub.f32 0.0, %v1601_v23 }
0x23f4   :  { %v1606_v16 = vadd.f32 %v1604_v62, %v1601_v23 }
0x23f6   :  { %v6099_v30 = vadd.f32 1.0, %v1606_v16 }
0x23f8   :  { %v1645_v9 = vrot.slane %v6099_v30, %v5740_v40 }
0x23fa   :  { %5254 = vrcp.f32 %v1645_v9 }
0x2404   :  { %v5255_v47 = vpop.eup %5254 }
0x2405   :  { %v1647_v37 = vmul.f32 %v5255_v47, %v1630_v43 }
0x2462   :  { %v1611_v53 = vpop.permute.xlu0 %1610 }
0x2463   :  { %v6094_v61 = vsub.f32 %v6047_v15, %v1611_v53  ;;  %v7654_v53 = vmov 1  }
0x2465   :  { %v1635_v54 = vrot.slane %v6094_v61, %v5740_v40 }
0x2467   :  { %1637 = vrot.lane.b32.xlu0 %v1635_v54, %s5630_s10  ;;  %v1627_v54 = vrot.slane %v1591_v55, 7 }
0x2469   :  { %v1629_v6 = vadd.f32 %v1627_v54, %v1591_v55 }
0x246b   :  { %v1662_v62 = vrot.slane %v1629_v6, %v5740_v40 }
0x24d9   :  { %v1638_v33 = vpop.permute.xlu0 %1637 }
0x24da   :  { %v1641_v42 = vsel %vm86_vm7, %v1631_v19, %v1638_v33 }
0x24db   :  { %v1648_v29 = vmul.f32 %v5255_v47, %v1641_v42 }
0x24dd   :  { %1656 = vperm.xlu1 %5193, %v1648_v29  }
0x24e1   :  { %1651 = vperm.xlu1 %5193, %v1647_v37  }
0x24e5   :  { %5194 = vset.pattern.permute.xlu1 %v7654_v53 }
0x255c   :  { %v1657_v16 = vpop.permute.xlu1 %1656 }
0x255d   :  { %v1664_v17 = vmul.f32 %v1662_v62, %v1657_v16 }
0x255f   :  { %v1666_v9 = vadd.f32 %v1664_v17, %v1592_v50 }
0x2560   :  { %v1652_v35 = vpop.permute.xlu1 %1651 }
0x2561   :  { %v1663_v27 = vmul.f32 %v1662_v62, %v1652_v35  ;;  %1671 = vrot.lane.b32.xlu0 %v1666_v9, %s5628_s8 }
0x2563   :  { %v1665_v45 = vadd.f32 %v1663_v27, %v1591_v55 }
0x2565   :  { %1669 = vrot.lane.b32.xlu1 %v1665_v45, %s5628_s8 }
0x25d3   :  { %v1672_v23 = vpop.permute.xlu0 %1671 }
0x25d4   :  { %v1676_v19 = vadd.f32 %v1672_v23, %v1666_v9 }
0x25d6   :  { %v1682_v33 = vrot.slane %v1676_v19, 4  ;;  %v1678_v43 = vrot.slane %v1676_v19, 7  ;;  %v1708_v54 = vsub.f32 0.0, %v1676_v19 }
0x25d7   :  { %v1670_v50 = vpop.permute.xlu1 %1669 }
0x25d8   :  { %1683 = vrot.lane.b32.xlu0 %v1682_v33, %s5629_s9  ;;  %v1675_v17 = vadd.f32 %v1670_v50, %v1665_v45 }
0x25da   :  { %v1680_v27 = vadd.f32 %v1678_v43, %v1675_v17  ;;  %v1707_v23 = vsub.f32 0.0, %v1675_v17 }
0x25dc   :  { %v6116_v55 = vadd.f32 1.0, %v1680_v27 }
0x25de   :  { %v1722_v37 = vrot.slane %v6116_v55, %v5822_v59 }
0x25e0   :  { %5256 = vrcp.f32 %v1722_v37 }
0x25ea   :  { %v5257_v62 = vpop.eup %5256 }
0x25eb   :  { %v1724_v33 = vmul.f32 %v5257_v62, %v1707_v23 }
0x264a   :  { %v1684_v47 = vpop.permute.xlu0 %1683 }
0x264b   :  { %v6111_v42 = vsub.f32 %v6047_v15, %v1684_v47  ;;  %v1704_v47 = vrot.slane %v1666_v9, 7 }
0x264d   :  { %7655 = vst [vmem:[#allocation21_spill] sm:$0xff] %v6111_v42  ;;  %v1712_v29 = vrot.slane %v6111_v42, %v5740_v40 }
0x264f   :  { %1714 = vrot.lane.b32.xlu0 %v1712_v29, %s5630_s10  ;;  %v1706_v29 = vadd.f32 %v1704_v47, %v1665_v45 }
0x2651   :  { %v1739_v50 = vrot.slane %v1706_v29, %v5822_v59 }
0x26c1   :  { %v1715_v6 = vpop.permute.xlu0 %1714 }
0x26c2   :  { %v1718_v16 = vsel %vm86_vm7, %v1708_v54, %v1715_v6 }
0x26c3   :  { %v1725_v35 = vmul.f32 %v5257_v62, %v1718_v16 }
0x26c5   :  { %1733 = vperm.xlu1 %5194, %v1725_v35  }
0x26c9   :  { %1728 = vperm.xlu1 %5194, %v1724_v33  }
0x2744   :  { %v1734_v43 = vpop.permute.xlu1 %1733 }
0x2745   :  { %v1741_v27 = vmul.f32 %v1739_v50, %v1734_v43 }
0x2747   :  { %v1743_v42 = vadd.f32 %v1741_v27, %v1666_v9 }
0x2748   :  { %v1729_v1 = vpop.permute.xlu1 %1728 }
0x2749   :  { %v1740_v37 = vmul.f32 %v1739_v50, %v1729_v1  ;;  %1748 = vrot.lane.b32.xlu0 %v1743_v42, %s5632_s11 }
0x274b   :  { %v1742_v19 = vadd.f32 %v1740_v37, %v1665_v45 }
0x274d   :  { %1746 = vrot.lane.b32.xlu1 %v1742_v19, %s5632_s11 }
0x27bb   :  { %v1749_v54 = vpop.permute.xlu0 %1748 }
0x27bc   :  { %v1753_v6 = vadd.f32 %v1749_v54, %v1743_v42 }
0x27be   :  { %v1757_v17 = vrot.slane %v1753_v6, 4  ;;  %v1781_v47 = vsub.f32 0.0, %v1753_v6 }
0x27bf   :  { %v1747_v1 = vpop.permute.xlu1 %1746 }
0x27c0   :  { %1758 = vrot.lane.b32.xlu0 %v1757_v17, %s5633_s12  ;;  %v1752_v9 = vadd.f32 %v1747_v1, %v1742_v19  ;;  %v1779_v17 = vadd.f32 %v1743_v42, %v1742_v19 }
0x27c2   :  { %v1754_v23 = vadd.f32 %v1753_v6, %v1752_v9  ;;  %v1780_v37 = vsub.f32 0.0, %v1752_v9 }
0x27c4   :  { %v6132_v45 = vadd.f32 1.0, %v1754_v23 }
0x27c6   :  { %7657 = vst [vmem:[#allocation23_spill] sm:$0xff] %v6132_v45  ;;  %v1795_v33 = vrot.slane %v6132_v45, %v5822_v59 }
0x27c8   :  { %5258 = vrcp.f32 %v1795_v33 }
0x27d2   :  { %v5259_v50 = vpop.eup %5258 }
0x27d3   :  { %v1797_v54 = vmul.f32 %v5259_v50, %v1780_v37 }
0x2832   :  { %v1759_v62 = vpop.permute.xlu0 %1758 }
0x2833   :  { %v6127_v16 = vsub.f32 %v6047_v15, %v1759_v62  ;;  %v1812_v62 = vrot.slane %v1779_v17, %v5822_v59 }
0x2835   :  { %7656 = vst [vmem:[#allocation22_spill] sm:$0xff] %v6127_v16  ;;  %v1785_v35 = vrot.slane %v6127_v16, %v5740_v40 }
0x2837   :  { %1787 = vrot.lane.b32.xlu0 %v1785_v35, %s5622_s2 }
0x28a9   :  { %v1788_v29 = vpop.permute.xlu0 %1787 }
0x28aa   :  { %v1791_v43 = vsel %vm86_vm7, %v1781_v47, %v1788_v29 }
0x28ab   :  { %v1798_v27 = vmul.f32 %v5259_v50, %v1791_v43 }
0x28ad   :  { %1806 = vperm.xlu1 %5194, %v1798_v27  }
0x28b1   :  { %1801 = vperm.xlu1 %5194, %v1797_v54  }
0x292c   :  { %v1807_v35 = vpop.permute.xlu1 %1806 }
0x292d   :  { %v1814_v1 = vmul.f32 %v1812_v62, %v1807_v35 }
0x292f   :  { %v1816_v23 = vadd.f32 %v1814_v1, %v1743_v42 }
0x2930   :  { %v1802_v16 = vpop.permute.xlu1 %1801 }
0x2931   :  { %v1813_v41 = vmul.f32 %v1812_v62, %v1802_v16  ;;  %1821 = vrot.lane.b32.xlu0 %v1816_v23, %s5634_s13 }
0x2933   :  { %v1815_v6 = vadd.f32 %v1813_v41, %v1742_v19 }
0x2935   :  { %1819 = vrot.lane.b32.xlu1 %v1815_v6, %s5634_s13 }
0x29a3   :  { %v1822_v33 = vpop.permute.xlu0 %1821 }
0x29a4   :  { %v1826_v47 = vadd.f32 %v1822_v33, %v1816_v23 }
0x29a6   :  { %v1832_v29 = vrot.slane %v1826_v47, 4  ;;  %v1828_v27 = vrot.slane %v1826_v47, 1  ;;  %v1858_v54 = vsub.f32 0.0, %v1826_v47 }
0x29a7   :  { %v1820_v42 = vpop.permute.xlu1 %1819 }
0x29a8   :  { %1833 = vrot.lane.b32.xlu0 %v1832_v29, %s5635_s1  ;;  %v1825_v16 = vadd.f32 %v1820_v42, %v1815_v6 }
0x29aa   :  { %v1830_v41 = vadd.f32 %v1828_v27, %v1825_v16  ;;  %v1857_v33 = vsub.f32 0.0, %v1825_v16 }
0x29ac   :  { %v6148_v19 = vadd.f32 1.0, %v1830_v41 }
0x29ae   :  { %7659 = vst [vmem:[#allocation25_spill] sm:$0xff] %v6148_v19  ;;  %v1872_v37 = vrot.slane %v6148_v19, %v5822_v59 }
0x29b0   :  { %5260 = vrcp.f32 %v1872_v37 }
0x29ba   :  { %v5261_v62 = vpop.eup %5260 }
0x29bb   :  { %v1874_v29 = vmul.f32 %v5261_v62, %v1857_v33 }
0x2a1a   :  { %v1834_v9 = vpop.permute.xlu0 %1833 }
0x2a1b   :  { %v6143_v50 = vsub.f32 %v6047_v15, %v1834_v9  ;;  %v1854_v9 = vrot.slane %v1816_v23, 1 }
0x2a1d   :  { %7658 = vst [vmem:[#allocation24_spill] sm:$0xff] %v6143_v50  ;;  %v1862_v43 = vrot.slane %v6143_v50, %v5740_v40 }
0x2a1f   :  { %1864 = vrot.lane.b32.xlu0 %v1862_v43, %s5623_s29  ;;  %v1856_v43 = vadd.f32 %v1854_v9, %v1815_v6 }
0x2a21   :  { %v1889_v42 = vrot.slane %v1856_v43, %v5822_v59  ;;  %v7661_v43 = vmov 0  }
0x2a91   :  { %v1865_v17 = vpop.permute.xlu0 %1864 }
0x2a92   :  { %v1868_v35 = vsel %vm86_vm7, %v1858_v54, %v1865_v17 }
0x2a93   :  { %v1875_v1 = vmul.f32 %v5261_v62, %v1868_v35 }
0x2a95   :  { %1883 = vperm.xlu1 %5194, %v1875_v1  }
0x2a99   :  { %1878 = vperm.xlu1 %5194, %v1874_v29  }
0x2b14   :  { %v1884_v27 = vpop.permute.xlu1 %1883 }
0x2b15   :  { %v1891_v41 = vmul.f32 %v1889_v42, %v1884_v27 }
0x2b17   :  { %v1893_v50 = vadd.f32 %v1891_v41, %v1816_v23 }
0x2b18   :  { %v1879_v19 = vpop.permute.xlu1 %1878 }
0x2b19   :  { %v1890_v37 = vmul.f32 %v1889_v42, %v1879_v19  ;;  %1898 = vrot.lane.b32.xlu0 %v1893_v50, %s5636_s14 }
0x2b1b   :  { %v1892_v47 = vadd.f32 %v1890_v37, %v1815_v6  ;;  %v1931_v37 = vrot.slane %v1893_v50, 2 }
0x2b1d   :  { %1896 = vrot.lane.b32.xlu1 %v1892_v47, %s5636_s14 }
0x2b8b   :  { %v1899_v54 = vpop.permute.xlu0 %1898 }
0x2b8c   :  { %v1903_v17 = vadd.f32 %v1899_v54, %v1893_v50  ;;  %v1933_v54 = vadd.f32 %v1931_v37, %v1892_v47 }
0x2b8e   :  { %v1909_v16 = vrot.slane %v1903_v17, 4  ;;  %v1905_v62 = vrot.slane %v1903_v17, 2 }
0x2b8f   :  { %v1897_v35 = vpop.permute.xlu1 %1896 }
0x2b90   :  { %v1902_v1 = vadd.f32 %v1897_v35, %v1892_v47  ;;  %1910 = vrot.lane.b32.xlu0 %v1909_v16, %s5637_s15  ;;  %v1966_v16 = vrot.slane %v1933_v54, %v5822_v59 }
0x2b92   :  { %v1907_v33 = vadd.f32 %v1905_v62, %v1902_v1  ;;  %v1934_v19 = vsub.f32 0.0, %v1902_v1 }
0x2b94   :  { %v6158_v29 = vadd.f32 1.0, %v1907_v33  ;;  %v1935_v33 = vsub.f32 0.0, %v1903_v17 }
0x2b96   :  { %7660 = vst [vmem:[#allocation26_spill] sm:$0xff] %v6158_v29  ;;  %v1949_v23 = vrot.slane %v6158_v29, %v5822_v59 }
0x2b98   :  { %5262 = vrcp.f32 %v1949_v23 }
0x2ba2   :  { %v5263_v9 = vpop.eup %5262 }
0x2ba3   :  { %v1951_v6 = vmul.f32 %v5263_v9, %v1934_v19 }
0x2ba5   :  { %1955 = vperm.xlu1 %5194, %v1951_v6  }
0x2ba9   :  { %5197 = vset.pattern.permute.xlu1 %v7661_v43 }
0x2c02   :  { %v1911_v42 = vpop.permute.xlu0 %1910 }
0x2c03   :  { %v6164_v27 = vsub.f32 %v6047_v15, %v1911_v42 }
0x2c05   :  { %7662 = vst [vmem:[#allocation27_spill] sm:$0xff] %v6164_v27  ;;  %v1939_v41 = vrot.slane %v6164_v27, %v5740_v40 }
0x2c07   :  { %1941 = vrot.lane.b32.xlu0 %v1939_v41, %s5626_s6 }
0x2c24   :  { %v1956_v35 = vpop.permute.xlu1 %1955 }
0x2c25   :  { %v1967_v62 = vmul.f32 %v1966_v16, %v1956_v35 }
0x2c27   :  { %v1969_v1 = vadd.f32 %v1967_v62, %v1892_v47 }
0x2c29   :  { %1980 = vrot.lane.b32.xlu1 %v1969_v1, %s5619_s28 }
0x2c79   :  { %v1942_v23 = vpop.permute.xlu0 %1941 }
0x2c7a   :  { %v1945_v15 = vsel %vm86_vm7, %v1935_v33, %v1942_v23 }
0x2c7b   :  { %v1952_v19 = vmul.f32 %v5263_v9, %v1945_v15 }
0x2c7d   :  { %1960 = vperm.xlu0 %5195, %v1952_v19  }
0x2c81   :  { %1986 = vrot.lane.b32.xlu0 %v1969_v1, %s5618_s27 }
0x2c82   :  { %5196 = vset.pattern.permute.xlu0 %v7661_v43 }
0x2c9b   :  { %v1981_v47 = vpop.permute.xlu1 %1980 }
0x2cfc   :  { %v1961_v6 = vpop.permute.xlu0 %1960 }
0x2cfd   :  { %v1968_v42 = vmul.f32 %v1966_v16, %v1961_v6 }
0x2cff   :  { %v1970_v41 = vadd.f32 %v1968_v42, %v1893_v50 }
0x2d00   :  { %v1987_v37 = vpop.permute.xlu0 %1986 }
0x2d01   :  { %1982 = vrot.lane.b32.xlu1 %v1970_v41, %s5619_s28  ;;  %v1992_v17 = vsel %vm105_vm3, %v1981_v47, %v1987_v37 }
0x2d02   :  { %v1994_v35 = vmul.f32 %v5714_v7, %v1992_v17 }
0x2d04   :  { %v1996_v33 = vadd.f32 %v1994_v35, %v1969_v1 }
0x2d05   :  { %1988 = vrot.lane.b32.xlu1 %v1970_v41, %s5618_s27 }
0x2d06   :  { %v2000_v16 = vrot.slane %v1996_v33, 2  ;;  %v2005_v50 = vrot.slane %v1996_v33, 5 }
0x2d73   :  { %v1983_v54 = vpop.permute.xlu1 %1982 }
0x2d77   :  { %v1989_v9 = vpop.permute.xlu1 %1988 }
0x2d78   :  { %v1993_v62 = vsel %vm105_vm3, %v1983_v54, %v1989_v9 }
0x2d79   :  { %v1995_v23 = vmul.f32 %v5714_v7, %v1993_v62 }
0x2d7b   :  { %v1997_v15 = vadd.f32 %v1995_v23, %v1970_v41 }
0x2d7d   :  { %v2001_v19 = vrot.slane %v1997_v15, 2 }
0x2d7f   :  { %v2002_v6 = vsel %vm114_vm5, %v2000_v16, %v2001_v19  ;;  %v2007_v42 = vsel %vm122_vm6, %v2001_v19, %v2005_v50 }
0x2d80   :  { %v2008_v27 = vmul.f32 %v5724_v21, %v2002_v6  ;;  %v2009_v47 = vmul.f32 0.0, %v2007_v42 }
0x2d82   :  { %v2011_v37 = vadd.f32 %v2009_v47, %v1997_v15  ;;  %v2010_v29 = vadd.f32 %v2008_v27, %v1996_v33  ;;  %v6192_v33 = vld [vmem:[#allocation2 + $0x3] sm:$0x1] }
0x2d84   :  { %v2013_v17 = vadd.f32 %v6035_v63, %v2011_v37  ;;  %v2012_v54 = vadd.f32 %v6038_v39, %v2010_v29 }
0x2d86   :  { %2018 = vrot.lane.b32.xlu1 %v2013_v17, %s5622_s2  ;;  %2016 = vrot.lane.b32.xlu0 %v2012_v54, %s5622_s2  ;;  %v2037_v37 = vrot.slane %v2012_v54, 4 }
0x2df8   :  { %v2017_v1 = vpop.permute.xlu0 %2016  ;;  %v2019_v35 = vpop.permute.xlu1 %2018 }
0x2df9   :  { %v2022_v41 = vadd.f32 %v2017_v1, %v2012_v54  ;;  %v2023_v62 = vadd.f32 %v2019_v35, %v2013_v17  ;;  %v2039_v1 = vadd.f32 %v2037_v37, %v2012_v54 }
0x2dfb   :  { %v2025_v9 = vrot.slane %v2022_v41, 4  ;;  %v2030_v50 = vrot.slane %v2023_v62, 4  ;;  %v2041_v29 = vsub.f32 0.0, %v2023_v62  ;;  %v2040_v15 = vsub.f32 0.0, %v2022_v41 }
0x2dfc   :  { %v2068_v35 = vrot.slane %v2039_v1, %v5740_v40 }
0x2dfd   :  { %v2027_v23 = vadd.f32 %v2025_v9, %v2022_v41  ;;  %v6195_v63 = vsub.f32 %v6192_v33, %v2030_v50 }
0x2dff   :  { %v6188_v16 = vadd.f32 1.0, %v2027_v23  ;;  %7664 = vst [vmem:[#allocation29_spill] sm:$0xff] %v6195_v63  ;;  %v2045_v39 = vrot.slane %v6195_v63, %v5740_v40 }
0x2e01   :  { %7663 = vst [vmem:[#allocation28_spill] sm:$0xff] %v6188_v16  ;;  %v2051_v27 = vrot.slane %v6188_v16, %v5740_v40  ;;  %v2047_v6 = vsel %vm86_vm7, %v2041_v29, %v2045_v39 }
0x2e03   :  { %5264 = vrcp.f32 %v2051_v27 }
0x2e0d   :  { %v5265_v19 = vpop.eup %5264 }
0x2e0e   :  { %v2054_v42 = vmul.f32 %v5265_v19, %v2047_v6  ;;  %v2053_v47 = vmul.f32 %v5265_v19, %v2040_v15 }
0x2e10   :  { %2062 = vperm.xlu0 %5196, %v2054_v42  }
0x2e14   :  { %5199 = vset.pattern.permute.xlu0 %v7654_v53 }
0x2e8f   :  { %v2063_v9 = vpop.permute.xlu0 %2062 }
0x2e90   :  { %v2070_v23 = vmul.f32 %v2068_v35, %v2063_v9 }
0x2e92   :  { %v2072_v50 = vadd.f32 %v2070_v23, %v2013_v17 }
0x2e94   :  { %2077 = vrot.lane.b32.xlu1 %v2072_v50, %s5623_s29 }
0x2e98   :  { %2057 = vperm.xlu1 %5197, %v2053_v47  }
0x2f06   :  { %v2078_v41 = vpop.permute.xlu1 %2077 }
0x2f07   :  { %v2082_v62 = vadd.f32 %v2078_v41, %v2072_v50 }
0x2f09   :  { %v2089_v27 = vrot.slane %v2082_v62, 4 }
0x2f0b   :  { %2090 = vrot.lane.b32.xlu0 %v2089_v27, %s5624_s30 }
0x2f17   :  { %v2058_v39 = vpop.permute.xlu1 %2057 }
0x2f18   :  { %v2069_v29 = vmul.f32 %v2068_v35, %v2058_v39  ;;  %v2111_v35 = vsub.f32 0.0, %v2082_v62 }
0x2f1a   :  { %v2071_v15 = vadd.f32 %v2069_v29, %v2012_v54 }
0x2f1c   :  { %2075 = vrot.lane.b32.xlu1 %v2071_v15, %s5623_s29 }
0x2f7d   :  { %v2091_v19 = vpop.permute.xlu0 %2090 }
0x2f7e   :  { %v6207_v6 = vsub.f32 %v6192_v33, %v2091_v19 }
0x2f80   :  { %7665 = vst [vmem:[#allocation30_spill] sm:$0xff] %v6207_v6  ;;  %v2115_v17 = vrot.slane %v6207_v6, %v5740_v40 }
0x2f82   :  { %2117 = vrot.lane.b32.xlu0 %v2115_v17, %s5625_s5  ;;  %v2107_v17 = vrot.slane %v2071_v15, 5 }
0x2f8e   :  { %v2076_v42 = vpop.permute.xlu1 %2075 }
0x2f8f   :  { %v2081_v47 = vadd.f32 %v2076_v42, %v2071_v15  ;;  %v2109_v42 = vadd.f32 %v2107_v17, %v2071_v15 }
0x2f91   :  { %v2084_v37 = vrot.slane %v2081_v47, 5  ;;  %v2110_v29 = vsub.f32 0.0, %v2081_v47 }
0x2f93   :  { %v2086_v1 = vadd.f32 %v2084_v37, %v2081_v47  ;;  %v2142_v37 = vrot.slane %v2109_v42, %v5740_v40 }
0x2f95   :  { %v6212_v9 = vadd.f32 1.0, %v2086_v1 }
0x2f97   :  { %7666 = vst [vmem:[#allocation31_spill] sm:$0xff] %v6212_v9  ;;  %v2125_v54 = vrot.slane %v6212_v9, %v5740_v40 }
0x2f99   :  { %5266 = vrcp.f32 %v2125_v54 }
0x2fa3   :  { %v5267_v41 = vpop.eup %5266 }
0x2fa4   :  { %v2127_v19 = vmul.f32 %v5267_v41, %v2110_v29 }
0x2ff4   :  { %v2118_v23 = vpop.permute.xlu0 %2117 }
0x2ff5   :  { %v2121_v27 = vsel %vm86_vm7, %v2111_v35, %v2118_v23 }
0x2ff6   :  { %v2128_v39 = vmul.f32 %v5267_v41, %v2121_v27 }
0x2ff8   :  { %2136 = vperm.xlu1 %5197, %v2128_v39  }
0x2ffc   :  { %2131 = vperm.xlu1 %5197, %v2127_v19  }
0x3077   :  { %v2137_v1 = vpop.permute.xlu1 %2136 }
0x3078   :  { %v2144_v63 = vmul.f32 %v2142_v37, %v2137_v1 }
0x307a   :  { %v2146_v16 = vadd.f32 %v2144_v63, %v2072_v50 }
0x307b   :  { %v2132_v6 = vpop.permute.xlu1 %2131 }
0x307c   :  { %v2143_v54 = vmul.f32 %v2142_v37, %v2132_v6  ;;  %2151 = vrot.lane.b32.xlu0 %v2146_v16, %s5626_s6 }
0x307e   :  { %v2145_v62 = vadd.f32 %v2143_v54, %v2071_v15 }
0x3080   :  { %2149 = vrot.lane.b32.xlu1 %v2145_v62, %s5626_s6 }
0x30ee   :  { %v2152_v35 = vpop.permute.xlu0 %2151 }
0x30ef   :  { %v2156_v23 = vadd.f32 %v2152_v35, %v2146_v16 }
0x30f1   :  { %v2163_v47 = vrot.slane %v2156_v23, 4  ;;  %v2185_v17 = vsub.f32 0.0, %v2156_v23 }
0x30f2   :  { %v2150_v63 = vpop.permute.xlu1 %2149 }
0x30f3   :  { %2164 = vrot.lane.b32.xlu0 %v2163_v47, %s5627_s7  ;;  %v2155_v50 = vadd.f32 %v2150_v63, %v2145_v62 }
0x30f5   :  { %v2158_v6 = vrot.slane %v2155_v50, 6  ;;  %v2184_v35 = vsub.f32 0.0, %v2155_v50 }
0x30f7   :  { %v2160_v15 = vadd.f32 %v2158_v6, %v2155_v50 }
0x30f9   :  { %v6228_v29 = vadd.f32 1.0, %v2160_v15 }
0x30fb   :  { %7668 = vst [vmem:[#allocation33_spill] sm:$0xff] %v6228_v29  ;;  %v2199_v19 = vrot.slane %v6228_v29, %v5740_v40 }
0x30fd   :  { %5268 = vrcp.f32 %v2199_v19 }
0x3107   :  { %v5269_v37 = vpop.eup %5268 }
0x3108   :  { %v2201_v47 = vmul.f32 %v5269_v37, %v2184_v35 }
0x3165   :  { %v2165_v41 = vpop.permute.xlu0 %2164 }
0x3166   :  { %v6223_v27 = vsub.f32 %v6192_v33, %v2165_v41  ;;  %v2181_v41 = vrot.slane %v2145_v62, 6 }
0x3168   :  { %7667 = vst [vmem:[#allocation32_spill] sm:$0xff] %v6223_v27  ;;  %v2189_v39 = vrot.slane %v6223_v27, %v5740_v40 }
0x316a   :  { %2191 = vrot.lane.b32.xlu0 %v2189_v39, %s5619_s28  ;;  %v2183_v39 = vadd.f32 %v2181_v41, %v2145_v62 }
0x316c   :  { %v2216_v63 = vrot.slane %v2183_v39, %v5740_v40 }
0x31dc   :  { %v2192_v42 = vpop.permute.xlu0 %2191 }
0x31dd   :  { %v2195_v1 = vsel %vm86_vm7, %v2185_v17, %v2192_v42 }
0x31de   :  { %v2202_v54 = vmul.f32 %v5269_v37, %v2195_v1 }
0x31e0   :  { %2210 = vperm.xlu1 %5197, %v2202_v54  }
0x31e4   :  { %2205 = vperm.xlu1 %5197, %v2201_v47  }
0x325f   :  { %v2211_v6 = vpop.permute.xlu1 %2210 }
0x3260   :  { %v2218_v15 = vmul.f32 %v2216_v63, %v2211_v6 }
0x3262   :  { %v2220_v27 = vadd.f32 %v2218_v15, %v2146_v16 }
0x3263   :  { %v2206_v29 = vpop.permute.xlu1 %2205 }
0x3264   :  { %v2217_v19 = vmul.f32 %v2216_v63, %v2206_v29  ;;  %2225 = vrot.lane.b32.xlu0 %v2220_v27, %s5628_s8 }
0x3266   :  { %v2219_v23 = vadd.f32 %v2217_v19, %v2145_v62 }
0x3268   :  { %2223 = vrot.lane.b32.xlu1 %v2219_v23, %s5628_s8 }
0x32d6   :  { %v2226_v17 = vpop.permute.xlu0 %2225 }
0x32d7   :  { %v2230_v42 = vadd.f32 %v2226_v17, %v2220_v27 }
0x32d9   :  { %v2237_v50 = vrot.slane %v2230_v42, 4  ;;  %v2259_v39 = vsub.f32 0.0, %v2230_v42 }
0x32da   :  { %v2224_v16 = vpop.permute.xlu1 %2223 }
0x32db   :  { %2238 = vrot.lane.b32.xlu0 %v2237_v50, %s5629_s9  ;;  %v2229_v29 = vadd.f32 %v2224_v16, %v2219_v23 }
0x32dd   :  { %v2232_v35 = vrot.slane %v2229_v29, 7  ;;  %v2258_v17 = vsub.f32 0.0, %v2229_v29 }
0x32df   :  { %v2234_v62 = vadd.f32 %v2232_v35, %v2229_v29 }
0x32e1   :  { %v6244_v47 = vadd.f32 1.0, %v2234_v62 }
0x32e3   :  { %7670 = vst [vmem:[#allocation35_spill] sm:$0xff] %v6244_v47  ;;  %v2273_v41 = vrot.slane %v6244_v47, %v5740_v40 }
0x32e5   :  { %5270 = vrcp.f32 %v2273_v41 }
0x32ef   :  { %v5271_v6 = vpop.eup %5270 }
0x32f0   :  { %v2275_v50 = vmul.f32 %v5271_v6, %v2258_v17 }
0x334d   :  { %v2239_v37 = vpop.permute.xlu0 %2238 }
0x334e   :  { %v6239_v1 = vsub.f32 %v6192_v33, %v2239_v37  ;;  %v2255_v37 = vrot.slane %v2219_v23, 7 }
0x3350   :  { %7669 = vst [vmem:[#allocation34_spill] sm:$0xff] %v6239_v1  ;;  %v2263_v54 = vrot.slane %v6239_v1, %v5740_v40 }
0x3352   :  { %2265 = vrot.lane.b32.xlu0 %v2263_v54, %s5630_s10  ;;  %v2257_v54 = vadd.f32 %v2255_v37, %v2219_v23 }
0x3354   :  { %v2290_v16 = vrot.slane %v2257_v54, %v5740_v40 }
0x33c4   :  { %v2266_v63 = vpop.permute.xlu0 %2265 }
0x33c5   :  { %v2269_v15 = vsel %vm86_vm7, %v2259_v39, %v2266_v63 }
0x33c6   :  { %v2276_v19 = vmul.f32 %v5271_v6, %v2269_v15 }
0x33c8   :  { %2284 = vperm.xlu1 %5197, %v2276_v19  }
0x33cc   :  { %2279 = vperm.xlu1 %5197, %v2275_v50  }
0x33d0   :  { %5198 = vset.pattern.permute.xlu1 %v7654_v53 }
0x3447   :  { %v2285_v35 = vpop.permute.xlu1 %2284 }
0x3448   :  { %v2292_v62 = vmul.f32 %v2290_v16, %v2285_v35 }
0x344a   :  { %v2294_v41 = vadd.f32 %v2292_v62, %v2220_v27 }
0x344b   :  { %v2280_v42 = vpop.permute.xlu1 %2279 }
0x344c   :  { %v2291_v1 = vmul.f32 %v2290_v16, %v2280_v42  ;;  %2299 = vrot.lane.b32.xlu0 %v2294_v41, %s5628_s8 }
0x344e   :  { %v2293_v47 = vadd.f32 %v2291_v1, %v2219_v23 }
0x3450   :  { %2297 = vrot.lane.b32.xlu1 %v2293_v47, %s5628_s8 }
0x34be   :  { %v2300_v29 = vpop.permute.xlu0 %2299 }
0x34bf   :  { %v2304_v39 = vadd.f32 %v2300_v29, %v2294_v41 }
0x34c1   :  { %v2310_v63 = vrot.slane %v2304_v39, 4  ;;  %v2306_v50 = vrot.slane %v2304_v39, 7  ;;  %v2336_v54 = vsub.f32 0.0, %v2304_v39 }
0x34c2   :  { %v2298_v27 = vpop.permute.xlu1 %2297 }
0x34c3   :  { %2311 = vrot.lane.b32.xlu0 %v2310_v63, %s5629_s9  ;;  %v2303_v17 = vadd.f32 %v2298_v27, %v2293_v47 }
0x34c5   :  { %v2308_v23 = vadd.f32 %v2306_v50, %v2303_v17  ;;  %v2335_v29 = vsub.f32 0.0, %v2303_v17 }
0x34c7   :  { %v6261_v1 = vadd.f32 1.0, %v2308_v23 }
0x34c9   :  { %7672 = vst [vmem:[#allocation37_spill] sm:$0xff] %v6261_v1  ;;  %v2350_v37 = vrot.slane %v6261_v1, %v5822_v59 }
0x34cb   :  { %5272 = vrcp.f32 %v2350_v37 }
0x34d5   :  { %v5273_v35 = vpop.eup %5272 }
0x34d6   :  { %v2352_v63 = vmul.f32 %v5273_v35, %v2335_v29 }
0x3535   :  { %v2312_v6 = vpop.permute.xlu0 %2311 }
0x3536   :  { %v6256_v15 = vsub.f32 %v6192_v33, %v2312_v6  ;;  %v2332_v6 = vrot.slane %v2294_v41, 7 }
0x3538   :  { %7671 = vst [vmem:[#allocation36_spill] sm:$0xff] %v6256_v15  ;;  %v2340_v19 = vrot.slane %v6256_v15, %v5740_v40 }
0x353a   :  { %2342 = vrot.lane.b32.xlu0 %v2340_v19, %s5630_s10  ;;  %v2334_v19 = vadd.f32 %v2332_v6, %v2293_v47 }
0x353c   :  { %v2367_v27 = vrot.slane %v2334_v19, %v5822_v59 }
0x35ac   :  { %v2343_v16 = vpop.permute.xlu0 %2342 }
0x35ad   :  { %v2346_v62 = vsel %vm86_vm7, %v2336_v54, %v2343_v16 }
0x35ae   :  { %v2353_v42 = vmul.f32 %v5273_v35, %v2346_v62 }
0x35b0   :  { %2361 = vperm.xlu1 %5198, %v2353_v42  }
0x35b4   :  { %2356 = vperm.xlu1 %5198, %v2352_v63  }
0x362f   :  { %v2362_v50 = vpop.permute.xlu1 %2361 }
0x3630   :  { %v2369_v23 = vmul.f32 %v2367_v27, %v2362_v50 }
0x3632   :  { %v2371_v15 = vadd.f32 %v2369_v23, %v2294_v41 }
0x3633   :  { %v2357_v1 = vpop.permute.xlu1 %2356 }
0x3634   :  { %v2368_v37 = vmul.f32 %v2367_v27, %v2357_v1  ;;  %2376 = vrot.lane.b32.xlu0 %v2371_v15, %s5632_s11 }
0x3636   :  { %v2370_v39 = vadd.f32 %v2368_v37, %v2293_v47 }
0x3638   :  { %2374 = vrot.lane.b32.xlu1 %v2370_v39, %s5632_s11 }
0x36a6   :  { %v2377_v54 = vpop.permute.xlu0 %2376 }
0x36a7   :  { %v2381_v16 = vadd.f32 %v2377_v54, %v2371_v15 }
0x36a9   :  { %v2385_v17 = vrot.slane %v2381_v16, 4  ;;  %v2409_v6 = vsub.f32 0.0, %v2381_v16 }
0x36aa   :  { %v2375_v41 = vpop.permute.xlu1 %2374 }
0x36ab   :  { %2386 = vrot.lane.b32.xlu0 %v2385_v17, %s5633_s12  ;;  %v2380_v1 = vadd.f32 %v2375_v41, %v2370_v39  ;;  %v2407_v17 = vadd.f32 %v2371_v15, %v2370_v39 }
0x36ad   :  { %v2382_v29 = vadd.f32 %v2381_v16, %v2380_v1  ;;  %v2408_v37 = vsub.f32 0.0, %v2380_v1 }
0x36af   :  { %v6277_v47 = vadd.f32 1.0, %v2382_v29 }
0x36b1   :  { %7674 = vst [vmem:[#allocation39_spill] sm:$0xff] %v6277_v47  ;;  %v2423_v63 = vrot.slane %v6277_v47, %v5822_v59 }
0x36b3   :  { %5274 = vrcp.f32 %v2423_v63 }
0x36bd   :  { %v5275_v27 = vpop.eup %5274 }
0x36be   :  { %v2425_v54 = vmul.f32 %v5275_v27, %v2408_v37 }
0x371d   :  { %v2387_v35 = vpop.permute.xlu0 %2386 }
0x371e   :  { %v6272_v62 = vsub.f32 %v6192_v33, %v2387_v35  ;;  %v2440_v35 = vrot.slane %v2407_v17, %v5822_v59 }
0x3720   :  { %7673 = vst [vmem:[#allocation38_spill] sm:$0xff] %v6272_v62  ;;  %v2413_v42 = vrot.slane %v6272_v62, %v5740_v40 }
0x3722   :  { %2415 = vrot.lane.b32.xlu0 %v2413_v42, %s5622_s2 }
0x3794   :  { %v2416_v19 = vpop.permute.xlu0 %2415 }
0x3795   :  { %v2419_v50 = vsel %vm86_vm7, %v2409_v6, %v2416_v19 }
0x3796   :  { %v2426_v23 = vmul.f32 %v5275_v27, %v2419_v50 }
0x3798   :  { %2434 = vperm.xlu1 %5198, %v2426_v23  }
0x379c   :  { %2429 = vperm.xlu1 %5198, %v2425_v54  }
0x3817   :  { %v2435_v42 = vpop.permute.xlu1 %2434 }
0x3818   :  { %v2442_v41 = vmul.f32 %v2440_v35, %v2435_v42 }
0x381a   :  { %v2444_v29 = vadd.f32 %v2442_v41, %v2371_v15 }
0x381b   :  { %v2430_v62 = vpop.permute.xlu1 %2429 }
0x381c   :  { %v2441_v47 = vmul.f32 %v2440_v35, %v2430_v62  ;;  %2449 = vrot.lane.b32.xlu0 %v2444_v29, %s5634_s13 }
0x381e   :  { %v2443_v16 = vadd.f32 %v2441_v47, %v2370_v39 }
0x3820   :  { %2447 = vrot.lane.b32.xlu1 %v2443_v16, %s5634_s13 }
0x388e   :  { %v2450_v63 = vpop.permute.xlu0 %2449 }
0x388f   :  { %v2454_v6 = vadd.f32 %v2450_v63, %v2444_v29 }
0x3891   :  { %v2460_v19 = vrot.slane %v2454_v6, 4  ;;  %v2456_v23 = vrot.slane %v2454_v6, 1  ;;  %v2486_v54 = vsub.f32 0.0, %v2454_v6 }
0x3892   :  { %v2448_v15 = vpop.permute.xlu1 %2447 }
0x3893   :  { %2461 = vrot.lane.b32.xlu0 %v2460_v19, %s5635_s1  ;;  %v2453_v62 = vadd.f32 %v2448_v15, %v2443_v16 }
0x3895   :  { %v2458_v39 = vadd.f32 %v2456_v23, %v2453_v62  ;;  %v2485_v63 = vsub.f32 0.0, %v2453_v62 }
0x3897   :  { %v6293_v47 = vadd.f32 1.0, %v2458_v39 }
0x3899   :  { %7676 = vst [vmem:[#allocation41_spill] sm:$0xff] %v6293_v47  ;;  %v2500_v37 = vrot.slane %v6293_v47, %v5822_v59 }
0x389b   :  { %5276 = vrcp.f32 %v2500_v37 }
0x38a5   :  { %v5277_v35 = vpop.eup %5276 }
0x38a6   :  { %v2502_v19 = vmul.f32 %v5277_v35, %v2485_v63 }
0x3905   :  { %v2462_v1 = vpop.permute.xlu0 %2461 }
0x3906   :  { %v6288_v27 = vsub.f32 %v6192_v33, %v2462_v1  ;;  %v2482_v1 = vrot.slane %v2444_v29, 1 }
0x3908   :  { %7675 = vst [vmem:[#allocation40_spill] sm:$0xff] %v6288_v27  ;;  %v2490_v50 = vrot.slane %v6288_v27, %v5740_v40 }
0x390a   :  { %2492 = vrot.lane.b32.xlu0 %v2490_v50, %s5623_s29  ;;  %v2484_v50 = vadd.f32 %v2482_v1, %v2443_v16 }
0x390c   :  { %v2517_v15 = vrot.slane %v2484_v50, %v5822_v59 }
0x397c   :  { %v2493_v17 = vpop.permute.xlu0 %2492 }
0x397d   :  { %v2496_v42 = vsel %vm86_vm7, %v2486_v54, %v2493_v17 }
0x397e   :  { %v2503_v41 = vmul.f32 %v5277_v35, %v2496_v42 }
0x3980   :  { %2511 = vperm.xlu1 %5198, %v2503_v41  }
0x3984   :  { %2506 = vperm.xlu1 %5198, %v2502_v19  }
0x39ff   :  { %v2512_v23 = vpop.permute.xlu1 %2511 }
0x3a00   :  { %v2519_v39 = vmul.f32 %v2517_v15, %v2512_v23 }
0x3a02   :  { %v2521_v27 = vadd.f32 %v2519_v39, %v2444_v29 }
0x3a03   :  { %v2507_v47 = vpop.permute.xlu1 %2506 }
0x3a04   :  { %v2518_v37 = vmul.f32 %v2517_v15, %v2507_v47  ;;  %2526 = vrot.lane.b32.xlu0 %v2521_v27, %s5636_s14  ;;  %v2559_v39 = vrot.slane %v2521_v27, 2 }
0x3a06   :  { %v2520_v6 = vadd.f32 %v2518_v37, %v2443_v16 }
0x3a08   :  { %2524 = vrot.lane.b32.xlu1 %v2520_v6, %s5636_s14  ;;  %v2561_v37 = vadd.f32 %v2559_v39, %v2520_v6 }
0x3a76   :  { %v2527_v54 = vpop.permute.xlu0 %2526 }
0x3a77   :  { %v2531_v17 = vadd.f32 %v2527_v54, %v2521_v27  ;;  %v2594_v54 = vrot.slane %v2561_v37, %v5822_v59 }
0x3a79   :  { %v2537_v62 = vrot.slane %v2531_v17, 4  ;;  %v2533_v35 = vrot.slane %v2531_v17, 2 }
0x3a7a   :  { %v2525_v42 = vpop.permute.xlu1 %2524 }
0x3a7b   :  { %v2530_v41 = vadd.f32 %v2525_v42, %v2520_v6  ;;  %2538 = vrot.lane.b32.xlu0 %v2537_v62, %s5637_s15 }
0x3a7d   :  { %v2535_v63 = vadd.f32 %v2533_v35, %v2530_v41  ;;  %v2562_v47 = vsub.f32 0.0, %v2530_v41  ;;  %v2563_v41 = vsub.f32 0.0, %v2531_v17 }
0x3a7f   :  { %v6303_v19 = vadd.f32 1.0, %v2535_v63 }
0x3a81   :  { %7677 = vst [vmem:[#allocation42_spill] sm:$0xff] %v6303_v19  ;;  %v2577_v29 = vrot.slane %v6303_v19, %v5822_v59 }
0x3a83   :  { %5278 = vrcp.f32 %v2577_v29 }
0x3a8d   :  { %v5279_v1 = vpop.eup %5278 }
0x3a8e   :  { %v2579_v16 = vmul.f32 %v5279_v1, %v2562_v47 }
0x3a90   :  { %2583 = vperm.xlu1 %5198, %v2579_v16  }
0x3a94   :  { %5201 = vset.pattern.permute.xlu1 %v7661_v43 }
0x3aed   :  { %v2539_v50 = vpop.permute.xlu0 %2538 }
0x3aee   :  { %v6309_v15 = vsub.f32 %v6192_v33, %v2539_v50 }
0x3af0   :  { %7678 = vst [vmem:[#allocation43_spill] sm:$0xff] %v6309_v15  ;;  %v2567_v23 = vrot.slane %v6309_v15, %v5740_v40 }
0x3af2   :  { %2569 = vrot.lane.b32.xlu0 %v2567_v23, %s5626_s6 }
0x3b0f   :  { %v2584_v62 = vpop.permute.xlu1 %2583 }
0x3b10   :  { %v2595_v42 = vmul.f32 %v2594_v54, %v2584_v62 }
0x3b12   :  { %v2597_v35 = vadd.f32 %v2595_v42, %v2520_v6 }
0x3b14   :  { %2608 = vrot.lane.b32.xlu1 %v2597_v35, %s5619_s28 }
0x3b64   :  { %v2570_v63 = vpop.permute.xlu0 %2569 }
0x3b65   :  { %v2573_v33 = vsel %vm86_vm7, %v2563_v41, %v2570_v63 }
0x3b66   :  { %v2580_v29 = vmul.f32 %v5279_v1, %v2573_v33 }
0x3b68   :  { %2588 = vperm.xlu0 %5199, %v2580_v29  }
0x3b6c   :  { %2614 = vrot.lane.b32.xlu0 %v2597_v35, %s5618_s27 }
0x3b6d   :  { %5200 = vset.pattern.permute.xlu0 %v7661_v43 }
0x3b86   :  { %v2609_v6 = vpop.permute.xlu1 %2608 }
0x3be7   :  { %v2589_v47 = vpop.permute.xlu0 %2588 }
0x3be8   :  { %v2596_v16 = vmul.f32 %v2594_v54, %v2589_v47 }
0x3bea   :  { %v2598_v50 = vadd.f32 %v2596_v16, %v2521_v27 }
0x3beb   :  { %v2615_v23 = vpop.permute.xlu0 %2614 }
0x3bec   :  { %2610 = vrot.lane.b32.xlu1 %v2598_v50, %s5619_s28  ;;  %v2620_v17 = vsel %vm105_vm3, %v2609_v6, %v2615_v23 }
0x3bed   :  { %v2622_v37 = vmul.f32 %v5714_v7, %v2620_v17  ;;  %v6329_v17 = vld [vmem:[#allocation7 + $0x8] sm:$0x1f] }
0x3bef   :  { %v2624_v42 = vadd.f32 %v2622_v37, %v2597_v35  ;;  %v6332_v35 = vld [vmem:[#allocation7] sm:$0xff] }
0x3bf0   :  { %2616 = vrot.lane.b32.xlu1 %v2598_v50, %s5618_s27 }
0x3bf1   :  { %v2628_v54 = vrot.slane %v2624_v42, 2  ;;  %v2633_v27 = vrot.slane %v2624_v42, 5 }
0x3c5e   :  { %v2611_v39 = vpop.permute.xlu1 %2610 }
0x3c62   :  { %v2617_v1 = vpop.permute.xlu1 %2616 }
0x3c63   :  { %v2621_v62 = vsel %vm105_vm3, %v2611_v39, %v2617_v1 }
0x3c64   :  { %v2623_v41 = vmul.f32 %v5714_v7, %v2621_v62 }
0x3c66   :  { %v2625_v63 = vadd.f32 %v2623_v41, %v2598_v50 }
0x3c68   :  { %v2629_v33 = vrot.slane %v2625_v63, 2 }
0x3c6a   :  { %v2630_v29 = vsel %vm114_vm5, %v2628_v54, %v2629_v33  ;;  %v2635_v47 = vsel %vm122_vm6, %v2629_v33, %v2633_v27 }
0x3c6b   :  { %v2636_v16 = vmul.f32 %v5724_v21, %v2630_v29  ;;  %v2637_v6 = vmul.f32 0.0, %v2635_v47  ;;  %v6341_v29 = vld [vmem:[#allocation2 + $0x4] sm:$0x1] }
0x3c6d   :  { %v2639_v23 = vadd.f32 %v2637_v6, %v2625_v63  ;;  %v2638_v15 = vadd.f32 %v2636_v16, %v2624_v42 }
0x3c6f   :  { %v2641_v39 = vadd.f32 %v6329_v17, %v2639_v23  ;;  %v2640_v50 = vadd.f32 %v6332_v35, %v2638_v15 }
0x3c71   :  { %2646 = vrot.lane.b32.xlu1 %v2641_v39, %s5622_s2  ;;  %2644 = vrot.lane.b32.xlu0 %v2640_v50, %s5622_s2 }
0x3ce3   :  { %v2645_v37 = vpop.permute.xlu0 %2644  ;;  %v2647_v62 = vpop.permute.xlu1 %2646 }
0x3ce4   :  { %v2650_v1 = vadd.f32 %v2645_v37, %v2640_v50  ;;  %v2651_v54 = vadd.f32 %v2647_v62, %v2641_v39 }
0x3ce6   :  { %v2653_v41 = vrot.slane %v2650_v1, 4  ;;  %v2658_v42 = vrot.slane %v2651_v54, 4  ;;  %v2669_v16 = vsub.f32 0.0, %v2651_v54  ;;  %v2668_v6 = vsub.f32 0.0, %v2650_v1 }
0x3ce8   :  { %v2655_v27 = vadd.f32 %v2653_v41, %v2650_v1  ;;  %v6344_v15 = vsub.f32 %v6341_v29, %v2658_v42 }
0x3cea   :  { %v6337_v63 = vadd.f32 1.0, %v2655_v27  ;;  %7680 = vst [vmem:[#allocation45_spill] sm:$0xff] %v6344_v15  ;;  %v2673_v47 = vrot.slane %v6344_v15, %v5740_v40  ;;  %v2665_v27 = vrot.slane %v2640_v50, 4 }
0x3cec   :  { %7679 = vst [vmem:[#allocation44_spill] sm:$0xff] %v6337_v63  ;;  %v2679_v33 = vrot.slane %v6337_v63, %v5740_v40  ;;  %v2675_v37 = vsel %vm86_vm7, %v2669_v16, %v2673_v47  ;;  %v2667_v63 = vadd.f32 %v2665_v27, %v2640_v50 }
0x3cee   :  { %5280 = vrcp.f32 %v2679_v33  ;;  %v2696_v33 = vrot.slane %v2667_v63, %v5740_v40 }
0x3cf8   :  { %v5281_v23 = vpop.eup %5280 }
0x3cf9   :  { %v2682_v62 = vmul.f32 %v5281_v23, %v2675_v37  ;;  %v2681_v41 = vmul.f32 %v5281_v23, %v2668_v6 }
0x3cfb   :  { %2690 = vperm.xlu0 %5200, %v2682_v62  }
0x3cff   :  { %5203 = vset.pattern.permute.xlu0 %v7654_v53 }
0x3d7a   :  { %v2691_v42 = vpop.permute.xlu0 %2690 }
0x3d7b   :  { %v2698_v19 = vmul.f32 %v2696_v33, %v2691_v42 }
0x3d7d   :  { %v2700_v9 = vadd.f32 %v2698_v19, %v2641_v39 }
0x3d7f   :  { %2705 = vrot.lane.b32.xlu1 %v2700_v9, %s5623_s29 }
0x3d83   :  { %2685 = vperm.xlu1 %5201, %v2681_v41  }
0x3df1   :  { %v2706_v1 = vpop.permute.xlu1 %2705 }
0x3df2   :  { %v2710_v54 = vadd.f32 %v2706_v1, %v2700_v9 }
0x3df4   :  { %v2717_v15 = vrot.slane %v2710_v54, 4 }
0x3df6   :  { %2718 = vrot.lane.b32.xlu0 %v2717_v15, %s5624_s30  ;;  %v2739_v15 = vsub.f32 0.0, %v2710_v54 }
0x3e02   :  { %v2686_v47 = vpop.permute.xlu1 %2685 }
0x3e03   :  { %v2697_v16 = vmul.f32 %v2696_v33, %v2686_v47 }
0x3e05   :  { %v2699_v6 = vadd.f32 %v2697_v16, %v2640_v50 }
0x3e07   :  { %2703 = vrot.lane.b32.xlu1 %v2699_v6, %s5623_s29 }
0x3e68   :  { %v2719_v23 = vpop.permute.xlu0 %2718 }
0x3e69   :  { %v6356_v37 = vsub.f32 %v6341_v29, %v2719_v23 }
0x3e6b   :  { %7681 = vst [vmem:[#allocation46_spill] sm:$0xff] %v6356_v37  ;;  %v2743_v19 = vrot.slane %v6356_v37, %v5740_v40 }
0x3e6d   :  { %2745 = vrot.lane.b32.xlu0 %v2743_v19, %s5625_s5  ;;  %v2735_v19 = vrot.slane %v2699_v6, 5 }
0x3e79   :  { %v2704_v39 = vpop.permute.xlu1 %2703 }
0x3e7a   :  { %v2709_v63 = vadd.f32 %v2704_v39, %v2699_v6  ;;  %v2737_v39 = vadd.f32 %v2735_v19, %v2699_v6 }
0x3e7c   :  { %v2712_v62 = vrot.slane %v2709_v63, 5  ;;  %v2738_v16 = vsub.f32 0.0, %v2709_v63 }
0x3e7e   :  { %v2714_v41 = vadd.f32 %v2712_v62, %v2709_v63  ;;  %v2770_v62 = vrot.slane %v2737_v39, %v5740_v40 }
0x3e80   :  { %v6361_v27 = vadd.f32 1.0, %v2714_v41 }
0x3e82   :  { %7682 = vst [vmem:[#allocation47_spill] sm:$0xff] %v6361_v27  ;;  %v2753_v50 = vrot.slane %v6361_v27, %v5740_v40 }
0x3e84   :  { %5282 = vrcp.f32 %v2753_v50 }
0x3e8e   :  { %v5283_v42 = vpop.eup %5282 }
0x3e8f   :  { %v2755_v23 = vmul.f32 %v5283_v42, %v2738_v16 }
0x3edf   :  { %v2746_v33 = vpop.permute.xlu0 %2745 }
0x3ee0   :  { %v2749_v1 = vsel %vm86_vm7, %v2739_v15, %v2746_v33 }
0x3ee1   :  { %v2756_v47 = vmul.f32 %v5283_v42, %v2749_v1 }
0x3ee3   :  { %2764 = vperm.xlu1 %5201, %v2756_v47  }
0x3ee7   :  { %2759 = vperm.xlu1 %5201, %v2755_v23  }
0x3f62   :  { %v2765_v41 = vpop.permute.xlu1 %2764 }
0x3f63   :  { %v2772_v37 = vmul.f32 %v2770_v62, %v2765_v41 }
0x3f65   :  { %v2774_v45 = vadd.f32 %v2772_v37, %v2700_v9 }
0x3f66   :  { %v2760_v27 = vpop.permute.xlu1 %2759 }
0x3f67   :  { %v2771_v50 = vmul.f32 %v2770_v62, %v2760_v27  ;;  %2779 = vrot.lane.b32.xlu0 %v2774_v45, %s5626_s6 }
0x3f69   :  { %v2773_v54 = vadd.f32 %v2771_v50, %v2699_v6 }
0x3f6b   :  { %2777 = vrot.lane.b32.xlu1 %v2773_v54, %s5626_s6 }
0x3fd9   :  { %v2780_v15 = vpop.permute.xlu0 %2779 }
0x3fda   :  { %v2784_v33 = vadd.f32 %v2780_v15, %v2774_v45 }
0x3fdc   :  { %v2791_v63 = vrot.slane %v2784_v33, 4  ;;  %v2813_v19 = vsub.f32 0.0, %v2784_v33 }
0x3fdd   :  { %v2778_v9 = vpop.permute.xlu1 %2777 }
0x3fde   :  { %2792 = vrot.lane.b32.xlu0 %v2791_v63, %s5627_s7  ;;  %v2783_v37 = vadd.f32 %v2778_v9, %v2773_v54 }
0x3fe0   :  { %v2786_v27 = vrot.slane %v2783_v37, 6  ;;  %v2812_v15 = vsub.f32 0.0, %v2783_v37 }
0x3fe2   :  { %v2788_v6 = vadd.f32 %v2786_v27, %v2783_v37 }
0x3fe4   :  { %v6377_v16 = vadd.f32 1.0, %v2788_v6 }
0x3fe6   :  { %7684 = vst [vmem:[#allocation49_spill] sm:$0xff] %v6377_v16  ;;  %v2827_v23 = vrot.slane %v6377_v16, %v5740_v40 }
0x3fe8   :  { %5284 = vrcp.f32 %v2827_v23 }
0x3ff2   :  { %v5285_v62 = vpop.eup %5284 }
0x3ff3   :  { %v2829_v63 = vmul.f32 %v5285_v62, %v2812_v15 }
0x4050   :  { %v2793_v42 = vpop.permute.xlu0 %2792 }
0x4051   :  { %v6372_v1 = vsub.f32 %v6341_v29, %v2793_v42  ;;  %v2809_v42 = vrot.slane %v2773_v54, 6 }
0x4053   :  { %7683 = vst [vmem:[#allocation48_spill] sm:$0xff] %v6372_v1  ;;  %v2817_v47 = vrot.slane %v6372_v1, %v5740_v40 }
0x4055   :  { %2819 = vrot.lane.b32.xlu0 %v2817_v47, %s5619_s28  ;;  %v2811_v47 = vadd.f32 %v2809_v42, %v2773_v54 }
0x4057   :  { %v2844_v9 = vrot.slane %v2811_v47, %v5740_v40 }
0x40c7   :  { %v2820_v39 = vpop.permute.xlu0 %2819 }
0x40c8   :  { %v2823_v41 = vsel %vm86_vm7, %v2813_v19, %v2820_v39 }
0x40c9   :  { %v2830_v50 = vmul.f32 %v5285_v62, %v2823_v41 }
0x40cb   :  { %2838 = vperm.xlu1 %5201, %v2830_v50  }
0x40cf   :  { %2833 = vperm.xlu1 %5201, %v2829_v63  }
0x414a   :  { %v2839_v27 = vpop.permute.xlu1 %2838 }
0x414b   :  { %v2846_v6 = vmul.f32 %v2844_v9, %v2839_v27 }
0x414d   :  { %v2848_v1 = vadd.f32 %v2846_v6, %v2774_v45 }
0x414e   :  { %v2834_v16 = vpop.permute.xlu1 %2833 }
0x414f   :  { %v2845_v23 = vmul.f32 %v2844_v9, %v2834_v16  ;;  %2853 = vrot.lane.b32.xlu0 %v2848_v1, %s5628_s8 }
0x4151   :  { %v2847_v33 = vadd.f32 %v2845_v23, %v2773_v54 }
0x4153   :  { %2851 = vrot.lane.b32.xlu1 %v2847_v33, %s5628_s8 }
0x41c1   :  { %v2854_v19 = vpop.permute.xlu0 %2853 }
0x41c2   :  { %v2858_v39 = vadd.f32 %v2854_v19, %v2848_v1 }
0x41c4   :  { %v2865_v37 = vrot.slane %v2858_v39, 4  ;;  %v2887_v47 = vsub.f32 0.0, %v2858_v39 }
0x41c5   :  { %v2852_v45 = vpop.permute.xlu1 %2851 }
0x41c6   :  { %2866 = vrot.lane.b32.xlu0 %v2865_v37, %s5629_s9  ;;  %v2857_v16 = vadd.f32 %v2852_v45, %v2847_v33 }
0x41c8   :  { %v2860_v15 = vrot.slane %v2857_v16, 7  ;;  %v2886_v19 = vsub.f32 0.0, %v2857_v16 }
0x41ca   :  { %v2862_v54 = vadd.f32 %v2860_v15, %v2857_v16 }
0x41cc   :  { %v6393_v63 = vadd.f32 1.0, %v2862_v54 }
0x41ce   :  { %7686 = vst [vmem:[#allocation51_spill] sm:$0xff] %v6393_v63  ;;  %v2901_v42 = vrot.slane %v6393_v63, %v5740_v40 }
0x41d0   :  { %5286 = vrcp.f32 %v2901_v42 }
0x41da   :  { %v5287_v27 = vpop.eup %5286 }
0x41db   :  { %v2903_v37 = vmul.f32 %v5287_v27, %v2886_v19 }
0x4238   :  { %v2867_v62 = vpop.permute.xlu0 %2866 }
0x4239   :  { %v6388_v41 = vsub.f32 %v6341_v29, %v2867_v62  ;;  %v2883_v62 = vrot.slane %v2847_v33, 7 }
0x423b   :  { %7685 = vst [vmem:[#allocation50_spill] sm:$0xff] %v6388_v41  ;;  %v2891_v50 = vrot.slane %v6388_v41, %v5740_v40 }
0x423d   :  { %2893 = vrot.lane.b32.xlu0 %v2891_v50, %s5630_s10  ;;  %v2885_v50 = vadd.f32 %v2883_v62, %v2847_v33 }
0x423f   :  { %v2918_v45 = vrot.slane %v2885_v50, %v5740_v40 }
0x42af   :  { %v2894_v9 = vpop.permute.xlu0 %2893 }
0x42b0   :  { %v2897_v6 = vsel %vm86_vm7, %v2887_v47, %v2894_v9 }
0x42b1   :  { %v2904_v23 = vmul.f32 %v5287_v27, %v2897_v6 }
0x42b3   :  { %2912 = vperm.xlu1 %5201, %v2904_v23  }
0x42b7   :  { %2907 = vperm.xlu1 %5201, %v2903_v37  }
0x42bb   :  { %5202 = vset.pattern.permute.xlu1 %v7654_v53 }
0x4332   :  { %v2913_v15 = vpop.permute.xlu1 %2912 }
0x4333   :  { %v2920_v54 = vmul.f32 %v2918_v45, %v2913_v15 }
0x4335   :  { %v2922_v42 = vadd.f32 %v2920_v54, %v2848_v1 }
0x4336   :  { %v2908_v39 = vpop.permute.xlu1 %2907 }
0x4337   :  { %v2919_v41 = vmul.f32 %v2918_v45, %v2908_v39  ;;  %2927 = vrot.lane.b32.xlu0 %v2922_v42, %s5628_s8 }
0x4339   :  { %v2921_v63 = vadd.f32 %v2919_v41, %v2847_v33 }
0x433b   :  { %2925 = vrot.lane.b32.xlu1 %v2921_v63, %s5628_s8 }
0x43a9   :  { %v2928_v16 = vpop.permute.xlu0 %2927 }
0x43aa   :  { %v2932_v47 = vadd.f32 %v2928_v16, %v2922_v42 }
0x43ac   :  { %v2938_v9 = vrot.slane %v2932_v47, 4  ;;  %v2934_v37 = vrot.slane %v2932_v47, 7  ;;  %v2964_v50 = vsub.f32 0.0, %v2932_v47 }
0x43ad   :  { %v2926_v1 = vpop.permute.xlu1 %2925 }
0x43ae   :  { %2939 = vrot.lane.b32.xlu0 %v2938_v9, %s5629_s9  ;;  %v2931_v19 = vadd.f32 %v2926_v1, %v2921_v63 }
0x43b0   :  { %v2936_v33 = vadd.f32 %v2934_v37, %v2931_v19  ;;  %v2963_v16 = vsub.f32 0.0, %v2931_v19 }
0x43b2   :  { %v6410_v41 = vadd.f32 1.0, %v2936_v33 }
0x43b4   :  { %7688 = vst [vmem:[#allocation53_spill] sm:$0xff] %v6410_v41  ;;  %v2978_v62 = vrot.slane %v6410_v41, %v5822_v59 }
0x43b6   :  { %5288 = vrcp.f32 %v2978_v62 }
0x43c0   :  { %v5289_v15 = vpop.eup %5288 }
0x43c1   :  { %v2980_v9 = vmul.f32 %v5289_v15, %v2963_v16 }
0x4420   :  { %v2940_v27 = vpop.permute.xlu0 %2939 }
0x4421   :  { %v6405_v6 = vsub.f32 %v6341_v29, %v2940_v27  ;;  %v2960_v27 = vrot.slane %v2922_v42, 7 }
0x4423   :  { %7687 = vst [vmem:[#allocation52_spill] sm:$0xff] %v6405_v6  ;;  %v2968_v23 = vrot.slane %v6405_v6, %v5740_v40 }
0x4425   :  { %2970 = vrot.lane.b32.xlu0 %v2968_v23, %s5630_s10  ;;  %v2962_v23 = vadd.f32 %v2960_v27, %v2921_v63 }
0x4427   :  { %v2995_v1 = vrot.slane %v2962_v23, %v5822_v59 }
0x4497   :  { %v2971_v45 = vpop.permute.xlu0 %2970 }
0x4498   :  { %v2974_v54 = vsel %vm86_vm7, %v2964_v50, %v2971_v45 }
0x4499   :  { %v2981_v39 = vmul.f32 %v5289_v15, %v2974_v54 }
0x449b   :  { %2989 = vperm.xlu1 %5202, %v2981_v39  }
0x449f   :  { %2984 = vperm.xlu1 %5202, %v2980_v9  }
0x451a   :  { %v2990_v37 = vpop.permute.xlu1 %2989 }
0x451b   :  { %v2997_v33 = vmul.f32 %v2995_v1, %v2990_v37 }
0x451d   :  { %v2999_v6 = vadd.f32 %v2997_v33, %v2922_v42 }
0x451e   :  { %v2985_v41 = vpop.permute.xlu1 %2984 }
0x451f   :  { %v2996_v62 = vmul.f32 %v2995_v1, %v2985_v41  ;;  %3004 = vrot.lane.b32.xlu0 %v2999_v6, %s5632_s11 }
0x4521   :  { %v2998_v47 = vadd.f32 %v2996_v62, %v2921_v63 }
0x4523   :  { %3002 = vrot.lane.b32.xlu1 %v2998_v47, %s5632_s11 }
0x4591   :  { %v3005_v50 = vpop.permute.xlu0 %3004 }
0x4592   :  { %v3009_v45 = vadd.f32 %v3005_v50, %v2999_v6 }
0x4594   :  { %v3013_v19 = vrot.slane %v3009_v45, 4  ;;  %v3037_v27 = vsub.f32 0.0, %v3009_v45 }
0x4595   :  { %v3003_v42 = vpop.permute.xlu1 %3002 }
0x4596   :  { %3014 = vrot.lane.b32.xlu0 %v3013_v19, %s5633_s12  ;;  %v3008_v41 = vadd.f32 %v3003_v42, %v2998_v47  ;;  %v3035_v19 = vadd.f32 %v2999_v6, %v2998_v47 }
0x4598   :  { %v3010_v16 = vadd.f32 %v3009_v45, %v3008_v41  ;;  %v3036_v62 = vsub.f32 0.0, %v3008_v41 }
0x459a   :  { %v6426_v63 = vadd.f32 1.0, %v3010_v16 }
0x459c   :  { %7690 = vst [vmem:[#allocation55_spill] sm:$0xff] %v6426_v63  ;;  %v3051_v9 = vrot.slane %v6426_v63, %v5822_v59 }
0x459e   :  { %5290 = vrcp.f32 %v3051_v9 }
0x45a8   :  { %v5291_v1 = vpop.eup %5290 }
0x45a9   :  { %v3053_v50 = vmul.f32 %v5291_v1, %v3036_v62 }
0x4608   :  { %v3015_v15 = vpop.permute.xlu0 %3014 }
0x4609   :  { %v6421_v54 = vsub.f32 %v6341_v29, %v3015_v15  ;;  %v3068_v15 = vrot.slane %v3035_v19, %v5822_v59 }
0x460b   :  { %7689 = vst [vmem:[#allocation54_spill] sm:$0xff] %v6421_v54  ;;  %v3041_v39 = vrot.slane %v6421_v54, %v5740_v40 }
0x460d   :  { %3043 = vrot.lane.b32.xlu0 %v3041_v39, %s5622_s2 }
0x467f   :  { %v3044_v23 = vpop.permute.xlu0 %3043 }
0x4680   :  { %v3047_v37 = vsel %vm86_vm7, %v3037_v27, %v3044_v23 }
0x4681   :  { %v3054_v33 = vmul.f32 %v5291_v1, %v3047_v37 }
0x4683   :  { %3062 = vperm.xlu1 %5202, %v3054_v33  }
0x4687   :  { %3057 = vperm.xlu1 %5202, %v3053_v50  }
0x4702   :  { %v3063_v39 = vpop.permute.xlu1 %3062 }
0x4703   :  { %v3070_v42 = vmul.f32 %v3068_v15, %v3063_v39 }
0x4705   :  { %v3072_v16 = vadd.f32 %v3070_v42, %v2999_v6 }
0x4706   :  { %v3058_v54 = vpop.permute.xlu1 %3057 }
0x4707   :  { %v3069_v63 = vmul.f32 %v3068_v15, %v3058_v54  ;;  %3077 = vrot.lane.b32.xlu0 %v3072_v16, %s5634_s13 }
0x4709   :  { %v3071_v45 = vadd.f32 %v3069_v63, %v2998_v47 }
0x470b   :  { %3075 = vrot.lane.b32.xlu1 %v3071_v45, %s5634_s13 }
0x4779   :  { %v3078_v9 = vpop.permute.xlu0 %3077 }
0x477a   :  { %v3082_v27 = vadd.f32 %v3078_v9, %v3072_v16 }
0x477c   :  { %v3088_v23 = vrot.slane %v3082_v27, 4  ;;  %v3084_v33 = vrot.slane %v3082_v27, 1  ;;  %v3114_v50 = vsub.f32 0.0, %v3082_v27 }
0x477d   :  { %v3076_v6 = vpop.permute.xlu1 %3075 }
0x477e   :  { %3089 = vrot.lane.b32.xlu0 %v3088_v23, %s5635_s1  ;;  %v3081_v54 = vadd.f32 %v3076_v6, %v3071_v45 }
0x4780   :  { %v3086_v47 = vadd.f32 %v3084_v33, %v3081_v54  ;;  %v3113_v9 = vsub.f32 0.0, %v3081_v54 }
0x4782   :  { %v6442_v63 = vadd.f32 1.0, %v3086_v47 }
0x4784   :  { %7692 = vst [vmem:[#allocation57_spill] sm:$0xff] %v6442_v63  ;;  %v3128_v62 = vrot.slane %v6442_v63, %v5822_v59 }
0x4786   :  { %5292 = vrcp.f32 %v3128_v62 }
0x4790   :  { %v5293_v15 = vpop.eup %5292 }
0x4791   :  { %v3130_v23 = vmul.f32 %v5293_v15, %v3113_v9 }
0x47f0   :  { %v3090_v41 = vpop.permute.xlu0 %3089 }
0x47f1   :  { %v6437_v1 = vsub.f32 %v6341_v29, %v3090_v41  ;;  %v3110_v41 = vrot.slane %v3072_v16, 1 }
0x47f3   :  { %7691 = vst [vmem:[#allocation56_spill] sm:$0xff] %v6437_v1  ;;  %v3118_v37 = vrot.slane %v6437_v1, %v5740_v40 }
0x47f5   :  { %3120 = vrot.lane.b32.xlu0 %v3118_v37, %s5623_s29  ;;  %v3112_v37 = vadd.f32 %v3110_v41, %v3071_v45 }
0x47f7   :  { %v3145_v6 = vrot.slane %v3112_v37, %v5822_v59 }
0x4867   :  { %v3121_v19 = vpop.permute.xlu0 %3120 }
0x4868   :  { %v3124_v39 = vsel %vm86_vm7, %v3114_v50, %v3121_v19 }
0x4869   :  { %v3131_v42 = vmul.f32 %v5293_v15, %v3124_v39 }
0x486b   :  { %3139 = vperm.xlu1 %5202, %v3131_v42  }
0x486f   :  { %3134 = vperm.xlu1 %5202, %v3130_v23  }
0x48ea   :  { %v3140_v33 = vpop.permute.xlu1 %3139 }
0x48eb   :  { %v3147_v47 = vmul.f32 %v3145_v6, %v3140_v33 }
0x48ed   :  { %v3149_v1 = vadd.f32 %v3147_v47, %v3072_v16 }
0x48ee   :  { %v3135_v63 = vpop.permute.xlu1 %3134 }
0x48ef   :  { %v3146_v62 = vmul.f32 %v3145_v6, %v3135_v63  ;;  %3154 = vrot.lane.b32.xlu0 %v3149_v1, %s5636_s14  ;;  %v3187_v47 = vrot.slane %v3149_v1, 2 }
0x48f1   :  { %v3148_v27 = vadd.f32 %v3146_v62, %v3071_v45 }
0x48f3   :  { %3152 = vrot.lane.b32.xlu1 %v3148_v27, %s5636_s14  ;;  %v3189_v62 = vadd.f32 %v3187_v47, %v3148_v27 }
0x4961   :  { %v3155_v50 = vpop.permute.xlu0 %3154 }
0x4962   :  { %v3159_v19 = vadd.f32 %v3155_v50, %v3149_v1  ;;  %v3222_v50 = vrot.slane %v3189_v62, %v5822_v59 }
0x4964   :  { %v3165_v54 = vrot.slane %v3159_v19, 4  ;;  %v3161_v15 = vrot.slane %v3159_v19, 2 }
0x4965   :  { %v3153_v39 = vpop.permute.xlu1 %3152 }
0x4966   :  { %v3158_v42 = vadd.f32 %v3153_v39, %v3148_v27  ;;  %3166 = vrot.lane.b32.xlu0 %v3165_v54, %s5637_s15 }
0x4968   :  { %v3163_v9 = vadd.f32 %v3161_v15, %v3158_v42  ;;  %v3190_v63 = vsub.f32 0.0, %v3158_v42  ;;  %v3191_v42 = vsub.f32 0.0, %v3159_v19 }
0x496a   :  { %v6452_v23 = vadd.f32 1.0, %v3163_v9 }
0x496c   :  { %7693 = vst [vmem:[#allocation58_spill] sm:$0xff] %v6452_v23  ;;  %v3205_v16 = vrot.slane %v6452_v23, %v5822_v59 }
0x496e   :  { %5294 = vrcp.f32 %v3205_v16 }
0x4978   :  { %v5295_v41 = vpop.eup %5294 }
0x4979   :  { %v3207_v45 = vmul.f32 %v5295_v41, %v3190_v63 }
0x497b   :  { %3211 = vperm.xlu1 %5202, %v3207_v45  }
0x497f   :  { %5205 = vset.pattern.permute.xlu1 %v7661_v43 }
0x49d8   :  { %v3167_v37 = vpop.permute.xlu0 %3166 }
0x49d9   :  { %v6458_v6 = vsub.f32 %v6341_v29, %v3167_v37 }
0x49db   :  { %7694 = vst [vmem:[#allocation59_spill] sm:$0xff] %v6458_v6  ;;  %v3195_v33 = vrot.slane %v6458_v6, %v5740_v40 }
0x49dd   :  { %3197 = vrot.lane.b32.xlu0 %v3195_v33, %s5626_s6 }
0x49fa   :  { %v3212_v54 = vpop.permute.xlu1 %3211 }
0x49fb   :  { %v3223_v39 = vmul.f32 %v3222_v50, %v3212_v54 }
0x49fd   :  { %v3225_v15 = vadd.f32 %v3223_v39, %v3148_v27 }
0x49ff   :  { %3236 = vrot.lane.b32.xlu1 %v3225_v15, %s5619_s28 }
0x4a4f   :  { %v3198_v9 = vpop.permute.xlu0 %3197 }
0x4a50   :  { %v3201_v29 = vsel %vm86_vm7, %v3191_v42, %v3198_v9 }
0x4a51   :  { %v3208_v16 = vmul.f32 %v5295_v41, %v3201_v29 }
0x4a53   :  { %3216 = vperm.xlu0 %5203, %v3208_v16  }
0x4a57   :  { %3242 = vrot.lane.b32.xlu0 %v3225_v15, %s5618_s27 }
0x4a58   :  { %5204 = vset.pattern.permute.xlu0 %v7661_v43 }
0x4a71   :  { %v3237_v27 = vpop.permute.xlu1 %3236 }
0x4ad2   :  { %v3217_v63 = vpop.permute.xlu0 %3216 }
0x4ad3   :  { %v3224_v45 = vmul.f32 %v3222_v50, %v3217_v63 }
0x4ad5   :  { %v3226_v37 = vadd.f32 %v3224_v45, %v3149_v1 }
0x4ad6   :  { %v3243_v33 = vpop.permute.xlu0 %3242 }
0x4ad7   :  { %3238 = vrot.lane.b32.xlu1 %v3226_v37, %s5619_s28  ;;  %v3248_v19 = vsel %vm105_vm3, %v3237_v27, %v3243_v33 }
0x4ad8   :  { %v3250_v62 = vmul.f32 %v5714_v7, %v3248_v19 }
0x4ada   :  { %v3252_v39 = vadd.f32 %v3250_v62, %v3225_v15 }
0x4adb   :  { %3244 = vrot.lane.b32.xlu1 %v3226_v37, %s5618_s27 }
0x4adc   :  { %v3256_v50 = vrot.slane %v3252_v39, 2  ;;  %v3261_v1 = vrot.slane %v3252_v39, 5 }
0x4b49   :  { %v3239_v47 = vpop.permute.xlu1 %3238 }
0x4b4d   :  { %v3245_v41 = vpop.permute.xlu1 %3244 }
0x4b4e   :  { %v3249_v54 = vsel %vm105_vm3, %v3239_v47, %v3245_v41 }
0x4b4f   :  { %v3251_v42 = vmul.f32 %v5714_v7, %v3249_v54 }
0x4b51   :  { %v3253_v9 = vadd.f32 %v3251_v42, %v3226_v37 }
0x4b53   :  { %v3257_v29 = vrot.slane %v3253_v9, 2 }
0x4b55   :  { %v3258_v16 = vsel %vm114_vm5, %v3256_v50, %v3257_v29  ;;  %v3263_v63 = vsel %vm122_vm6, %v3257_v29, %v3261_v1 }
0x4b56   :  { %v3264_v45 = vmul.f32 %v5724_v21, %v3258_v16  ;;  %v3265_v27 = vmul.f32 0.0, %v3263_v63 }
0x4b58   :  { %v3267_v33 = vadd.f32 %v3265_v27, %v3253_v9  ;;  %v3266_v6 = vadd.f32 %v3264_v45, %v3252_v39  ;;  %v6486_v9 = vld [vmem:[#allocation2 + $0x5] sm:$0x1] }
0x4b5a   :  { %v3269_v19 = vadd.f32 %v6329_v17, %v3267_v33  ;;  %v3268_v47 = vadd.f32 %v6332_v35, %v3266_v6 }
0x4b5c   :  { %3274 = vrot.lane.b32.xlu1 %v3269_v19, %s5622_s2  ;;  %3272 = vrot.lane.b32.xlu0 %v3268_v47, %s5622_s2  ;;  %v3293_v33 = vrot.slane %v3268_v47, 4 }
0x4bce   :  { %v3273_v15 = vpop.permute.xlu0 %3272  ;;  %v3275_v62 = vpop.permute.xlu1 %3274 }
0x4bcf   :  { %v3278_v37 = vadd.f32 %v3273_v15, %v3268_v47  ;;  %v3279_v54 = vadd.f32 %v3275_v62, %v3269_v19  ;;  %v3295_v15 = vadd.f32 %v3293_v33, %v3268_v47 }
0x4bd1   :  { %v3281_v41 = vrot.slane %v3278_v37, 4  ;;  %v3286_v1 = vrot.slane %v3279_v54, 4  ;;  %v3297_v6 = vsub.f32 0.0, %v3279_v54  ;;  %v3296_v29 = vsub.f32 0.0, %v3278_v37 }
0x4bd2   :  { %v3324_v62 = vrot.slane %v3295_v15, %v5740_v40 }
0x4bd3   :  { %v3283_v42 = vadd.f32 %v3281_v41, %v3278_v37  ;;  %v6489_v17 = vsub.f32 %v6486_v9, %v3286_v1 }
0x4bd5   :  { %v6482_v50 = vadd.f32 1.0, %v3283_v42  ;;  %7696 = vst [vmem:[#allocation61_spill] sm:$0xff] %v6489_v17  ;;  %v3301_v35 = vrot.slane %v6489_v17, %v5740_v40 }
0x4bd7   :  { %7695 = vst [vmem:[#allocation60_spill] sm:$0xff] %v6482_v50  ;;  %v3307_v39 = vrot.slane %v6482_v50, %v5740_v40  ;;  %v3303_v63 = vsel %vm86_vm7, %v3297_v6, %v3301_v35 }
0x4bd9   :  { %5296 = vrcp.f32 %v3307_v39 }
0x4be3   :  { %v5297_v16 = vpop.eup %5296 }
0x4be4   :  { %v3310_v45 = vmul.f32 %v5297_v16, %v3303_v63  ;;  %v3309_v27 = vmul.f32 %v5297_v16, %v3296_v29 }
0x4be6   :  { %3318 = vperm.xlu0 %5204, %v3310_v45  }
0x4bea   :  { %5207 = vset.pattern.permute.xlu0 %v7654_v53 }
0x4c65   :  { %v3319_v41 = vpop.permute.xlu0 %3318 }
0x4c66   :  { %v3326_v42 = vmul.f32 %v3324_v62, %v3319_v41 }
0x4c68   :  { %v3328_v1 = vadd.f32 %v3326_v42, %v3269_v19 }
0x4c6a   :  { %3333 = vrot.lane.b32.xlu1 %v3328_v1, %s5623_s29 }
0x4c6e   :  { %3313 = vperm.xlu1 %5205, %v3309_v27  }
0x4cdc   :  { %v3334_v37 = vpop.permute.xlu1 %3333 }
0x4cdd   :  { %v3338_v54 = vadd.f32 %v3334_v37, %v3328_v1 }
0x4cdf   :  { %v3345_v39 = vrot.slane %v3338_v54, 4 }
0x4ce1   :  { %3346 = vrot.lane.b32.xlu0 %v3345_v39, %s5624_s30 }
0x4ced   :  { %v3314_v35 = vpop.permute.xlu1 %3313 }
0x4cee   :  { %v3325_v6 = vmul.f32 %v3324_v62, %v3314_v35  ;;  %v3367_v62 = vsub.f32 0.0, %v3338_v54 }
0x4cf0   :  { %v3327_v29 = vadd.f32 %v3325_v6, %v3268_v47 }
0x4cf2   :  { %3331 = vrot.lane.b32.xlu1 %v3327_v29, %s5623_s29 }
0x4d53   :  { %v3347_v16 = vpop.permute.xlu0 %3346 }
0x4d54   :  { %v6501_v63 = vsub.f32 %v6486_v9, %v3347_v16 }
0x4d56   :  { %7697 = vst [vmem:[#allocation62_spill] sm:$0xff] %v6501_v63  ;;  %v3371_v19 = vrot.slane %v6501_v63, %v5740_v40 }
0x4d58   :  { %3373 = vrot.lane.b32.xlu0 %v3371_v19, %s5625_s5  ;;  %v3363_v19 = vrot.slane %v3327_v29, 5 }
0x4d64   :  { %v3332_v45 = vpop.permute.xlu1 %3331 }
0x4d65   :  { %v3337_v27 = vadd.f32 %v3332_v45, %v3327_v29  ;;  %v3365_v45 = vadd.f32 %v3363_v19, %v3327_v29 }
0x4d67   :  { %v3340_v33 = vrot.slane %v3337_v27, 5  ;;  %v3366_v6 = vsub.f32 0.0, %v3337_v27 }
0x4d69   :  { %v3342_v15 = vadd.f32 %v3340_v33, %v3337_v27  ;;  %v3398_v33 = vrot.slane %v3365_v45, %v5740_v40 }
0x4d6b   :  { %v6506_v41 = vadd.f32 1.0, %v3342_v15 }
0x4d6d   :  { %7698 = vst [vmem:[#allocation63_spill] sm:$0xff] %v6506_v41  ;;  %v3381_v47 = vrot.slane %v6506_v41, %v5740_v40 }
0x4d6f   :  { %5298 = vrcp.f32 %v3381_v47 }
0x4d79   :  { %v5299_v37 = vpop.eup %5298 }
0x4d7a   :  { %v3383_v16 = vmul.f32 %v5299_v37, %v3366_v6 }
0x4dca   :  { %v3374_v42 = vpop.permute.xlu0 %3373 }
0x4dcb   :  { %v3377_v39 = vsel %vm86_vm7, %v3367_v62, %v3374_v42 }
0x4dcc   :  { %v3384_v35 = vmul.f32 %v5299_v37, %v3377_v39 }
0x4dce   :  { %3392 = vperm.xlu1 %5205, %v3384_v35  }
0x4dd2   :  { %3387 = vperm.xlu1 %5205, %v3383_v16  }
0x4e4d   :  { %v3393_v15 = vpop.permute.xlu1 %3392 }
0x4e4e   :  { %v3400_v17 = vmul.f32 %v3398_v33, %v3393_v15 }
0x4e50   :  { %v3402_v50 = vadd.f32 %v3400_v17, %v3328_v1 }
0x4e51   :  { %v3388_v63 = vpop.permute.xlu1 %3387 }
0x4e52   :  { %v3399_v47 = vmul.f32 %v3398_v33, %v3388_v63  ;;  %3407 = vrot.lane.b32.xlu0 %v3402_v50, %s5626_s6 }
0x4e54   :  { %v3401_v54 = vadd.f32 %v3399_v47, %v3327_v29 }
0x4e56   :  { %3405 = vrot.lane.b32.xlu1 %v3401_v54, %s5626_s6 }
0x4ec4   :  { %v3408_v62 = vpop.permute.xlu0 %3407 }
0x4ec5   :  { %v3412_v42 = vadd.f32 %v3408_v62, %v3402_v50 }
0x4ec7   :  { %v3419_v27 = vrot.slane %v3412_v42, 4  ;;  %v3441_v19 = vsub.f32 0.0, %v3412_v42 }
0x4ec8   :  { %v3406_v17 = vpop.permute.xlu1 %3405 }
0x4ec9   :  { %3420 = vrot.lane.b32.xlu0 %v3419_v27, %s5627_s7  ;;  %v3411_v1 = vadd.f32 %v3406_v17, %v3401_v54 }
0x4ecb   :  { %v3414_v63 = vrot.slane %v3411_v1, 6  ;;  %v3440_v62 = vsub.f32 0.0, %v3411_v1 }
0x4ecd   :  { %v3416_v29 = vadd.f32 %v3414_v63, %v3411_v1 }
0x4ecf   :  { %v6522_v6 = vadd.f32 1.0, %v3416_v29 }
0x4ed1   :  { %7700 = vst [vmem:[#allocation65_spill] sm:$0xff] %v6522_v6  ;;  %v3455_v16 = vrot.slane %v6522_v6, %v5740_v40 }
0x4ed3   :  { %5300 = vrcp.f32 %v3455_v16 }
0x4edd   :  { %v5301_v33 = vpop.eup %5300 }
0x4ede   :  { %v3457_v27 = vmul.f32 %v5301_v33, %v3440_v62 }
0x4f3b   :  { %v3421_v37 = vpop.permute.xlu0 %3420 }
0x4f3c   :  { %v6517_v39 = vsub.f32 %v6486_v9, %v3421_v37  ;;  %v3437_v37 = vrot.slane %v3401_v54, 6 }
0x4f3e   :  { %7699 = vst [vmem:[#allocation64_spill] sm:$0xff] %v6517_v39  ;;  %v3445_v35 = vrot.slane %v6517_v39, %v5740_v40 }
0x4f40   :  { %3447 = vrot.lane.b32.xlu0 %v3445_v35, %s5619_s28  ;;  %v3439_v35 = vadd.f32 %v3437_v37, %v3401_v54 }
0x4f42   :  { %v3472_v17 = vrot.slane %v3439_v35, %v5740_v40 }
0x4fb2   :  { %v3448_v45 = vpop.permute.xlu0 %3447 }
0x4fb3   :  { %v3451_v15 = vsel %vm86_vm7, %v3441_v19, %v3448_v45 }
0x4fb4   :  { %v3458_v47 = vmul.f32 %v5301_v33, %v3451_v15 }
0x4fb6   :  { %3466 = vperm.xlu1 %5205, %v3458_v47  }
0x4fba   :  { %3461 = vperm.xlu1 %5205, %v3457_v27  }
0x5035   :  { %v3467_v63 = vpop.permute.xlu1 %3466 }
0x5036   :  { %v3474_v29 = vmul.f32 %v3472_v17, %v3467_v63 }
0x5038   :  { %v3476_v39 = vadd.f32 %v3474_v29, %v3402_v50 }
0x5039   :  { %v3462_v23 = vpop.permute.xlu1 %3461 }
0x503a   :  { %v3473_v16 = vmul.f32 %v3472_v17, %v3462_v23  ;;  %3481 = vrot.lane.b32.xlu0 %v3476_v39, %s5628_s8 }
0x503c   :  { %v3475_v42 = vadd.f32 %v3473_v16, %v3401_v54 }
0x503e   :  { %3479 = vrot.lane.b32.xlu1 %v3475_v42, %s5628_s8 }
0x50ac   :  { %v3482_v19 = vpop.permute.xlu0 %3481 }
0x50ad   :  { %v3486_v45 = vadd.f32 %v3482_v19, %v3476_v39 }
0x50af   :  { %v3493_v1 = vrot.slane %v3486_v45, 4  ;;  %v3515_v35 = vsub.f32 0.0, %v3486_v45 }
0x50b0   :  { %v3480_v23 = vpop.permute.xlu1 %3479 }
0x50b1   :  { %3494 = vrot.lane.b32.xlu0 %v3493_v1, %s5629_s9  ;;  %v3485_v50 = vadd.f32 %v3480_v23, %v3475_v42 }
0x50b3   :  { %v3488_v62 = vrot.slane %v3485_v50, 7  ;;  %v3514_v19 = vsub.f32 0.0, %v3485_v50 }
0x50b5   :  { %v3490_v54 = vadd.f32 %v3488_v62, %v3485_v50 }
0x50b7   :  { %v6538_v27 = vadd.f32 1.0, %v3490_v54 }
0x50b9   :  { %7702 = vst [vmem:[#allocation67_spill] sm:$0xff] %v6538_v27  ;;  %v3529_v37 = vrot.slane %v6538_v27, %v5740_v40 }
0x50bb   :  { %5302 = vrcp.f32 %v3529_v37 }
0x50c5   :  { %v5303_v63 = vpop.eup %5302 }
0x50c6   :  { %v3531_v1 = vmul.f32 %v5303_v63, %v3514_v19 }
0x5123   :  { %v3495_v33 = vpop.permute.xlu0 %3494 }
0x5124   :  { %v6533_v15 = vsub.f32 %v6486_v9, %v3495_v33  ;;  %v3511_v33 = vrot.slane %v3475_v42, 7 }
0x5126   :  { %7701 = vst [vmem:[#allocation66_spill] sm:$0xff] %v6533_v15  ;;  %v3519_v47 = vrot.slane %v6533_v15, %v5740_v40 }
0x5128   :  { %3521 = vrot.lane.b32.xlu0 %v3519_v47, %s5630_s10  ;;  %v3513_v47 = vadd.f32 %v3511_v33, %v3475_v42 }
0x512a   :  { %v3546_v23 = vrot.slane %v3513_v47, %v5740_v40 }
0x519a   :  { %v3522_v17 = vpop.permute.xlu0 %3521 }
0x519b   :  { %v3525_v29 = vsel %vm86_vm7, %v3515_v35, %v3522_v17 }
0x519c   :  { %v3532_v16 = vmul.f32 %v5303_v63, %v3525_v29 }
0x519e   :  { %3540 = vperm.xlu1 %5205, %v3532_v16  }
0x51a2   :  { %3535 = vperm.xlu1 %5205, %v3531_v1  }
0x51a6   :  { %5206 = vset.pattern.permute.xlu1 %v7654_v53 }
0x521d   :  { %v3541_v62 = vpop.permute.xlu1 %3540 }
0x521e   :  { %v3548_v54 = vmul.f32 %v3546_v23, %v3541_v62 }
0x5220   :  { %v3550_v37 = vadd.f32 %v3548_v54, %v3476_v39 }
0x5221   :  { %v3536_v45 = vpop.permute.xlu1 %3535 }
0x5222   :  { %v3547_v15 = vmul.f32 %v3546_v23, %v3536_v45  ;;  %3555 = vrot.lane.b32.xlu0 %v3550_v37, %s5628_s8 }
0x5224   :  { %v3549_v27 = vadd.f32 %v3547_v15, %v3475_v42 }
0x5226   :  { %3553 = vrot.lane.b32.xlu1 %v3549_v27, %s5628_s8 }
0x5294   :  { %v3556_v50 = vpop.permute.xlu0 %3555 }
0x5295   :  { %v3560_v35 = vadd.f32 %v3556_v50, %v3550_v37 }
0x5297   :  { %v3566_v17 = vrot.slane %v3560_v35, 4  ;;  %v3562_v1 = vrot.slane %v3560_v35, 7  ;;  %v3592_v47 = vsub.f32 0.0, %v3560_v35 }
0x5298   :  { %v3554_v39 = vpop.permute.xlu1 %3553 }
0x5299   :  { %3567 = vrot.lane.b32.xlu0 %v3566_v17, %s5629_s9  ;;  %v3559_v19 = vadd.f32 %v3554_v39, %v3549_v27 }
0x529b   :  { %v3564_v42 = vadd.f32 %v3562_v1, %v3559_v19  ;;  %v3591_v50 = vsub.f32 0.0, %v3559_v19 }
0x529d   :  { %v6555_v15 = vadd.f32 1.0, %v3564_v42 }
0x529f   :  { %7704 = vst [vmem:[#allocation69_spill] sm:$0xff] %v6555_v15  ;;  %v3606_v33 = vrot.slane %v6555_v15, %v5822_v59 }
0x52a1   :  { %5304 = vrcp.f32 %v3606_v33 }
0x52ab   :  { %v5305_v62 = vpop.eup %5304 }
0x52ac   :  { %v3608_v17 = vmul.f32 %v5305_v62, %v3591_v50 }
0x530b   :  { %v3568_v63 = vpop.permute.xlu0 %3567 }
0x530c   :  { %v6550_v29 = vsub.f32 %v6486_v9, %v3568_v63  ;;  %v3588_v63 = vrot.slane %v3550_v37, 7 }
0x530e   :  { %7703 = vst [vmem:[#allocation68_spill] sm:$0xff] %v6550_v29  ;;  %v3596_v16 = vrot.slane %v6550_v29, %v5740_v40 }
0x5310   :  { %3598 = vrot.lane.b32.xlu0 %v3596_v16, %s5630_s10  ;;  %v3590_v16 = vadd.f32 %v3588_v63, %v3549_v27 }
0x5312   :  { %v3623_v39 = vrot.slane %v3590_v16, %v5822_v59 }
0x5382   :  { %v3599_v23 = vpop.permute.xlu0 %3598 }
0x5383   :  { %v3602_v54 = vsel %vm86_vm7, %v3592_v47, %v3599_v23 }
0x5384   :  { %v3609_v45 = vmul.f32 %v5305_v62, %v3602_v54 }
0x5386   :  { %3617 = vperm.xlu1 %5206, %v3609_v45  }
0x538a   :  { %3612 = vperm.xlu1 %5206, %v3608_v17  }
0x5405   :  { %v3618_v1 = vpop.permute.xlu1 %3617 }
0x5406   :  { %v3625_v42 = vmul.f32 %v3623_v39, %v3618_v1 }
0x5408   :  { %v3627_v29 = vadd.f32 %v3625_v42, %v3550_v37 }
0x5409   :  { %v3613_v15 = vpop.permute.xlu1 %3612 }
0x540a   :  { %v3624_v33 = vmul.f32 %v3623_v39, %v3613_v15  ;;  %3632 = vrot.lane.b32.xlu0 %v3627_v29, %s5632_s11 }
0x540c   :  { %v3626_v35 = vadd.f32 %v3624_v33, %v3549_v27 }
0x540e   :  { %3630 = vrot.lane.b32.xlu1 %v3626_v35, %s5632_s11 }
0x547c   :  { %v3633_v47 = vpop.permute.xlu0 %3632 }
0x547d   :  { %v3637_v23 = vadd.f32 %v3633_v47, %v3627_v29 }
0x547f   :  { %v3641_v19 = vrot.slane %v3637_v23, 4  ;;  %v3665_v63 = vsub.f32 0.0, %v3637_v23 }
0x5480   :  { %v3631_v37 = vpop.permute.xlu1 %3630 }
0x5481   :  { %3642 = vrot.lane.b32.xlu0 %v3641_v19, %s5633_s12  ;;  %v3636_v15 = vadd.f32 %v3631_v37, %v3626_v35  ;;  %v3663_v19 = vadd.f32 %v3627_v29, %v3626_v35 }
0x5483   :  { %v3638_v50 = vadd.f32 %v3637_v23, %v3636_v15  ;;  %v3664_v33 = vsub.f32 0.0, %v3636_v15 }
0x5485   :  { %v6571_v27 = vadd.f32 1.0, %v3638_v50 }
0x5487   :  { %7706 = vst [vmem:[#allocation71_spill] sm:$0xff] %v6571_v27  ;;  %v3679_v17 = vrot.slane %v6571_v27, %v5822_v59 }
0x5489   :  { %5306 = vrcp.f32 %v3679_v17 }
0x5493   :  { %v5307_v39 = vpop.eup %5306 }
0x5494   :  { %v3681_v47 = vmul.f32 %v5307_v39, %v3664_v33 }
0x54f3   :  { %v3643_v62 = vpop.permute.xlu0 %3642 }
0x54f4   :  { %v6566_v54 = vsub.f32 %v6486_v9, %v3643_v62  ;;  %v3696_v62 = vrot.slane %v3663_v19, %v5822_v59 }
0x54f6   :  { %7705 = vst [vmem:[#allocation70_spill] sm:$0xff] %v6566_v54  ;;  %v3669_v45 = vrot.slane %v6566_v54, %v5740_v40 }
0x54f8   :  { %3671 = vrot.lane.b32.xlu0 %v3669_v45, %s5622_s2 }
0x556a   :  { %v3672_v16 = vpop.permute.xlu0 %3671 }
0x556b   :  { %v3675_v1 = vsel %vm86_vm7, %v3665_v63, %v3672_v16 }
0x556c   :  { %v3682_v42 = vmul.f32 %v5307_v39, %v3675_v1 }
0x556e   :  { %3690 = vperm.xlu1 %5206, %v3682_v42  }
0x5572   :  { %3685 = vperm.xlu1 %5206, %v3681_v47  }
0x55ed   :  { %v3691_v45 = vpop.permute.xlu1 %3690 }
0x55ee   :  { %v3698_v37 = vmul.f32 %v3696_v62, %v3691_v45 }
0x55f0   :  { %v3700_v50 = vadd.f32 %v3698_v37, %v3627_v29 }
0x55f1   :  { %v3686_v54 = vpop.permute.xlu1 %3685 }
0x55f2   :  { %v3697_v27 = vmul.f32 %v3696_v62, %v3686_v54  ;;  %3705 = vrot.lane.b32.xlu0 %v3700_v50, %s5634_s13 }
0x55f4   :  { %v3699_v23 = vadd.f32 %v3697_v27, %v3626_v35 }
0x55f6   :  { %3703 = vrot.lane.b32.xlu1 %v3699_v23, %s5634_s13 }
0x5664   :  { %v3706_v17 = vpop.permute.xlu0 %3705 }
0x5665   :  { %v3710_v63 = vadd.f32 %v3706_v17, %v3700_v50 }
0x5667   :  { %v3716_v16 = vrot.slane %v3710_v63, 4  ;;  %v3712_v42 = vrot.slane %v3710_v63, 1  ;;  %v3742_v47 = vsub.f32 0.0, %v3710_v63 }
0x5668   :  { %v3704_v29 = vpop.permute.xlu1 %3703 }
0x5669   :  { %3717 = vrot.lane.b32.xlu0 %v3716_v16, %s5635_s1  ;;  %v3709_v54 = vadd.f32 %v3704_v29, %v3699_v23 }
0x566b   :  { %v3714_v35 = vadd.f32 %v3712_v42, %v3709_v54  ;;  %v3741_v17 = vsub.f32 0.0, %v3709_v54 }
0x566d   :  { %v6587_v27 = vadd.f32 1.0, %v3714_v35 }
0x566f   :  { %7708 = vst [vmem:[#allocation73_spill] sm:$0xff] %v6587_v27  ;;  %v3756_v33 = vrot.slane %v6587_v27, %v5822_v59 }
0x5671   :  { %5308 = vrcp.f32 %v3756_v33 }
0x567b   :  { %v5309_v62 = vpop.eup %5308 }
0x567c   :  { %v3758_v16 = vmul.f32 %v5309_v62, %v3741_v17 }
0x56db   :  { %v3718_v15 = vpop.permute.xlu0 %3717 }
0x56dc   :  { %v6582_v39 = vsub.f32 %v6486_v9, %v3718_v15  ;;  %v3738_v15 = vrot.slane %v3700_v50, 1 }
0x56de   :  { %7707 = vst [vmem:[#allocation72_spill] sm:$0xff] %v6582_v39  ;;  %v3746_v1 = vrot.slane %v6582_v39, %v5740_v40 }
0x56e0   :  { %3748 = vrot.lane.b32.xlu0 %v3746_v1, %s5623_s29  ;;  %v3740_v1 = vadd.f32 %v3738_v15, %v3699_v23 }
0x56e2   :  { %v3773_v29 = vrot.slane %v3740_v1, %v5822_v59 }
0x5752   :  { %v3749_v19 = vpop.permute.xlu0 %3748 }
0x5753   :  { %v3752_v45 = vsel %vm86_vm7, %v3742_v47, %v3749_v19 }
0x5754   :  { %v3759_v37 = vmul.f32 %v5309_v62, %v3752_v45 }
0x5756   :  { %3767 = vperm.xlu1 %5206, %v3759_v37  }
0x575a   :  { %3762 = vperm.xlu1 %5206, %v3758_v16  }
0x57d5   :  { %v3768_v42 = vpop.permute.xlu1 %3767 }
0x57d6   :  { %v3775_v35 = vmul.f32 %v3773_v29, %v3768_v42 }
0x57d8   :  { %v3777_v39 = vadd.f32 %v3775_v35, %v3700_v50 }
0x57d9   :  { %v3763_v27 = vpop.permute.xlu1 %3762 }
0x57da   :  { %v3774_v33 = vmul.f32 %v3773_v29, %v3763_v27  ;;  %3782 = vrot.lane.b32.xlu0 %v3777_v39, %s5636_s14  ;;  %v3815_v35 = vrot.slane %v3777_v39, 2 }
0x57dc   :  { %v3776_v63 = vadd.f32 %v3774_v33, %v3699_v23 }
0x57de   :  { %3780 = vrot.lane.b32.xlu1 %v3776_v63, %s5636_s14  ;;  %v3817_v33 = vadd.f32 %v3815_v35, %v3776_v63 }
0x584c   :  { %v3783_v47 = vpop.permute.xlu0 %3782 }
0x584d   :  { %v3787_v19 = vadd.f32 %v3783_v47, %v3777_v39  ;;  %v3850_v47 = vrot.slane %v3817_v33, %v5822_v59 }
0x584f   :  { %v3793_v54 = vrot.slane %v3787_v19, 4  ;;  %v3789_v62 = vrot.slane %v3787_v19, 2 }
0x5850   :  { %v3781_v45 = vpop.permute.xlu1 %3780 }
0x5851   :  { %v3786_v37 = vadd.f32 %v3781_v45, %v3776_v63  ;;  %3794 = vrot.lane.b32.xlu0 %v3793_v54, %s5637_s15 }
0x5853   :  { %v3791_v17 = vadd.f32 %v3789_v62, %v3786_v37  ;;  %v3818_v27 = vsub.f32 0.0, %v3786_v37  ;;  %v3819_v37 = vsub.f32 0.0, %v3787_v19 }
0x5855   :  { %v6597_v16 = vadd.f32 1.0, %v3791_v17 }
0x5857   :  { %7709 = vst [vmem:[#allocation74_spill] sm:$0xff] %v6597_v16  ;;  %v3833_v50 = vrot.slane %v6597_v16, %v5822_v59 }
0x5859   :  { %5310 = vrcp.f32 %v3833_v50 }
0x5863   :  { %v5311_v15 = vpop.eup %5310 }
0x5864   :  { %v3835_v23 = vmul.f32 %v5311_v15, %v3818_v27 }
0x5866   :  { %3839 = vperm.xlu1 %5206, %v3835_v23  }
0x586a   :  { %5209 = vset.pattern.permute.xlu1 %v7661_v43 }
0x58c3   :  { %v3795_v1 = vpop.permute.xlu0 %3794 }
0x58c4   :  { %v6603_v29 = vsub.f32 %v6486_v9, %v3795_v1 }
0x58c6   :  { %7710 = vst [vmem:[#allocation75_spill] sm:$0xff] %v6603_v29  ;;  %v3823_v42 = vrot.slane %v6603_v29, %v5740_v40 }
0x58c8   :  { %3825 = vrot.lane.b32.xlu0 %v3823_v42, %s5626_s6 }
0x58e5   :  { %v3840_v54 = vpop.permute.xlu1 %3839 }
0x58e6   :  { %v3851_v45 = vmul.f32 %v3850_v47, %v3840_v54 }
0x58e8   :  { %v3853_v62 = vadd.f32 %v3851_v45, %v3776_v63 }
0x58ea   :  { %3864 = vrot.lane.b32.xlu1 %v3853_v62, %s5619_s28 }
0x593a   :  { %v3826_v17 = vpop.permute.xlu0 %3825 }
0x593b   :  { %v3829_v9 = vsel %vm86_vm7, %v3819_v37, %v3826_v17 }
0x593c   :  { %v3836_v50 = vmul.f32 %v5311_v15, %v3829_v9 }
0x593e   :  { %3844 = vperm.xlu0 %5207, %v3836_v50  }
0x5942   :  { %3870 = vrot.lane.b32.xlu0 %v3853_v62, %s5618_s27 }
0x5943   :  { %5208 = vset.pattern.permute.xlu0 %v7661_v43 }
0x595c   :  { %v3865_v63 = vpop.permute.xlu1 %3864 }
0x59bd   :  { %v3845_v27 = vpop.permute.xlu0 %3844 }
0x59be   :  { %v3852_v23 = vmul.f32 %v3850_v47, %v3845_v27 }
0x59c0   :  { %v3854_v1 = vadd.f32 %v3852_v23, %v3777_v39 }
0x59c1   :  { %v3871_v42 = vpop.permute.xlu0 %3870 }
0x59c2   :  { %3866 = vrot.lane.b32.xlu1 %v3854_v1, %s5619_s28  ;;  %v3876_v19 = vsel %vm105_vm3, %v3865_v63, %v3871_v42 }
0x59c3   :  { %v3878_v33 = vmul.f32 %v5714_v7, %v3876_v19  ;;  %v6623_v19 = vld [vmem:[#allocation7 + $0x8] sm:$0x1f] }
0x59c5   :  { %v3880_v45 = vadd.f32 %v3878_v33, %v3853_v62  ;;  %v6626_v62 = vld [vmem:[#allocation7] sm:$0xff] }
0x59c6   :  { %3872 = vrot.lane.b32.xlu1 %v3854_v1, %s5618_s27 }
0x59c7   :  { %v3884_v47 = vrot.slane %v3880_v45, 2  ;;  %v3889_v39 = vrot.slane %v3880_v45, 5 }
0x5a34   :  { %v3867_v35 = vpop.permute.xlu1 %3866 }
0x5a38   :  { %v3873_v15 = vpop.permute.xlu1 %3872 }
0x5a39   :  { %v3877_v54 = vsel %vm105_vm3, %v3867_v35, %v3873_v15 }
0x5a3a   :  { %v3879_v37 = vmul.f32 %v5714_v7, %v3877_v54 }
0x5a3c   :  { %v3881_v17 = vadd.f32 %v3879_v37, %v3854_v1 }
0x5a3e   :  { %v3885_v9 = vrot.slane %v3881_v17, 2 }
0x5a40   :  { %v3886_v50 = vsel %vm114_vm5, %v3884_v47, %v3885_v9  ;;  %v3891_v27 = vsel %vm122_vm6, %v3885_v9, %v3889_v39 }
0x5a41   :  { %v3892_v23 = vmul.f32 %v5724_v21, %v3886_v50  ;;  %v3893_v63 = vmul.f32 0.0, %v3891_v27  ;;  %v6635_v50 = vld [vmem:[#allocation2 + $0x6] sm:$0x1] }
0x5a43   :  { %v3895_v42 = vadd.f32 %v3893_v63, %v3881_v17  ;;  %v3894_v29 = vadd.f32 %v3892_v23, %v3880_v45 }
0x5a45   :  { %v3897_v35 = vadd.f32 %v6623_v19, %v3895_v42  ;;  %v3896_v1 = vadd.f32 %v6626_v62, %v3894_v29 }
0x5a47   :  { %3902 = vrot.lane.b32.xlu1 %v3897_v35, %s5622_s2  ;;  %3900 = vrot.lane.b32.xlu0 %v3896_v1, %s5622_s2 }
0x5ab9   :  { %v3901_v33 = vpop.permute.xlu0 %3900  ;;  %v3903_v54 = vpop.permute.xlu1 %3902 }
0x5aba   :  { %v3906_v15 = vadd.f32 %v3901_v33, %v3896_v1  ;;  %v3907_v47 = vadd.f32 %v3903_v54, %v3897_v35 }
0x5abc   :  { %v3909_v37 = vrot.slane %v3906_v15, 4  ;;  %v3914_v45 = vrot.slane %v3907_v47, 4  ;;  %v3925_v23 = vsub.f32 0.0, %v3907_v47  ;;  %v3924_v63 = vsub.f32 0.0, %v3906_v15 }
0x5abe   :  { %v3911_v39 = vadd.f32 %v3909_v37, %v3906_v15  ;;  %v6638_v29 = vsub.f32 %v6635_v50, %v3914_v45 }
0x5ac0   :  { %v6631_v17 = vadd.f32 1.0, %v3911_v39  ;;  %7712 = vst [vmem:[#allocation77_spill] sm:$0xff] %v6638_v29  ;;  %v3929_v27 = vrot.slane %v6638_v29, %v5740_v40  ;;  %v3921_v39 = vrot.slane %v3896_v1, 4 }
0x5ac2   :  { %7711 = vst [vmem:[#allocation76_spill] sm:$0xff] %v6631_v17  ;;  %v3935_v9 = vrot.slane %v6631_v17, %v5740_v40  ;;  %v3931_v33 = vsel %vm86_vm7, %v3925_v23, %v3929_v27  ;;  %v3923_v17 = vadd.f32 %v3921_v39, %v3896_v1 }
0x5ac4   :  { %5312 = vrcp.f32 %v3935_v9  ;;  %v3952_v9 = vrot.slane %v3923_v17, %v5740_v40 }
0x5ace   :  { %v5313_v42 = vpop.eup %5312 }
0x5acf   :  { %v3938_v54 = vmul.f32 %v5313_v42, %v3931_v33  ;;  %v3937_v37 = vmul.f32 %v5313_v42, %v3924_v63 }
0x5ad1   :  { %3946 = vperm.xlu0 %5208, %v3938_v54  }
0x5ad5   :  { %5211 = vset.pattern.permute.xlu0 %v7654_v53 }
0x5b50   :  { %v3947_v45 = vpop.permute.xlu0 %3946 }
0x5b51   :  { %v3954_v16 = vmul.f32 %v3952_v9, %v3947_v45 }
0x5b53   :  { %v3956_v6 = vadd.f32 %v3954_v16, %v3897_v35 }
0x5b55   :  { %3961 = vrot.lane.b32.xlu1 %v3956_v6, %s5623_s29 }
0x5b59   :  { %3941 = vperm.xlu1 %5209, %v3937_v37  }
0x5bc7   :  { %v3962_v15 = vpop.permute.xlu1 %3961 }
0x5bc8   :  { %v3966_v47 = vadd.f32 %v3962_v15, %v3956_v6 }
0x5bca   :  { %v3973_v29 = vrot.slane %v3966_v47, 4 }
0x5bcc   :  { %3974 = vrot.lane.b32.xlu0 %v3973_v29, %s5624_s30  ;;  %v3995_v29 = vsub.f32 0.0, %v3966_v47 }
0x5bd8   :  { %v3942_v27 = vpop.permute.xlu1 %3941 }
0x5bd9   :  { %v3953_v23 = vmul.f32 %v3952_v9, %v3942_v27 }
0x5bdb   :  { %v3955_v63 = vadd.f32 %v3953_v23, %v3896_v1 }
0x5bdd   :  { %3959 = vrot.lane.b32.xlu1 %v3955_v63, %s5623_s29 }
0x5c3e   :  { %v3975_v42 = vpop.permute.xlu0 %3974 }
0x5c3f   :  { %v6650_v33 = vsub.f32 %v6635_v50, %v3975_v42 }
0x5c41   :  { %7713 = vst [vmem:[#allocation78_spill] sm:$0xff] %v6650_v33  ;;  %v3999_v16 = vrot.slane %v6650_v33, %v5740_v40 }
0x5c43   :  { %4001 = vrot.lane.b32.xlu0 %v3999_v16, %s5625_s5  ;;  %v3991_v16 = vrot.slane %v3955_v63, 5 }
0x5c4f   :  { %v3960_v35 = vpop.permute.xlu1 %3959 }
0x5c50   :  { %v3965_v17 = vadd.f32 %v3960_v35, %v3955_v63  ;;  %v3993_v35 = vadd.f32 %v3991_v16, %v3955_v63 }
0x5c52   :  { %v3968_v54 = vrot.slane %v3965_v17, 5  ;;  %v3994_v23 = vsub.f32 0.0, %v3965_v17 }
0x5c54   :  { %v3970_v37 = vadd.f32 %v3968_v54, %v3965_v17  ;;  %v4026_v54 = vrot.slane %v3993_v35, %v5740_v40 }
0x5c56   :  { %v6655_v39 = vadd.f32 1.0, %v3970_v37 }
0x5c58   :  { %7714 = vst [vmem:[#allocation79_spill] sm:$0xff] %v6655_v39  ;;  %v4009_v1 = vrot.slane %v6655_v39, %v5740_v40 }
0x5c5a   :  { %5314 = vrcp.f32 %v4009_v1 }
0x5c64   :  { %v5315_v45 = vpop.eup %5314 }
0x5c65   :  { %v4011_v42 = vmul.f32 %v5315_v45, %v3994_v23 }
0x5cb5   :  { %v4002_v9 = vpop.permute.xlu0 %4001 }
0x5cb6   :  { %v4005_v15 = vsel %vm86_vm7, %v3995_v29, %v4002_v9 }
0x5cb7   :  { %v4012_v27 = vmul.f32 %v5315_v45, %v4005_v15 }
0x5cb9   :  { %4020 = vperm.xlu1 %5209, %v4012_v27  }
0x5cbd   :  { %4015 = vperm.xlu1 %5209, %v4011_v42  }
0x5d38   :  { %v4021_v37 = vpop.permute.xlu1 %4020 }
0x5d39   :  { %v4028_v33 = vmul.f32 %v4026_v54, %v4021_v37 }
0x5d3b   :  { %v4030_v41 = vadd.f32 %v4028_v33, %v3956_v6 }
0x5d3c   :  { %v4016_v39 = vpop.permute.xlu1 %4015 }
0x5d3d   :  { %v4027_v1 = vmul.f32 %v4026_v54, %v4016_v39  ;;  %4035 = vrot.lane.b32.xlu0 %v4030_v41, %s5626_s6 }
0x5d3f   :  { %v4029_v47 = vadd.f32 %v4027_v1, %v3955_v63 }
0x5d41   :  { %4033 = vrot.lane.b32.xlu1 %v4029_v47, %s5626_s6 }
0x5daf   :  { %v4036_v29 = vpop.permute.xlu0 %4035 }
0x5db0   :  { %v4040_v9 = vadd.f32 %v4036_v29, %v4030_v41 }
0x5db2   :  { %v4047_v17 = vrot.slane %v4040_v9, 4  ;;  %v4069_v16 = vsub.f32 0.0, %v4040_v9 }
0x5db3   :  { %v4034_v6 = vpop.permute.xlu1 %4033 }
0x5db4   :  { %4048 = vrot.lane.b32.xlu0 %v4047_v17, %s5627_s7  ;;  %v4039_v33 = vadd.f32 %v4034_v6, %v4029_v47 }
0x5db6   :  { %v4042_v39 = vrot.slane %v4039_v33, 6  ;;  %v4068_v29 = vsub.f32 0.0, %v4039_v33 }
0x5db8   :  { %v4044_v63 = vadd.f32 %v4042_v39, %v4039_v33 }
0x5dba   :  { %v6671_v23 = vadd.f32 1.0, %v4044_v63 }
0x5dbc   :  { %7716 = vst [vmem:[#allocation81_spill] sm:$0xff] %v6671_v23  ;;  %v4083_v42 = vrot.slane %v6671_v23, %v5740_v40 }
0x5dbe   :  { %5316 = vrcp.f32 %v4083_v42 }
0x5dc8   :  { %v5317_v54 = vpop.eup %5316 }
0x5dc9   :  { %v4085_v17 = vmul.f32 %v5317_v54, %v4068_v29 }
0x5e26   :  { %v4049_v45 = vpop.permute.xlu0 %4048 }
0x5e27   :  { %v6666_v15 = vsub.f32 %v6635_v50, %v4049_v45  ;;  %v4065_v45 = vrot.slane %v4029_v47, 6 }
0x5e29   :  { %7715 = vst [vmem:[#allocation80_spill] sm:$0xff] %v6666_v15  ;;  %v4073_v27 = vrot.slane %v6666_v15, %v5740_v40 }
0x5e2b   :  { %4075 = vrot.lane.b32.xlu0 %v4073_v27, %s5619_s28  ;;  %v4067_v27 = vadd.f32 %v4065_v45, %v4029_v47 }
0x5e2d   :  { %v4100_v6 = vrot.slane %v4067_v27, %v5740_v40 }
0x5e9d   :  { %v4076_v35 = vpop.permute.xlu0 %4075 }
0x5e9e   :  { %v4079_v37 = vsel %vm86_vm7, %v4069_v16, %v4076_v35 }
0x5e9f   :  { %v4086_v1 = vmul.f32 %v5317_v54, %v4079_v37 }
0x5ea1   :  { %4094 = vperm.xlu1 %5209, %v4086_v1  }
0x5ea5   :  { %4089 = vperm.xlu1 %5209, %v4085_v17  }
0x5f20   :  { %v4095_v39 = vpop.permute.xlu1 %4094 }
0x5f21   :  { %v4102_v63 = vmul.f32 %v4100_v6, %v4095_v39 }
0x5f23   :  { %v4104_v15 = vadd.f32 %v4102_v63, %v4030_v41 }
0x5f24   :  { %v4090_v23 = vpop.permute.xlu1 %4089 }
0x5f25   :  { %v4101_v42 = vmul.f32 %v4100_v6, %v4090_v23  ;;  %4109 = vrot.lane.b32.xlu0 %v4104_v15, %s5628_s8 }
0x5f27   :  { %v4103_v9 = vadd.f32 %v4101_v42, %v4029_v47 }
0x5f29   :  { %4107 = vrot.lane.b32.xlu1 %v4103_v9, %s5628_s8 }
0x5f97   :  { %v4110_v16 = vpop.permute.xlu0 %4109 }
0x5f98   :  { %v4114_v35 = vadd.f32 %v4110_v16, %v4104_v15 }
0x5f9a   :  { %v4121_v33 = vrot.slane %v4114_v35, 4  ;;  %v4143_v27 = vsub.f32 0.0, %v4114_v35 }
0x5f9b   :  { %v4108_v41 = vpop.permute.xlu1 %4107 }
0x5f9c   :  { %4122 = vrot.lane.b32.xlu0 %v4121_v33, %s5629_s9  ;;  %v4113_v23 = vadd.f32 %v4108_v41, %v4103_v9 }
0x5f9e   :  { %v4116_v29 = vrot.slane %v4113_v23, 7  ;;  %v4142_v16 = vsub.f32 0.0, %v4113_v23 }
0x5fa0   :  { %v4118_v47 = vadd.f32 %v4116_v29, %v4113_v23 }
0x5fa2   :  { %v6687_v17 = vadd.f32 1.0, %v4118_v47 }
0x5fa4   :  { %7718 = vst [vmem:[#allocation83_spill] sm:$0xff] %v6687_v17  ;;  %v4157_v45 = vrot.slane %v6687_v17, %v5740_v40 }
0x5fa6   :  { %5318 = vrcp.f32 %v4157_v45 }
0x5fb0   :  { %v5319_v39 = vpop.eup %5318 }
0x5fb1   :  { %v4159_v33 = vmul.f32 %v5319_v39, %v4142_v16 }
0x600e   :  { %v4123_v54 = vpop.permute.xlu0 %4122 }
0x600f   :  { %v6682_v37 = vsub.f32 %v6635_v50, %v4123_v54  ;;  %v4139_v54 = vrot.slane %v4103_v9, 7 }
0x6011   :  { %7717 = vst [vmem:[#allocation82_spill] sm:$0xff] %v6682_v37  ;;  %v4147_v1 = vrot.slane %v6682_v37, %v5740_v40 }
0x6013   :  { %4149 = vrot.lane.b32.xlu0 %v4147_v1, %s5630_s10  ;;  %v4141_v1 = vadd.f32 %v4139_v54, %v4103_v9 }
0x6015   :  { %v4174_v41 = vrot.slane %v4141_v1, %v5740_v40 }
0x6085   :  { %v4150_v6 = vpop.permute.xlu0 %4149 }
0x6086   :  { %v4153_v63 = vsel %vm86_vm7, %v4143_v27, %v4150_v6 }
0x6087   :  { %v4160_v42 = vmul.f32 %v5319_v39, %v4153_v63 }
0x6089   :  { %4168 = vperm.xlu1 %5209, %v4160_v42  }
0x608d   :  { %4163 = vperm.xlu1 %5209, %v4159_v33  }
0x6091   :  { %5210 = vset.pattern.permute.xlu1 %v7654_v53 }
0x6108   :  { %v4169_v29 = vpop.permute.xlu1 %4168 }
0x6109   :  { %v4176_v47 = vmul.f32 %v4174_v41, %v4169_v29 }
0x610b   :  { %v4178_v45 = vadd.f32 %v4176_v47, %v4104_v15 }
0x610c   :  { %v4164_v35 = vpop.permute.xlu1 %4163 }
0x610d   :  { %v4175_v37 = vmul.f32 %v4174_v41, %v4164_v35  ;;  %4183 = vrot.lane.b32.xlu0 %v4178_v45, %s5628_s8 }
0x610f   :  { %v4177_v17 = vadd.f32 %v4175_v37, %v4103_v9 }
0x6111   :  { %4181 = vrot.lane.b32.xlu1 %v4177_v17, %s5628_s8 }
0x617f   :  { %v4184_v23 = vpop.permute.xlu0 %4183 }
0x6180   :  { %v4188_v27 = vadd.f32 %v4184_v23, %v4178_v45 }
0x6182   :  { %v4194_v6 = vrot.slane %v4188_v27, 4  ;;  %v4190_v33 = vrot.slane %v4188_v27, 7  ;;  %v4220_v1 = vsub.f32 0.0, %v4188_v27 }
0x6183   :  { %v4182_v15 = vpop.permute.xlu1 %4181 }
0x6184   :  { %4195 = vrot.lane.b32.xlu0 %v4194_v6, %s5629_s9  ;;  %v4187_v16 = vadd.f32 %v4182_v15, %v4177_v17 }
0x6186   :  { %v4192_v9 = vadd.f32 %v4190_v33, %v4187_v16  ;;  %v4219_v23 = vsub.f32 0.0, %v4187_v16 }
0x6188   :  { %v6704_v37 = vadd.f32 1.0, %v4192_v9 }
0x618a   :  { %7720 = vst [vmem:[#allocation85_spill] sm:$0xff] %v6704_v37  ;;  %v4234_v54 = vrot.slane %v6704_v37, %v5822_v59 }
0x618c   :  { %5320 = vrcp.f32 %v4234_v54 }
0x6196   :  { %v5321_v29 = vpop.eup %5320 }
0x6197   :  { %v4236_v6 = vmul.f32 %v5321_v29, %v4219_v23 }
0x61f6   :  { %v4196_v39 = vpop.permute.xlu0 %4195 }
0x61f7   :  { %v6699_v63 = vsub.f32 %v6635_v50, %v4196_v39  ;;  %v4216_v39 = vrot.slane %v4178_v45, 7 }
0x61f9   :  { %7719 = vst [vmem:[#allocation84_spill] sm:$0xff] %v6699_v63  ;;  %v4224_v42 = vrot.slane %v6699_v63, %v5740_v40 }
0x61fb   :  { %4226 = vrot.lane.b32.xlu0 %v4224_v42, %s5630_s10  ;;  %v4218_v42 = vadd.f32 %v4216_v39, %v4177_v17 }
0x61fd   :  { %v4251_v15 = vrot.slane %v4218_v42, %v5822_v59 }
0x626d   :  { %v4227_v41 = vpop.permute.xlu0 %4226 }
0x626e   :  { %v4230_v47 = vsel %vm86_vm7, %v4220_v1, %v4227_v41 }
0x626f   :  { %v4237_v35 = vmul.f32 %v5321_v29, %v4230_v47 }
0x6271   :  { %4245 = vperm.xlu1 %5210, %v4237_v35  }
0x6275   :  { %4240 = vperm.xlu1 %5210, %v4236_v6  }
0x62f0   :  { %v4246_v33 = vpop.permute.xlu1 %4245 }
0x62f1   :  { %v4253_v9 = vmul.f32 %v4251_v15, %v4246_v33 }
0x62f3   :  { %v4255_v63 = vadd.f32 %v4253_v9, %v4178_v45 }
0x62f4   :  { %v4241_v37 = vpop.permute.xlu1 %4240 }
0x62f5   :  { %v4252_v54 = vmul.f32 %v4251_v15, %v4241_v37  ;;  %4260 = vrot.lane.b32.xlu0 %v4255_v63, %s5632_s11 }
0x62f7   :  { %v4254_v27 = vadd.f32 %v4252_v54, %v4177_v17 }
0x62f9   :  { %4258 = vrot.lane.b32.xlu1 %v4254_v27, %s5632_s11 }
0x6367   :  { %v4261_v1 = vpop.permute.xlu0 %4260 }
0x6368   :  { %v4265_v41 = vadd.f32 %v4261_v1, %v4255_v63 }
0x636a   :  { %v4269_v16 = vrot.slane %v4265_v41, 4  ;;  %v4293_v39 = vsub.f32 0.0, %v4265_v41 }
0x636b   :  { %v4259_v45 = vpop.permute.xlu1 %4258 }
0x636c   :  { %4270 = vrot.lane.b32.xlu0 %v4269_v16, %s5633_s12  ;;  %v4264_v37 = vadd.f32 %v4259_v45, %v4254_v27  ;;  %v4291_v16 = vadd.f32 %v4255_v63, %v4254_v27 }
0x636e   :  { %v4266_v23 = vadd.f32 %v4265_v41, %v4264_v37  ;;  %v4292_v54 = vsub.f32 0.0, %v4264_v37 }
0x6370   :  { %v6720_v17 = vadd.f32 1.0, %v4266_v23 }
0x6372   :  { %7722 = vst [vmem:[#allocation87_spill] sm:$0xff] %v6720_v17  ;;  %v4307_v6 = vrot.slane %v6720_v17, %v5822_v59 }
0x6374   :  { %5322 = vrcp.f32 %v4307_v6 }
0x637e   :  { %v5323_v15 = vpop.eup %5322 }
0x637f   :  { %v4309_v1 = vmul.f32 %v5323_v15, %v4292_v54 }
0x63de   :  { %v4271_v29 = vpop.permute.xlu0 %4270 }
0x63df   :  { %v6715_v47 = vsub.f32 %v6635_v50, %v4271_v29  ;;  %v4324_v29 = vrot.slane %v4291_v16, %v5822_v59 }
0x63e1   :  { %7721 = vst [vmem:[#allocation86_spill] sm:$0xff] %v6715_v47  ;;  %v4297_v35 = vrot.slane %v6715_v47, %v5740_v40 }
0x63e3   :  { %4299 = vrot.lane.b32.xlu0 %v4297_v35, %s5622_s2 }
0x6455   :  { %v4300_v42 = vpop.permute.xlu0 %4299 }
0x6456   :  { %v4303_v33 = vsel %vm86_vm7, %v4293_v39, %v4300_v42 }
0x6457   :  { %v4310_v9 = vmul.f32 %v5323_v15, %v4303_v33 }
0x6459   :  { %4318 = vperm.xlu1 %5210, %v4310_v9  }
0x645d   :  { %4313 = vperm.xlu1 %5210, %v4309_v1  }
0x64d8   :  { %v4319_v35 = vpop.permute.xlu1 %4318 }
0x64d9   :  { %v4326_v45 = vmul.f32 %v4324_v29, %v4319_v35 }
0x64db   :  { %v4328_v23 = vadd.f32 %v4326_v45, %v4255_v63 }
0x64dc   :  { %v4314_v47 = vpop.permute.xlu1 %4313 }
0x64dd   :  { %v4325_v17 = vmul.f32 %v4324_v29, %v4314_v47  ;;  %4333 = vrot.lane.b32.xlu0 %v4328_v23, %s5634_s13 }
0x64df   :  { %v4327_v41 = vadd.f32 %v4325_v17, %v4254_v27 }
0x64e1   :  { %4331 = vrot.lane.b32.xlu1 %v4327_v41, %s5634_s13 }
0x654f   :  { %v4334_v6 = vpop.permute.xlu0 %4333 }
0x6550   :  { %v4338_v39 = vadd.f32 %v4334_v6, %v4328_v23 }
0x6552   :  { %v4344_v42 = vrot.slane %v4338_v39, 4  ;;  %v4340_v9 = vrot.slane %v4338_v39, 1  ;;  %v4370_v1 = vsub.f32 0.0, %v4338_v39 }
0x6553   :  { %v4332_v63 = vpop.permute.xlu1 %4331 }
0x6554   :  { %4345 = vrot.lane.b32.xlu0 %v4344_v42, %s5635_s1  ;;  %v4337_v47 = vadd.f32 %v4332_v63, %v4327_v41 }
0x6556   :  { %v4342_v27 = vadd.f32 %v4340_v9, %v4337_v47  ;;  %v4369_v6 = vsub.f32 0.0, %v4337_v47 }
0x6558   :  { %v6736_v17 = vadd.f32 1.0, %v4342_v27 }
0x655a   :  { %7724 = vst [vmem:[#allocation89_spill] sm:$0xff] %v6736_v17  ;;  %v4384_v54 = vrot.slane %v6736_v17, %v5822_v59 }
0x655c   :  { %5324 = vrcp.f32 %v4384_v54 }
0x6566   :  { %v5325_v29 = vpop.eup %5324 }
0x6567   :  { %v4386_v42 = vmul.f32 %v5325_v29, %v4369_v6 }
0x65c6   :  { %v4346_v37 = vpop.permute.xlu0 %4345 }
0x65c7   :  { %v6731_v15 = vsub.f32 %v6635_v50, %v4346_v37  ;;  %v4366_v37 = vrot.slane %v4328_v23, 1 }
0x65c9   :  { %7723 = vst [vmem:[#allocation88_spill] sm:$0xff] %v6731_v15  ;;  %v4374_v33 = vrot.slane %v6731_v15, %v5740_v40 }
0x65cb   :  { %4376 = vrot.lane.b32.xlu0 %v4374_v33, %s5623_s29  ;;  %v4368_v33 = vadd.f32 %v4366_v37, %v4327_v41 }
0x65cd   :  { %v4401_v63 = vrot.slane %v4368_v33, %v5822_v59 }
0x663d   :  { %v4377_v16 = vpop.permute.xlu0 %4376 }
0x663e   :  { %v4380_v35 = vsel %vm86_vm7, %v4370_v1, %v4377_v16 }
0x663f   :  { %v4387_v45 = vmul.f32 %v5325_v29, %v4380_v35 }
0x6641   :  { %4395 = vperm.xlu1 %5210, %v4387_v45  }
0x6645   :  { %4390 = vperm.xlu1 %5210, %v4386_v42  }
0x66c0   :  { %v4396_v9 = vpop.permute.xlu1 %4395 }
0x66c1   :  { %v4403_v27 = vmul.f32 %v4401_v63, %v4396_v9 }
0x66c3   :  { %v4405_v15 = vadd.f32 %v4403_v27, %v4328_v23 }
0x66c4   :  { %v4391_v17 = vpop.permute.xlu1 %4390 }
0x66c5   :  { %v4402_v54 = vmul.f32 %v4401_v63, %v4391_v17  ;;  %4410 = vrot.lane.b32.xlu0 %v4405_v15, %s5636_s14  ;;  %v4443_v27 = vrot.slane %v4405_v15, 2 }
0x66c7   :  { %v4404_v39 = vadd.f32 %v4402_v54, %v4327_v41 }
0x66c9   :  { %4408 = vrot.lane.b32.xlu1 %v4404_v39, %s5636_s14  ;;  %v4445_v54 = vadd.f32 %v4443_v27, %v4404_v39 }
0x6737   :  { %v4411_v1 = vpop.permute.xlu0 %4410 }
0x6738   :  { %v4415_v16 = vadd.f32 %v4411_v1, %v4405_v15  ;;  %v4478_v1 = vrot.slane %v4445_v54, %v5822_v59 }
0x673a   :  { %v4421_v47 = vrot.slane %v4415_v16, 4  ;;  %v4417_v29 = vrot.slane %v4415_v16, 2 }
0x673b   :  { %v4409_v35 = vpop.permute.xlu1 %4408 }
0x673c   :  { %v4414_v45 = vadd.f32 %v4409_v35, %v4404_v39  ;;  %4422 = vrot.lane.b32.xlu0 %v4421_v47, %s5637_s15 }
0x673e   :  { %v4419_v6 = vadd.f32 %v4417_v29, %v4414_v45  ;;  %v4446_v17 = vsub.f32 0.0, %v4414_v45  ;;  %v4447_v45 = vsub.f32 0.0, %v4415_v16 }
0x6740   :  { %v6746_v42 = vadd.f32 1.0, %v4419_v6 }
0x6742   :  { %v4461_v23 = vrot.slane %v6746_v42, %v5822_v59 }
0x6744   :  { %5326 = vrcp.f32 %v4461_v23 }
0x674e   :  { %v5327_v37 = vpop.eup %5326 }
0x674f   :  { %v4463_v41 = vmul.f32 %v5327_v37, %v4446_v17 }
0x6751   :  { %4467 = vperm.xlu1 %5210, %v4463_v41  }
0x6755   :  { %5213 = vset.pattern.permute.xlu1 %v7661_v43 }
0x67ae   :  { %v4423_v33 = vpop.permute.xlu0 %4422 }
0x67af   :  { %v6752_v63 = vsub.f32 %v6635_v50, %v4423_v33 }
0x67b1   :  { %7725 = vst [vmem:[#allocation90_spill] sm:$0xff] %v6752_v63  ;;  %v4451_v9 = vrot.slane %v6752_v63, %v5740_v40 }
0x67b3   :  { %4453 = vrot.lane.b32.xlu0 %v4451_v9, %s5626_s6 }
0x67d0   :  { %v4468_v47 = vpop.permute.xlu1 %4467 }
0x67d1   :  { %v4479_v35 = vmul.f32 %v4478_v1, %v4468_v47 }
0x67d3   :  { %v4481_v29 = vadd.f32 %v4479_v35, %v4404_v39 }
0x67d5   :  { %4492 = vrot.lane.b32.xlu1 %v4481_v29, %s5619_s28 }
0x6825   :  { %v4454_v6 = vpop.permute.xlu0 %4453 }
0x6826   :  { %v4457_v50 = vsel %vm86_vm7, %v4447_v45, %v4454_v6 }
0x6827   :  { %v4464_v23 = vmul.f32 %v5327_v37, %v4457_v50 }
0x6829   :  { %4472 = vperm.xlu0 %5211, %v4464_v23  }
0x682d   :  { %4498 = vrot.lane.b32.xlu0 %v4481_v29, %s5618_s27 }
0x682e   :  { %5212 = vset.pattern.permute.xlu0 %v7661_v43 }
0x6847   :  { %v4493_v39 = vpop.permute.xlu1 %4492 }
0x68a8   :  { %v4473_v17 = vpop.permute.xlu0 %4472 }
0x68a9   :  { %v4480_v41 = vmul.f32 %v4478_v1, %v4473_v17 }
0x68ab   :  { %v4482_v33 = vadd.f32 %v4480_v41, %v4405_v15 }
0x68ac   :  { %v4499_v9 = vpop.permute.xlu0 %4498 }
0x68ad   :  { %4494 = vrot.lane.b32.xlu1 %v4482_v33, %s5619_s28  ;;  %v4504_v16 = vsel %vm105_vm3, %v4493_v39, %v4499_v9 }
0x68ae   :  { %v4506_v54 = vmul.f32 %v5714_v7, %v4504_v16 }
0x68b0   :  { %v4508_v35 = vadd.f32 %v4506_v54, %v4481_v29 }
0x68b1   :  { %4500 = vrot.lane.b32.xlu1 %v4482_v33, %s5618_s27 }
0x68b2   :  { %v4512_v1 = vrot.slane %v4508_v35, 2  ;;  %v4517_v15 = vrot.slane %v4508_v35, 5 }
0x691f   :  { %v4495_v27 = vpop.permute.xlu1 %4494 }
0x6923   :  { %v4501_v37 = vpop.permute.xlu1 %4500 }
0x6924   :  { %v4505_v47 = vsel %vm105_vm3, %v4495_v27, %v4501_v37 }
0x6925   :  { %v4507_v43 = vmul.f32 %v5714_v7, %v4505_v47 }
0x6927   :  { %v4509_v45 = vadd.f32 %v4507_v43, %v4482_v33 }
0x6929   :  { %v4513_v6 = vrot.slane %v4509_v45, 2 }
0x692b   :  { %v4514_v50 = vsel %vm114_vm5, %v4512_v1, %v4513_v6  ;;  %v4519_v23 = vsel %vm122_vm6, %v4513_v6, %v4517_v15 }
0x692c   :  { %v4520_v17 = vmul.f32 %v5724_v21, %v4514_v50  ;;  %v4521_v41 = vmul.f32 0.0, %v4519_v23 }
0x692e   :  { %v4523_v39 = vadd.f32 %v4521_v41, %v4509_v45  ;;  %v4522_v9 = vadd.f32 %v4520_v17, %v4508_v35  ;;  %v6780_v45 = vld [vmem:[#allocation2 + $0x7] sm:$0x1] }
0x6930   :  { %v4525_v16 = vadd.f32 %v6623_v19, %v4523_v39  ;;  %v4524_v27 = vadd.f32 %v6626_v62, %v4522_v9 }
0x6932   :  { %4530 = vrot.lane.b32.xlu1 %v4525_v16, %s5622_s2  ;;  %4528 = vrot.lane.b32.xlu0 %v4524_v27, %s5622_s2  ;;  %v4549_v41 = vrot.slane %v4524_v27, 4 }
0x6934   :  { %v4551_v39 = vadd.f32 %v4549_v41, %v4524_v27 }
0x6936   :  { %v4580_v9 = vrot.slane %v4551_v39, %v5740_v40 }
0x69a4   :  { %v4529_v7 = vpop.permute.xlu0 %4528  ;;  %v4531_v33 = vpop.permute.xlu1 %4530 }
0x69a5   :  { %v4534_v29 = vadd.f32 %v4529_v7, %v4524_v27  ;;  %v4535_v37 = vadd.f32 %v4531_v33, %v4525_v16 }
0x69a7   :  { %v4537_v54 = vrot.slane %v4534_v29, 4  ;;  %v4542_v21 = vrot.slane %v4535_v37, 4  ;;  %v4553_v1 = vsub.f32 0.0, %v4535_v37  ;;  %v4552_v15 = vsub.f32 0.0, %v4534_v29 }
0x69a9   :  { %v4539_v47 = vadd.f32 %v4537_v54, %v4534_v29  ;;  %v6783_v19 = vsub.f32 %v6780_v45, %v4542_v21 }
0x69ab   :  { %v6776_v43 = vadd.f32 1.0, %v4539_v47  ;;  %7727 = vst [vmem:[#allocation92_spill] sm:$0xff] %v6783_v19  ;;  %v4557_v62 = vrot.slane %v6783_v19, %v5740_v40 }
0x69ad   :  { %7726 = vst [vmem:[#allocation91_spill] sm:$0xff] %v6776_v43  ;;  %v4563_v35 = vrot.slane %v6776_v43, %v5740_v40  ;;  %v4559_v50 = vsel %vm86_vm7, %v4553_v1, %v4557_v62 }
0x69af   :  { %5328 = vrcp.f32 %v4563_v35 }
0x69b9   :  { %v5329_v6 = vpop.eup %5328 }
0x69ba   :  { %v4566_v23 = vmul.f32 %v5329_v6, %v4559_v50  ;;  %v4565_v17 = vmul.f32 %v5329_v6, %v4552_v15 }
0x69bc   :  { %4574 = vperm.xlu0 %5212, %v4566_v23  }
0x69c0   :  { %5215 = vset.pattern.permute.xlu0 %v7654_v53 }
0x6a3b   :  { %v4575_v7 = vpop.permute.xlu0 %4574 }
0x6a3c   :  { %v4582_v33 = vmul.f32 %v4580_v9, %v4575_v7 }
0x6a3e   :  { %v4584_v54 = vadd.f32 %v4582_v33, %v4525_v16 }
0x6a40   :  { %4589 = vrot.lane.b32.xlu1 %v4584_v54, %s5623_s29 }
0x6a44   :  { %4569 = vperm.xlu1 %5213, %v4565_v17  }
0x6ab2   :  { %v4590_v29 = vpop.permute.xlu1 %4589 }
0x6ab3   :  { %v4594_v37 = vadd.f32 %v4590_v29, %v4584_v54 }
0x6ab5   :  { %v4601_v47 = vrot.slane %v4594_v37, 4  ;;  %v4623_v39 = vsub.f32 0.0, %v4594_v37 }
0x6ab7   :  { %4602 = vrot.lane.b32.xlu0 %v4601_v47, %s5624_s30 }
0x6ac3   :  { %v4570_v21 = vpop.permute.xlu1 %4569 }
0x6ac4   :  { %v4581_v35 = vmul.f32 %v4580_v9, %v4570_v21 }
0x6ac6   :  { %v4583_v62 = vadd.f32 %v4581_v35, %v4524_v27 }
0x6ac8   :  { %4587 = vrot.lane.b32.xlu1 %v4583_v62, %s5623_s29  ;;  %v4619_v35 = vrot.slane %v4583_v62, 5 }
0x6b29   :  { %v4603_v1 = vpop.permute.xlu0 %4602 }
0x6b2a   :  { %v6795_v15 = vsub.f32 %v6780_v45, %v4603_v1  ;;  %v4621_v1 = vadd.f32 %v4619_v35, %v4583_v62 }
0x6b2c   :  { %7728 = vst [vmem:[#allocation93_spill] sm:$0xff] %v6795_v15  ;;  %v4627_v16 = vrot.slane %v6795_v15, %v5740_v40 }
0x6b2e   :  { %4629 = vrot.lane.b32.xlu0 %v4627_v16, %s5625_s5  ;;  %v4654_v16 = vrot.slane %v4621_v1, %v5740_v40 }
0x6b3a   :  { %v4588_v6 = vpop.permute.xlu1 %4587 }
0x6b3b   :  { %v4593_v50 = vadd.f32 %v4588_v6, %v4583_v62 }
0x6b3d   :  { %v4596_v23 = vrot.slane %v4593_v50, 5  ;;  %v4622_v47 = vsub.f32 0.0, %v4593_v50 }
0x6b3f   :  { %v4598_v17 = vadd.f32 %v4596_v23, %v4593_v50 }
0x6b41   :  { %v6800_v41 = vadd.f32 1.0, %v4598_v17 }
0x6b43   :  { %v4637_v27 = vrot.slane %v6800_v41, %v5740_v40 }
0x6b45   :  { %5330 = vrcp.f32 %v4637_v27 }
0x6b4f   :  { %v5331_v7 = vpop.eup %5330 }
0x6b50   :  { %v4639_v21 = vmul.f32 %v5331_v7, %v4622_v47 }
0x6ba0   :  { %v4630_v9 = vpop.permute.xlu0 %4629 }
0x6ba1   :  { %v4633_v33 = vsel %vm86_vm7, %v4623_v39, %v4630_v9 }
0x6ba2   :  { %v4640_v29 = vmul.f32 %v5331_v7, %v4633_v33 }
0x6ba4   :  { %4648 = vperm.xlu1 %5213, %v4640_v29  }
0x6ba8   :  { %4643 = vperm.xlu1 %5213, %v4639_v21  }
0x6c23   :  { %v4649_v6 = vpop.permute.xlu1 %4648 }
0x6c24   :  { %v4656_v23 = vmul.f32 %v4654_v16, %v4649_v6 }
0x6c26   :  { %v4658_v17 = vadd.f32 %v4656_v23, %v4584_v54 }
0x6c27   :  { %v4644_v19 = vpop.permute.xlu1 %4643 }
0x6c28   :  { %v4655_v27 = vmul.f32 %v4654_v16, %v4644_v19  ;;  %4663 = vrot.lane.b32.xlu0 %v4658_v17, %s5626_s6 }
0x6c2a   :  { %v4657_v37 = vadd.f32 %v4655_v27, %v4583_v62 }
0x6c2c   :  { %4661 = vrot.lane.b32.xlu1 %v4657_v37, %s5626_s6 }
0x6c9a   :  { %v4664_v39 = vpop.permute.xlu0 %4663 }
0x6c9b   :  { %v4668_v9 = vadd.f32 %v4664_v39, %v4658_v17 }
0x6c9d   :  { %v4675_v50 = vrot.slane %v4668_v9, 4  ;;  %v4697_v1 = vsub.f32 0.0, %v4668_v9 }
0x6c9e   :  { %v4662_v19 = vpop.permute.xlu1 %4661 }
0x6c9f   :  { %4676 = vrot.lane.b32.xlu0 %v4675_v50, %s5627_s7  ;;  %v4667_v54 = vadd.f32 %v4662_v19, %v4657_v37 }
0x6ca1   :  { %v4670_v47 = vrot.slane %v4667_v54, 6  ;;  %v4696_v39 = vsub.f32 0.0, %v4667_v54 }
0x6ca3   :  { %v4672_v62 = vadd.f32 %v4670_v47, %v4667_v54 }
0x6ca5   :  { %v6816_v21 = vadd.f32 1.0, %v4672_v62 }
0x6ca7   :  { %7730 = vst [vmem:[#allocation95_spill] sm:$0xff] %v6816_v21  ;;  %v4711_v35 = vrot.slane %v6816_v21, %v5740_v40 }
0x6ca9   :  { %5332 = vrcp.f32 %v4711_v35 }
0x6cb3   :  { %v5333_v6 = vpop.eup %5332 }
0x6cb4   :  { %v4713_v50 = vmul.f32 %v5333_v6, %v4696_v39 }
0x6d11   :  { %v4677_v7 = vpop.permute.xlu0 %4676 }
0x6d12   :  { %v6811_v33 = vsub.f32 %v6780_v45, %v4677_v7  ;;  %v4693_v7 = vrot.slane %v4657_v37, 6 }
0x6d14   :  { %7729 = vst [vmem:[#allocation94_spill] sm:$0xff] %v6811_v33  ;;  %v4701_v29 = vrot.slane %v6811_v33, %v5740_v40 }
0x6d16   :  { %4703 = vrot.lane.b32.xlu0 %v4701_v29, %s5619_s28  ;;  %v4695_v29 = vadd.f32 %v4693_v7, %v4657_v37 }
0x6d18   :  { %v4728_v19 = vrot.slane %v4695_v29, %v5740_v40 }
0x6d88   :  { %v4704_v16 = vpop.permute.xlu0 %4703 }
0x6d89   :  { %v4707_v23 = vsel %vm86_vm7, %v4697_v1, %v4704_v16 }
0x6d8a   :  { %v4714_v27 = vmul.f32 %v5333_v6, %v4707_v23 }
0x6d8c   :  { %4722 = vperm.xlu1 %5213, %v4714_v27  }
0x6d90   :  { %4717 = vperm.xlu1 %5213, %v4713_v50  }
0x6e0b   :  { %v4723_v47 = vpop.permute.xlu1 %4722 }
0x6e0c   :  { %v4730_v62 = vmul.f32 %v4728_v19, %v4723_v47 }
0x6e0e   :  { %v4732_v43 = vadd.f32 %v4730_v62, %v4658_v17 }
0x6e0f   :  { %v4718_v63 = vpop.permute.xlu1 %4717 }
0x6e10   :  { %v4729_v35 = vmul.f32 %v4728_v19, %v4718_v63  ;;  %4737 = vrot.lane.b32.xlu0 %v4732_v43, %s5628_s8 }
0x6e12   :  { %v4731_v9 = vadd.f32 %v4729_v35, %v4657_v37 }
0x6e14   :  { %4735 = vrot.lane.b32.xlu1 %v4731_v9, %s5628_s8 }
0x6e82   :  { %v4738_v1 = vpop.permute.xlu0 %4737 }
0x6e83   :  { %v4742_v16 = vadd.f32 %v4738_v1, %v4732_v43 }
0x6e85   :  { %v4749_v54 = vrot.slane %v4742_v16, 4  ;;  %v4771_v29 = vsub.f32 0.0, %v4742_v16 }
0x6e86   :  { %v4736_v63 = vpop.permute.xlu1 %4735 }
0x6e87   :  { %4750 = vrot.lane.b32.xlu0 %v4749_v54, %s5629_s9  ;;  %v4741_v17 = vadd.f32 %v4736_v63, %v4731_v9 }
0x6e89   :  { %v4744_v39 = vrot.slane %v4741_v17, 7  ;;  %v4770_v1 = vsub.f32 0.0, %v4741_v17 }
0x6e8b   :  { %v4746_v37 = vadd.f32 %v4744_v39, %v4741_v17 }
0x6e8d   :  { %v6832_v50 = vadd.f32 1.0, %v4746_v37 }
0x6e8f   :  { %7732 = vst [vmem:[#allocation97_spill] sm:$0xff] %v6832_v50  ;;  %v4785_v7 = vrot.slane %v6832_v50, %v5740_v40 }
0x6e91   :  { %5334 = vrcp.f32 %v4785_v7 }
0x6e9b   :  { %v5335_v47 = vpop.eup %5334 }
0x6e9c   :  { %v4787_v54 = vmul.f32 %v5335_v47, %v4770_v1 }
0x6ef9   :  { %v4751_v6 = vpop.permute.xlu0 %4750 }
0x6efa   :  { %v6827_v23 = vsub.f32 %v6780_v45, %v4751_v6  ;;  %v4767_v6 = vrot.slane %v4731_v9, 7 }
0x6efc   :  { %7731 = vst [vmem:[#allocation96_spill] sm:$0xff] %v6827_v23  ;;  %v4775_v27 = vrot.slane %v6827_v23, %v5740_v40 }
0x6efe   :  { %4777 = vrot.lane.b32.xlu0 %v4775_v27, %s5630_s10  ;;  %v4769_v27 = vadd.f32 %v4767_v6, %v4731_v9 }
0x6f00   :  { %v4802_v63 = vrot.slane %v4769_v27, %v5740_v40 }
0x6f70   :  { %v4778_v19 = vpop.permute.xlu0 %4777 }
0x6f71   :  { %v4781_v62 = vsel %vm86_vm7, %v4771_v29, %v4778_v19 }
0x6f72   :  { %v4788_v35 = vmul.f32 %v5335_v47, %v4781_v62 }
0x6f74   :  { %4796 = vperm.xlu1 %5213, %v4788_v35  }
0x6f78   :  { %4791 = vperm.xlu1 %5213, %v4787_v54  }
0x6f7c   :  { %5214 = vset.pattern.permute.xlu1 %v7654_v53 }
0x6ff3   :  { %v4797_v39 = vpop.permute.xlu1 %4796 }
0x6ff4   :  { %v4804_v37 = vmul.f32 %v4802_v63, %v4797_v39 }
0x6ff6   :  { %v4806_v7 = vadd.f32 %v4804_v37, %v4732_v43 }
0x6ff7   :  { %v4792_v16 = vpop.permute.xlu1 %4791 }
0x6ff8   :  { %v4803_v23 = vmul.f32 %v4802_v63, %v4792_v16  ;;  %4811 = vrot.lane.b32.xlu0 %v4806_v7, %s5628_s8 }
0x6ffa   :  { %v4805_v33 = vadd.f32 %v4803_v23, %v4731_v9 }
0x6ffc   :  { %4809 = vrot.lane.b32.xlu1 %v4805_v33, %s5628_s8 }
0x706a   :  { %v4812_v17 = vpop.permute.xlu0 %4811 }
0x706b   :  { %v4816_v29 = vadd.f32 %v4812_v17, %v4806_v7 }
0x706d   :  { %v4822_v19 = vrot.slane %v4816_v29, 4  ;;  %v4818_v1 = vrot.slane %v4816_v29, 7  ;;  %v4848_v6 = vsub.f32 0.0, %v4816_v29 }
0x706e   :  { %v4810_v43 = vpop.permute.xlu1 %4809 }
0x706f   :  { %4823 = vrot.lane.b32.xlu0 %v4822_v19, %s5629_s9  ;;  %v4815_v35 = vadd.f32 %v4810_v43, %v4805_v33  ;;  %v4844_v19 = vrot.slane %v4806_v7, 7 }
0x7071   :  { %v4820_v9 = vadd.f32 %v4818_v1, %v4815_v35  ;;  %v4847_v16 = vsub.f32 0.0, %v4815_v35 }
0x7073   :  { %v6849_v23 = vadd.f32 1.0, %v4820_v9 }
0x7075   :  { %v4862_v54 = vrot.slane %v6849_v23, %v5822_v59 }
0x7077   :  { %5336 = vrcp.f32 %v4862_v54 }
0x7081   :  { %v5337_v63 = vpop.eup %5336 }
0x7082   :  { %v4864_v17 = vmul.f32 %v5337_v63, %v4847_v16 }
0x70e1   :  { %v4824_v53 = vpop.permute.xlu0 %4823 }
0x70e2   :  { %v6844_v47 = vsub.f32 %v6780_v45, %v4824_v53  ;;  %v4846_v53 = vadd.f32 %v4844_v19, %v4805_v33 }
0x70e4   :  { %7733 = vst [vmem:[#allocation98_spill] sm:$0xff] %v6844_v47  ;;  %v4852_v62 = vrot.slane %v6844_v47, %v5740_v40 }
0x70e6   :  { %4854 = vrot.lane.b32.xlu0 %v4852_v62, %s5630_s10  ;;  %v4879_v62 = vrot.slane %v4846_v53, %v5822_v59 }
0x7158   :  { %v4855_v27 = vpop.permute.xlu0 %4854 }
0x7159   :  { %v4858_v39 = vsel %vm86_vm7, %v4848_v6, %v4855_v27 }
0x715a   :  { %v4865_v37 = vmul.f32 %v5337_v63, %v4858_v39 }
0x715c   :  { %4873 = vperm.xlu1 %5214, %v4865_v37  }
0x7160   :  { %4868 = vperm.xlu1 %5214, %v4864_v17  }
0x71db   :  { %v4874_v43 = vpop.permute.xlu1 %4873 }
0x71dc   :  { %v4881_v1 = vmul.f32 %v4879_v62, %v4874_v43 }
0x71de   :  { %v4883_v9 = vadd.f32 %v4881_v1, %v4806_v7 }
0x71df   :  { %v4869_v47 = vpop.permute.xlu1 %4868 }
0x71e0   :  { %v4880_v54 = vmul.f32 %v4879_v62, %v4869_v47  ;;  %4888 = vrot.lane.b32.xlu0 %v4883_v9, %s5632_s11 }
0x71e2   :  { %v4882_v29 = vadd.f32 %v4880_v54, %v4805_v33 }
0x71e4   :  { %4886 = vrot.lane.b32.xlu1 %v4882_v29, %s5632_s11 }
0x7252   :  { %v4889_v6 = vpop.permute.xlu0 %4888 }
0x7253   :  { %v4893_v27 = vadd.f32 %v4889_v6, %v4883_v9 }
0x7255   :  { %v4897_v35 = vrot.slane %v4893_v27, 4  ;;  %v4921_v19 = vsub.f32 0.0, %v4893_v27 }
0x7256   :  { %v4887_v7 = vpop.permute.xlu1 %4886 }
0x7257   :  { %4898 = vrot.lane.b32.xlu0 %v4897_v35, %s5633_s12  ;;  %v4892_v47 = vadd.f32 %v4887_v7, %v4882_v29  ;;  %v4919_v35 = vadd.f32 %v4883_v9, %v4882_v29 }
0x7259   :  { %v4894_v16 = vadd.f32 %v4893_v27, %v4892_v47  ;;  %v4920_v54 = vsub.f32 0.0, %v4892_v47 }
0x725b   :  { %v6865_v33 = vadd.f32 1.0, %v4894_v16 }
0x725d   :  { %v4935_v17 = vrot.slane %v6865_v33, %v5822_v59 }
0x725f   :  { %5338 = vrcp.f32 %v4935_v17 }
0x7269   :  { %v5339_v62 = vpop.eup %5338 }
0x726a   :  { %v4937_v6 = vmul.f32 %v5339_v62, %v4920_v54 }
0x72c9   :  { %v4899_v63 = vpop.permute.xlu0 %4898 }
0x72ca   :  { %v6860_v39 = vsub.f32 %v6780_v45, %v4899_v63  ;;  %v4952_v63 = vrot.slane %v4919_v35, %v5822_v59 }
0x72cc   :  { %v4925_v37 = vrot.slane %v6860_v39, %v5740_v40 }
0x72ce   :  { %4927 = vrot.lane.b32.xlu0 %v4925_v37, %s5622_s2 }
0x7340   :  { %v4928_v53 = vpop.permute.xlu0 %4927 }
0x7341   :  { %v4931_v43 = vsel %vm86_vm7, %v4921_v19, %v4928_v53 }
0x7342   :  { %v4938_v1 = vmul.f32 %v5339_v62, %v4931_v43 }
0x7344   :  { %4946 = vperm.xlu1 %5214, %v4938_v1  }
0x7348   :  { %4941 = vperm.xlu1 %5214, %v4937_v6   ;;  %v211_v6 = vmul.f32 %v5764_v3, %v5764_v3  ;;  %v507_v3 = vrot.slane %v5838_v31, 1  ;;  %v582_v31 = vrot.slane %v5854_v12, 1 }
0x73c3   :  { %v4947_v37 = vpop.permute.xlu1 %4946 }
0x73c4   :  { %v4954_v7 = vmul.f32 %v4952_v63, %v4947_v37  ;;  %v285_v37 = vmul.f32 %v5780_v38, %v5780_v38 }
0x73c6   :  { %v6872_v16 = vadd.f32 %v4954_v7, %v4883_v9 }
0x73c7   :  { %v4942_v15 = vpop.permute.xlu1 %4941 }
0x73c8   :  { %v4953_v17 = vmul.f32 %v4952_v63, %v4942_v15  ;;  %4961 = vrot.lane.b32.xlu0 %v6872_v16, %s5634_s13 }
0x73ca   :  { %v6876_v27 = vadd.f32 %v4953_v17, %v4882_v29  ;;  %v432_v29 = vrot.slane %v5819_v58, 1  ;;  %v359_v17 = vmul.f32 %v5796_v10, %v5796_v10 }
0x73cc   :  { %4959 = vrot.lane.b32.xlu1 %v6876_v27, %s5634_s13 }
0x743a   :  { %v4962_v47 = vpop.permute.xlu0 %4961 }
0x743b   :  { %v6881_v19 = vadd.f32 %v4962_v47, %v6872_v16 }
0x743d   :  { %v4972_v53 = vrot.slane %v6881_v19, 4 }
0x743e   :  { %v4960_v38 = vpop.permute.xlu1 %4959 }
0x743f   :  { %4973 = vrot.lane.b32.xlu0 %v4972_v53, %s5635_s1  ;;  %v4965_v12 = vadd.f32 %v4960_v38, %v6876_v27 }
0x74b1   :  { %v4974_v9 = vpop.permute.xlu0 %4973 }
0x74b2   :  { %v6886_v62 = vsub.f32 %v6780_v45, %v4974_v9 }
0x74b4   :  { %v5002_v15 = vrot.slane %v6886_v62, %v5740_v40  ;;  %v4983_v46 = vmul.f32 %v6886_v62, %v6886_v62 }
0x74b6   :  { %5004 = vrot.lane.b32.xlu0 %v5002_v15, %s5623_s29 }
0x74ba   :  { %213 = vrot.lane.b32.xlu0 %v5769_v11, %s5624_s30 }
0x74be   :  { %287 = vrot.lane.b32.xlu0 %v5785_v49, %s5627_s7 }
0x74c2   :  { %361 = vrot.lane.b32.xlu0 %v5801_v18, %s5629_s9 }
0x74c6   :  { %433 = vrot.lane.b32.xlu0 %v432_v29, %s5625_s5 }
0x7528   :  { %v6899_v45 = vpop.permute.xlu0 %5004 }
0x752c   :  { %v214_v43 = vpop.permute.xlu0 %213 }
0x752d   :  { %5340 = vrcp.f32 %v214_v43 }
0x7530   :  { %v288_v1 = vpop.permute.xlu0 %287 }
0x7531   :  { %5342 = vrcp.f32 %v288_v1  ;;  %v437_v1 = vmul.f32 %v5814_v52, %v5814_v52 }
0x7534   :  { %v362_v54 = vpop.permute.xlu0 %361 }
0x7535   :  { %5344 = vrcp.f32 %v362_v54 }
0x7537   :  { %v5341_v35 = vpop.eup %5340 }
0x7538   :  { %v217_v63 = vmul.f32 %v5341_v35, %v211_v6 }
0x753a   :  { %219 = vrot.lane.b32.xlu1 %v217_v63, %s5625_s5 }
0x753b   :  { %v5343_v58 = vpop.eup %5342 }
0x753c   :  { %v291_v7 = vmul.f32 %v5343_v58, %v285_v37  ;;  %v512_v37 = vmul.f32 %v5833_v24, %v5833_v24 }
0x753e   :  { %293 = vrot.lane.b32.xlu1 %v291_v7, %s5619_s28  ;;  %v659_v7 = vrot.slane %v5864_v51, 1  ;;  %v587_v51 = vmul.f32 %v5849_v0, %v5849_v0  ;;  %v1135_v0 = vrot.slane %v5983_v57, 1 }
0x753f   :  { %v5345_v47 = vpop.eup %5344 }
0x7540   :  { %v365_v53 = vmul.f32 %v5345_v47, %v359_v17  ;;  %v4968_v47 = vrot.slane %v6881_v19, 1 }
0x7542   :  { %367 = vrot.lane.b32.xlu1 %v365_v53, %s5630_s10  ;;  %v4970_v53 = vadd.f32 %v4968_v47, %v4965_v12 }
0x7544   :  { %v6941_v24 = vadd.f32 1.0, %v4970_v53 }
0x7546   :  { %438 = vrot.lane.b32.xlu1 %v432_v29, %s5629_s9  ;;  %v6925_v29 = vpop.permute.xlu0 %433 }
0x754a   :  { %508 = vrot.lane.b32.xlu1 %v507_v3, %s5625_s5 }
0x75ac   :  { %v6913_v9 = vpop.permute.xlu1 %219 }
0x75b0   :  { %v6915_v15 = vpop.permute.xlu1 %293 }
0x75b4   :  { %v6917_v43 = vpop.permute.xlu1 %367 }
0x75b8   :  { %v439_v10 = vpop.permute.xlu1 %438 }
0x75b9   :  { %5346 = vrcp.f32 %v439_v10 }
0x75bc   :  { %v6936_v17 = vpop.permute.xlu1 %508 }
0x75c3   :  { %v5347_v54 = vpop.eup %5346 }
0x75c4   :  { %v442_v6 = vmul.f32 %v5347_v54, %v437_v1  ;;  %v5012_v1 = vrot.slane %v6941_v24, %v5822_v59 }
0x75c6   :  { %444 = vrot.lane.b32.xlu0 %v442_v6, %s5622_s2 }
0x75ca   :  { %513 = vrot.lane.b32.xlu0 %v507_v3, %s5633_s12 }
0x75ce   :  { %583 = vrot.lane.b32.xlu0 %v582_v31, %s5625_s5 }
0x7638   :  { %v6927_v35 = vpop.permute.xlu0 %444 }
0x763c   :  { %v514_v63 = vpop.permute.xlu0 %513 }
0x763d   :  { %5348 = vrcp.f32 %v514_v63 }
0x7647   :  { %v5349_v52 = vpop.eup %5348 }
0x7648   :  { %v517_v58 = vmul.f32 %v5349_v52, %v512_v37  ;;  %v1060_v37 = vrot.slane %v5967_v44, 1  ;;  %v7734_v52 = vmov 0.0   ;;  %v664_v44 = vmul.f32 %v5870_v60, %v5870_v60 }
0x7649   :  { %68 = vst.msk [vmem:[#allocation9] sm:$0x1] %vm67_vm8, %v7734_v52  ;;  %v839_v60 = vmul.f32 %v5913_v36, %v5913_v36 }
0x764a   :  { %519 = vrot.lane.b32.xlu1 %v517_v58, %s5623_s29  ;;  %v6960_v58 = vpop.permute.xlu0 %583 }
0x764e   :  { %588 = vrot.lane.b32.xlu1 %v582_v31, %s5635_s1  ;;  %v4997_v31 = vsub.f32 0.0, %v4965_v12 }
0x7652   :  { %660 = vrot.lane.b32.xlu1 %v659_v7, %s5625_s5 }
0x76bc   :  { %v6939_v3 = vpop.permute.xlu1 %519 }
0x76c0   :  { %v589_v10 = vpop.permute.xlu1 %588 }
0x76c1   :  { %5350 = vrcp.f32 %v589_v10 }
0x76c2   :  { %5352 = vrcp.f32 %v5012_v1 }
0x76c4   :  { %v6971_v10 = vpop.permute.xlu1 %660 }
0x76cb   :  { %v5351_v54 = vpop.eup %5350 }
0x76cc   :  { %v592_v38 = vmul.f32 %v5351_v54, %v587_v51  ;;  %v5353_v6 = vpop.eup %5352 }
0x76cd   :  { %v5014_v63 = vmul.f32 %v5353_v6, %v4997_v31 }
0x76ce   :  { %594 = vrot.lane.b32.xlu0 %v592_v38, %s5626_s6 }
0x76d2   :  { %665 = vrot.lane.b32.xlu0 %v659_v7, %s5637_s15 }
0x76d6   :  { %5018 = vperm.xlu0 %5215, %v5014_v63  }
0x76da   :  { %915 = vrot.lane.b32.xlu0 %v5934_v34, %s5627_s7 }
0x76de   :  { %989 = vrot.lane.b32.xlu0 %v5950_v20, %s5629_s9 }
0x76e2   :  { %1061 = vrot.lane.b32.xlu0 %v1060_v37, %s5625_s5 }
0x76e6   :  { %1066 = vrot.lane.b32.xlu0 %v1060_v37, %s5629_s9  ;;  %v4998_v37 = vsub.f32 0.0, %v6881_v19  ;;  %v987_v19 = vmul.f32 %v5945_v14, %v5945_v14 }
0x76ea   :  { %1136 = vrot.lane.b32.xlu0 %v1135_v0, %s5625_s5 }
0x7740   :  { %v6962_v7 = vpop.permute.xlu0 %594 }
0x7744   :  { %v666_v12 = vpop.permute.xlu0 %665 }
0x7745   :  { %5354 = vrcp.f32 %v666_v12 }
0x774f   :  { %v5355_v47 = vpop.eup %5354 }
0x7750   :  { %v669_v53 = vmul.f32 %v5355_v47, %v664_v44  ;;  %v5008_v44 = vsel %vm86_vm7, %v4998_v37, %v6899_v45  ;;  %v1065_v45 = vmul.f32 %v5962_v8, %v5962_v8 }
0x7751   :  { %v5015_v47 = vmul.f32 %v5353_v6, %v5008_v44  ;;  %v1140_v44 = vmul.f32 %v5978_v28, %v5978_v28 }
0x7752   :  { %671 = vrot.lane.b32.xlu1 %v669_v53, %s5628_s8 }
0x7755   :  { %v6969_v57 = vpop.permute.xlu0 %5018 }
0x7756   :  { %841 = vrot.lane.b32.xlu1 %v5918_v48, %s5624_s30 }
0x7759   :  { %v916_v1 = vpop.permute.xlu0 %915 }
0x775d   :  { %v990_v54 = vpop.permute.xlu0 %989 }
0x7761   :  { %v6975_v31 = vpop.permute.xlu0 %1061 }
0x7765   :  { %v1067_v52 = vpop.permute.xlu0 %1066 }
0x77c4   :  { %v6973_v51 = vpop.permute.xlu1 %671 }
0x77c8   :  { %v842_v38 = vpop.permute.xlu1 %841 }
0x77c9   :  { %5356 = vrcp.f32 %v842_v38 }
0x77ca   :  { %5358 = vrcp.f32 %v916_v1  ;;  %v913_v1 = vmul.f32 %v5929_v22, %v5929_v22  ;;  %v1210_v22 = vrot.slane %v5999_v13, 1  ;;  %v1287_v13 = vrot.slane %v6009_v4, 1 }
0x77cb   :  { %5360 = vrcp.f32 %v990_v54  ;;  %v1688_v4 = vrot.slane %v6116_v55, 1  ;;  %v1467_v55 = vmul.f32 %v6062_v32, %v6062_v32  ;;  %v7735_v32 = vld [vmem:[#allocation23_spill] sm:$0xff] }
0x77cc   :  { %5362 = vrcp.f32 %v1067_v52 }
0x77d3   :  { %v5357_v63 = vpop.eup %5356 }
0x77d4   :  { %v845_v12 = vmul.f32 %v5357_v63, %v839_v60  ;;  %v5359_v53 = vpop.eup %5358 }
0x77d5   :  { %v919_v36 = vmul.f32 %v5359_v53, %v913_v1  ;;  %v5361_v38 = vpop.eup %5360  ;;  %v1137_v53 = vpop.permute.xlu0 %1136 }
0x77d6   :  { %847 = vrot.lane.b32.xlu1 %v845_v12, %s5625_s5  ;;  %v993_v54 = vmul.f32 %v5361_v38, %v987_v19  ;;  %v5363_v60 = vpop.eup %5362  ;;  %v1215_v38 = vmul.f32 %v5994_v2, %v5994_v2 }
0x77d7   :  { %v1070_v6 = vmul.f32 %v5363_v60, %v1065_v45 }
0x77da   :  { %5023 = vperm.xlu1 %5214, %v5015_v47  }
0x77de   :  { %921 = vrot.lane.b32.xlu1 %v919_v36, %s5619_s28 }
0x77e2   :  { %995 = vrot.lane.b32.xlu1 %v993_v54, %s5630_s10 }
0x77e6   :  { %1072 = vrot.lane.b32.xlu1 %v1070_v6, %s5622_s2 }
0x77ea   :  { %1141 = vrot.lane.b32.xlu1 %v1135_v0, %s5633_s12 }
0x77ee   :  { %1211 = vrot.lane.b32.xlu1 %v1210_v22, %s5625_s5 }
0x7848   :  { %v6996_v63 = vpop.permute.xlu1 %847 }
0x7859   :  { %v6998_v14 = vpop.permute.xlu1 %5023 }
0x785d   :  { %v7000_v37 = vpop.permute.xlu1 %921 }
0x7861   :  { %v7002_v52 = vpop.permute.xlu1 %995 }
0x7865   :  { %v7004_v8 = vpop.permute.xlu1 %1072 }
0x7869   :  { %v1142_v12 = vpop.permute.xlu1 %1141 }
0x786a   :  { %5364 = vrcp.f32 %v1142_v12 }
0x786d   :  { %v1212_v2 = vpop.permute.xlu1 %1211 }
0x7874   :  { %v5365_v0 = vpop.eup %5364 }
0x7875   :  { %v1145_v47 = vmul.f32 %v5365_v0, %v1140_v44 }
0x7877   :  { %1147 = vrot.lane.b32.xlu0 %v1145_v47, %s5623_s29 }
0x787b   :  { %1216 = vrot.lane.b32.xlu0 %v1210_v22, %s5635_s1  ;;  %v1292_v22 = vmul.f32 %v6015_v25, %v6015_v25  ;;  %v1615_v25 = vmul.f32 %v6094_v61, %v6094_v61 }
0x787f   :  { %1288 = vrot.lane.b32.xlu0 %v1287_v13, %s5625_s5 }
0x78e9   :  { %v7012_v1 = vpop.permute.xlu0 %1147 }
0x78ed   :  { %v1217_v36 = vpop.permute.xlu0 %1216 }
0x78ee   :  { %5366 = vrcp.f32 %v1217_v36  ;;  %v1541_v36 = vmul.f32 %v6078_v56, %v6078_v56  ;;  %v7736_v56 = vld [vmem:[#allocation15_spill] sm:$0xff] }
0x78f8   :  { %v5367_v19 = vpop.eup %5366 }
0x78f9   :  { %v1220_v28 = vmul.f32 %v5367_v19, %v1215_v38 }
0x78fb   :  { %1222 = vrot.lane.b32.xlu1 %v1220_v28, %s5626_s6 }
0x78ff   :  { %1293 = vrot.lane.b32.xlu1 %v1287_v13, %s5637_s15 }
0x7903   :  { %1469 = vrot.lane.b32.xlu1 %v6067_v5, %s5624_s30 }
0x7907   :  { %1543 = vrot.lane.b32.xlu1 %v6083_v26, %s5627_s7 }
0x790b   :  { %1617 = vrot.lane.b32.xlu1 %v6099_v30, %s5629_s9 }
0x790f   :  { %1689 = vrot.lane.b32.xlu1 %v1688_v4, %s5625_s5 }
0x796d   :  { %v7026_v54 = vpop.permute.xlu1 %1222 }
0x7971   :  { %v1294_v60 = vpop.permute.xlu1 %1293 }
0x7972   :  { %5368 = vrcp.f32 %v1294_v60 }
0x7975   :  { %v1470_v45 = vpop.permute.xlu1 %1469 }
0x7976   :  { %5370 = vrcp.f32 %v1470_v45  ;;  %v1763_v45 = vrot.slane %v7735_v32, 1 }
0x7979   :  { %v1544_v6 = vpop.permute.xlu1 %1543 }
0x797a   :  { %5372 = vrcp.f32 %v1544_v6  ;;  %v210_v6 = vmul.f32 %v5769_v11, %v7736_v56 }
0x797c   :  { %v5369_v12 = vpop.eup %5368 }
0x797d   :  { %v1618_v44 = vpop.permute.xlu1 %1617  ;;  %v1297_v0 = vmul.f32 %v5369_v12, %v1292_v22  ;;  %v284_v22 = vmul.f32 %v5785_v49, %v210_v6 }
0x797e   :  { %5374 = vrcp.f32 %v1618_v44  ;;  %v7737_v44 = vld [vmem:[#allocation17_spill] sm:$0xff] }
0x797f   :  { %1299 = vrot.lane.b32.xlu0 %v1297_v0, %s5628_s8  ;;  %5376 = vrcp.f32 %v7736_v56  ;;  %v358_v61 = vmul.f32 %v5801_v18, %v284_v22 }
0x7980   :  { %v5371_v47 = vpop.eup %5370  ;;  %5378 = vrcp.f32 %v7737_v44 }
0x7981   :  { %v1473_v13 = vmul.f32 %v5371_v47, %v1467_v55  ;;  %v436_v12 = vmul.f32 %v6925_v29, %v358_v61  ;;  %v7738_v29 = vld [vmem:[#allocation16_spill] sm:$0xff] }
0x7983   :  { %1475 = vrot.lane.b32.xlu0 %v1473_v13, %s5625_s5  ;;  %v511_v0 = vmul.f32 %v6936_v17, %v436_v12 }
0x7984   :  { %v5373_v38 = vpop.eup %5372 }
0x7985   :  { %v1547_v19 = vmul.f32 %v5373_v38, %v1541_v36  ;;  %v586_v47 = vmul.f32 %v6960_v58, %v511_v0  ;;  %v149_v38 = vmul.f32 %v7738_v29, %v7738_v29 }
0x7987   :  { %1549 = vrot.lane.b32.xlu0 %v1547_v19, %s5619_s28  ;;  %v663_v11 = vmul.f32 %v6971_v10, %v586_v47 }
0x7988   :  { %v5375_v28 = vpop.eup %5374 }
0x7989   :  { %v1621_v60 = vmul.f32 %v5375_v28, %v1615_v25  ;;  %v5377_v18 = vpop.eup %5376  ;;  %5380 = vlog2.f32 %v663_v11  ;;  %v7739_v28 = vld [vmem:[#allocation18_spill] sm:$0xff] }
0x798a   :  { %v151_v19 = vmul.f32 %v5377_v18, %v149_v38  ;;  %v5379_v25 = vpop.eup %5378  ;;  %v89_v11 = vld [vmem:[#allocation9] sm:$0x1]  ;;  %v7740_v38 = vld [vmem:[#allocation21_spill] sm:$0xff] }
0x798b   :  { %1623 = vrot.lane.b32.xlu0 %v1621_v60, %s5630_s10 }
0x798c   :  { %v222_v58 = vadd.f32 %v6913_v9, %v151_v19 }
0x798f   :  { %1694 = vrot.lane.b32.xlu0 %v1688_v4, %s5629_s9  ;;  %v838_v4 = vmul.f32 %v5918_v48, %v7737_v44  ;;  %v1289_v48 = vpop.permute.xlu0 %1288 }
0x7991   :  { %v912_v55 = vmul.f32 %v5934_v34, %v838_v4 }
0x7993   :  { %1764 = vrot.lane.b32.xlu0 %v1763_v45, %s5625_s5  ;;  %v986_v13 = vmul.f32 %v5950_v20, %v912_v55  ;;  %v296_v20 = vadd.f32 %v6915_v15, %v222_v58  ;;  %v5381_v56 = vpop.eup %5380 }
0x7994   :  { %v716_v22 = vmul.f32 0.6931472, %v5381_v56 }
0x7995   :  { %v1064_v49 = vmul.f32 %v6975_v31, %v986_v13  ;;  %v370_v10 = vadd.f32 %v6917_v43, %v296_v20  ;;  %v777_v31 = vmul.f32 %v7739_v28, %v7739_v28  ;;  %v1690_v20 = vpop.permute.xlu1 %1689  ;;  %v4994_v28 = vrot.slane %v6872_v16, 1 }
0x7996   :  { %v717_v44 = vadd.f32 14.703016, %v716_v22 }
0x7997   :  { %v1139_v36 = vmul.f32 %v1137_v53, %v1064_v49  ;;  %v447_v53 = vadd.f32 %v6927_v35, %v370_v10  ;;  %v779_v60 = vmul.f32 %v5379_v25, %v777_v31  ;;  %v4996_v32 = vadd.f32 %v4994_v28, %v6876_v27 }
0x7999   :  { %v1214_v17 = vmul.f32 %v1212_v2, %v1139_v36  ;;  %v522_v6 = vadd.f32 %v6939_v3, %v447_v53  ;;  %v850_v2 = vadd.f32 %v6996_v63, %v779_v60  ;;  %v7743_v53 = vld [vmem:[#allocation22_spill] sm:$0xff]  ;;  %v5029_v56 = vrot.slane %v4996_v32, %v5822_v59 }
0x799a   :  { %v1768_v60 = vmul.f32 %v7743_v53, %v7743_v53 }
0x799b   :  { %v1291_v34 = vmul.f32 %v1289_v48, %v1214_v17  ;;  %v597_v9 = vadd.f32 %v6962_v7, %v522_v6  ;;  %v924_v15 = vadd.f32 %v7000_v37, %v850_v2  ;;  %v7741_v17 = vld [vmem:[#allocation25_spill] sm:$0xff]  ;;  %v5030_v2 = vmul.f32 %v5029_v56, %v6969_v57 }
0x799c   :  { %v1838_v19 = vrot.slane %v7741_v17, 1  ;;  %v7752_v17 = vld [vmem:[#allocation35_spill] sm:$0xff] }
0x799d   :  { %5382 = vlog2.f32 %v1291_v34  ;;  %v674_v61 = vadd.f32 %v6973_v51, %v597_v9  ;;  %v998_v43 = vadd.f32 %v7002_v52, %v924_v15  ;;  %v7742_v34 = vld [vmem:[#allocation26_spill] sm:$0xff]  ;;  %v7098_v9 = vadd.f32 %v5030_v2, %v6876_v27  ;;  %v7745_v15 = vld [vmem:[#allocation24_spill] sm:$0xff] }
0x799e   :  { %v1915_v58 = vrot.slane %v7742_v34, 1 }
0x799f   :  { %v1075_v4 = vadd.f32 %v7004_v8, %v998_v43  ;;  %v718_v35 = vadd.f32 %v717_v44, %v674_v61  ;;  %7744 = vst [vmem:[#allocation23_spill] sm:$0xff] %v7098_v9  ;;  %v1843_v61 = vmul.f32 %v7745_v15, %v7745_v15  ;;  %v7746_v44 = vld [vmem:[#allocation19_spill] sm:$0xff] }
0x79a1   :  { %v1150_v0 = vadd.f32 %v7012_v1, %v1075_v4  ;;  %v719_v47 = vmul.f32 0.5, %v718_v35  ;;  %v1693_v1 = vmul.f32 %v7740_v38, %v7740_v38  ;;  %v7747_v4 = vld [vmem:[#allocation20_spill] sm:$0xff] }
0x79a2   :  { %v1405_v35 = vmul.f32 %v7747_v4, %v7747_v4 }
0x79a3   :  { %v1225_v3 = vadd.f32 %v7026_v54, %v1150_v0  ;;  %v720_v51 = vsub.f32 %v89_v11, %v719_v47 }
0x79a7   :  { %v5383_v12 = vpop.eup %5382 }
0x79a8   :  { %v1344_v55 = vmul.f32 0.6931472, %v5383_v12 }
0x79aa   :  { %v1345_v13 = vadd.f32 14.703016, %v1344_v55 }
0x79f1   :  { %v1300_v63 = vpop.permute.xlu0 %1299 }
0x79f2   :  { %v1302_v7 = vadd.f32 %v1300_v63, %v1225_v3 }
0x79f4   :  { %v1346_v37 = vadd.f32 %v1345_v13, %v1302_v7 }
0x79f5   :  { %v1476_v49 = vpop.permute.xlu0 %1475 }
0x79f6   :  { %v1347_v18 = vmul.f32 0.5, %v1346_v37 }
0x79f8   :  { %v7077_v52 = vsub.f32 %v720_v51, %v1347_v18 }
0x79f9   :  { %v1550_v36 = vpop.permute.xlu0 %1549 }
0x79fd   :  { %v1624_v29 = vpop.permute.xlu0 %1623 }
0x7a01   :  { %v1695_v8 = vpop.permute.xlu0 %1694 }
0x7a02   :  { %5384 = vrcp.f32 %v1695_v8  ;;  %v7748_v8 = vld [vmem:[#allocation27_spill] sm:$0xff] }
0x7a03   :  { %v1920_v38 = vmul.f32 %v7748_v8, %v7748_v8 }
0x7a05   :  { %v1765_v27 = vpop.permute.xlu0 %1764 }
0x7a0c   :  { %v5385_v48 = vpop.eup %5384 }
0x7a0d   :  { %v1698_v54 = vmul.f32 %v5385_v48, %v1693_v1  ;;  %v5031_v48 = vmul.f32 %v5029_v56, %v6998_v14 }
0x7a0f   :  { %1700 = vrot.lane.b32.xlu1 %v1698_v54, %s5622_s2 }
0x7a13   :  { %1769 = vrot.lane.b32.xlu1 %v1763_v45, %s5633_s12 }
0x7a17   :  { %1839 = vrot.lane.b32.xlu1 %v1838_v19, %s5625_s5 }
0x7a1b   :  { %1844 = vrot.lane.b32.xlu1 %v1838_v19, %s5635_s1  ;;  %v7753_v19 = vld [vmem:[#allocation37_spill] sm:$0xff] }
0x7a1c   :  { %v2316_v14 = vrot.slane %v7753_v19, 1 }
0x7a1f   :  { %1916 = vrot.lane.b32.xlu1 %v1915_v58, %s5625_s5 }
0x7a81   :  { %v1701_v25 = vpop.permute.xlu1 %1700 }
0x7a85   :  { %v1770_v10 = vpop.permute.xlu1 %1769 }
0x7a86   :  { %5386 = vrcp.f32 %v1770_v10 }
0x7a89   :  { %v1840_v31 = vpop.permute.xlu1 %1839 }
0x7a8d   :  { %v1845_v45 = vpop.permute.xlu1 %1844 }
0x7a8e   :  { %5388 = vrcp.f32 %v1845_v45 }
0x7a8f   :  { %5390 = vrcp.f32 %v7746_v44 }
0x7a90   :  { %v5387_v6 = vpop.eup %5386 }
0x7a91   :  { %v1773_v22 = vmul.f32 %v5387_v6, %v1768_v60  ;;  %v1917_v28 = vpop.permute.xlu1 %1916 }
0x7a93   :  { %1775 = vrot.lane.b32.xlu0 %v1773_v22, %s5623_s29 }
0x7a97   :  { %5036 = vrot.lane.b32.xlu0 %v7098_v9, %s5636_s14 }
0x7a98   :  { %v5389_v43 = vpop.eup %5388 }
0x7a99   :  { %v1848_v12 = vmul.f32 %v5389_v43, %v1843_v61  ;;  %v5391_v57 = vpop.eup %5390 }
0x7a9a   :  { %v1407_v0 = vmul.f32 %v5391_v57, %v1405_v35  ;;  %v7755_v57 = vld [vmem:[#allocation32_spill] sm:$0xff] }
0x7a9b   :  { %1850 = vrot.lane.b32.xlu0 %v1848_v12, %s5626_s6  ;;  %v2169_v4 = vmul.f32 %v7755_v57, %v7755_v57 }
0x7a9c   :  { %v1478_v55 = vadd.f32 %v1476_v49, %v1407_v0  ;;  %v7116_v49 = vadd.f32 %v5031_v48, %v6872_v16  ;;  %v1466_v16 = vmul.f32 %v6067_v5, %v7746_v44  ;;  %v7756_v0 = vld [vmem:[#allocation34_spill] sm:$0xff]  ;;  %v7791_v5 = vld [vmem:[#allocation56_spill] sm:$0xff] }
0x7a9e   :  { %v1552_v63 = vadd.f32 %v1550_v36, %v1478_v55  ;;  %7749 = vst [vmem:[#allocation15_spill] sm:$0xff] %v7116_v49  ;;  %v7750_v36 = vld [vmem:[#allocation31_spill] sm:$0xff]  ;;  %v1540_v34 = vmul.f32 %v6083_v26, %v1466_v16  ;;  %v2243_v55 = vmul.f32 %v7756_v0, %v7756_v0 }
0x7a9f   :  { %1921 = vrot.lane.b32.xlu0 %v1915_v58, %s5637_s15  ;;  %v7770_v0 = vld [vmem:[#allocation83_spill] sm:$0xff] }
0x7aa0   :  { %v1626_v47 = vadd.f32 %v1624_v29, %v1552_v63  ;;  %v7751_v29 = vld [vmem:[#allocation33_spill] sm:$0xff]  ;;  %v1614_v58 = vmul.f32 %v6099_v30, %v1540_v34 }
0x7aa2   :  { %v1703_v7 = vadd.f32 %v1701_v25, %v1626_v47  ;;  %v1692_v25 = vmul.f32 %v1690_v20, %v1614_v58  ;;  %v7757_v47 = vld [vmem:[#allocation39_spill] sm:$0xff] }
0x7aa4   :  { %v1767_v10 = vmul.f32 %v1765_v27, %v1692_v25 }
0x7aa6   :  { %v1842_v32 = vmul.f32 %v1840_v31, %v1767_v10  ;;  %v7754_v31 = vld [vmem:[#allocation30_spill] sm:$0xff] }
0x7aa7   :  { %v2095_v43 = vmul.f32 %v7754_v31, %v7754_v31  ;;  %v7764_v31 = vld [vmem:[#allocation47_spill] sm:$0xff] }
0x7aa8   :  { %v1919_v45 = vmul.f32 %v1917_v28, %v1842_v32  ;;  %v7761_v28 = vld [vmem:[#allocation41_spill] sm:$0xff] }
0x7aa9   :  { %v2466_v32 = vrot.slane %v7761_v28, 1 }
0x7b05   :  { %v1776_v3 = vpop.permute.xlu0 %1775 }
0x7b06   :  { %v1778_v11 = vadd.f32 %v1776_v3, %v1703_v7  ;;  %v2391_v7 = vrot.slane %v7757_v47, 1 }
0x7b09   :  { %v7109_v13 = vpop.permute.xlu0 %5036 }
0x7b0d   :  { %v1851_v37 = vpop.permute.xlu0 %1850 }
0x7b0e   :  { %v1853_v51 = vadd.f32 %v1851_v37, %v1778_v11  ;;  %v7758_v11 = vld [vmem:[#allocation28_spill] sm:$0xff] }
0x7b11   :  { %v1922_v18 = vpop.permute.xlu0 %1921 }
0x7b12   :  { %5392 = vrcp.f32 %v1922_v18 }
0x7b13   :  { %5394 = vlog2.f32 %v1919_v45 }
0x7b1c   :  { %v5393_v1 = vpop.eup %5392 }
0x7b1d   :  { %v1925_v54 = vmul.f32 %v5393_v1, %v1920_v38  ;;  %v5395_v53 = vpop.eup %5394 }
0x7b1e   :  { %v1972_v60 = vmul.f32 0.6931472, %v5395_v53 }
0x7b1f   :  { %1927 = vrot.lane.b32.xlu1 %v1925_v54, %s5628_s8 }
0x7b20   :  { %v1973_v6 = vadd.f32 14.703016, %v1972_v60 }
0x7b23   :  { %5038 = vrot.lane.b32.xlu1 %v7116_v49, %s5636_s14 }
0x7b27   :  { %2097 = vrot.lane.b32.xlu1 %v7750_v36, %s5624_s30 }
0x7b2b   :  { %2171 = vrot.lane.b32.xlu1 %v7751_v29, %s5627_s7 }
0x7b2f   :  { %2245 = vrot.lane.b32.xlu1 %v7752_v17, %s5629_s9 }
0x7b33   :  { %2317 = vrot.lane.b32.xlu1 %v2316_v14, %s5625_s5 }
0x7b91   :  { %v1928_v56 = vpop.permute.xlu1 %1927 }
0x7b92   :  { %v1930_v2 = vadd.f32 %v1928_v56, %v1853_v51  ;;  %v7759_v51 = vld [vmem:[#allocation29_spill] sm:$0xff] }
0x7b93   :  { %v2033_v18 = vmul.f32 %v7759_v51, %v7759_v51  ;;  %v7773_v51 = vld [vmem:[#allocation58_spill] sm:$0xff] }
0x7b94   :  { %v1974_v22 = vadd.f32 %v1973_v6, %v1930_v2  ;;  %v7762_v6 = vld [vmem:[#allocation38_spill] sm:$0xff] }
0x7b95   :  { %v7132_v15 = vpop.permute.xlu1 %5038  ;;  %v2396_v2 = vmul.f32 %v7762_v6, %v7762_v6 }
0x7b96   :  { %v7134_v61 = vmul.f32 0.5, %v1974_v22 }
0x7b99   :  { %v2098_v26 = vpop.permute.xlu1 %2097 }
0x7b9a   :  { %5396 = vrcp.f32 %v2098_v26 }
0x7b9d   :  { %v2172_v30 = vpop.permute.xlu1 %2171 }
0x7b9e   :  { %5398 = vrcp.f32 %v2172_v30  ;;  %v7763_v30 = vld [vmem:[#allocation42_spill] sm:$0xff] }
0x7ba1   :  { %v2246_v20 = vpop.permute.xlu1 %2245 }
0x7ba2   :  { %5400 = vrcp.f32 %v2246_v20  ;;  %v2543_v20 = vrot.slane %v7763_v30, 1 }
0x7ba3   :  { %5402 = vrcp.f32 %v7758_v11 }
0x7ba4   :  { %v5397_v12 = vpop.eup %5396 }
0x7ba5   :  { %v2101_v44 = vmul.f32 %v5397_v12, %v2095_v43  ;;  %v7159_v45 = vpop.permute.xlu1 %2317  ;;  %v7765_v43 = vld [vmem:[#allocation63_spill] sm:$0xff]  ;;  %v7766_v12 = vld [vmem:[#allocation65_spill] sm:$0xff] }
0x7ba7   :  { %2103 = vrot.lane.b32.xlu0 %v2101_v44, %s5625_s5  ;;  %v7767_v44 = vld [vmem:[#allocation53_spill] sm:$0xff] }
0x7ba8   :  { %v5399_v35 = vpop.eup %5398  ;;  %v7640_v57 = vrot.slane %v7767_v44, 1 }
0x7ba9   :  { %v2175_v27 = vmul.f32 %v5399_v35, %v2169_v4  ;;  %v7768_v4 = vld [vmem:[#allocation81_spill] sm:$0xff]  ;;  %v7769_v35 = vld [vmem:[#allocation55_spill] sm:$0xff] }
0x7bab   :  { %2177 = vrot.lane.b32.xlu0 %v2175_v27, %s5619_s28  ;;  %v3019_v27 = vrot.slane %v7769_v35, 1  ;;  %v7778_v35 = vld [vmem:[#allocation62_spill] sm:$0xff] }
0x7bac   :  { %v5401_v3 = vpop.eup %5400 }
0x7bad   :  { %v2249_v63 = vmul.f32 %v5401_v3, %v2243_v55  ;;  %v5403_v37 = vpop.eup %5402  ;;  %v7771_v55 = vld [vmem:[#allocation57_spill] sm:$0xff] }
0x7bae   :  { %v2035_v8 = vmul.f32 %v5403_v37, %v2033_v18  ;;  %v3094_v3 = vrot.slane %v7771_v55, 1  ;;  %v7639_v18 = vrot.slane %v7773_v51, 1  ;;  %v3351_v55 = vmul.f32 %v7778_v35, %v7778_v35  ;;  %v7785_v35 = vld [vmem:[#allocation67_spill] sm:$0xff] }
0x7baf   :  { %2251 = vrot.lane.b32.xlu0 %v2249_v63, %s5630_s10  ;;  %v7186_v63 = vadd.f32 %v7132_v15, %v7116_v49  ;;  %v7775_v15 = vld [vmem:[#allocation74_spill] sm:$0xff] }
0x7bb1   :  { %v5049_v47 = vrot.slane %v7186_v63, 4  ;;  %v5045_v49 = vrot.slane %v7186_v63, 2 }
0x7bb3   :  { %2322 = vrot.lane.b32.xlu0 %v2316_v14, %s5629_s9  ;;  %v7760_v14 = vld [vmem:[#allocation36_spill] sm:$0xff] }
0x7bb4   :  { %v2321_v58 = vmul.f32 %v7760_v14, %v7760_v14 }
0x7bb7   :  { %2392 = vrot.lane.b32.xlu0 %v2391_v7, %s5625_s5 }
0x7c19   :  { %v2104_v38 = vpop.permute.xlu0 %2103 }
0x7c1a   :  { %v2106_v1 = vadd.f32 %v2104_v38, %v2035_v8  ;;  %v7774_v8 = vld [vmem:[#allocation87_spill] sm:$0xff] }
0x7c1b   :  { %v7638_v38 = vrot.slane %v7774_v8, 1 }
0x7c1d   :  { %v2178_v48 = vpop.permute.xlu0 %2177 }
0x7c1e   :  { %v2180_v54 = vadd.f32 %v2178_v48, %v2106_v1  ;;  %v7637_v1 = vrot.slane %v7775_v15, 1  ;;  %v7636_v48 = vrot.slane %v6865_v33, 1 }
0x7c21   :  { %v2252_v19 = vpop.permute.xlu0 %2251 }
0x7c22   :  { %v2254_v16 = vadd.f32 %v2252_v19, %v2180_v54  ;;  %v7635_v54 = vrot.slane %v6941_v24, 1 }
0x7c25   :  { %v2323_v34 = vpop.permute.xlu0 %2322 }
0x7c26   :  { %5404 = vrcp.f32 %v2323_v34 }
0x7c29   :  { %v7213_v19 = vpop.permute.xlu0 %2392 }
0x7c30   :  { %v5405_v25 = vpop.eup %5404 }
0x7c31   :  { %v2326_v10 = vmul.f32 %v5405_v25, %v2321_v58 }
0x7c33   :  { %2328 = vrot.lane.b32.xlu1 %v2326_v10, %s5622_s2  ;;  %v7776_v10 = vld [vmem:[#allocation40_spill] sm:$0xff] }
0x7c34   :  { %v2471_v28 = vmul.f32 %v7776_v10, %v7776_v10  ;;  %v7781_v10 = vld [vmem:[#allocation51_spill] sm:$0xff] }
0x7c37   :  { %2397 = vrot.lane.b32.xlu1 %v2391_v7, %s5633_s12  ;;  %v7772_v7 = vld [vmem:[#allocation85_spill] sm:$0xff] }
0x7c38   :  { %v4200_v37 = vrot.slane %v7772_v7, 1 }
0x7c3b   :  { %2467 = vrot.lane.b32.xlu1 %v2466_v32, %s5625_s5 }
0x7ca5   :  { %v2329_v53 = vpop.permute.xlu1 %2328 }
0x7ca6   :  { %v2331_v60 = vadd.f32 %v2329_v53, %v2254_v16 }
0x7ca9   :  { %v2398_v56 = vpop.permute.xlu1 %2397 }
0x7caa   :  { %5406 = vrcp.f32 %v2398_v56 }
0x7cb4   :  { %v5407_v22 = vpop.eup %5406 }
0x7cb5   :  { %v2401_v26 = vmul.f32 %v5407_v22, %v2396_v2  ;;  %v7777_v2 = vld [vmem:[#allocation46_spill] sm:$0xff] }
0x7cb7   :  { %2403 = vrot.lane.b32.xlu0 %v2401_v26, %s5623_s29 }
0x7cbb   :  { %2472 = vrot.lane.b32.xlu0 %v2466_v32, %s5635_s1 }
0x7cbf   :  { %2544 = vrot.lane.b32.xlu0 %v2543_v20, %s5625_s5 }
0x7cc3   :  { %2725 = vrot.lane.b32.xlu0 %v7764_v31, %s5624_s30 }
0x7cc7   :  { %3353 = vrot.lane.b32.xlu0 %v7765_v43, %s5624_s30 }
0x7ccb   :  { %3427 = vrot.lane.b32.xlu0 %v7766_v12, %s5627_s7 }
0x7ccf   :  { %2950 = vrot.lane.b32.xlu0 %v7640_v57, %s5629_s9 }
0x7cd3   :  { %4055 = vrot.lane.b32.xlu0 %v7768_v4, %s5627_s7 }
0x7cd7   :  { %3025 = vrot.lane.b32.xlu0 %v3019_v27, %s5633_s12 }
0x7cdb   :  { %4129 = vrot.lane.b32.xlu0 %v7770_v0, %s5629_s9 }
0x7cdf   :  { %3100 = vrot.lane.b32.xlu0 %v3094_v3, %s5635_s1 }
0x7ce3   :  { %5050 = vrot.lane.b32.xlu0 %v5049_v47, %s5637_s15  ;;  %v7779_v47 = vld [vmem:[#allocation49_spill] sm:$0xff] }
0x7ce7   :  { %4206 = vrot.lane.b32.xlu0 %v4200_v37, %s5629_s9 }
0x7ceb   :  { %3177 = vrot.lane.b32.xlu0 %v7639_v18, %s5637_s15 }
0x7cef   :  { %4281 = vrot.lane.b32.xlu0 %v7638_v38, %s5633_s12 }
0x7cf3   :  { %3805 = vrot.lane.b32.xlu0 %v7637_v1, %s5637_s15 }
0x7cf7   :  { %4909 = vrot.lane.b32.xlu0 %v7636_v48, %s5633_s12 }
0x7cfb   :  { %4984 = vrot.lane.b32.xlu0 %v7635_v54, %s5635_s1  ;;  %v5494_v54 = vld [vmem:[#allocation2 + $0x7] sm:$0x1] }
0x7d29   :  { %v2404_v16 = vpop.permute.xlu0 %2403 }
0x7d2a   :  { %v7215_v34 = vadd.f32 %v2404_v16, %v2331_v60  ;;  %v2723_v60 = vmul.f32 %v7777_v2, %v7777_v2  ;;  %v7783_v2 = vld [vmem:[#allocation79_spill] sm:$0xff] }
0x7d2d   :  { %v2473_v14 = vpop.permute.xlu0 %2472 }
0x7d2e   :  { %5408 = vrcp.f32 %v2473_v14 }
0x7d31   :  { %v7217_v58 = vpop.permute.xlu0 %2544 }
0x7d35   :  { %v2726_v25 = vpop.permute.xlu0 %2725 }
0x7d36   :  { %5410 = vrcp.f32 %v2726_v25  ;;  %v7780_v25 = vld [vmem:[#allocation64_spill] sm:$0xff] }
0x7d38   :  { %v5409_v32 = vpop.eup %5408 }
0x7d39   :  { %v3354_v53 = vpop.permute.xlu0 %3353  ;;  %v2476_v56 = vmul.f32 %v5409_v32, %v2471_v28 }
0x7d3a   :  { %5412 = vrcp.f32 %v3354_v53 }
0x7d3b   :  { %2478 = vrot.lane.b32.xlu1 %v2476_v56, %s5626_s6  ;;  %v7782_v56 = vld [vmem:[#allocation52_spill] sm:$0xff] }
0x7d3d   :  { %v3428_v6 = vpop.permute.xlu0 %3427 }
0x7d3e   :  { %5414 = vrcp.f32 %v3428_v6  ;;  %v2949_v6 = vmul.f32 %v7782_v56, %v7782_v56  ;;  %v7788_v56 = vld [vmem:[#allocation69_spill] sm:$0xff] }
0x7d3f   :  { %2549 = vrot.lane.b32.xlu1 %v2543_v20, %s5637_s15  ;;  %v3425_v20 = vmul.f32 %v7780_v25, %v7780_v25 }
0x7d40   :  { %v5411_v22 = vpop.eup %5410 }
0x7d41   :  { %v2951_v26 = vpop.permute.xlu0 %2950  ;;  %v2729_v30 = vmul.f32 %v5411_v22, %v2723_v60 }
0x7d42   :  { %5416 = vrcp.f32 %v2951_v26 }
0x7d43   :  { %2799 = vrot.lane.b32.xlu1 %v7779_v47, %s5627_s7  ;;  %2731 = vrot.lane.b32.xlu0 %v2729_v30, %s5625_s5  ;;  %v7784_v30 = vld [vmem:[#allocation80_spill] sm:$0xff] }
0x7d44   :  { %v5413_v7 = vpop.eup %5412 }
0x7d45   :  { %v4056_v16 = vpop.permute.xlu0 %4055  ;;  %v7230_v14 = vmul.f32 %v5413_v7, %v3351_v55  ;;  %v7786_v7 = vld [vmem:[#allocation73_spill] sm:$0xff] }
0x7d46   :  { %5418 = vrcp.f32 %v4056_v16  ;;  %v3722_v16 = vrot.slane %v7786_v7, 1 }
0x7d47   :  { %2873 = vrot.lane.b32.xlu1 %v7781_v10, %s5629_s9  ;;  %3020 = vrot.lane.b32.xlu0 %v3019_v27, %s5625_s5  ;;  %v4053_v27 = vmul.f32 %v7784_v30, %v7784_v30 }
0x7d48   :  { %v5415_v28 = vpop.eup %5414 }
0x7d49   :  { %v3026_v32 = vpop.permute.xlu0 %3025  ;;  %v7237_v53 = vmul.f32 %v5415_v28, %v3425_v20 }
0x7d4a   :  { %5420 = vrcp.f32 %v3026_v32 }
0x7d4b   :  { %3981 = vrot.lane.b32.xlu1 %v7783_v2, %s5624_s30  ;;  %3095 = vrot.lane.b32.xlu0 %v3094_v3, %s5625_s5  ;;  %v7787_v3 = vld [vmem:[#allocation54_spill] sm:$0xff] }
0x7d4c   :  { %v5417_v60 = vpop.eup %5416  ;;  %v3024_v28 = vmul.f32 %v7787_v3, %v7787_v3 }
0x7d4d   :  { %v4130_v22 = vpop.permute.xlu0 %4129  ;;  %v7244_v26 = vmul.f32 %v5417_v60, %v2949_v6  ;;  %v3572_v6 = vrot.slane %v7788_v56, 1  ;;  %v3099_v56 = vmul.f32 %v7791_v5, %v7791_v5 }
0x7d4e   :  { %5422 = vrcp.f32 %v4130_v22  ;;  %v7789_v22 = vld [vmem:[#allocation82_spill] sm:$0xff] }
0x7d4f   :  { %3501 = vrot.lane.b32.xlu1 %v7785_v35, %s5629_s9  ;;  %4201 = vrot.lane.b32.xlu0 %v4200_v37, %s5625_s5  ;;  %v4828_v37 = vrot.slane %v6849_v23, 1  ;;  %v4127_v30 = vmul.f32 %v7789_v22, %v7789_v22  ;;  %v4427_v22 = vrot.slane %v6746_v42, 1 }
0x7d50   :  { %v5419_v55 = vpop.eup %5418 }
0x7d51   :  { %v3101_v25 = vpop.permute.xlu0 %3100  ;;  %v7252_v20 = vmul.f32 %v5419_v55, %v4053_v27  ;;  %v7790_v55 = vld [vmem:[#allocation89_spill] sm:$0xff] }
0x7d52   :  { %5424 = vrcp.f32 %v3101_v25  ;;  %v4350_v7 = vrot.slane %v7790_v55, 1 }
0x7d53   :  { %4609 = vrot.lane.b32.xlu1 %v6800_v41, %s5624_s30  ;;  %3723 = vrot.lane.b32.xlu0 %v3722_v16, %s5625_s5 }
0x7d54   :  { %v5421_v32 = vpop.eup %5420 }
0x7d55   :  { %v7261_v60 = vmul.f32 %v5421_v32, %v3024_v28  ;;  %v5051_v3 = vpop.permute.xlu0 %5050  ;;  %v7792_v28 = vld [vmem:[#allocation71_spill] sm:$0xff] }
0x7d56   :  { %v3647_v32 = vrot.slane %v7792_v28, 1  ;;  %v7277_v48 = vsub.f32 %v5494_v54, %v5051_v3  ;;  %v7794_v3 = vld [vmem:[#allocation44_spill] sm:$0xff] }
0x7d57   :  { %3578 = vrot.lane.b32.xlu1 %v3572_v6, %s5629_s9  ;;  %4829 = vrot.lane.b32.xlu0 %v4828_v37, %s5625_s5  ;;  %5426 = vrcp.f32 %v7794_v3 }
0x7d58   :  { %v5423_v27 = vpop.eup %5422  ;;  %7793 = vst [vmem:[#allocation17_spill] sm:$0xff] %v7277_v48  ;;  %v5079_v5 = vrot.slane %v7277_v48, %v5740_v40  ;;  %v7293_v40 = vpop.permute.xlu1 %2467  ;;  %v7796_v48 = vld [vmem:[#allocation43_spill] sm:$0xff] }
0x7d59   :  { %v7268_v25 = vmul.f32 %v5423_v27, %v4127_v30  ;;  %v4207_v42 = vpop.permute.xlu0 %4206 }
0x7d5b   :  { %4683 = vrot.lane.b32.xlu1 %v6816_v21, %s5627_s7  ;;  %4351 = vrot.lane.b32.xlu0 %v4350_v7, %s5625_s5 }
0x7d5c   :  { %v5425_v23 = vpop.eup %5424 }
0x7d5d   :  { %v7279_v55 = vmul.f32 %v5425_v23, %v3099_v56  ;;  %v3178_v54 = vpop.permute.xlu0 %3177 }
0x7d5f   :  { %3653 = vrot.lane.b32.xlu1 %v3647_v32, %s5633_s12  ;;  %4428 = vrot.lane.b32.xlu0 %v4427_v22, %s5625_s5 }
0x7d61   :  { %v4282_v30 = vpop.permute.xlu0 %4281 }
0x7d63   :  { %4757 = vrot.lane.b32.xlu1 %v6832_v50, %s5629_s9  ;;  %5081 = vrot.lane.b32.xlu0 %v5079_v5, %s5626_s6 }
0x7d65   :  { %v3806_v27 = vpop.permute.xlu0 %3805 }
0x7d67   :  { %3728 = vrot.lane.b32.xlu1 %v3722_v16, %s5635_s1  ;;  %v5427_v16 = vpop.eup %5426 }
0x7d69   :  { %v4910_v56 = vpop.permute.xlu0 %4909 }
0x7d6b   :  { %4834 = vrot.lane.b32.xlu1 %v4828_v37, %s5629_s9 }
0x7d6d   :  { %v7298_v5 = vpop.permute.xlu0 %4984 }
0x7d6f   :  { %4356 = vrot.lane.b32.xlu1 %v4350_v7, %s5635_s1  ;;  %v7795_v7 = vld [vmem:[#allocation45_spill] sm:$0xff] }
0x7d73   :  { %4433 = vrot.lane.b32.xlu1 %v4427_v22, %s5637_s15  ;;  %v2661_v22 = vmul.f32 %v7795_v7, %v7795_v7  ;;  %v7797_v7 = vld [vmem:[#allocation48_spill] sm:$0xff] }
0x7d75   :  { %v2663_v1 = vmul.f32 %v5427_v16, %v2661_v22  ;;  %v2797_v16 = vmul.f32 %v7797_v7, %v7797_v7  ;;  %v7798_v22 = vrot.slane %v7767_v44, 1 }
0x7dad   :  { %v2479_v23 = vpop.permute.xlu1 %2478 }
0x7dae   :  { %v7296_v28 = vadd.f32 %v2479_v23, %v7215_v34  ;;  %v2548_v34 = vmul.f32 %v7796_v48, %v7796_v48  ;;  %v7309_v23 = vadd.f32 %v7109_v13, %v7098_v9 }
0x7db1   :  { %v2550_v37 = vpop.permute.xlu1 %2549 }
0x7db2   :  { %5428 = vrcp.f32 %v2550_v37  ;;  %v5047_v37 = vadd.f32 %v5045_v49, %v7309_v23  ;;  %v7799_v49 = vrot.slane %v7773_v51, 1  ;;  %v7801_v51 = vrot.slane %v7775_v15, 1 }
0x7db5   :  { %v2732_v38 = vpop.permute.xlu0 %2731  ;;  %v2800_v18 = vpop.permute.xlu1 %2799 }
0x7db6   :  { %v7302_v57 = vadd.f32 %v2732_v38, %v2663_v1  ;;  %5430 = vrcp.f32 %v2800_v18  ;;  %v5048_v18 = vadd.f32 1.0, %v5047_v37 }
0x7db7   :  { %5432 = vrcp.f32 %v4207_v42  ;;  %v7802_v42 = vld [vmem:[#allocation84_spill] sm:$0xff] }
0x7db8   :  { %v5055_v9 = vrot.slane %v5048_v18, 1  ;;  %5434 = vrcp.f32 %v3178_v54 }
0x7db9   :  { %v7319_v13 = vpop.permute.xlu0 %3020  ;;  %v2874_v48 = vpop.permute.xlu1 %2873  ;;  %5436 = vrcp.f32 %v4282_v30 }
0x7dba   :  { %5438 = vrcp.f32 %v2874_v48  ;;  %v7807_v48 = vld [vmem:[#allocation86_spill] sm:$0xff] }
0x7dbb   :  { %5440 = vrcp.f32 %v3806_v27  ;;  %v7805_v27 = vrot.slane %v6941_v24, 1 }
0x7dbc   :  { %v5429_v50 = vpop.eup %5428 }
0x7dbd   :  { %v2553_v21 = vmul.f32 %v5429_v50, %v2548_v34  ;;  %v7323_v50 = vpop.permute.xlu0 %3095  ;;  %v7800_v34 = vrot.slane %v7774_v8, 1 }
0x7dbf   :  { %2555 = vrot.lane.b32.xlu1 %v2553_v21, %s5628_s8  ;;  %v3982_v21 = vpop.permute.xlu1 %3981 }
0x7dc0   :  { %v5431_v38 = vpop.eup %5430  ;;  %5442 = vrcp.f32 %v3982_v21 }
0x7dc1   :  { %v2803_v1 = vmul.f32 %v5431_v38, %v2797_v16  ;;  %v7333_v44 = vpop.permute.xlu0 %4201  ;;  %5444 = vrcp.f32 %v4910_v56  ;;  %v5089_v38 = vrot.slane %v5048_v18, %v5822_v59  ;;  %v4280_v56 = vmul.f32 %v7807_v48, %v7807_v48  ;;  %v7808_v18 = vld [vmem:[#allocation75_spill] sm:$0xff] }
0x7dc3   :  { %2945 = vrot.lane.b32.xlu1 %v7798_v22, %s5625_s5  ;;  %2805 = vrot.lane.b32.xlu0 %v2803_v1, %s5619_s28  ;;  %v7806_v1 = vld [vmem:[#allocation50_spill] sm:$0xff] }
0x7dc4   :  { %v2871_v22 = vmul.f32 %v7806_v1, %v7806_v1  ;;  %v7811_v1 = vld [vmem:[#allocation93_spill] sm:$0xff] }
0x7dc7   :  { %3573 = vrot.lane.b32.xlu1 %v3572_v6, %s5625_s5  ;;  %5056 = vrot.lane.b32.xlu0 %v5055_v9, %s5625_s5  ;;  %v3502_v6 = vpop.permute.xlu1 %3501 }
0x7dc8   :  { %5446 = vrcp.f32 %v3502_v6 }
0x7dcb   :  { %3648 = vrot.lane.b32.xlu1 %v3647_v32, %s5625_s5  ;;  %3433 = vrot.lane.b32.xlu0 %v7237_v53, %s5619_s28  ;;  %v7340_v32 = vpop.permute.xlu0 %3723  ;;  %v4610_v53 = vpop.permute.xlu1 %4609 }
0x7dcc   :  { %5448 = vrcp.f32 %v4610_v53 }
0x7dcd   :  { %5450 = vrcp.f32 %v5089_v38 }
0x7dce   :  { %5452 = vrcp.f32 %v7298_v5  ;;  %v5075_v5 = vsub.f32 0.0, %v7186_v63 }
0x7dcf   :  { %3172 = vrot.lane.b32.xlu1 %v7799_v49, %s5625_s5  ;;  %2956 = vrot.lane.b32.xlu0 %v7244_v26, %s5622_s2  ;;  %v7350_v8 = vpop.permute.xlu0 %4829  ;;  %v3579_v26 = vpop.permute.xlu1 %3578 }
0x7dd0   :  { %5454 = vrcp.f32 %v3579_v26 }
0x7dd3   :  { %4276 = vrot.lane.b32.xlu1 %v7800_v34, %s5625_s5  ;;  %4061 = vrot.lane.b32.xlu0 %v7252_v20, %s5619_s28  ;;  %v5433_v20 = vpop.eup %5432  ;;  %v7361_v37 = vpop.permute.xlu0 %4351 }
0x7dd4   :  { %v5435_v54 = vpop.eup %5434  ;;  %v4684_v7 = vpop.permute.xlu1 %4683 }
0x7dd5   :  { %5456 = vrcp.f32 %v4684_v7 }
0x7dd7   :  { %5061 = vrot.lane.b32.xlu1 %v5055_v9, %s5637_s15  ;;  %3031 = vrot.lane.b32.xlu0 %v7261_v60, %s5623_s29  ;;  %v4205_v9 = vmul.f32 %v7802_v42, %v7802_v42  ;;  %v7803_v60 = vrot.slane %v6865_v33, 1  ;;  %v5437_v33 = vpop.eup %5436  ;;  %v7375_v21 = vpop.permute.xlu0 %4428  ;;  %v7809_v42 = vld [vmem:[#allocation78_spill] sm:$0xff] }
0x7dd8   :  { %v3654_v49 = vpop.permute.xlu1 %3653  ;;  %v4285_v6 = vmul.f32 %v5437_v33, %v4280_v56 }
0x7dd9   :  { %v4210_v15 = vmul.f32 %v5433_v20, %v4205_v9  ;;  %v3804_v20 = vmul.f32 %v7808_v18, %v7808_v18  ;;  %v3979_v9 = vmul.f32 %v7809_v42, %v7809_v42  ;;  %5458 = vrcp.f32 %v3654_v49  ;;  %v7813_v42 = vld [vmem:[#allocation94_spill] sm:$0xff] }
0x7dda   :  { %v4681_v49 = vmul.f32 %v7813_v42, %v7813_v42 }
0x7ddb   :  { %3800 = vrot.lane.b32.xlu1 %v7801_v51, %s5625_s5  ;;  %4135 = vrot.lane.b32.xlu0 %v7268_v25, %s5630_s10  ;;  %v7804_v25 = vld [vmem:[#allocation59_spill] sm:$0xff] }
0x7ddc   :  { %v3176_v30 = vmul.f32 %v7804_v25, %v7804_v25  ;;  %v4758_v33 = vpop.permute.xlu1 %4757 }
0x7ddd   :  { %5460 = vrcp.f32 %v4758_v33 }
0x7dde   :  { %v3181_v16 = vmul.f32 %v5435_v54, %v3176_v30  ;;  %v7810_v54 = vld [vmem:[#allocation66_spill] sm:$0xff]  ;;  %v4908_v30 = vmul.f32 %v6860_v39, %v6860_v39 }
0x7ddf   :  { %4904 = vrot.lane.b32.xlu1 %v7803_v60, %s5625_s5  ;;  %3106 = vrot.lane.b32.xlu0 %v7279_v55, %s5626_s6  ;;  %v5439_v55 = vpop.eup %5438  ;;  %v3499_v25 = vmul.f32 %v7810_v54, %v7810_v54 }
0x7de0   :  { %v5441_v24 = vpop.eup %5440  ;;  %v2877_v34 = vmul.f32 %v5439_v55, %v2871_v22  ;;  %v4607_v22 = vmul.f32 %v7811_v1, %v7811_v1 }
0x7de1   :  { %v5443_v51 = vpop.eup %5442  ;;  %v3809_v53 = vmul.f32 %v5441_v24, %v3804_v20  ;;  %v3729_v24 = vpop.permute.xlu1 %3728 }
0x7de2   :  { %v3985_v60 = vmul.f32 %v5443_v51, %v3979_v9  ;;  %5462 = vrcp.f32 %v3729_v24 }
0x7de3   :  { %4979 = vrot.lane.b32.xlu1 %v7805_v27, %s5625_s5  ;;  %4212 = vrot.lane.b32.xlu0 %v4210_v15, %s5622_s2  ;;  %v5082_v27 = vpop.permute.xlu0 %5081 }
0x7de4   :  { %v5085_v38 = vsel %vm86_vm7, %v5075_v5, %v5082_v27 }
0x7de5   :  { %v4835_v9 = vpop.permute.xlu1 %4834 }
0x7de6   :  { %5464 = vrcp.f32 %v4835_v9 }
0x7de7   :  { %3359 = vrot.lane.b32.xlu1 %v7230_v14, %s5625_s5  ;;  %3183 = vrot.lane.b32.xlu0 %v3181_v16, %s5628_s8  ;;  %v5445_v14 = vpop.eup %5444 }
0x7de8   :  { %v5447_v15 = vpop.eup %5446  ;;  %v4913_v26 = vmul.f32 %v5445_v14, %v4908_v30  ;;  %v7815_v30 = vld [vmem:[#allocation96_spill] sm:$0xff] }
0x7de9   :  { %v3505_v16 = vmul.f32 %v5447_v15, %v3499_v25  ;;  %v5449_v55 = vpop.eup %5448  ;;  %v4357_v15 = vpop.permute.xlu1 %4356  ;;  %v4755_v27 = vmul.f32 %v7815_v30, %v7815_v30 }
0x7dea   :  { %v5451_v39 = vpop.eup %5450  ;;  %v4613_v63 = vmul.f32 %v5449_v55, %v4607_v22  ;;  %5466 = vrcp.f32 %v4357_v15  ;;  %v7817_v22 = vld [vmem:[#allocation98_spill] sm:$0xff] }
0x7deb   :  { %4287 = vrot.lane.b32.xlu0 %v4285_v6, %s5623_s29  ;;  %2879 = vrot.lane.b32.xlu1 %v2877_v34, %s5630_s10  ;;  %v5453_v48 = vpop.eup %5452  ;;  %v5092_v56 = vmul.f32 %v5451_v39, %v5085_v38  ;;  %v7812_v6 = vld [vmem:[#allocation68_spill] sm:$0xff] }
0x7dec   :  { %v5455_v7 = vpop.eup %5454  ;;  %v3577_v34 = vmul.f32 %v7812_v6, %v7812_v6  ;;  %v4988_v51 = vmul.f32 %v5453_v48, %v4983_v46  ;;  %v4833_v48 = vmul.f32 %v7817_v22, %v7817_v22  ;;  %v2094_v6 = vmul.f32 %v7750_v36, %v7758_v11 }
0x7ded   :  { %v5457_v20 = vpop.eup %5456  ;;  %v4434_v55 = vpop.permute.xlu1 %4433  ;;  %v5074_v46 = vsub.f32 0.0, %v7309_v23 }
0x7dee   :  { %v3582_v18 = vmul.f32 %v5455_v7, %v3577_v34  ;;  %v4687_v14 = vmul.f32 %v5457_v20, %v4681_v49  ;;  %5468 = vrcp.f32 %v4434_v55  ;;  %v7819_v49 = vld [vmem:[#allocation90_spill] sm:$0xff] }
0x7def   :  { %3811 = vrot.lane.b32.xlu0 %v3809_v53, %s5628_s8  ;;  %3987 = vrot.lane.b32.xlu1 %v3985_v60, %s5625_s5  ;;  %v5459_v53 = vpop.eup %5458  ;;  %v7814_v60 = vld [vmem:[#allocation70_spill] sm:$0xff]  ;;  %v5091_v20 = vmul.f32 %v5451_v39, %v5074_v46  ;;  %v4432_v9 = vmul.f32 %v7819_v49, %v7819_v49  ;;  %v7823_v46 = vld [vmem:[#allocation91_spill] sm:$0xff] }
0x7df0   :  { %v3652_v62 = vmul.f32 %v7814_v60, %v7814_v60  ;;  %v5461_v25 = vpop.eup %5460 }
0x7df1   :  { %v4761_v33 = vmul.f32 %v5461_v25, %v4755_v27  ;;  %v5463_v5 = vpop.eup %5462  ;;  %v7820_v27 = vld [vmem:[#allocation60_spill] sm:$0xff] }
0x7df2   :  { %v3657_v54 = vmul.f32 %v5459_v53, %v3652_v62  ;;  %v5465_v1 = vpop.eup %5464 }
0x7df3   :  { %4915 = vrot.lane.b32.xlu0 %v4913_v26, %s5623_s29  ;;  %3507 = vrot.lane.b32.xlu1 %v3505_v16, %s5630_s10  ;;  %v7816_v26 = vld [vmem:[#allocation72_spill] sm:$0xff] }
0x7df4   :  { %v3727_v16 = vmul.f32 %v7816_v26, %v7816_v26  ;;  %v5467_v24 = vpop.eup %5466 }
0x7df6   :  { %v3732_v38 = vmul.f32 %v5463_v5, %v3727_v16  ;;  %v7821_v5 = vsub.f32 %v7077_v52, %v7134_v61 }
0x7df7   :  { %5100 = vperm.xlu0 %5215, %v5092_v56   ;;  %4615 = vrot.lane.b32.xlu1 %v4613_v63, %s5625_s5  ;;  %v4838_v56 = vmul.f32 %v5465_v1, %v4833_v48  ;;  %v7818_v63 = vld [vmem:[#allocation88_spill] sm:$0xff] }
0x7df8   :  { %v4355_v7 = vmul.f32 %v7818_v63, %v7818_v63  ;;  %v5469_v42 = vpop.eup %5468  ;;  %v7822_v1 = vld [vmem:[#allocation76_spill] sm:$0xff] }
0x7df9   :  { %v4437_v36 = vmul.f32 %v5469_v42, %v4432_v9 }
0x7dfa   :  { %v4360_v34 = vmul.f32 %v5467_v24, %v4355_v7 }
0x7dfb   :  { %4990 = vrot.lane.b32.xlu0 %v4988_v51, %s5626_s6  ;;  %3584 = vrot.lane.b32.xlu1 %v3582_v18, %s5622_s2  ;;  %v2168_v51 = vmul.f32 %v7751_v29, %v2094_v6 }
0x7dfd   :  { %v2242_v18 = vmul.f32 %v7752_v17, %v2168_v51 }
0x7dff   :  { %4689 = vrot.lane.b32.xlu1 %v4687_v14, %s5619_s28  ;;  %v2320_v14 = vmul.f32 %v7159_v45, %v2242_v18  ;;  %v2722_v45 = vmul.f32 %v7764_v31, %v7794_v3  ;;  %v7825_v18 = vld [vmem:[#allocation97_spill] sm:$0xff] }
0x7e01   :  { %v2395_v53 = vmul.f32 %v7213_v19, %v2320_v14  ;;  %v2796_v19 = vmul.f32 %v7779_v47, %v2722_v45 }
0x7e03   :  { %3659 = vrot.lane.b32.xlu1 %v3657_v54, %s5623_s29  ;;  %v2470_v11 = vmul.f32 %v7293_v40, %v2395_v53  ;;  %v7826_v53 = vld [vmem:[#allocation17_spill] sm:$0xff] }
0x7e05   :  { %v2547_v29 = vmul.f32 %v7217_v58, %v2470_v11  ;;  %v2870_v58 = vmul.f32 %v7781_v10, %v2796_v19 }
0x7e07   :  { %4763 = vrot.lane.b32.xlu1 %v4761_v33, %s5630_s10  ;;  %5470 = vlog2.f32 %v2547_v29  ;;  %v3350_v33 = vmul.f32 %v7765_v43, %v7820_v27  ;;  %v3978_v43 = vmul.f32 %v7783_v2, %v7822_v1  ;;  %v4606_v2 = vmul.f32 %v6800_v41, %v7823_v46 }
0x7e08   :  { %v5060_v41 = vmul.f32 %v7826_v53, %v7826_v53 }
0x7e09   :  { %v3424_v31 = vmul.f32 %v7766_v12, %v3350_v33  ;;  %v4052_v52 = vmul.f32 %v7768_v4, %v3978_v43  ;;  %v7824_v4 = vld [vmem:[#allocation95_spill] sm:$0xff] }
0x7e0b   :  { %3734 = vrot.lane.b32.xlu1 %v3732_v38, %s5626_s6  ;;  %v3498_v16 = vmul.f32 %v7785_v35, %v3424_v31  ;;  %v4126_v12 = vmul.f32 %v7770_v0, %v4052_v52  ;;  %v7829_v52 = vld [vmem:[#allocation92_spill] sm:$0xff] }
0x7e0d   :  { %v4204_v35 = vmul.f32 %v7333_v44, %v4126_v12 }
0x7e0f   :  { %4840 = vrot.lane.b32.xlu1 %v4838_v56, %s5622_s2 }
0x7e11   :  { %v5471_v23 = vpop.eup %5470 }
0x7e12   :  { %v2600_v17 = vmul.f32 0.6931472, %v5471_v23 }
0x7e13   :  { %4362 = vrot.lane.b32.xlu1 %v4360_v34, %s5626_s6 }
0x7e14   :  { %v2601_v60 = vadd.f32 14.703016, %v2600_v17 }
0x7e17   :  { %5095 = vperm.xlu1 %5214, %v5091_v20  }
0x7e1b   :  { %4439 = vrot.lane.b32.xlu1 %v4437_v36, %s5628_s8 }
0x7e31   :  { %v2556_v39 = vpop.permute.xlu1 %2555 }
0x7e32   :  { %v2558_v62 = vadd.f32 %v2556_v39, %v7296_v28  ;;  %v7827_v39 = vld [vmem:[#allocation61_spill] sm:$0xff] }
0x7e34   :  { %v2602_v15 = vadd.f32 %v2601_v60, %v2558_v62  ;;  %v3289_v60 = vmul.f32 %v7827_v39, %v7827_v39 }
0x7e35   :  { %v2806_v54 = vpop.permute.xlu0 %2805  ;;  %v2946_v25 = vpop.permute.xlu1 %2945 }
0x7e36   :  { %v2603_v40 = vmul.f32 0.5, %v2602_v15  ;;  %v2808_v30 = vadd.f32 %v2806_v54, %v7302_v57  ;;  %v2948_v26 = vmul.f32 %v2946_v25, %v2870_v58 }
0x7e38   :  { %v7445_v28 = vsub.f32 %v7821_v5, %v2603_v40  ;;  %v3023_v55 = vmul.f32 %v7319_v13, %v2948_v26 }
0x7e39   :  { %v5057_v3 = vpop.permute.xlu0 %5056  ;;  %v3574_v47 = vpop.permute.xlu1 %3573 }
0x7e3a   :  { %v3576_v57 = vmul.f32 %v3574_v47, %v3498_v16  ;;  %v3098_v61 = vmul.f32 %v7323_v50, %v3023_v55  ;;  %v4680_v50 = vmul.f32 %v7824_v4, %v4606_v2 }
0x7e3c   :  { %v4754_v20 = vmul.f32 %v7825_v18, %v4680_v50 }
0x7e3d   :  { %v3434_v38 = vpop.permute.xlu0 %3433  ;;  %v3649_v10 = vpop.permute.xlu1 %3648 }
0x7e3e   :  { %v3651_v22 = vmul.f32 %v3649_v10, %v3576_v57  ;;  %v4832_v49 = vmul.f32 %v7350_v8, %v4754_v20 }
0x7e40   :  { %v3726_v51 = vmul.f32 %v7340_v32, %v3651_v22 }
0x7e41   :  { %v2957_v48 = vpop.permute.xlu0 %2956  ;;  %v3173_v56 = vpop.permute.xlu1 %3172 }
0x7e42   :  { %v3175_v24 = vmul.f32 %v3173_v56, %v3098_v61 }
0x7e45   :  { %v4062_v63 = vpop.permute.xlu0 %4061  ;;  %v4277_v13 = vpop.permute.xlu1 %4276 }
0x7e46   :  { %v7456_v7 = vmul.f32 %v4277_v13, %v4204_v35 }
0x7e49   :  { %v3032_v6 = vpop.permute.xlu0 %3031  ;;  %v5062_v34 = vpop.permute.xlu1 %5061 }
0x7e4a   :  { %5472 = vrcp.f32 %v5062_v34 }
0x7e4b   :  { %5474 = vrcp.f32 %v7820_v27  ;;  %v7828_v27 = vld [vmem:[#allocation77_spill] sm:$0xff] }
0x7e4c   :  { %5476 = vrcp.f32 %v7822_v1  ;;  %v3917_v33 = vmul.f32 %v7828_v27, %v7828_v27 }
0x7e4d   :  { %v3801_v0 = vpop.permute.xlu1 %3800  ;;  %v4136_v44 = vpop.permute.xlu0 %4135  ;;  %5478 = vlog2.f32 %v3175_v24 }
0x7e4e   :  { %v3803_v42 = vmul.f32 %v3801_v0, %v3726_v51  ;;  %5480 = vrcp.f32 %v7823_v46  ;;  %v7830_v51 = vld [vmem:[#allocation15_spill] sm:$0xff] }
0x7e4f   :  { %v5071_v0 = vrot.slane %v7830_v51, 2 }
0x7e50   :  { %5482 = vlog2.f32 %v3803_v42 }
0x7e51   :  { %v4905_v9 = vpop.permute.xlu1 %4904  ;;  %v3107_v11 = vpop.permute.xlu0 %3106 }
0x7e52   :  { %v4907_v14 = vmul.f32 %v4905_v9, %v4832_v49  ;;  %v7831_v49 = vld [vmem:[#allocation23_spill] sm:$0xff] }
0x7e53   :  { %v5073_v9 = vadd.f32 %v5071_v0, %v7831_v49 }
0x7e54   :  { %v5473_v36 = vpop.eup %5472 }
0x7e55   :  { %v5475_v29 = vpop.eup %5474  ;;  %v4980_v23 = vpop.permute.xlu1 %4979  ;;  %v5065_v32 = vmul.f32 %v5473_v36, %v5060_v41  ;;  %v5106_v41 = vrot.slane %v5073_v9, %v5822_v59 }
0x7e56   :  { %v4982_v17 = vmul.f32 %v4980_v23, %v4907_v14  ;;  %v3291_v62 = vmul.f32 %v5475_v29, %v3289_v60  ;;  %v4213_v15 = vpop.permute.xlu0 %4212  ;;  %v5477_v25 = vpop.eup %5476 }
0x7e57   :  { %5067 = vrot.lane.b32.xlu1 %v5065_v32, %s5628_s8  ;;  %v5479_v5 = vpop.eup %5478  ;;  %v3919_v47 = vmul.f32 %v5477_v25, %v3917_v33 }
0x7e58   :  { %v7471_v8 = vmul.f32 %v5057_v3, %v4982_v17  ;;  %v3228_v3 = vmul.f32 0.6931472, %v5479_v5  ;;  %v5481_v43 = vpop.eup %5480 }
0x7e59   :  { %v3360_v45 = vpop.permute.xlu1 %3359 }
0x7e5a   :  { %v3362_v19 = vadd.f32 %v3360_v45, %v3291_v62  ;;  %v3184_v26 = vpop.permute.xlu0 %3183  ;;  %v3229_v61 = vadd.f32 14.703016, %v3228_v3  ;;  %v5483_v29 = vpop.eup %5482 }
0x7e5c   :  { %v3436_v54 = vadd.f32 %v3434_v38, %v3362_v19  ;;  %v4545_v38 = vmul.f32 %v7829_v52, %v7829_v52  ;;  %v4354_v19 = vmul.f32 %v7361_v37, %v7456_v7 }
0x7e5d   :  { %v2880_v40 = vpop.permute.xlu1 %2879 }
0x7e5e   :  { %v2882_v58 = vadd.f32 %v2880_v40, %v2808_v30  ;;  %v4288_v30 = vpop.permute.xlu0 %4287  ;;  %v4547_v13 = vmul.f32 %v5481_v43, %v4545_v38 }
0x7e60   :  { %v2959_v31 = vadd.f32 %v2957_v48, %v2882_v58  ;;  %v4431_v58 = vmul.f32 %v7375_v21, %v4354_v19 }
0x7e61   :  { %v3988_v16 = vpop.permute.xlu1 %3987 }
0x7e62   :  { %v3034_v55 = vadd.f32 %v3032_v6, %v2959_v31  ;;  %v3990_v57 = vadd.f32 %v3988_v16, %v3919_v47  ;;  %v3812_v4 = vpop.permute.xlu0 %3811  ;;  %5484 = vlog2.f32 %v4431_v58 }
0x7e64   :  { %v3109_v10 = vadd.f32 %v3107_v11, %v3034_v55  ;;  %v4064_v1 = vadd.f32 %v4062_v63, %v3990_v57 }
0x7e65   :  { %v3508_v22 = vpop.permute.xlu1 %3507 }
0x7e66   :  { %v3186_v56 = vadd.f32 %v3184_v26, %v3109_v10  ;;  %v4138_v12 = vadd.f32 %v4136_v44, %v4064_v1  ;;  %v3510_v24 = vadd.f32 %v3508_v22, %v3436_v54  ;;  %v4916_v44 = vpop.permute.xlu0 %4915 }
0x7e68   :  { %v3230_v35 = vadd.f32 %v3229_v61, %v3186_v56  ;;  %v4215_v48 = vadd.f32 %v4213_v15, %v4138_v12 }
0x7e69   :  { %v4616_v34 = vpop.permute.xlu1 %4615 }
0x7e6a   :  { %v4618_v46 = vadd.f32 %v4616_v34, %v4547_v13  ;;  %v4290_v2 = vadd.f32 %v4288_v30, %v4215_v48  ;;  %v3231_v6 = vmul.f32 0.5, %v3230_v35 }
0x7e6c   :  { %v3232_v63 = vsub.f32 %v7445_v28, %v3231_v6  ;;  %v3856_v28 = vmul.f32 0.6931472, %v5483_v29  ;;  %v5485_v5 = vpop.eup %5484 }
0x7e6d   :  { %v3585_v50 = vpop.permute.xlu1 %3584  ;;  %v4484_v47 = vmul.f32 0.6931472, %v5485_v5 }
0x7e6e   :  { %v3587_v18 = vadd.f32 %v3585_v50, %v3510_v24  ;;  %v3857_v60 = vadd.f32 14.703016, %v3856_v28 }
0x7e6f   :  { %v4485_v7 = vadd.f32 14.703016, %v4484_v47 }
0x7e71   :  { %v4690_v20 = vpop.permute.xlu1 %4689 }
0x7e72   :  { %v4692_v14 = vadd.f32 %v4690_v20, %v4618_v46 }
0x7e75   :  { %v3660_v53 = vpop.permute.xlu1 %3659 }
0x7e76   :  { %v5101_v36 = vpop.permute.xlu0 %5100  ;;  %v3662_v17 = vadd.f32 %v3660_v53, %v3587_v18 }
0x7e77   :  { %v5108_v11 = vmul.f32 %v5106_v41, %v5101_v36 }
0x7e79   :  { %v5110_v23 = vadd.f32 %v5108_v11, %v7830_v51  ;;  %v4764_v32 = vpop.permute.xlu1 %4763 }
0x7e7a   :  { %v4766_v62 = vadd.f32 %v4764_v32, %v4692_v14 }
0x7e7b   :  { %5120 = vst.msk [vmem:[#allocation8 + $0x8] sm:$0x1f] %vm65_vm1, %v5110_v23 }
0x7e7d   :  { %v3735_v39 = vpop.permute.xlu1 %3734 }
0x7e7e   :  { %v3737_v42 = vadd.f32 %v3735_v39, %v3662_v17 }
0x7e80   :  { %v3814_v45 = vadd.f32 %v3812_v4, %v3737_v42 }
0x7e81   :  { %v4841_v15 = vpop.permute.xlu1 %4840 }
0x7e82   :  { %v3858_v59 = vadd.f32 %v3857_v60, %v3814_v45  ;;  %v4843_v54 = vadd.f32 %v4841_v15, %v4766_v62 }
0x7e84   :  { %v3859_v25 = vmul.f32 0.5, %v3858_v59  ;;  %v4918_v40 = vadd.f32 %v4916_v44, %v4843_v54 }
0x7e85   :  { %v4363_v33 = vpop.permute.xlu1 %4362 }
0x7e86   :  { %v3860_v27 = vsub.f32 %v3232_v63, %v3859_v25  ;;  %v4365_v16 = vadd.f32 %v4363_v33, %v4290_v2 }
0x7e96   :  { %v5096_v26 = vpop.permute.xlu1 %5095 }
0x7e97   :  { %v5107_v31 = vmul.f32 %v5106_v41, %v5096_v26 }
0x7e99   :  { %v5109_v3 = vadd.f32 %v5107_v31, %v7831_v49 }
0x7e9a   :  { %v4440_v37 = vpop.permute.xlu1 %4439 }
0x7e9b   :  { %5118 = vst.msk [vmem:[#allocation8] sm:$0xff] %vm63_vm0, %v5109_v3  ;;  %v4442_v55 = vadd.f32 %v4440_v37, %v4365_v16 }
0x7e9c   :  { %5572 = shalt.err (!%p5569_p0)
}
0x7e9d   :  { %s5573_s21 = scalar_lea.hbm %s7521_s3, 256 }
0x7e9e   :  { %p5574_p1 = scmp.ne.s32.totalorder %s7521_s3, %s5573_s21  ;;  %p5577_p2 = scmp.lt.u32.totalorder %s5573_s21, %s7521_s3 }
0x7ea0   :  { %p5579_p3 = pnand %p5577_p2, %p5574_p1 }
0x7ea2   :  { %5582 = shalt.err (!%p5579_p3)
}
0x7ea3   :  { %5134 = dma.vmem_to_hbm [thread:$0]  %s5129_s17, 256, %s7521_s3, [#allocation4], %s5614_s25, %s5614_s25, %s5615_s26   ;;  %v4486_v21 = vadd.f32 %v4485_v7, %v4442_v55  ;;  %5486 = vlog2.f32 %v7471_v8  ;;  %v4991_v22 = vpop.permute.xlu0 %4990 }
0x7ea4   :  { %v4993_v52 = vadd.f32 %v4991_v22, %v4918_v40  ;;  %s5639_s2 = smov [#allocation9]  }
0x7ea5   :  { %v4487_v57 = vmul.f32 0.5, %v4486_v21  ;;  %s5141_s29 = sshll.u32 %s5639_s2, 4  ;;  %s5142_s29 = int_to_ptr.vmem [resolvable:$true] %s5141_s29 }
0x7ea6   :  { %s5583_s3 = scalar_lea.vmem %s5142_s29, 16  ;;  %s5587_s25 = scalar_lea.vmem %s5142_s29, 32 }
0x7ea7   :  { %v4488_v10 = vsub.f32 %v3860_v27, %v4487_v57  ;;  %p5584_p4 = scmp.ne.s32.totalorder %s5142_s29, %s5583_s3  ;;  %p5588_p5 = scmp.lt.s32.totalorder %s5142_s29, %s5142_s29 }
0x7ea8   :  { %p5589_p6 = scmp.lt.s32.totalorder %s5587_s25, %s5583_s3 }
0x7eaa   :  { %p5590_p7 = por %p5589_p6, %p5588_p5 }
0x7eac   :  { %p5591_p8 = pnand %p5590_p7, %p5584_p4 }
0x7ead   :  { %v5487_v1 = vpop.eup %5486 }
0x7eae   :  { %v5112_v43 = vmul.f32 0.6931472, %v5487_v1 }
0x7eb0   :  { %v5113_v61 = vadd.f32 14.703016, %v5112_v43 }
0x7ec9   :  { %v5068_v38 = vpop.permute.xlu1 %5067 }
0x7eca   :  { %v5070_v30 = vadd.f32 %v5068_v38, %v4993_v52 }
0x7ecc   :  { %v5114_v56 = vadd.f32 %v5113_v61, %v5070_v30 }
0x7ece   :  { %v5115_v12 = vmul.f32 0.5, %v5114_v56 }
0x7ed0   :  { %v5116_v24 = vsub.f32 %v4488_v10, %v5115_v12 }
0x7ed2   :  { %5122 = vst.msk [vmem:[#allocation9] sm:$0x1] %vm67_vm8, %v5116_v24 }
0x7ed3   :  { %5594 = shalt.err (!%p5591_p8)
}
0x7ed4   :  { %s5595_s5 = scalar_lea.hbm %s7522_s4, 16 }
0x7ed5   :  { %p5596_p9 = scmp.ne.s32.totalorder %s7522_s4, %s5595_s5  ;;  %p5599_p10 = scmp.lt.u32.totalorder %s5595_s5, %s7522_s4 }
0x7ed7   :  { %p5601_p11 = pnand %p5599_p10, %p5596_p9 }
0x7ed9   :  { %5604 = shalt.err (!%p5601_p11)
}
0x7eda   :  { %5144 = dma.vmem_to_hbm [thread:$0]  %s5142_s29, 16, %s7522_s4, [#allocation10]  }
0x7edb   :  { %5609 = dma.done.wait [#allocation4], 256  }
0x7edc   :  { %5610 = vsyncadd [#allocation4], 4294967040 }
0x7edd   :  { %5611 = dma.done.wait [#allocation10], 16  }
0x7ede   :  { %5612 = vsyncadd [#allocation10], 4294967280 }
0x7edf   :  { %5151 = vsyncpa [#allocation3], 1 }
0x7ee0   :  { %5152 = vsyncpa [#allocation6], 1 }
0x7ee1   :  { %5153 = vsyncpa [#allocation4], 1 }
0x7ee2   :  { %5154 = vsyncpa [#allocation10], 1 }

</bundles_post_ra>
